<compile_context>
chip_gen: v6e
topology: v6e:2x2x1
jax: 0.10.0
libtpu: 0.0.40
codegen_flags: <defaults>
</compile_context>

<pallas_src>
import jax
import jax.numpy as jnp
from jax.experimental import pallas as pl
from jax.experimental.pallas import tpu as pltpu


def _round_up(x: int, m: int) -> int:
    return ((x + m - 1) // m) * m


# --------------------------------------------------------------------------
# Kernels
# --------------------------------------------------------------------------
def _linear_resident_kernel(x_ref, w_ref, b_ref, o_ref):
    # x_ref: (tm, K) bf16   w_ref: (K, n_pad) bf16 (resident across the grid)
    # b_ref: (1, n_pad) f32 o_ref: (tm, n_pad)
    acc = jnp.dot(x_ref[...], w_ref[...], preferred_element_type=jnp.float32)
    o_ref[...] = (acc + b_ref[...].astype(jnp.float32)).astype(o_ref.dtype)


def _linear_tiled_kernel(x_ref, w_ref, b_ref, o_ref, acc_ref):
    # Fallback for weights that do not fit in VMEM.
    # x_ref: (tm, tk)  w_ref: (tk, tn)  b_ref: (1, tn)  o_ref: (tm, tn)
    # acc_ref: (tm, tn) f32 scratch, resident across the innermost K axis.
    k = pl.program_id(2)

    @pl.when(k == 0)
    def _():
        acc_ref[...] = jnp.zeros_like(acc_ref)

    acc_ref[...] += jnp.dot(x_ref[...], w_ref[...],
                            preferred_element_type=jnp.float32)

    @pl.when(k == pl.num_programs(2) - 1)
    def _():
        # Bias added exactly once, in f32, at the final K step.
        o_ref[...] = (acc_ref[...] + b_ref[...].astype(jnp.float32)).astype(o_ref.dtype)


# --------------------------------------------------------------------------
# Paths
# --------------------------------------------------------------------------
def _resident_path(x2d, w_t, bias_f32, out_dtype, compute_dtype, tm_max):
    M, K = x2d.shape
    _, N = w_t.shape

    # Pad only the (small) weight / bias along N to a lane-dense multiple of
    # 128 so output stores are unmasked.  x (the big operand) is never padded.
    n_pad = _round_up(N, 128)
    if n_pad != N:
        w_t = jnp.pad(w_t, ((0, 0), (0, n_pad - N)))
        bias_f32 = jnp.pad(bias_f32, (0, n_pad - N))
    b2d = bias_f32.reshape(1, n_pad)

    bc = jnp.dtype(compute_dtype).itemsize
    bo = jnp.dtype(out_dtype).itemsize
    w_bytes = K * n_pad * bc

    def vmem_need(t):
        # 2x buffered x tile + 2x buffered out tile + resident W + bias.
        return 2 * t * K * bc + 2 * t * n_pad * bo + w_bytes + n_pad * 4

    # ~40 MiB tile budget: leaves pipelining headroom on v7x (64 MiB / TC) and
    # is comfortably inside v5e/v6e's 128 MiB.
    budget = 40 * 1024 * 1024
    tm = min(tm_max, _round_up(M, 8))
    while tm > 8 and vmem_need(tm) > budget:
        tm = max(8, _round_up(tm // 2, 8))
    # v7x megacore: make sure the parallel M axis has >= 2 blocks when M is
    # large enough for both TensorCores to get real work.
    if pl.cdiv(M, tm) < 2 and M >= 1024:
        tm = max(8, _round_up(pl.cdiv(M, 2), 8))

    grid = (pl.cdiv(M, tm),)
    vmem_limit = int(min(48 * 2**20, max(32 * 2**20, vmem_need(tm) * 3 // 2)))

    out2d = pl.pallas_call(
        _linear_resident_kernel,
        out_shape=jax.ShapeDtypeStruct((M, n_pad), out_dtype),
        grid_spec=pltpu.PrefetchScalarGridSpec(
            num_scalar_prefetch=0,
            grid=grid,
            in_specs=[
                pl.BlockSpec((tm, K), lambda i: (i, 0)),       # x   (streamed)
                pl.BlockSpec((K, n_pad), lambda i: (0, 0)),    # W^T (resident)
                pl.BlockSpec((1, n_pad), lambda i: (0, 0)),    # bias
            ],
            out_specs=pl.BlockSpec((tm, n_pad), lambda i: (i, 0)),
        ),
        compiler_params=pltpu.CompilerParams(
            dimension_semantics=("parallel",),
            vmem_limit_bytes=vmem_limit,
        ),
    )(x2d, w_t, b2d)

    return out2d[:, :N] if n_pad != N else out2d


def _tiled_path(x2d, w_t, bias_f32, out_dtype, compute_dtype,
                tm_max, tn_max, tk_max):
    M, K = x2d.shape
    _, N = w_t.shape

    def tile(dim, tmax, align):
        steps = pl.cdiv(_round_up(dim, align), tmax)
        return min(tmax, _round_up(pl.cdiv(dim, steps), align))

    tm = tile(M, tm_max, 8)
    tn = tile(N, tn_max, 128)   # 128-aligned; typical adapter dims are already
    tk = tile(K, tk_max, 128)   # multiples of 256 for full v6e/v7x MXU passes.

    # Only K genuinely requires zero-padding (it is the reduction axis).
    k_pad = _round_up(K, tk)
    if k_pad != K:
        x2d = jnp.pad(x2d, ((0, 0), (0, k_pad - K)))
        w_t = jnp.pad(w_t, ((0, k_pad - K), (0, 0)))
    b2d = bias_f32.reshape(1, N)

    grid = (pl.cdiv(M, tm), pl.cdiv(N, tn), k_pad // tk)

    bc = jnp.dtype(compute_dtype).itemsize
    bo = jnp.dtype(out_dtype).itemsize
    need = (2 * tm * tk * bc + 2 * tk * tn * bc + 2 * tm * tn * bo
            + tm * tn * 4 + 2 * tn * 4)
    vmem_limit = int(min(48 * 2**20, max(32 * 2**20, need * 3 // 2)))

    # NOTE: with bf16 inputs a deeper pipeline (pipeline_mode=pl.Buffered(3))
    # or larger tk can help hide DMA on this fallback path; left at the
    # default double-buffering for robustness.
    out2d = pl.pallas_call(
        _linear_tiled_kernel,
        out_shape=jax.ShapeDtypeStruct((M, N), out_dtype),
        grid_spec=pltpu.PrefetchScalarGridSpec(
            num_scalar_prefetch=0,
            grid=grid,
            in_specs=[
                pl.BlockSpec((tm, tk), lambda i, j, k: (i, k)),   # x
                pl.BlockSpec((tk, tn), lambda i, j, k: (k, j)),   # W^T
                pl.BlockSpec((1, tn), lambda i, j, k: (0, j)),    # bias
            ],
            out_specs=pl.BlockSpec((tm, tn), lambda i, j, k: (i, j)),
            scratch_shapes=[pltpu.VMEM((tm, tn), jnp.float32)],
        ),
        compiler_params=pltpu.CompilerParams(
            dimension_semantics=("parallel", "parallel", "arbitrary"),
            vmem_limit_bytes=vmem_limit,
        ),
    )(x2d, w_t, b2d)
    return out2d


# --------------------------------------------------------------------------
# Public wrapper (nn.Linear forward)
# --------------------------------------------------------------------------
def linear_adapter_forward(x, weight, bias, *,
                           compute_dtype=jnp.bfloat16,
                           max_resident_weight_bytes=12 * 2**20,
                           tm_max=512, tn_max=512, tk_max=1024):
    """y = x @ weight.T + bias, matching nn.Linear.

    x:      (..., input_dim)
    weight: (output_dim, input_dim)
    bias:   (output_dim,)
    """
    *lead, K = x.shape
    N, Kw = weight.shape
    assert Kw == K
    M = 1
    for d in lead:
        M *= d
    out_dtype = x.dtype

    # Small-shape fast path: sub-tile adapters (e.g. input_dim=32,
    # output_dim=48) are faster as a plain fused XLA matmul than a padded
    # Pallas launch (<10% MXU utilization after padding to 128).
    if M < 8 or N < 128 or K < 128 or (M * N * K) < (1 << 18):
        y2d = jnp.dot(x.reshape(M, K), weight.T) + bias
        return y2d.reshape(*lead, N).astype(out_dtype)

    # Pin both operands to one compute dtype (bf16-native MXU on all gens);
    # accumulation stays f32 inside the kernels.
    x2d = x.reshape(M, K).astype(compute_dtype)
    # TODO(synk): in a persistent module, cache W^T (K, N) once at init instead
    # of transposing the (small) adapter weight per call.
    w_t = weight.T.astype(compute_dtype)
    bias_f32 = bias.astype(jnp.float32)

    w_resident_bytes = K * _round_up(N, 128) * jnp.dtype(compute_dtype).itemsize
    if w_resident_bytes <= max_resident_weight_bytes:
        out2d = _resident_path(x2d, w_t, bias_f32, out_dtype, compute_dtype, tm_max)
    else:
        out2d = _tiled_path(x2d, w_t, bias_f32, out_dtype, compute_dtype,
                            tm_max, tn_max, tk_max)

    return out2d.reshape(*lead, N)


# --------------------------------------------------------------------------
# Self-test
# --------------------------------------------------------------------------
if __name__ == "__main__":
    key = jax.random.PRNGKey(0)

    # ---- 1) Spec-sized tiny adapter -> small-shape fast path ---------------
    batch, seq, input_dim, output_dim = 2, 8, 32, 48
    kx, kw, kb, key = jax.random.split(key, 4)
    bound = 1.0 / float(input_dim) ** 0.5
    weight = jax.random.uniform(kw, (output_dim, input_dim), jnp.float32,
                                minval=-bound, maxval=bound)
    bias = jax.random.uniform(kb, (output_dim,), jnp.float32,
                              minval=-bound, maxval=bound)
    x = jax.random.normal(kx, (batch, seq, input_dim), jnp.float32)

    y = jax.block_until_ready(linear_adapter_forward(x, weight, bias))
    y_ref = x @ weight.T + bias
    assert y.shape == (batch, seq, output_dim)
    assert jnp.allclose(y, y_ref, atol=1e-5, rtol=1e-5)

    # ---- 2) Realistic adapter (whisper d=1280 -> nllb d=1024):
    #         resident-weight Pallas kernel, bf16 compute / f32 accumulate ----
    b2, s2, in2, out2 = 2, 96, 1280, 1024
    kx2, kw2, kb2, key = jax.random.split(key, 4)
    bound2 = 1.0 / float(in2) ** 0.5
    w2 = jax.random.uniform(kw2, (out2, in2), jnp.float32,
                            minval=-bound2, maxval=bound2)
    bvec2 = jax.random.uniform(kb2, (out2,), jnp.float32,
                               minval=-bound2, maxval=bound2)
    x2 = jax.random.normal(kx2, (b2, s2, in2), jnp.float32)

    y2 = jax.block_until_ready(linear_adapter_forward(x2, w2, bvec2))
    # Reference with the same bf16 input rounding (f32 accumulation both ways).
    x2_bf = x2.astype(jnp.bfloat16).astype(jnp.float32)
    w2_bf = w2.astype(jnp.bfloat16).astype(jnp.float32)
    y2_ref = x2_bf @ w2_bf.T + bvec2
    assert y2.shape == (b2, s2, out2)
    assert jnp.allclose(y2, y2_ref, atol=2e-3, rtol=2e-3)
    # Loose sanity check against the full-f32 reference (bf16 rounding only).
    assert jnp.allclose(y2, x2 @ w2.T + bvec2, atol=5e-2, rtol=5e-2)

    # ---- 3) Force the streaming-K tiled fallback (large-weight path) -------
    y3 = jax.block_until_ready(
        linear_adapter_forward(x2, w2, bvec2, max_resident_weight_bytes=0))
    assert jnp.allclose(y3, y2_ref, atol=2e-3, rtol=2e-3)

    print("KERNEL_OK")
</pallas_src>

<mosaic_0001>
module attributes {stable_mosaic.version = 11 : i64} {
  func.func @_linear_resident_kernel(%arg0: i32, %arg1: memref<192x1280xbf16, #tpu.memory_space<vmem>>, %arg2: memref<1280x1024xbf16, #tpu.memory_space<vmem>>, %arg3: memref<1x1024xf32, #tpu.memory_space<vmem>>, %arg4: memref<192x1024xf32, #tpu.memory_space<vmem>>) attributes {dimension_semantics = [#tpu.dimension_semantics<parallel>], iteration_bounds = array<i64: 1>, scalar_prefetch = 0 : i64, scratch_operands = 0 : i64, tpu.core_type = #tpu.core_type<tc>, window_params = [{transform_indices = @transform_0, window_bounds = array<i64: 192, 1280>}, {pipeline_mode = #tpu.pipeline_mode<synchronous>, transform_indices = @transform_1, window_bounds = array<i64: 1280, 1024>}, {pipeline_mode = #tpu.pipeline_mode<synchronous>, transform_indices = @transform_2, window_bounds = array<i64: 1, 1024>}, {transform_indices = @transform_3, window_bounds = array<i64: 192, 1024>}]} {
    %c0 = arith.constant 0 : index
    %c0_0 = arith.constant 0 : index
    %0 = vector.load %arg1[%c0, %c0_0] : memref<192x1280xbf16, #tpu.memory_space<vmem>>, vector<192x1280xbf16>
    %c0_1 = arith.constant 0 : index
    %c0_2 = arith.constant 0 : index
    %1 = vector.load %arg2[%c0_1, %c0_2] : memref<1280x1024xbf16, #tpu.memory_space<vmem>>, vector<1280x1024xbf16>
    %cst = arith.constant dense<0.000000e+00> : vector<192x1024xf32>
    %2 = tpu.matmul %0, %1, %cst {dimension_numbers = #tpu.dot_dimension_numbers<[1], [0], [0], [1], [0, 0, 1, 1], [], []>} : vector<192x1280xbf16>, vector<1280x1024xbf16>, vector<192x1024xf32> -> vector<192x1024xf32>
    %c0_3 = arith.constant 0 : index
    %c0_4 = arith.constant 0 : index
    %3 = vector.load %arg3[%c0_3, %c0_4] : memref<1x1024xf32, #tpu.memory_space<vmem>>, vector<1x1024xf32>
    %4 = vector.broadcast %3 : vector<1x1024xf32> to vector<192x1024xf32>
    %5 = arith.addf %2, %4 : vector<192x1024xf32>
    %c0_5 = arith.constant 0 : index
    %c0_6 = arith.constant 0 : index
    %6 = vector.load %arg4[%c0_5, %c0_6] : memref<192x1024xf32, #tpu.memory_space<vmem>>, vector<192x1024xf32>
    tpu.vector_store %arg4[%c0_5, %c0_6], %5 {strides = array<i32>} : memref<192x1024xf32, #tpu.memory_space<vmem>>, vector<192x1024xf32>,
    return
  }
  func.func @transform_0(%arg0: i32) -> (i32, i32) {
    %c0_i32 = arith.constant 0 : i32
    %c0_i32_0 = arith.constant 0 : i32
    return %arg0, %c0_i32 : i32, i32
  }
  func.func @transform_1(%arg0: i32) -> (i32, i32) {
    %c0_i32 = arith.constant 0 : i32
    %c0_i32_0 = arith.constant 0 : i32
    %c0_i32_1 = arith.constant 0 : i32
    return %c0_i32, %c0_i32_0 : i32, i32
  }
  func.func @transform_2(%arg0: i32) -> (i32, i32) {
    %c0_i32 = arith.constant 0 : i32
    %c0_i32_0 = arith.constant 0 : i32
    %c0_i32_1 = arith.constant 0 : i32
    return %c0_i32, %c0_i32_0 : i32, i32
  }
  func.func @transform_3(%arg0: i32) -> (i32, i32) {
    %c0_i32 = arith.constant 0 : i32
    %c0_i32_0 = arith.constant 0 : i32
    return %arg0, %c0_i32 : i32, i32
  }
}

</mosaic_0001>

<bundles_post_ra>
// kernel: tpu_custom_call.1
= control target key start
LH: loop header
LB: loop body
LE: loop exit
PB: predicated region body
PF: predicated region fallthrough
CT: control target
= control target key end

     0   :  { %8 = vsyncpa [#allocation3], 0  ;;  %s11193_s0 = inlined_call_operand.hbm [shape: bf16[192,1280], index: 0, kind: input, shape index: {}]   ;;  %s11194_s1 = inlined_call_operand.hbm [shape: bf16[1280,1024], index: 1, kind: input, shape index: {}]   ;;  %s11195_s2 = inlined_call_operand.hbm [shape: f32[1,1024], index: 2, kind: input, shape index: {}]   ;;  %s11196_s3 = inlined_call_operand.hbm [shape: f32[192,1024], index: 3, kind: output, shape index: {}]  }
   0x1   :  { %9 = vsyncpa [#allocation6], 0 }
   0x2   :  { %10 = vsyncpa [#allocation4], 0  ;;  %s9325_s12 = smov [#allocation5]  }
   0x3   :  { %s28_s13 = sshll.u32 %s9325_s12, 4  ;;  %s29_s13 = int_to_ptr.vmem [resolvable:$true] %s28_s13 }
   0x4   :  { %s9247_s14 = scalar_lea.vmem %s29_s13, 81920  ;;  %p9252_p1 = scmp.lt.s32.totalorder %s29_s13, %s29_s13 }
   0x5   :  { %p9248_p0 = scmp.ne.s32.totalorder %s29_s13, %s9247_s14  ;;  %p9253_p2 = scmp.lt.s32.totalorder %s9247_s14, %s9247_s14 }
   0x7   :  { %p9254_p3 = por %p9253_p2, %p9252_p1 }
   0x9   :  { %p9255_p4 = pnand %p9254_p3, %p9248_p0 }
   0xb   :  { %9258 = shalt.err (!%p9255_p4)
}
   0xc   :  { %s9326_s15 = smov 512   ;;  %s9327_s16 = smov 32  }
   0xd   :  { %34 = dma.hbm_to_vmem [thread:$0]  %s11194_s1, 81920, %s29_s13, [#allocation6], %s9326_s15, %s9326_s15, %s9327_s16  }
   0xe   :  { %s9328_s19 = smov [#allocation2]  }
   0xf   :  { %s16_s20 = sshll.u32 %s9328_s19, 4  ;;  %s17_s20 = int_to_ptr.vmem [resolvable:$true] %s16_s20 }
  0x10   :  { %s9267_s21 = scalar_lea.vmem %s17_s20, 15360  ;;  %p9272_p6 = scmp.lt.s32.totalorder %s17_s20, %s17_s20 }
  0x11   :  { %p9268_p5 = scmp.ne.s32.totalorder %s17_s20, %s9267_s21  ;;  %p9273_p7 = scmp.lt.s32.totalorder %s9267_s21, %s9267_s21 }
  0x13   :  { %p9274_p8 = por %p9273_p7, %p9272_p6 }
  0x15   :  { %p9275_p9 = pnand %p9274_p8, %p9268_p5 }
  0x17   :  { %9278 = shalt.err (!%p9275_p9)
}
  0x18   :  { %s9329_s22 = smov 640   ;;  %s9330_s23 = smov 40  }
  0x19   :  { %22 = dma.hbm_to_vmem [thread:$0]  %s11193_s0, 15360, %s17_s20, [#allocation3], %s9329_s22, %s9329_s22, %s9330_s23  }
  0x1a   :  { %s9331_s26 = smov [#allocation7]  }
  0x1b   :  { %s41_s27 = sshll.u32 %s9331_s26, 4  ;;  %s42_s27 = int_to_ptr.vmem [resolvable:$true] %s41_s27 }
  0x1c   :  { %s9287_s1 = scalar_lea.vmem %s42_s27, 128  ;;  %p9292_p11 = scmp.lt.s32.totalorder %s42_s27, %s42_s27 }
  0x1d   :  { %p9288_p10 = scmp.ne.s32.totalorder %s42_s27, %s9287_s1  ;;  %p9293_p12 = scmp.lt.s32.totalorder %s9287_s1, %s9287_s1 }
  0x1f   :  { %p9294_p13 = por %p9293_p12, %p9292_p11 }
  0x21   :  { %p9295_p0 = pnand %p9294_p13, %p9288_p10 }
  0x23   :  { %9298 = shalt.err (!%p9295_p0)
}
  0x24   :  { %44 = dma.hbm_to_vmem [thread:$0]  %s11195_s2, 128, %s42_s27, [#allocation6]  }
  0x25   :  { %9319 = dma.done.wait [#allocation3], 15360  }
  0x26   :  { %9320 = vsyncadd [#allocation3], 4294951936 }
  0x27   :  { %9321 = dma.done.wait [#allocation6], 82048  }
  0x28   :  { %9322 = vsyncadd [#allocation6], 4294885248  ;;  %v230_v0 = vld [vmem:[#allocation5 + $0x1c0] sm:$0xff]  ;;  %v8698_v59 = vld [vmem:[#allocation2 + $0xc] ss:$40 sps:$4 sm:$0xff]   ;;  %s9332_s0 = smov [#allocation8]  }
  0x29   :  { %v234_v1 = vld [vmem:[#allocation5 + $0x1e0] sm:$0xff]  ;;  %4841 = vmatprep.mubr.bf16.mxu1 %v8698_v59  ;;  %s7913_s2 = sshll.u32 %s9332_s0, 4  ;;  %s7914_s2 = int_to_ptr.vmem [resolvable:$true] %s7913_s2 }
  0x2a   :  { %v358_v2 = vld [vmem:[#allocation5 + $0x5c0] sm:$0xff]  ;;  %v8103_v3 = vcombine.high %v230_v0, %v234_v1  ;;  %v8102_v5 = vcombine.low %v230_v0, %v234_v1  ;;  %s9299_s30 = scalar_lea.vmem %s7914_s2, 24576  ;;  %p9304_p2 = scmp.lt.s32.totalorder %s7914_s2, %s7914_s2 }
  0x2b   :  { %v362_v4 = vld [vmem:[#allocation5 + $0x5e0] sm:$0xff]  ;;  %p9300_p1 = scmp.ne.s32.totalorder %s7914_s2, %s9299_s30  ;;  %p9305_p3 = scmp.lt.s32.totalorder %s9299_s30, %s9299_s30 }
  0x2c   :  { %v222_v6 = vld [vmem:[#allocation5 + $0x180] sm:$0xff]  ;;  %v8231_v8 = vcombine.high %v358_v2, %v362_v4  ;;  %v8230_v9 = vcombine.low %v358_v2, %v362_v4  ;;  %4656 = vmatprep.subr.bf16.mxu0 %v8103_v3 }
  0x2d   :  { %v226_v7 = vld [vmem:[#allocation5 + $0x1a0] sm:$0xff]  ;;  %4657 = vmatpush1.bf16.msra.mxu0 %v8102_v5  ;;  %p9306_p4 = por %p9305_p3, %p9304_p2 }
  0x2e   :  { %v8095_v10 = vcombine.high %v222_v6, %v226_v7  ;;  %v350_v11 = vld [vmem:[#allocation5 + $0x580] sm:$0xff]  ;;  %4809 = vmatprep.subr.bf16.mxu1 %v8231_v8  ;;  %v8094_v18 = vcombine.low %v222_v6, %v226_v7 }
  0x2f   :  { %v354_v12 = vld [vmem:[#allocation5 + $0x5a0] sm:$0xff]  ;;  %4810 = vmatpush1.bf16.msra.mxu1 %v8230_v9  ;;  %p9307_p5 = pnand %p9306_p4, %p9300_p1 }
  0x30   :  { %v214_v13 = vld [vmem:[#allocation5 + $0x140] sm:$0xff]  ;;  %v8223_v14 = vcombine.high %v350_v11, %v354_v12  ;;  %4658 = vmatprep.subr.bf16.mxu0 %v8095_v10  ;;  %v8222_v19 = vcombine.low %v350_v11, %v354_v12 }
  0x31   :  { %v218_v15 = vld [vmem:[#allocation5 + $0x160] sm:$0xff]  ;;  %4659 = vmatpush1.bf16.msra.mxu0 %v8094_v18 }
  0x32   :  { %v342_v16 = vld [vmem:[#allocation5 + $0x540] sm:$0xff]  ;;  %v8087_v20 = vcombine.high %v214_v13, %v218_v15  ;;  %4811 = vmatprep.subr.bf16.mxu1 %v8223_v14  ;;  %v8086_v26 = vcombine.low %v214_v13, %v218_v15 }
  0x33   :  { %v346_v17 = vld [vmem:[#allocation5 + $0x560] sm:$0xff]  ;;  %4812 = vmatpush1.bf16.msra.mxu1 %v8222_v19 }
  0x34   :  { %v8215_v21 = vcombine.high %v342_v16, %v346_v17  ;;  %v206_v22 = vld [vmem:[#allocation5 + $0x100] sm:$0xff]  ;;  %4660 = vmatprep.subr.bf16.mxu0 %v8087_v20  ;;  %v8214_v27 = vcombine.low %v342_v16, %v346_v17 }
  0x35   :  { %v210_v23 = vld [vmem:[#allocation5 + $0x120] sm:$0xff]  ;;  %4661 = vmatpush1.bf16.msra.mxu0 %v8086_v26 }
  0x36   :  { %v334_v24 = vld [vmem:[#allocation5 + $0x500] sm:$0xff]  ;;  %v8079_v28 = vcombine.high %v206_v22, %v210_v23  ;;  %4813 = vmatprep.subr.bf16.mxu1 %v8215_v21  ;;  %v8078_v34 = vcombine.low %v206_v22, %v210_v23 }
  0x37   :  { %v338_v25 = vld [vmem:[#allocation5 + $0x520] sm:$0xff]  ;;  %4814 = vmatpush1.bf16.msra.mxu1 %v8214_v27 }
  0x38   :  { %v8207_v29 = vcombine.high %v334_v24, %v338_v25  ;;  %v198_v30 = vld [vmem:[#allocation5 + $0xc0] sm:$0xff]  ;;  %4662 = vmatprep.subr.bf16.mxu0 %v8079_v28  ;;  %v8206_v35 = vcombine.low %v334_v24, %v338_v25 }
  0x39   :  { %v202_v31 = vld [vmem:[#allocation5 + $0xe0] sm:$0xff]  ;;  %4663 = vmatpush1.bf16.msra.mxu0 %v8078_v34 }
  0x3a   :  { %v326_v32 = vld [vmem:[#allocation5 + $0x4c0] sm:$0xff]  ;;  %v8071_v36 = vcombine.high %v198_v30, %v202_v31  ;;  %4815 = vmatprep.subr.bf16.mxu1 %v8207_v29  ;;  %v8070_v42 = vcombine.low %v198_v30, %v202_v31 }
  0x3b   :  { %v330_v33 = vld [vmem:[#allocation5 + $0x4e0] sm:$0xff]  ;;  %4816 = vmatpush1.bf16.msra.mxu1 %v8206_v35 }
  0x3c   :  { %v8199_v37 = vcombine.high %v326_v32, %v330_v33  ;;  %v190_v38 = vld [vmem:[#allocation5 + $0x80] sm:$0xff]  ;;  %4664 = vmatprep.subr.bf16.mxu0 %v8071_v36  ;;  %v8198_v43 = vcombine.low %v326_v32, %v330_v33 }
  0x3d   :  { %v194_v39 = vld [vmem:[#allocation5 + $0xa0] sm:$0xff]  ;;  %4665 = vmatpush1.bf16.msra.mxu0 %v8070_v42 }
  0x3e   :  { %v318_v40 = vld [vmem:[#allocation5 + $0x480] sm:$0xff]  ;;  %v8063_v44 = vcombine.high %v190_v38, %v194_v39  ;;  %4817 = vmatprep.subr.bf16.mxu1 %v8199_v37  ;;  %v8062_v50 = vcombine.low %v190_v38, %v194_v39 }
  0x3f   :  { %v322_v41 = vld [vmem:[#allocation5 + $0x4a0] sm:$0xff]  ;;  %4818 = vmatpush1.bf16.msra.mxu1 %v8198_v43 }
  0x40   :  { %v8191_v45 = vcombine.high %v318_v40, %v322_v41  ;;  %v182_v46 = vld [vmem:[#allocation5 + $0x40] sm:$0xff]  ;;  %4666 = vmatprep.subr.bf16.mxu0 %v8063_v44  ;;  %v8190_v52 = vcombine.low %v318_v40, %v322_v41 }
  0x41   :  { %v186_v47 = vld [vmem:[#allocation5 + $0x60] sm:$0xff]  ;;  %4667 = vmatpush1.bf16.msra.mxu0 %v8062_v50 }
  0x42   :  { %v310_v48 = vld [vmem:[#allocation5 + $0x440] sm:$0xff]  ;;  %v8055_v53 = vcombine.high %v182_v46, %v186_v47  ;;  %4819 = vmatprep.subr.bf16.mxu1 %v8191_v45  ;;  %v8054_v60 = vcombine.low %v182_v46, %v186_v47 }
  0x43   :  { %v314_v49 = vld [vmem:[#allocation5 + $0x460] sm:$0xff]  ;;  %4820 = vmatpush1.bf16.msra.mxu1 %v8190_v52 }
  0x44   :  { %v174_v51 = vld [vmem:[#allocation5] sm:$0xff]  ;;  %v8183_v55 = vcombine.high %v310_v48, %v314_v49  ;;  %4668 = vmatprep.subr.bf16.mxu0 %v8055_v53  ;;  %v8182_v61 = vcombine.low %v310_v48, %v314_v49 }
  0x45   :  { %v178_v54 = vld [vmem:[#allocation5 + $0x20] sm:$0xff]  ;;  %4669 = vmatpush1.bf16.msra.mxu0 %v8054_v60 }
  0x46   :  { %v8696_v56 = vld [vmem:[#allocation2 + $0x4] ss:$40 sps:$4 sm:$0xff]   ;;  %v8047_v62 = vcombine.high %v174_v51, %v178_v54  ;;  %4821 = vmatprep.subr.bf16.mxu1 %v8183_v55  ;;  %v8046_v4 = vcombine.low %v174_v51, %v178_v54 }
  0x47   :  { %v302_v57 = vld [vmem:[#allocation5 + $0x400] sm:$0xff]  ;;  %4688 = vmatprep.mubr.bf16.mxu0 %v8696_v56  ;;  %4822 = vmatpush1.bf16.msra.mxu1 %v8182_v61 }
  0x48   :  { %v306_v58 = vld [vmem:[#allocation5 + $0x420] sm:$0xff]  ;;  %4670 = vmatprep.subr.bf16.mxu0 %v8047_v62 }
  0x49   :  { %v294_v63 = vld [vmem:[#allocation5 + $0x3c0] sm:$0xff]  ;;  %v8175_v1 = vcombine.high %v302_v57, %v306_v58  ;;  %v8174_v5 = vcombine.low %v302_v57, %v306_v58  ;;  %4671 = vmatpush1.bf16.msra.mxu0 %v8046_v4 }
  0x4a   :  { %v298_v0 = vld [vmem:[#allocation5 + $0x3e0] sm:$0xff] }
  0x4b   :  { %v422_v2 = vld [vmem:[#allocation5 + $0x7c0] sm:$0xff]  ;;  %v8167_v6 = vcombine.high %v294_v63, %v298_v0  ;;  %4823 = vmatprep.subr.bf16.mxu1 %v8175_v1  ;;  %v8166_v12 = vcombine.low %v294_v63, %v298_v0 }
  0x4c   :  { %v426_v3 = vld [vmem:[#allocation5 + $0x7e0] sm:$0xff]  ;;  %4824 = vmatpush1.bf16.msra.mxu1 %v8174_v5 }
  0x4d   :  { %v286_v7 = vld [vmem:[#allocation5 + $0x380] sm:$0xff]  ;;  %v8295_v8 = vcombine.high %v422_v2, %v426_v3  ;;  %4672 = vmatprep.subr.bf16.mxu0 %v8167_v6  ;;  %v8294_v13 = vcombine.low %v422_v2, %v426_v3 }
  0x4e   :  { %v290_v9 = vld [vmem:[#allocation5 + $0x3a0] sm:$0xff]  ;;  %4673 = vmatpush2.bf16.msra.mxu0 %v8166_v12 }
  0x4f   :  { %v414_v10 = vld [vmem:[#allocation5 + $0x780] sm:$0xff]  ;;  %v8159_v14 = vcombine.high %v286_v7, %v290_v9  ;;  %4825 = vmatprep.subr.bf16.mxu1 %v8295_v8  ;;  %v8158_v20 = vcombine.low %v286_v7, %v290_v9 }
  0x50   :  { %v418_v11 = vld [vmem:[#allocation5 + $0x7a0] sm:$0xff]  ;;  %4826 = vmatpush2.bf16.msra.mxu1 %v8294_v13  ;;  %v8702_v13 = vld [vmem:[#allocation2 + $0x54] ss:$40 sps:$4 sm:$0xff]  }
  0x51   :  { %v278_v15 = vld [vmem:[#allocation5 + $0x340] sm:$0xff]  ;;  %v8287_v16 = vcombine.high %v414_v10, %v418_v11  ;;  %4674 = vmatprep.subr.bf16.mxu0 %v8159_v14  ;;  %v8286_v21 = vcombine.low %v414_v10, %v418_v11  ;;  %v8701_v11 = vld [vmem:[#allocation2 + $0x8] ss:$40 sps:$4 sm:$0xff]  }
  0x52   :  { %v282_v17 = vld [vmem:[#allocation5 + $0x360] sm:$0xff]  ;;  %4675 = vmatpush2.bf16.msra.mxu0 %v8158_v20 }
  0x53   :  { %v406_v18 = vld [vmem:[#allocation5 + $0x740] sm:$0xff]  ;;  %v8151_v22 = vcombine.high %v278_v15, %v282_v17  ;;  %4827 = vmatprep.subr.bf16.mxu1 %v8287_v16  ;;  %v8150_v28 = vcombine.low %v278_v15, %v282_v17 }
  0x54   :  { %v410_v19 = vld [vmem:[#allocation5 + $0x760] sm:$0xff]  ;;  %4828 = vmatpush2.bf16.msra.mxu1 %v8286_v21 }
  0x55   :  { %v8279_v23 = vcombine.high %v406_v18, %v410_v19  ;;  %v270_v24 = vld [vmem:[#allocation5 + $0x300] sm:$0xff]  ;;  %4676 = vmatprep.subr.bf16.mxu0 %v8151_v22  ;;  %v8278_v29 = vcombine.low %v406_v18, %v410_v19 }
  0x56   :  { %v274_v25 = vld [vmem:[#allocation5 + $0x320] sm:$0xff]  ;;  %4677 = vmatpush2.bf16.msra.mxu0 %v8150_v28 }
  0x57   :  { %v398_v26 = vld [vmem:[#allocation5 + $0x700] sm:$0xff]  ;;  %v8143_v30 = vcombine.high %v270_v24, %v274_v25  ;;  %4829 = vmatprep.subr.bf16.mxu1 %v8279_v23  ;;  %v8142_v36 = vcombine.low %v270_v24, %v274_v25  ;;  %v8706_v25 = vld [vmem:[#allocation2 + $0x50] ss:$40 sps:$4 sm:$0xff]  }
  0x58   :  { %v402_v27 = vld [vmem:[#allocation5 + $0x720] sm:$0xff]  ;;  %4830 = vmatpush2.bf16.msra.mxu1 %v8278_v29 }
  0x59   :  { %v8271_v31 = vcombine.high %v398_v26, %v402_v27  ;;  %v262_v32 = vld [vmem:[#allocation5 + $0x2c0] sm:$0xff]  ;;  %4678 = vmatprep.subr.bf16.mxu0 %v8143_v30  ;;  %v8270_v37 = vcombine.low %v398_v26, %v402_v27 }
  0x5a   :  { %v266_v33 = vld [vmem:[#allocation5 + $0x2e0] sm:$0xff]  ;;  %4679 = vmatpush2.bf16.msra.mxu0 %v8142_v36  ;;  %v8710_v36 = vld [vmem:[#allocation2 + $0xac] ss:$40 sps:$4 sm:$0xff]  }
  0x5b   :  { %v390_v34 = vld [vmem:[#allocation5 + $0x6c0] sm:$0xff]  ;;  %v8135_v38 = vcombine.high %v262_v32, %v266_v33  ;;  %4831 = vmatprep.subr.bf16.mxu1 %v8271_v31  ;;  %v8134_v44 = vcombine.low %v262_v32, %v266_v33 }
  0x5c   :  { %v394_v35 = vld [vmem:[#allocation5 + $0x6e0] sm:$0xff]  ;;  %4832 = vmatpush2.bf16.msra.mxu1 %v8270_v37 }
  0x5d   :  { %v8263_v39 = vcombine.high %v390_v34, %v394_v35  ;;  %v254_v40 = vld [vmem:[#allocation5 + $0x280] sm:$0xff]  ;;  %4680 = vmatprep.subr.bf16.mxu0 %v8135_v38  ;;  %v8262_v45 = vcombine.low %v390_v34, %v394_v35 }
  0x5e   :  { %v258_v41 = vld [vmem:[#allocation5 + $0x2a0] sm:$0xff]  ;;  %4681 = vmatpush2.bf16.msra.mxu0 %v8134_v44 }
  0x5f   :  { %v382_v42 = vld [vmem:[#allocation5 + $0x680] sm:$0xff]  ;;  %v8127_v46 = vcombine.high %v254_v40, %v258_v41  ;;  %4833 = vmatprep.subr.bf16.mxu1 %v8263_v39  ;;  %v8126_v52 = vcombine.low %v254_v40, %v258_v41 }
  0x60   :  { %v386_v43 = vld [vmem:[#allocation5 + $0x6a0] sm:$0xff]  ;;  %4834 = vmatpush2.bf16.msra.mxu1 %v8262_v45 }
  0x61   :  { %v8255_v47 = vcombine.high %v382_v42, %v386_v43  ;;  %v246_v48 = vld [vmem:[#allocation5 + $0x240] sm:$0xff]  ;;  %4682 = vmatprep.subr.bf16.mxu0 %v8127_v46  ;;  %v8254_v53 = vcombine.low %v382_v42, %v386_v43 }
  0x62   :  { %v250_v49 = vld [vmem:[#allocation5 + $0x260] sm:$0xff]  ;;  %4683 = vmatpush2.bf16.msra.mxu0 %v8126_v52 }
  0x63   :  { %v374_v50 = vld [vmem:[#allocation5 + $0x640] sm:$0xff]  ;;  %v8119_v54 = vcombine.high %v246_v48, %v250_v49  ;;  %4835 = vmatprep.subr.bf16.mxu1 %v8255_v47  ;;  %v8118_v60 = vcombine.low %v246_v48, %v250_v49  ;;  %v8713_v47 = vld [vmem:[#allocation2 + $0xa8] ss:$40 sps:$4 sm:$0xff]   ;;  %v8714_v49 = vld [vmem:[#allocation2 + $0xf4] ss:$40 sps:$4 sm:$0xff]  }
  0x64   :  { %v378_v51 = vld [vmem:[#allocation5 + $0x660] sm:$0xff]  ;;  %4836 = vmatpush2.bf16.msra.mxu1 %v8254_v53 }
  0x65   :  { %v8247_v55 = vcombine.high %v374_v50, %v378_v51  ;;  %v238_v56 = vld [vmem:[#allocation5 + $0x200] sm:$0xff]  ;;  %4684 = vmatprep.subr.bf16.mxu0 %v8119_v54  ;;  %v8246_v61 = vcombine.low %v374_v50, %v378_v51 }
  0x66   :  { %v242_v57 = vld [vmem:[#allocation5 + $0x220] sm:$0xff]  ;;  %4685 = vmatpush2.bf16.msra.mxu0 %v8118_v60 }
  0x67   :  { %v366_v58 = vld [vmem:[#allocation5 + $0x600] sm:$0xff]  ;;  %v8111_v62 = vcombine.high %v238_v56, %v242_v57  ;;  %4837 = vmatprep.subr.bf16.mxu1 %v8247_v55  ;;  %v8110_v4 = vcombine.low %v238_v56, %v242_v57 }
  0x68   :  { %v370_v59 = vld [vmem:[#allocation5 + $0x620] sm:$0xff]  ;;  %4838 = vmatpush2.bf16.msra.mxu1 %v8246_v61 }
  0x69   :  { %v486_v63 = vld [vmem:[#allocation5 + $0x9c0] sm:$0xff]  ;;  %v8239_v0 = vcombine.high %v366_v58, %v370_v59  ;;  %4686 = vmatprep.subr.bf16.mxu0 %v8111_v62  ;;  %v8238_v5 = vcombine.low %v366_v58, %v370_v59 }
  0x6a   :  { %v490_v1 = vld [vmem:[#allocation5 + $0x9e0] sm:$0xff]  ;;  %4687 = vmatpush2.bf16.msra.mxu0 %v8110_v4 }
  0x6b   :  { %v614_v2 = vld [vmem:[#allocation5 + $0xdc0] sm:$0xff]  ;;  %v8359_v6 = vcombine.high %v486_v63, %v490_v1  ;;  %4839 = vmatprep.subr.bf16.mxu1 %v8239_v0  ;;  %v8358_v12 = vcombine.low %v486_v63, %v490_v1  ;;  %v8718_v1 = vld [vmem:[#allocation2 + $0xf0] ss:$40 sps:$4 sm:$0xff]  }
  0x6c   :  { %v618_v3 = vld [vmem:[#allocation5 + $0xde0] sm:$0xff]  ;;  %4840 = vmatpush2.bf16.msra.mxu1 %v8238_v5 }
  0x6d   :  { %v478_v7 = vld [vmem:[#allocation5 + $0x980] sm:$0xff]  ;;  %v8487_v8 = vcombine.high %v614_v2, %v618_v3  ;;  %4962 = vmatprep.subr.bf16.mxu0 %v8359_v6  ;;  %v8486_v16 = vcombine.low %v614_v2, %v618_v3 }
  0x6e   :  { %v482_v9 = vld [vmem:[#allocation5 + $0x9a0] sm:$0xff] }
  0x6f   :  { %v8700_v10 = vld [vmem:[#allocation2] ss:$40 sps:$4 sm:$0xff]   ;;  %v8351_v17 = vcombine.high %v478_v7, %v482_v9  ;;  %v8704_v18 = vld [vmem:[#allocation2 + $0x5c] ss:$40 sps:$4 sm:$0xff]   ;;  %5115 = vmatprep.subr.bf16.mxu1 %v8487_v8  ;;  %4842 = vmatmul.mubr.bf16.vlgmr.msra.gmra.mxu1 %v8701_v11  ;;  %v8350_v24 = vcombine.low %v478_v7, %v482_v9  ;;  %v8722_v11 = vld [vmem:[#allocation2 + $0x14c] ss:$40 sps:$4 sm:$0xff]  }
  0x70   :  { %v606_v14 = vld [vmem:[#allocation5 + $0xd80] sm:$0xff]  ;;  %4689 = vmatmul.mubr.bf16.vlgmr.msra.gmra.mxu0 %v8700_v10  ;;  %5116 = vmatpush1.bf16.msra.mxu1 %v8486_v16 }
  0x71   :  { %v610_v15 = vld [vmem:[#allocation5 + $0xda0] sm:$0xff]  ;;  %4963 = vmatpush1.bf16.msra.mxu0 %v8358_v12  ;;  %4698 = vmatprep.mubr.bf16.mxu0 %v8702_v13 }
  0x72   :  { %v470_v19 = vld [vmem:[#allocation5 + $0x940] sm:$0xff]  ;;  %v8479_v22 = vcombine.high %v606_v14, %v610_v15  ;;  %4964 = vmatprep.subr.bf16.mxu0 %v8351_v17  ;;  %v8478_v26 = vcombine.low %v606_v14, %v610_v15  ;;  %4851 = vmatprep.mubr.bf16.mxu1 %v8704_v18 }
  0x73   :  { %v474_v20 = vld [vmem:[#allocation5 + $0x960] sm:$0xff] }
  0x74   :  { %v598_v21 = vld [vmem:[#allocation5 + $0xd40] sm:$0xff]  ;;  %v8343_v27 = vcombine.high %v470_v19, %v474_v20  ;;  %5117 = vmatprep.subr.bf16.mxu1 %v8479_v22  ;;  %v8342_v32 = vcombine.low %v470_v19, %v474_v20 }
  0x75   :  { %v602_v23 = vld [vmem:[#allocation5 + $0xd60] sm:$0xff]  ;;  %4965 = vmatpush1.bf16.msra.mxu0 %v8350_v24  ;;  %5118 = vmatpush1.bf16.msra.mxu1 %v8478_v26  ;;  %v8725_v24 = vld [vmem:[#allocation2 + $0x148] ss:$40 sps:$4 sm:$0xff]  }
  0x76   :  { %v8707_v28 = vld [vmem:[#allocation2 + $0x58] ss:$40 sps:$4 sm:$0xff]   ;;  %v8471_v29 = vcombine.high %v598_v21, %v602_v23  ;;  %4966 = vmatprep.subr.bf16.mxu0 %v8343_v27  ;;  %v8708_v35 = vld [vmem:[#allocation2 + $0xa4] ss:$40 sps:$4 sm:$0xff]   ;;  %v8470_v37 = vcombine.low %v598_v21, %v602_v23 }
  0x77   :  { %v462_v30 = vld [vmem:[#allocation5 + $0x900] sm:$0xff]  ;;  %4852 = vmatmul.mubr.bf16.gmra.mxu1 %v8707_v28  ;;  %v8726_v28 = vld [vmem:[#allocation2 + $0x194] ss:$40 sps:$4 sm:$0xff]  }
  0x78   :  { %v466_v31 = vld [vmem:[#allocation5 + $0x920] sm:$0xff]  ;;  %5119 = vmatprep.subr.bf16.mxu1 %v8471_v29  ;;  %4699 = vmatmul.mubr.bf16.gmra.mxu0 %v8706_v25 }
  0x79   :  { %v590_v33 = vld [vmem:[#allocation5 + $0xd00] sm:$0xff]  ;;  %v8335_v38 = vcombine.high %v462_v30, %v466_v31  ;;  %4967 = vmatpush1.bf16.msra.mxu0 %v8342_v32  ;;  %v8334_v43 = vcombine.low %v462_v30, %v466_v31  ;;  %4708 = vmatprep.mubr.bf16.mxu0 %v8708_v35 }
  0x7a   :  { %v594_v34 = vld [vmem:[#allocation5 + $0xd20] sm:$0xff]  ;;  %4861 = vmatprep.mubr.bf16.mxu1 %v8710_v36  ;;  %5120 = vmatpush1.bf16.msra.mxu1 %v8470_v37 }
  0x7b   :  { %v454_v39 = vld [vmem:[#allocation5 + $0x8c0] sm:$0xff]  ;;  %v8463_v41 = vcombine.high %v590_v33, %v594_v34  ;;  %4968 = vmatprep.subr.bf16.mxu0 %v8335_v38  ;;  %v8462_v48 = vcombine.low %v590_v33, %v594_v34 }
  0x7c   :  { %v458_v40 = vld [vmem:[#allocation5 + $0x8e0] sm:$0xff] }
  0x7d   :  { %v582_v42 = vld [vmem:[#allocation5 + $0xcc0] sm:$0xff]  ;;  %v8327_v46 = vcombine.high %v454_v39, %v458_v40  ;;  %5121 = vmatprep.subr.bf16.mxu1 %v8463_v41  ;;  %4969 = vmatpush1.bf16.msra.mxu0 %v8334_v43  ;;  %v8326_v56 = vcombine.low %v454_v39, %v458_v40  ;;  %v8730_v41 = vld [vmem:[#allocation2 + $0x190] ss:$40 sps:$4 sm:$0xff]  }
  0x7e   :  { %v586_v44 = vld [vmem:[#allocation5 + $0xce0] sm:$0xff]  ;;  %5122 = vmatpush1.bf16.msra.mxu1 %v8462_v48 }
  0x7f   :  { %v8712_v45 = vld [vmem:[#allocation2 + $0xa0] ss:$40 sps:$4 sm:$0xff]   ;;  %v8455_v52 = vcombine.high %v582_v42, %v586_v44  ;;  %v8716_v55 = vld [vmem:[#allocation2 + $0xfc] ss:$40 sps:$4 sm:$0xff]   ;;  %4970 = vmatprep.subr.bf16.mxu0 %v8327_v46  ;;  %v8454_v57 = vcombine.low %v582_v42, %v586_v44  ;;  %4862 = vmatmul.mubr.bf16.gmra.mxu1 %v8713_v47 }
  0x80   :  { %v446_v50 = vld [vmem:[#allocation5 + $0x880] sm:$0xff]  ;;  %4709 = vmatmul.mubr.bf16.gmra.mxu0 %v8712_v45  ;;  %4871 = vmatprep.mubr.bf16.mxu1 %v8716_v55 }
  0x81   :  { %v450_v51 = vld [vmem:[#allocation5 + $0x8a0] sm:$0xff]  ;;  %5123 = vmatprep.subr.bf16.mxu1 %v8455_v52  ;;  %4718 = vmatprep.mubr.bf16.mxu0 %v8714_v49 }
  0x82   :  { %v574_v53 = vld [vmem:[#allocation5 + $0xc80] sm:$0xff]  ;;  %v8319_v58 = vcombine.high %v446_v50, %v450_v51  ;;  %4971 = vmatpush1.bf16.msra.mxu0 %v8326_v56  ;;  %v8318_v0 = vcombine.low %v446_v50, %v450_v51  ;;  %5124 = vmatpush1.bf16.msra.mxu1 %v8454_v57  ;;  %v8734_v51 = vld [vmem:[#allocation2 + $0x1ec] ss:$40 sps:$4 sm:$0xff]  }
  0x83   :  { %v578_v54 = vld [vmem:[#allocation5 + $0xca0] sm:$0xff] }
  0x84   :  { %v8447_v59 = vcombine.high %v574_v53, %v578_v54  ;;  %v438_v60 = vld [vmem:[#allocation5 + $0x840] sm:$0xff]  ;;  %4972 = vmatprep.subr.bf16.mxu0 %v8319_v58  ;;  %v8446_v4 = vcombine.low %v574_v53, %v578_v54 }
  0x85   :  { %v442_v61 = vld [vmem:[#allocation5 + $0x860] sm:$0xff] }
  0x86   :  { %v566_v62 = vld [vmem:[#allocation5 + $0xc40] sm:$0xff]  ;;  %v8311_v5 = vcombine.high %v438_v60, %v442_v61  ;;  %5125 = vmatprep.subr.bf16.mxu1 %v8447_v59  ;;  %4973 = vmatpush1.bf16.msra.mxu0 %v8318_v0  ;;  %v8310_v12 = vcombine.low %v438_v60, %v442_v61 }
  0x87   :  { %v570_v63 = vld [vmem:[#allocation5 + $0xc60] sm:$0xff]  ;;  %5126 = vmatpush1.bf16.msra.mxu1 %v8446_v4 }
  0x88   :  { %v8719_v2 = vld [vmem:[#allocation2 + $0xf8] ss:$40 sps:$4 sm:$0xff]   ;;  %v8720_v3 = vld [vmem:[#allocation2 + $0x144] ss:$40 sps:$4 sm:$0xff]   ;;  %v8439_v6 = vcombine.high %v566_v62, %v570_v63  ;;  %4974 = vmatprep.subr.bf16.mxu0 %v8311_v5  ;;  %v8438_v13 = vcombine.low %v566_v62, %v570_v63  ;;  %4719 = vmatmul.mubr.bf16.gmra.mxu0 %v8718_v1  ;;  %v8737_v62 = vld [vmem:[#allocation2 + $0x1e8] ss:$40 sps:$4 sm:$0xff]  }
  0x89   :  { %v430_v7 = vld [vmem:[#allocation5 + $0x800] sm:$0xff]  ;;  %4872 = vmatmul.mubr.bf16.gmra.mxu1 %v8719_v2  ;;  %4728 = vmatprep.mubr.bf16.mxu0 %v8720_v3  ;;  %v8738_v63 = vld [vmem:[#allocation2 + $0x234] ss:$40 sps:$4 sm:$0xff]  }
  0x8a   :  { %v434_v8 = vld [vmem:[#allocation5 + $0x820] sm:$0xff]  ;;  %5127 = vmatprep.subr.bf16.mxu1 %v8439_v6  ;;  %4881 = vmatprep.mubr.bf16.mxu1 %v8722_v11 }
  0x8b   :  { %v558_v9 = vld [vmem:[#allocation5 + $0xc00] sm:$0xff]  ;;  %v8303_v14 = vcombine.high %v430_v7, %v434_v8  ;;  %4975 = vmatpush1.bf16.msra.mxu0 %v8310_v12  ;;  %v8302_v20 = vcombine.low %v430_v7, %v434_v8  ;;  %5128 = vmatpush1.bf16.msra.mxu1 %v8438_v13 }
  0x8c   :  { %v562_v10 = vld [vmem:[#allocation5 + $0xc20] sm:$0xff] }
  0x8d   :  { %v8431_v15 = vcombine.high %v558_v9, %v562_v10  ;;  %v550_v16 = vld [vmem:[#allocation5 + $0xbc0] sm:$0xff]  ;;  %4976 = vmatprep.subr.bf16.mxu0 %v8303_v14  ;;  %v8430_v22 = vcombine.low %v558_v9, %v562_v10 }
  0x8e   :  { %v554_v17 = vld [vmem:[#allocation5 + $0xbe0] sm:$0xff] }
  0x8f   :  { %v678_v18 = vld [vmem:[#allocation5 + $0xfc0] sm:$0xff]  ;;  %v8423_v23 = vcombine.high %v550_v16, %v554_v17  ;;  %5129 = vmatprep.subr.bf16.mxu1 %v8431_v15  ;;  %4977 = vmatpush1.bf16.msra.mxu0 %v8302_v20  ;;  %v8422_v32 = vcombine.low %v550_v16, %v554_v17  ;;  %v8742_v16 = vld [vmem:[#allocation2 + $0x230] ss:$40 sps:$4 sm:$0xff]  }
  0x90   :  { %v682_v19 = vld [vmem:[#allocation5 + $0xfe0] sm:$0xff]  ;;  %5130 = vmatpush1.bf16.msra.mxu1 %v8430_v22 }
  0x91   :  { %v8724_v21 = vld [vmem:[#allocation2 + $0x140] ss:$40 sps:$4 sm:$0xff]   ;;  %v8551_v25 = vcombine.high %v678_v18, %v682_v19  ;;  %v8728_v31 = vld [vmem:[#allocation2 + $0x19c] ss:$40 sps:$4 sm:$0xff]   ;;  %4978 = vmatprep.subr.bf16.mxu0 %v8423_v23  ;;  %v8550_v33 = vcombine.low %v678_v18, %v682_v19  ;;  %4882 = vmatmul.mubr.bf16.gmra.mxu1 %v8725_v24 }
  0x92   :  { %v542_v26 = vld [vmem:[#allocation5 + $0xb80] sm:$0xff]  ;;  %4729 = vmatmul.mubr.bf16.gmra.mxu0 %v8724_v21  ;;  %4891 = vmatprep.mubr.bf16.mxu1 %v8728_v31 }
  0x93   :  { %v546_v27 = vld [vmem:[#allocation5 + $0xba0] sm:$0xff]  ;;  %5131 = vmatprep.subr.bf16.mxu1 %v8551_v25  ;;  %4738 = vmatprep.mubr.bf16.mxu0 %v8726_v28 }
  0x94   :  { %v670_v29 = vld [vmem:[#allocation5 + $0xf80] sm:$0xff]  ;;  %v8415_v34 = vcombine.high %v542_v26, %v546_v27  ;;  %4979 = vmatpush2.bf16.msra.mxu0 %v8422_v32  ;;  %v8414_v40 = vcombine.low %v542_v26, %v546_v27  ;;  %5132 = vmatpush2.bf16.msra.mxu1 %v8550_v33  ;;  %v8746_v27 = vld [vmem:[#allocation2 + $0x28c] ss:$40 sps:$4 sm:$0xff]  }
  0x95   :  { %v674_v30 = vld [vmem:[#allocation5 + $0xfa0] sm:$0xff] }
  0x96   :  { %v8543_v35 = vcombine.high %v670_v29, %v674_v30  ;;  %v534_v36 = vld [vmem:[#allocation5 + $0xb40] sm:$0xff]  ;;  %4980 = vmatprep.subr.bf16.mxu0 %v8415_v34  ;;  %v8542_v42 = vcombine.low %v670_v29, %v674_v30  ;;  %v9368_v34 = vld [vmem:[#allocation5 + $0x1c8] sm:$0xff] }
  0x97   :  { %v538_v37 = vld [vmem:[#allocation5 + $0xb60] sm:$0xff] }
  0x98   :  { %v662_v38 = vld [vmem:[#allocation5 + $0xf40] sm:$0xff]  ;;  %v8407_v43 = vcombine.high %v534_v36, %v538_v37  ;;  %5133 = vmatprep.subr.bf16.mxu1 %v8543_v35  ;;  %4981 = vmatpush2.bf16.msra.mxu0 %v8414_v40  ;;  %v8406_v52 = vcombine.low %v534_v36, %v538_v37  ;;  %v9370_v35 = vld [vmem:[#allocation5 + $0x1e8] sm:$0xff] }
  0x99   :  { %v666_v39 = vld [vmem:[#allocation5 + $0xf60] sm:$0xff]  ;;  %5134 = vmatpush2.bf16.msra.mxu1 %v8542_v42  ;;  %v8749_v40 = vld [vmem:[#allocation2 + $0x288] ss:$40 sps:$4 sm:$0xff]   ;;  %v8750_v42 = vld [vmem:[#allocation2 + $0x2d4] ss:$40 sps:$4 sm:$0xff]  }
  0x9a   :  { %v8731_v44 = vld [vmem:[#allocation2 + $0x198] ss:$40 sps:$4 sm:$0xff]   ;;  %v8535_v45 = vcombine.high %v662_v38, %v666_v39  ;;  %v8732_v48 = vld [vmem:[#allocation2 + $0x1e4] ss:$40 sps:$4 sm:$0xff]   ;;  %4982 = vmatprep.subr.bf16.mxu0 %v8407_v43  ;;  %v8534_v53 = vcombine.low %v662_v38, %v666_v39  ;;  %4739 = vmatmul.mubr.bf16.gmra.mxu0 %v8730_v41  ;;  %v8105_v41 = vcombine.high %v9368_v34, %v9370_v35 }
  0x9b   :  { %v526_v46 = vld [vmem:[#allocation5 + $0xb00] sm:$0xff]  ;;  %4892 = vmatmul.mubr.bf16.gmra.mxu1 %v8731_v44  ;;  %4748 = vmatprep.mubr.bf16.mxu0 %v8732_v48  ;;  %v8754_v44 = vld [vmem:[#allocation2 + $0x2d0] ss:$40 sps:$4 sm:$0xff]  }
  0x9c   :  { %v530_v47 = vld [vmem:[#allocation5 + $0xb20] sm:$0xff]  ;;  %5135 = vmatprep.subr.bf16.mxu1 %v8535_v45  ;;  %4901 = vmatprep.mubr.bf16.mxu1 %v8734_v51 }
  0x9d   :  { %v654_v49 = vld [vmem:[#allocation5 + $0xf00] sm:$0xff]  ;;  %v8399_v54 = vcombine.high %v526_v46, %v530_v47  ;;  %4983 = vmatpush2.bf16.msra.mxu0 %v8406_v52  ;;  %v8398_v61 = vcombine.low %v526_v46, %v530_v47  ;;  %5136 = vmatpush2.bf16.msra.mxu1 %v8534_v53  ;;  %v8758_v47 = vld [vmem:[#allocation2 + $0x32c] ss:$40 sps:$4 sm:$0xff]   ;;  %v8766_v52 = vld [vmem:[#allocation2 + $0x370] ss:$40 sps:$4 sm:$0xff]  }
  0x9e   :  { %v658_v50 = vld [vmem:[#allocation5 + $0xf20] sm:$0xff] }
  0x9f   :  { %v518_v55 = vld [vmem:[#allocation5 + $0xac0] sm:$0xff]  ;;  %v8527_v56 = vcombine.high %v654_v49, %v658_v50  ;;  %4984 = vmatprep.subr.bf16.mxu0 %v8399_v54  ;;  %v8526_v0 = vcombine.low %v654_v49, %v658_v50  ;;  %v8761_v49 = vld [vmem:[#allocation2 + $0x328] ss:$40 sps:$4 sm:$0xff]   ;;  %v8762_v50 = vld [vmem:[#allocation2 + $0x374] ss:$40 sps:$4 sm:$0xff]  }
  0xa0   :  { %v522_v57 = vld [vmem:[#allocation5 + $0xae0] sm:$0xff]  ;;  %v8770_v54 = vld [vmem:[#allocation2 + $0x14] ss:$40 sps:$4 sm:$0xff]  }
  0xa1   :  { %v646_v58 = vld [vmem:[#allocation5 + $0xec0] sm:$0xff]  ;;  %v8391_v1 = vcombine.high %v518_v55, %v522_v57  ;;  %5137 = vmatprep.subr.bf16.mxu1 %v8527_v56  ;;  %4985 = vmatpush2.bf16.msra.mxu0 %v8398_v61  ;;  %v8390_v8 = vcombine.low %v518_v55, %v522_v57  ;;  %v223_v61 = vld [vmem:[#allocation5 + $0x188] sm:$0xff] }
  0xa2   :  { %v650_v59 = vld [vmem:[#allocation5 + $0xee0] sm:$0xff]  ;;  %5138 = vmatpush2.bf16.msra.mxu1 %v8526_v0 }
  0xa3   :  { %v8736_v60 = vld [vmem:[#allocation2 + $0x1e0] ss:$40 sps:$4 sm:$0xff]   ;;  %v8519_v3 = vcombine.high %v646_v58, %v650_v59  ;;  %v8740_v7 = vld [vmem:[#allocation2 + $0x23c] ss:$40 sps:$4 sm:$0xff]   ;;  %4986 = vmatprep.subr.bf16.mxu0 %v8391_v1  ;;  %v8518_v9 = vcombine.low %v646_v58, %v650_v59  ;;  %4902 = vmatmul.mubr.bf16.gmra.mxu1 %v8737_v62  ;;  %v8768_v58 = vld [vmem:[#allocation2 + $0x10] ss:$40 sps:$4 sm:$0xff]  }
  0xa4   :  { %v510_v2 = vld [vmem:[#allocation5 + $0xa80] sm:$0xff]  ;;  %4749 = vmatmul.mubr.bf16.gmra.mxu0 %v8736_v60  ;;  %4911 = vmatprep.mubr.bf16.mxu1 %v8740_v7  ;;  %v227_v62 = vld [vmem:[#allocation5 + $0x1a8] sm:$0xff] }
  0xa5   :  { %v514_v4 = vld [vmem:[#allocation5 + $0xaa0] sm:$0xff]  ;;  %5139 = vmatprep.subr.bf16.mxu1 %v8519_v3  ;;  %4758 = vmatprep.mubr.bf16.mxu0 %v8738_v63  ;;  %v8104_v63 = vcombine.low %v9368_v34, %v9370_v35  ;;  %v219_v7 = vld [vmem:[#allocation5 + $0x168] sm:$0xff] }
  0xa6   :  { %v638_v5 = vld [vmem:[#allocation5 + $0xe80] sm:$0xff]  ;;  %v8383_v10 = vcombine.high %v510_v2, %v514_v4  ;;  %4987 = vmatpush2.bf16.msra.mxu0 %v8390_v8  ;;  %v8382_v17 = vcombine.low %v510_v2, %v514_v4  ;;  %5140 = vmatpush2.bf16.msra.mxu1 %v8518_v9  ;;  %v8776_v2 = vld [vmem:[#allocation2 + $0x6c] ss:$40 sps:$4 sm:$0xff]   ;;  %v8096_v9 = vcombine.low %v223_v61, %v227_v62 }
  0xa7   :  { %v642_v6 = vld [vmem:[#allocation5 + $0xea0] sm:$0xff] }
  0xa8   :  { %v502_v11 = vld [vmem:[#allocation5 + $0xa40] sm:$0xff]  ;;  %v8511_v12 = vcombine.high %v638_v5, %v642_v6  ;;  %4988 = vmatprep.subr.bf16.mxu0 %v8383_v10  ;;  %v8510_v20 = vcombine.low %v638_v5, %v642_v6  ;;  %v8097_v5 = vcombine.high %v223_v61, %v227_v62  ;;  %v215_v6 = vld [vmem:[#allocation5 + $0x148] sm:$0xff] }
  0xa9   :  { %v506_v13 = vld [vmem:[#allocation5 + $0xa60] sm:$0xff] }
  0xaa   :  { %v630_v14 = vld [vmem:[#allocation5 + $0xe40] sm:$0xff]  ;;  %v8375_v21 = vcombine.high %v502_v11, %v506_v13  ;;  %5141 = vmatprep.subr.bf16.mxu1 %v8511_v12  ;;  %4989 = vmatpush2.bf16.msra.mxu0 %v8382_v17  ;;  %v8374_v28 = vcombine.low %v502_v11, %v506_v13  ;;  %v8089_v11 = vcombine.high %v215_v6, %v219_v7  ;;  %v207_v17 = vld [vmem:[#allocation5 + $0x108] sm:$0xff] }
  0xab   :  { %v634_v15 = vld [vmem:[#allocation5 + $0xe60] sm:$0xff]  ;;  %5142 = vmatpush2.bf16.msra.mxu1 %v8510_v20 }
  0xac   :  { %v8743_v18 = vld [vmem:[#allocation2 + $0x238] ss:$40 sps:$4 sm:$0xff]   ;;  %v8744_v19 = vld [vmem:[#allocation2 + $0x284] ss:$40 sps:$4 sm:$0xff]   ;;  %v8503_v24 = vcombine.high %v630_v14, %v634_v15  ;;  %4990 = vmatprep.subr.bf16.mxu0 %v8375_v21  ;;  %v8502_v29 = vcombine.low %v630_v14, %v634_v15  ;;  %4759 = vmatmul.mubr.bf16.gmra.mxu0 %v8742_v16  ;;  %v8779_v15 = vld [vmem:[#allocation2 + $0x68] ss:$40 sps:$4 sm:$0xff]   ;;  %v8088_v21 = vcombine.low %v215_v6, %v219_v7 }
  0xad   :  { %v494_v22 = vld [vmem:[#allocation5 + $0xa00] sm:$0xff]  ;;  %4912 = vmatmul.mubr.bf16.gmra.mxu1 %v8743_v18  ;;  %4768 = vmatprep.mubr.bf16.mxu0 %v8744_v19  ;;  %v211_v18 = vld [vmem:[#allocation5 + $0x128] sm:$0xff]  ;;  %v8780_v19 = vld [vmem:[#allocation2 + $0xb4] ss:$40 sps:$4 sm:$0xff]  }
  0xae   :  { %v498_v23 = vld [vmem:[#allocation5 + $0xa20] sm:$0xff]  ;;  %5143 = vmatprep.subr.bf16.mxu1 %v8503_v24  ;;  %4921 = vmatprep.mubr.bf16.mxu1 %v8746_v27  ;;  %v199_v27 = vld [vmem:[#allocation5 + $0xc8] sm:$0xff] }
  0xaf   :  { %v622_v25 = vld [vmem:[#allocation5 + $0xe00] sm:$0xff]  ;;  %v8367_v30 = vcombine.high %v494_v22, %v498_v23  ;;  %4991 = vmatpush2.bf16.msra.mxu0 %v8374_v28  ;;  %v8366_v36 = vcombine.low %v494_v22, %v498_v23  ;;  %5144 = vmatpush2.bf16.msra.mxu1 %v8502_v29  ;;  %v203_v28 = vld [vmem:[#allocation5 + $0xe8] sm:$0xff] }
  0xb0   :  { %v626_v26 = vld [vmem:[#allocation5 + $0xe20] sm:$0xff] }
  0xb1   :  { %v8495_v31 = vcombine.high %v622_v25, %v626_v26  ;;  %v9364_v32 = vld [vmem:[#allocation5 + $0x11c0] sm:$0xff]  ;;  %4992 = vmatprep.subr.bf16.mxu0 %v8367_v30  ;;  %v8494_v37 = vcombine.low %v622_v25, %v626_v26  ;;  %v8081_v25 = vcombine.high %v207_v17, %v211_v18  ;;  %v8784_v30 = vld [vmem:[#allocation2 + $0xb0] ss:$40 sps:$4 sm:$0xff]  }
  0xb2   :  { %v9366_v33 = vld [vmem:[#allocation5 + $0x11e0] sm:$0xff] }
  0xb3   :  { %v8615_v38 = vcombine.high %v9364_v32, %v9366_v33  ;;  %v8748_v39 = vld [vmem:[#allocation2 + $0x280] ss:$40 sps:$4 sm:$0xff]   ;;  %5145 = vmatprep.subr.bf16.mxu1 %v8495_v31  ;;  %v8752_v43 = vld [vmem:[#allocation2 + $0x2dc] ss:$40 sps:$4 sm:$0xff]   ;;  %4993 = vmatpush2.bf16.msra.mxu0 %v8366_v36  ;;  %v8614_v60 = vcombine.low %v9364_v32, %v9366_v33  ;;  %v8080_v31 = vcombine.low %v207_v17, %v211_v18 }
  0xb4   :  { %5146 = vmatpush2.bf16.msra.mxu1 %v8494_v37  ;;  %4769 = vmatmul.mubr.bf16.gmra.mxu0 %v8748_v39  ;;  %v8755_v45 = vld [vmem:[#allocation2 + $0x2d8] ss:$40 sps:$4 sm:$0xff]   ;;  %v8756_v46 = vld [vmem:[#allocation2 + $0x324] ss:$40 sps:$4 sm:$0xff]   ;;  %v8073_v33 = vcombine.high %v199_v27, %v203_v28 }
  0xb5   :  { %5268 = vmatprep.subr.bf16.mxu0 %v8615_v38  ;;  %5421 = vmatprep.subr.bf16.mxu1 %v8105_v41  ;;  %v8760_v48 = vld [vmem:[#allocation2 + $0x320] ss:$40 sps:$4 sm:$0xff]   ;;  %v8764_v51 = vld [vmem:[#allocation2 + $0x37c] ss:$40 sps:$4 sm:$0xff]   ;;  %v8788_v39 = vld [vmem:[#allocation2 + $0x10c] ss:$40 sps:$4 sm:$0xff]   ;;  %v8072_v41 = vcombine.low %v199_v27, %v203_v28 }
  0xb6   :  { %4922 = vmatmul.mubr.bf16.gmra.mxu1 %v8749_v40  ;;  %4778 = vmatprep.mubr.bf16.mxu0 %v8750_v42  ;;  %v8767_v53 = vld [vmem:[#allocation2 + $0x378] ss:$40 sps:$4 sm:$0xff]   ;;  %v8773_v55 = vld [vmem:[#allocation2 + $0x1c] ss:$40 sps:$4 sm:$0xff]   ;;  %v191_v37 = vld [vmem:[#allocation5 + $0x88] sm:$0xff] }
  0xb7   :  { %4931 = vmatprep.mubr.bf16.mxu1 %v8752_v43  ;;  %v734_v56 = vld [vmem:[#allocation5 + $0x1180] sm:$0xff]  ;;  %v195_v38 = vld [vmem:[#allocation5 + $0xa8] sm:$0xff] }
  0xb8   :  { %v738_v57 = vld [vmem:[#allocation5 + $0x11a0] sm:$0xff]  ;;  %v8065_v43 = vcombine.high %v191_v37, %v195_v38  ;;  %v8803_v28 = vld [vmem:[#allocation2 + $0x1a8] ss:$40 sps:$4 sm:$0xff]  }
  0xb9   :  { %v8771_v59 = vld [vmem:[#allocation2 + $0x18] ss:$40 sps:$4 sm:$0xff]   ;;  %v8607_v0 = vcombine.high %v734_v56, %v738_v57  ;;  %v8774_v1 = vld [vmem:[#allocation2 + $0x64] ss:$40 sps:$4 sm:$0xff]   ;;  %v8606_v8 = vcombine.low %v734_v56, %v738_v57  ;;  %v8792_v56 = vld [vmem:[#allocation2 + $0x154] ss:$40 sps:$4 sm:$0xff]  }
  0xba   :  { %v726_v3 = vld [vmem:[#allocation5 + $0x1140] sm:$0xff]  ;;  %v175_v57 = vld [vmem:[#allocation5 + $0x8] sm:$0xff] }
  0xbb   :  { %v730_v4 = vld [vmem:[#allocation5 + $0x1160] sm:$0xff] }
  0xbc   :  { %4779 = vmatmul.mubr.bf16.gmra.mxu0 %v8754_v44  ;;  %v8599_v10 = vcombine.high %v726_v3, %v730_v4  ;;  %v8778_v12 = vld [vmem:[#allocation2 + $0x60] ss:$40 sps:$4 sm:$0xff]   ;;  %v8598_v16 = vcombine.low %v726_v3, %v730_v4  ;;  %v8782_v20 = vld [vmem:[#allocation2 + $0xbc] ss:$40 sps:$4 sm:$0xff]  }
  0xbd   :  { %4788 = vmatprep.mubr.bf16.mxu0 %v8756_v46  ;;  %v718_v13 = vld [vmem:[#allocation5 + $0x1100] sm:$0xff]  ;;  %v183_v46 = vld [vmem:[#allocation5 + $0x48] sm:$0xff] }
  0xbe   :  { %4932 = vmatmul.mubr.bf16.gmra.mxu1 %v8755_v45  ;;  %v722_v14 = vld [vmem:[#allocation5 + $0x1120] sm:$0xff]  ;;  %v299_v3 = vld [vmem:[#allocation5 + $0x3e8] sm:$0xff] }
  0xbf   :  { %4941 = vmatprep.mubr.bf16.mxu1 %v8758_v47  ;;  %v8591_v22 = vcombine.high %v718_v13, %v722_v14  ;;  %v710_v23 = vld [vmem:[#allocation5 + $0x10c0] sm:$0xff]  ;;  %v8590_v26 = vcombine.low %v718_v13, %v722_v14  ;;  %v187_v47 = vld [vmem:[#allocation5 + $0x68] sm:$0xff] }
  0xc0   :  { %v714_v24 = vld [vmem:[#allocation5 + $0x10e0] sm:$0xff]  ;;  %v8056_v61 = vcombine.low %v183_v46, %v187_v47  ;;  %v287_v13 = vld [vmem:[#allocation5 + $0x388] sm:$0xff] }
  0xc1   :  { %v8583_v29 = vcombine.high %v710_v23, %v714_v24  ;;  %v8785_v32 = vld [vmem:[#allocation2 + $0xb8] ss:$40 sps:$4 sm:$0xff]   ;;  %v8786_v36 = vld [vmem:[#allocation2 + $0x104] ss:$40 sps:$4 sm:$0xff]   ;;  %v8582_v40 = vcombine.low %v710_v23, %v714_v24 }
  0xc2   :  { %v702_v34 = vld [vmem:[#allocation5 + $0x1080] sm:$0xff]  ;;  %v291_v14 = vld [vmem:[#allocation5 + $0x3a8] sm:$0xff] }
  0xc3   :  { %v706_v35 = vld [vmem:[#allocation5 + $0x10a0] sm:$0xff]  ;;  %v283_v23 = vld [vmem:[#allocation5 + $0x368] sm:$0xff] }
  0xc4   :  { %4789 = vmatmul.mubr.bf16.gmra.mxu0 %v8760_v48  ;;  %v8575_v42 = vcombine.high %v702_v34, %v706_v35  ;;  %v694_v44 = vld [vmem:[#allocation5 + $0x1040] sm:$0xff]  ;;  %v8574_v48 = vcombine.low %v702_v34, %v706_v35  ;;  %v275_v34 = vld [vmem:[#allocation5 + $0x328] sm:$0xff] }
  0xc5   :  { %4798 = vmatprep.mubr.bf16.mxu0 %v8762_v50  ;;  %v698_v45 = vld [vmem:[#allocation5 + $0x1060] sm:$0xff]  ;;  %v8064_v50 = vcombine.low %v191_v37, %v195_v38 }
  0xc6   :  { %4942 = vmatmul.mubr.bf16.gmra.mxu1 %v8761_v49  ;;  %v8790_v49 = vld [vmem:[#allocation2 + $0x100] ss:$40 sps:$4 sm:$0xff]   ;;  %v8806_v35 = vld [vmem:[#allocation2 + $0x1fc] ss:$40 sps:$4 sm:$0xff]  }
  0xc7   :  { %4951 = vmatprep.mubr.bf16.mxu1 %v8764_v51  ;;  %v8567_v51 = vcombine.high %v694_v44, %v698_v45 }
  0xcc   :  { %4799 = vmatmul.mubr.bf16.gmra.mxu0 %v8766_v52  ;;  %v8791_v52 = vld [vmem:[#allocation2 + $0x108] ss:$40 sps:$4 sm:$0xff]  }
  0xcd   :  { %4994 = vmatprep.mubr.bf16.mxu0 %v8770_v54  ;;  %v686_v54 = vld [vmem:[#allocation5 + $0x1000] sm:$0xff] }
  0xce   :  { %4952 = vmatmul.mubr.bf16.gmra.mxu1 %v8767_v53  ;;  %v8057_v53 = vcombine.high %v183_v46, %v187_v47 }
  0xcf   :  { %5147 = vmatprep.mubr.bf16.mxu1 %v8773_v55  ;;  %v690_v55 = vld [vmem:[#allocation5 + $0x1020] sm:$0xff] }
  0xd0   :  { %v8559_v62 = vcombine.high %v686_v54, %v690_v55  ;;  %v8558_v4 = vcombine.low %v686_v54, %v690_v55  ;;  %v259_v54 = vld [vmem:[#allocation5 + $0x2a8] sm:$0xff] }
  0xd1   :  { %v8812_v55 = vld [vmem:[#allocation2 + $0x24c] ss:$40 sps:$4 sm:$0xff]  }
  0xd4   :  { %4995 = vmatmul.mubr.bf16.vlgmr.msra.gmra.mxu0 %v8768_v58  ;;  %v179_v58 = vld [vmem:[#allocation5 + $0x28] sm:$0xff] }
  0xd5   :  { %5269 = vmatpush1.bf16.msra.mxu0 %v8614_v60  ;;  %5004 = vmatprep.mubr.bf16.mxu0 %v8774_v1  ;;  %v8566_v60 = vcombine.low %v694_v44, %v698_v45  ;;  %v810_v1 = vld [vmem:[#allocation5 + $0x13e0] sm:$0xff]  ;;  %v8048_v6 = vcombine.low %v175_v57, %v179_v58  ;;  %v8808_v45 = vld [vmem:[#allocation2 + $0x1f0] ss:$40 sps:$4 sm:$0xff]  }
  0xd6   :  { %5148 = vmatmul.mubr.bf16.vlgmr.msra.gmra.mxu1 %v8771_v59  ;;  %5270 = vmatprep.subr.bf16.mxu0 %v8607_v0  ;;  %v8794_v59 = vld [vmem:[#allocation2 + $0x15c] ss:$40 sps:$4 sm:$0xff]  }
  0xd7   :  { %5422 = vmatpush1.bf16.msra.mxu1 %v8104_v63  ;;  %5157 = vmatprep.mubr.bf16.mxu1 %v8776_v2  ;;  %v8049_v63 = vcombine.high %v175_v57, %v179_v58  ;;  %v806_v0 = vld [vmem:[#allocation5 + $0x13c0] sm:$0xff]  ;;  %v295_v2 = vld [vmem:[#allocation5 + $0x3c8] sm:$0xff] }
  0xd8   :  { %5423 = vmatprep.subr.bf16.mxu1 %v8097_v5  ;;  %v8796_v5 = vld [vmem:[#allocation2 + $0x150] ss:$40 sps:$4 sm:$0xff]   ;;  %v8679_v7 = vcombine.high %v806_v0, %v810_v1  ;;  %v8168_v17 = vcombine.low %v295_v2, %v299_v3 }
  0xd9   :  { %5271 = vmatpush1.bf16.msra.mxu0 %v8606_v8  ;;  %v8797_v8 = vld [vmem:[#allocation2 + $0x158] ss:$40 sps:$4 sm:$0xff]  }
  0xda   :  { %5272 = vmatprep.subr.bf16.mxu0 %v8599_v10  ;;  %v798_v10 = vld [vmem:[#allocation5 + $0x1380] sm:$0xff] }
  0xdb   :  { %5424 = vmatpush1.bf16.msra.mxu1 %v8096_v9  ;;  %v8169_v9 = vcombine.high %v295_v2, %v299_v3 }
  0xdc   :  { %5425 = vmatprep.subr.bf16.mxu1 %v8089_v11  ;;  %5005 = vmatmul.mubr.bf16.gmra.mxu0 %v8778_v12  ;;  %v802_v11 = vld [vmem:[#allocation5 + $0x13a0] sm:$0xff] }
  0xdd   :  { %5273 = vmatpush1.bf16.msra.mxu0 %v8598_v16  ;;  %5014 = vmatprep.mubr.bf16.mxu0 %v8780_v19  ;;  %v8798_v12 = vld [vmem:[#allocation2 + $0x1a4] ss:$40 sps:$4 sm:$0xff]   ;;  %v8678_v16 = vcombine.low %v806_v0, %v810_v1  ;;  %v8671_v18 = vcombine.high %v798_v10, %v802_v11  ;;  %v8161_v19 = vcombine.high %v287_v13, %v291_v14  ;;  %v8814_v1 = vld [vmem:[#allocation2 + $0x240] ss:$40 sps:$4 sm:$0xff]  }
  0xde   :  { %5158 = vmatmul.mubr.bf16.gmra.mxu1 %v8779_v15  ;;  %5274 = vmatprep.subr.bf16.mxu0 %v8591_v22  ;;  %v8800_v15 = vld [vmem:[#allocation2 + $0x1ac] ss:$40 sps:$4 sm:$0xff]   ;;  %v8670_v24 = vcombine.low %v798_v10, %v802_v11  ;;  %v8818_v11 = vld [vmem:[#allocation2 + $0x29c] ss:$40 sps:$4 sm:$0xff]  }
  0xdf   :  { %5167 = vmatprep.mubr.bf16.mxu1 %v8782_v20  ;;  %5426 = vmatpush1.bf16.msra.mxu1 %v8088_v21  ;;  %v790_v20 = vld [vmem:[#allocation5 + $0x1340] sm:$0xff]  ;;  %v279_v22 = vld [vmem:[#allocation5 + $0x348] sm:$0xff] }
  0xe0   :  { %5427 = vmatprep.subr.bf16.mxu1 %v8081_v25  ;;  %v794_v21 = vld [vmem:[#allocation5 + $0x1360] sm:$0xff]  ;;  %v8152_v37 = vcombine.low %v279_v22, %v283_v23  ;;  %v243_v10 = vld [vmem:[#allocation5 + $0x228] sm:$0xff] }
  0xe1   :  { %5275 = vmatpush1.bf16.msra.mxu0 %v8590_v26  ;;  %v8802_v25 = vld [vmem:[#allocation2 + $0x1a0] ss:$40 sps:$4 sm:$0xff]   ;;  %v8160_v26 = vcombine.low %v287_v13, %v291_v14  ;;  %v8663_v27 = vcombine.high %v790_v20, %v794_v21 }
  0xe2   :  { %5276 = vmatprep.subr.bf16.mxu0 %v8583_v29  ;;  %v8153_v29 = vcombine.high %v279_v22, %v283_v23  ;;  %v8820_v23 = vld [vmem:[#allocation2 + $0x290] ss:$40 sps:$4 sm:$0xff]  }
  0xe3   :  { %5428 = vmatpush1.bf16.msra.mxu1 %v8080_v31  ;;  %v786_v31 = vld [vmem:[#allocation5 + $0x1320] sm:$0xff] }
  0xe4   :  { %5015 = vmatmul.mubr.bf16.gmra.mxu0 %v8784_v30  ;;  %5429 = vmatprep.subr.bf16.mxu1 %v8073_v33  ;;  %v782_v30 = vld [vmem:[#allocation5 + $0x1300] sm:$0xff]  ;;  %v271_v33 = vld [vmem:[#allocation5 + $0x308] sm:$0xff] }
  0xe5   :  { %5024 = vmatprep.mubr.bf16.mxu0 %v8786_v36  ;;  %5277 = vmatpush1.bf16.msra.mxu0 %v8582_v40  ;;  %v8662_v36 = vcombine.low %v790_v20, %v794_v21  ;;  %v8655_v38 = vcombine.high %v782_v30, %v786_v31  ;;  %v774_v40 = vld [vmem:[#allocation5 + $0x12c0] sm:$0xff]  ;;  %v8654_v44 = vcombine.low %v782_v30, %v786_v31  ;;  %v8828_v30 = vld [vmem:[#allocation2 + $0x334] ss:$40 sps:$4 sm:$0xff]  }
  0xe6   :  { %5168 = vmatmul.mubr.bf16.gmra.mxu1 %v8785_v32  ;;  %5278 = vmatprep.subr.bf16.mxu0 %v8575_v42  ;;  %v8804_v32 = vld [vmem:[#allocation2 + $0x1f4] ss:$40 sps:$4 sm:$0xff]   ;;  %v263_v42 = vld [vmem:[#allocation5 + $0x2c8] sm:$0xff]  ;;  %v8144_v46 = vcombine.low %v271_v33, %v275_v34 }
  0xe7   :  { %5177 = vmatprep.mubr.bf16.mxu1 %v8788_v39  ;;  %5430 = vmatpush1.bf16.msra.mxu1 %v8072_v41  ;;  %v8145_v39 = vcombine.high %v271_v33, %v275_v34  ;;  %v778_v41 = vld [vmem:[#allocation5 + $0x12e0] sm:$0xff] }
  0xe8   :  { %5431 = vmatprep.subr.bf16.mxu1 %v8065_v43  ;;  %v267_v43 = vld [vmem:[#allocation5 + $0x2e8] sm:$0xff]  ;;  %v8647_v47 = vcombine.high %v774_v40, %v778_v41  ;;  %v8830_v31 = vld [vmem:[#allocation2 + $0x33c] ss:$40 sps:$4 sm:$0xff]   ;;  %v8833_v33 = vld [vmem:[#allocation2 + $0x338] ss:$40 sps:$4 sm:$0xff]  }
  0xe9   :  { %5279 = vmatpush1.bf16.msra.mxu0 %v8574_v48  ;;  %v8809_v48 = vld [vmem:[#allocation2 + $0x1f8] ss:$40 sps:$4 sm:$0xff]   ;;  %v8136_v57 = vcombine.low %v263_v42, %v267_v43  ;;  %v8834_v34 = vld [vmem:[#allocation2 + $0x384] ss:$40 sps:$4 sm:$0xff]  }
  0xea   :  { %5280 = vmatprep.subr.bf16.mxu0 %v8567_v51  ;;  %v770_v51 = vld [vmem:[#allocation5 + $0x12a0] sm:$0xff] }
  0xeb   :  { %5432 = vmatpush1.bf16.msra.mxu1 %v8064_v50  ;;  %v766_v50 = vld [vmem:[#allocation5 + $0x1280] sm:$0xff] }
  0xec   :  { %5025 = vmatmul.mubr.bf16.gmra.mxu0 %v8790_v49  ;;  %5433 = vmatprep.subr.bf16.mxu1 %v8057_v53  ;;  %v8137_v49 = vcombine.high %v263_v42, %v267_v43  ;;  %v255_v53 = vld [vmem:[#allocation5 + $0x288] sm:$0xff]  ;;  %v8639_v58 = vcombine.high %v766_v50, %v770_v51  ;;  %v8638_v0 = vcombine.low %v766_v50, %v770_v51  ;;  %v814_v43 = vld [vmem:[#allocation7] sm:$0xff] }
  0xed   :  { %5034 = vmatprep.mubr.bf16.mxu0 %v8792_v56  ;;  %5281 = vmatpush1.bf16.msra.mxu0 %v8566_v60  ;;  %v8646_v56 = vcombine.low %v774_v40, %v778_v41  ;;  %v758_v60 = vld [vmem:[#allocation5 + $0x1240] sm:$0xff]  ;;  %v8128_v2 = vcombine.low %v255_v53, %v259_v54  ;;  %v479_v50 = vld [vmem:[#allocation5 + $0x988] sm:$0xff] }
  0xee   :  { %5178 = vmatmul.mubr.bf16.gmra.mxu1 %v8791_v52  ;;  %5282 = vmatprep.subr.bf16.mxu0 %v8559_v62  ;;  %v8810_v52 = vld [vmem:[#allocation2 + $0x244] ss:$40 sps:$4 sm:$0xff]  }
  0xef   :  { %5187 = vmatprep.mubr.bf16.mxu1 %v8794_v59  ;;  %5434 = vmatpush1.bf16.msra.mxu1 %v8056_v61  ;;  %v8129_v59 = vcombine.high %v255_v53, %v259_v54  ;;  %v762_v61 = vld [vmem:[#allocation5 + $0x1260] sm:$0xff]  ;;  %v247_v62 = vld [vmem:[#allocation5 + $0x248] sm:$0xff] }
  0xf0   :  { %5435 = vmatprep.subr.bf16.mxu1 %v8049_v63  ;;  %v251_v63 = vld [vmem:[#allocation5 + $0x268] sm:$0xff]  ;;  %v8631_v3 = vcombine.high %v758_v60, %v762_v61 }
  0xf1   :  { %5283 = vmatpush1.bf16.msra.mxu0 %v8558_v4  ;;  %v8815_v4 = vld [vmem:[#allocation2 + $0x248] ss:$40 sps:$4 sm:$0xff]   ;;  %v8120_v13 = vcombine.low %v247_v62, %v251_v63  ;;  %v8876_v42 = vld [vmem:[#allocation2 + $0x4] ss:$40 sps:$4 sm:$0xff]  }
  0xf2   :  { %5284 = vmatprep.subr.bf16.mxu0 %v8679_v7  ;;  %v754_v7 = vld [vmem:[#allocation5 + $0x1220] sm:$0xff]  ;;  %v483_v51 = vld [vmem:[#allocation5 + $0x9a8] sm:$0xff] }
  0xf3   :  { %5436 = vmatpush1.bf16.msra.mxu1 %v8048_v6  ;;  %v750_v6 = vld [vmem:[#allocation5 + $0x1200] sm:$0xff] }
  0xf4   :  { %5035 = vmatmul.mubr.bf16.gmra.mxu0 %v8796_v5  ;;  %5437 = vmatprep.subr.bf16.mxu1 %v8169_v9  ;;  %v8121_v5 = vcombine.high %v247_v62, %v251_v63  ;;  %v239_v9 = vld [vmem:[#allocation5 + $0x208] sm:$0xff]  ;;  %v8623_v14 = vcombine.high %v750_v6, %v754_v7  ;;  %v8622_v20 = vcombine.low %v750_v6, %v754_v7 }
  0xf5   :  { %5044 = vmatprep.mubr.bf16.mxu0 %v8798_v12  ;;  %5285 = vmatpush2.bf16.msra.mxu0 %v8678_v16  ;;  %v8630_v12 = vcombine.low %v758_v60, %v762_v61  ;;  %v9380_v16 = vld [vmem:[#allocation5 + $0x5c8] sm:$0xff]  ;;  %v8112_v21 = vcombine.low %v239_v9, %v243_v10 }
  0xf6   :  { %5188 = vmatmul.mubr.bf16.gmra.mxu1 %v8797_v8  ;;  %5286 = vmatprep.subr.bf16.mxu0 %v8671_v18  ;;  %v8816_v8 = vld [vmem:[#allocation2 + $0x294] ss:$40 sps:$4 sm:$0xff]   ;;  %v9384_v18 = vld [vmem:[#allocation5 + $0x9c8] sm:$0xff] }
  0xf7   :  { %5197 = vmatprep.mubr.bf16.mxu1 %v8800_v15  ;;  %5438 = vmatpush2.bf16.msra.mxu1 %v8168_v17  ;;  %v8113_v15 = vcombine.high %v239_v9, %v243_v10  ;;  %v9382_v17 = vld [vmem:[#allocation5 + $0x5e8] sm:$0xff] }
  0xf8   :  { %5439 = vmatprep.subr.bf16.mxu1 %v8161_v19  ;;  %v9386_v19 = vld [vmem:[#allocation5 + $0x9e8] sm:$0xff]  ;;  %v8233_v22 = vcombine.high %v9380_v16, %v9382_v17 }
  0xf9   :  { %5287 = vmatpush2.bf16.msra.mxu0 %v8670_v24  ;;  %v8361_v24 = vcombine.high %v9384_v18, %v9386_v19  ;;  %v9404_v60 = vld [vmem:[#allocation5 + $0x948] sm:$0xff] }
  0xfa   :  { %5288 = vmatprep.subr.bf16.mxu0 %v8663_v27  ;;  %v8824_v27 = vld [vmem:[#allocation2 + $0x2ec] ss:$40 sps:$4 sm:$0xff]  }
  0xfb   :  { %5440 = vmatpush2.bf16.msra.mxu1 %v8160_v26  ;;  %v8822_v26 = vld [vmem:[#allocation2 + $0x2e4] ss:$40 sps:$4 sm:$0xff]  }
  0xfc   :  { %5045 = vmatmul.mubr.bf16.gmra.mxu0 %v8802_v25  ;;  %5441 = vmatprep.subr.bf16.mxu1 %v8153_v29  ;;  %v8821_v25 = vld [vmem:[#allocation2 + $0x298] ss:$40 sps:$4 sm:$0xff]   ;;  %v8827_v29 = vld [vmem:[#allocation2 + $0x2e8] ss:$40 sps:$4 sm:$0xff]  }
  0xfd   :  { %5054 = vmatprep.mubr.bf16.mxu0 %v8804_v32  ;;  %5289 = vmatpush2.bf16.msra.mxu0 %v8662_v36  ;;  %v8832_v32 = vld [vmem:[#allocation2 + $0x330] ss:$40 sps:$4 sm:$0xff]   ;;  %v816_v36 = vlaneseq  ;;  %v9406_v61 = vld [vmem:[#allocation5 + $0x968] sm:$0xff] }
  0xfe   :  { %5198 = vmatmul.mubr.bf16.gmra.mxu1 %v8803_v28  ;;  %5290 = vmatprep.subr.bf16.mxu0 %v8655_v38  ;;  %v8826_v28 = vld [vmem:[#allocation2 + $0x2e0] ss:$40 sps:$4 sm:$0xff]   ;;  %v8345_v9 = vcombine.high %v9404_v60, %v9406_v61 }
  0xff   :  { %5207 = vmatprep.mubr.bf16.mxu1 %v8806_v35  ;;  %5442 = vmatpush2.bf16.msra.mxu1 %v8152_v37  ;;  %v8836_v35 = vld [vmem:[#allocation2 + $0x38c] ss:$40 sps:$4 sm:$0xff]   ;;  %v8838_v37 = vld [vmem:[#allocation2 + $0x380] ss:$40 sps:$4 sm:$0xff]   ;;  %v9392_v40 = vshrl.u32 %v816_v36, 7 }
 0x100   :  { %5443 = vmatprep.subr.bf16.mxu1 %v8145_v39  ;;  %v8839_v38 = vld [vmem:[#allocation2 + $0x388] ss:$40 sps:$4 sm:$0xff]   ;;  %v8842_v39 = vld [vmem:[#allocation2 + $0x24] ss:$40 sps:$4 sm:$0xff]  }
 0x101   :  { %5291 = vmatpush2.bf16.msra.mxu0 %v8654_v44  ;;  %11201 = vst [vmem:[#allocation12_spill] sm:$0xff] %v9392_v40  ;;  %v818_v41 = vsub.s32 0, %v9392_v40  ;;  %v822_v44 = vsub.s32 1, %v9392_v40  ;;  %v455_v36 = vld [vmem:[#allocation5 + $0x8c8] sm:$0xff] }
 0x102   :  { %5292 = vmatprep.subr.bf16.mxu0 %v8647_v47  ;;  %v8840_v47 = vld [vmem:[#allocation2 + $0x20] ss:$40 sps:$4 sm:$0xff]  }
 0x103   :  { %5444 = vmatpush2.bf16.msra.mxu1 %v8144_v46  ;;  %v355_v46 = vld [vmem:[#allocation5 + $0x5a8] sm:$0xff]  ;;  %v9402_v54 = vrot.slane %v814_v43, %v822_v44 }
 0x104   :  { %5055 = vmatmul.mubr.bf16.gmra.mxu0 %v8808_v45  ;;  %5445 = vmatprep.subr.bf16.mxu1 %v8137_v49  ;;  %v351_v45 = vld [vmem:[#allocation5 + $0x588] sm:$0xff]  ;;  %v8232_v49 = vcombine.low %v9380_v16, %v9382_v17 }
 0x105   :  { %5064 = vmatprep.mubr.bf16.mxu0 %v8810_v52  ;;  %5293 = vmatpush2.bf16.msra.mxu0 %v8646_v56  ;;  %v8360_v52 = vcombine.low %v9384_v18, %v9386_v19  ;;  %v8225_v53 = vcombine.high %v351_v45, %v355_v46  ;;  %v343_v56 = vld [vmem:[#allocation5 + $0x548] sm:$0xff] }
 0x106   :  { %5208 = vmatmul.mubr.bf16.gmra.mxu1 %v8809_v48  ;;  %5294 = vmatprep.subr.bf16.mxu0 %v8639_v58  ;;  %v9396_v48 = vrot.slane %v814_v43, %v818_v41  ;;  %v463_v18 = vld [vmem:[#allocation5 + $0x908] sm:$0xff] }
 0x107   :  { %5217 = vmatprep.mubr.bf16.mxu1 %v8812_v55  ;;  %5446 = vmatpush2.bf16.msra.mxu1 %v8136_v57  ;;  %v8843_v55 = vld [vmem:[#allocation2 + $0x74] ss:$40 sps:$4 sm:$0xff]   ;;  %v347_v57 = vld [vmem:[#allocation5 + $0x568] sm:$0xff] }
 0x108   :  { %5447 = vmatprep.subr.bf16.mxu1 %v8129_v59  ;;  %v8353_v59 = vcombine.high %v479_v50, %v483_v51  ;;  %v8216_v17 = vcombine.low %v343_v56, %v347_v57  ;;  %v467_v19 = vld [vmem:[#allocation5 + $0x928] sm:$0xff] }
 0x109   :  { %5295 = vmatpush2.bf16.msra.mxu0 %v8638_v0  ;;  %v8877_v0 = vld [vmem:[#allocation2] ss:$40 sps:$4 sm:$0xff]  }
 0x10a   :  { %5296 = vmatprep.subr.bf16.mxu0 %v8631_v3  ;;  %v8352_v3 = vcombine.low %v479_v50, %v483_v51  ;;  %v319_v50 = vld [vmem:[#allocation5 + $0x488] sm:$0xff] }
 0x10b   :  { %5448 = vmatpush2.bf16.msra.mxu1 %v8128_v2  ;;  %v323_v51 = vld [vmem:[#allocation5 + $0x4a8] sm:$0xff] }
 0x10c   :  { %5065 = vmatmul.mubr.bf16.gmra.mxu0 %v8814_v1  ;;  %5449 = vmatprep.subr.bf16.mxu1 %v8121_v5  ;;  %v8224_v1 = vcombine.low %v351_v45, %v355_v46  ;;  %v8336_v45 = vcombine.low %v463_v18, %v467_v19 }
 0x10d   :  { %5074 = vmatprep.mubr.bf16.mxu0 %v8816_v8  ;;  %5297 = vmatpush2.bf16.msra.mxu0 %v8630_v12  ;;  %v8878_v8 = vld [vmem:[#allocation2 + $0x54] ss:$40 sps:$4 sm:$0xff]   ;;  %v335_v12 = vld [vmem:[#allocation5 + $0x508] sm:$0xff] }
 0x10e   :  { %5218 = vmatmul.mubr.bf16.gmra.mxu1 %v8815_v4  ;;  %5298 = vmatprep.subr.bf16.mxu0 %v8623_v14  ;;  %v8217_v4 = vcombine.high %v343_v56, %v347_v57  ;;  %v8849_v56 = vld [vmem:[#allocation2 + $0x114] ss:$40 sps:$4 sm:$0xff]   ;;  %v447_v57 = vld [vmem:[#allocation5 + $0x888] sm:$0xff] }
 0x10f   :  { %5227 = vmatprep.mubr.bf16.mxu1 %v8818_v11  ;;  %5450 = vmatpush2.bf16.msra.mxu1 %v8120_v13  ;;  %v8845_v11 = vld [vmem:[#allocation2 + $0x70] ss:$40 sps:$4 sm:$0xff]   ;;  %v339_v13 = vld [vmem:[#allocation5 + $0x528] sm:$0xff] }
 0x110   :  { %5451 = vmatprep.subr.bf16.mxu1 %v8113_v15 }
 0x111   :  { %5299 = vmatpush2.bf16.msra.mxu0 %v8622_v20 }
 0x112   :  { %5574 = vmatprep.subr.bf16.mxu0 %v8233_v22 }
 0x113   :  { %5452 = vmatpush2.bf16.msra.mxu1 %v8112_v21  ;;  %v8846_v21 = vld [vmem:[#allocation2 + $0xc4] ss:$40 sps:$4 sm:$0xff]  }
 0x114   :  { %5075 = vmatmul.mubr.bf16.gmra.mxu0 %v8820_v23  ;;  %5727 = vmatprep.subr.bf16.mxu1 %v8361_v24 }
 0x115   :  { %5084 = vmatprep.mubr.bf16.mxu0 %v8822_v26  ;;  %v8209_v26 = vcombine.high %v335_v12, %v339_v13 }
 0x116   :  { %5228 = vmatmul.mubr.bf16.gmra.mxu1 %v8821_v25  ;;  %v8344_v25 = vcombine.low %v9404_v60, %v9406_v61 }
 0x117   :  { %5237 = vmatprep.mubr.bf16.mxu1 %v8824_v27  ;;  %v9422_v27 = vld [vmem:[#allocation5 + $0x4c8] sm:$0xff] }
 0x11c   :  { %5085 = vmatmul.mubr.bf16.gmra.mxu0 %v8826_v28  ;;  %v9424_v28 = vld [vmem:[#allocation5 + $0x4e8] sm:$0xff] }
 0x11d   :  { %5094 = vmatprep.mubr.bf16.mxu0 %v8828_v30  ;;  %v8337_v30 = vcombine.high %v463_v18, %v467_v19  ;;  %v8201_v41 = vcombine.high %v9422_v27, %v9424_v28  ;;  %v8200_v60 = vcombine.low %v9422_v27, %v9424_v28  ;;  %v307_v27 = vld [vmem:[#allocation5 + $0x428] sm:$0xff] }
 0x11e   :  { %5238 = vmatmul.mubr.bf16.gmra.mxu1 %v8827_v29 }
 0x11f   :  { %5247 = vmatprep.mubr.bf16.mxu1 %v8830_v31 }
 0x124   :  { %5095 = vmatmul.mubr.bf16.gmra.mxu0 %v8832_v32 }
 0x125   :  { %5104 = vmatprep.mubr.bf16.mxu0 %v8834_v34  ;;  %v8879_v34 = vld [vmem:[#allocation2 + $0x50] ss:$40 sps:$4 sm:$0xff]  }
 0x126   :  { %5248 = vmatmul.mubr.bf16.gmra.mxu1 %v8833_v33 }
 0x127   :  { %5257 = vmatprep.mubr.bf16.mxu1 %v8836_v35  ;;  %v8208_v35 = vcombine.low %v335_v12, %v339_v13  ;;  %v443_v12 = vld [vmem:[#allocation5 + $0x868] sm:$0xff] }
 0x12c   :  { %5105 = vmatmul.mubr.bf16.gmra.mxu0 %v8838_v37  ;;  %v459_v37 = vld [vmem:[#allocation5 + $0x8e8] sm:$0xff] }
 0x12d   :  { %5300 = vmatprep.mubr.bf16.mxu0 %v8842_v39  ;;  %v8880_v39 = vld [vmem:[#allocation2 + $0xa4] ss:$40 sps:$4 sm:$0xff]  }
 0x12e   :  { %5258 = vmatmul.mubr.bf16.gmra.mxu1 %v8839_v38 }
 0x12f   :  { %5453 = vmatprep.mubr.bf16.mxu1 %v8876_v42  ;;  %v4843_v63 = vpop.f32.mrf.mxu1 }
 0x130   :  { %v4690_v58 = vpop.f32.mrf.mxu0 }
 0x131   :  { %v4691_v62 = vadd.f32 %v4690_v58, %v9396_v48  ;;  %v4845_v7 = vpop.f32.mrf.mxu1  ;;  %v451_v58 = vld [vmem:[#allocation5 + $0x8a8] sm:$0xff] }
 0x132   :  { %v4692_v2 = vpop.f32.mrf.mxu0 }
 0x133   :  { %v9409_v5 = vadd.f32 %v4843_v63, %v4691_v62  ;;  %v4693_v6 = vadd.f32 %v4692_v2, %v9402_v54  ;;  %v4847_v16 = vpop.f32.mrf.mxu1 }
 0x134   :  { %5301 = vmatmul.mubr.bf16.vlgmr.msra.gmra.mxu0 %v8840_v47  ;;  %v4694_v10 = vpop.f32.mrf.mxu0  ;;  %v8848_v47 = vld [vmem:[#allocation2 + $0xc0] ss:$40 sps:$4 sm:$0xff]  }
 0x135   :  { %5575 = vmatpush1.bf16.msra.mxu0 %v8232_v49  ;;  %5310 = vmatprep.mubr.bf16.mxu0 %v8843_v55  ;;  %v9414_v14 = vadd.f32 %v4845_v7, %v4693_v6  ;;  %v4695_v15 = vadd.f32 %v4694_v10, %v9396_v48  ;;  %v4849_v24 = vpop.f32.mrf.mxu1  ;;  %v8329_v49 = vcombine.high %v455_v36, %v459_v37  ;;  %v315_v6 = vld [vmem:[#allocation5 + $0x468] sm:$0xff] }
 0x136   :  { %5454 = vmatmul.mubr.bf16.vlgmr.msra.gmra.mxu1 %v8877_v0  ;;  %5576 = vmatprep.subr.bf16.mxu0 %v8225_v53  ;;  %v4696_v20 = vpop.f32.mrf.mxu0  ;;  %v8328_v0 = vcombine.low %v455_v36, %v459_v37  ;;  %v8881_v10 = vld [vmem:[#allocation2 + $0xa0] ss:$40 sps:$4 sm:$0xff]  }
 0x137   :  { %5728 = vmatpush1.bf16.msra.mxu1 %v8360_v52  ;;  %5463 = vmatprep.mubr.bf16.mxu1 %v8878_v8  ;;  %v9417_v22 = vadd.f32 %v4847_v16, %v4695_v15  ;;  %v4697_v23 = vadd.f32 %v4696_v20, %v9402_v54  ;;  %v4853_v33 = vpop.f32.mrf.mxu1  ;;  %v8882_v15 = vld [vmem:[#allocation2 + $0xf4] ss:$40 sps:$4 sm:$0xff]   ;;  %v8192_v16 = vcombine.low %v319_v50, %v323_v51 }
 0x138   :  { %5729 = vmatprep.subr.bf16.mxu1 %v8353_v59  ;;  %v4700_v29 = vpop.f32.mrf.mxu0 }
 0x139   :  { %5577 = vmatpush1.bf16.msra.mxu0 %v8224_v1  ;;  %v9426_v31 = vadd.f32 %v4849_v24, %v4697_v23  ;;  %v4701_v32 = vadd.f32 %v4700_v29, %v9396_v48  ;;  %v4855_v44 = vpop.f32.mrf.mxu1  ;;  %v8193_v1 = vcombine.high %v319_v50, %v323_v51  ;;  %v8851_v24 = vld [vmem:[#allocation2 + $0x110] ss:$40 sps:$4 sm:$0xff]  }
 0x13a   :  { %5578 = vmatprep.subr.bf16.mxu0 %v8217_v4  ;;  %v4702_v38 = vpop.f32.mrf.mxu0  ;;  %v311_v4 = vld [vmem:[#allocation5 + $0x448] sm:$0xff] }
 0x13b   :  { %5730 = vmatpush1.bf16.msra.mxu1 %v8352_v3  ;;  %v9431_v42 = vadd.f32 %v4853_v33, %v4701_v32  ;;  %v4703_v43 = vadd.f32 %v4702_v38, %v9402_v54  ;;  %v4857_v55 = vpop.f32.mrf.mxu1  ;;  %v8321_v3 = vcombine.high %v447_v57, %v451_v58  ;;  %v8852_v32 = vld [vmem:[#allocation2 + $0x164] ss:$40 sps:$4 sm:$0xff]   ;;  %v8184_v36 = vcombine.low %v311_v4, %v315_v6 }
 0x13c   :  { %5731 = vmatprep.subr.bf16.mxu1 %v8345_v9  ;;  %5311 = vmatmul.mubr.bf16.gmra.mxu0 %v8845_v11  ;;  %v4704_v46 = vpop.f32.mrf.mxu0  ;;  %v439_v11 = vld [vmem:[#allocation5 + $0x848] sm:$0xff] }
 0x13d   :  { %5579 = vmatpush1.bf16.msra.mxu0 %v8216_v17  ;;  %5320 = vmatprep.mubr.bf16.mxu0 %v8846_v21  ;;  %v9434_v52 = vadd.f32 %v4855_v44, %v4703_v43  ;;  %v4705_v53 = vadd.f32 %v4704_v46, %v9396_v48  ;;  %v4859_v63 = vpop.f32.mrf.mxu1  ;;  %v8320_v17 = vcombine.low %v447_v57, %v451_v58  ;;  %v431_v33 = vld [vmem:[#allocation5 + $0x808] sm:$0xff] }
 0x13e   :  { %5464 = vmatmul.mubr.bf16.gmra.mxu1 %v8879_v34  ;;  %5580 = vmatprep.subr.bf16.mxu0 %v8209_v26  ;;  %v4706_v59 = vpop.f32.mrf.mxu0  ;;  %v8185_v21 = vcombine.high %v311_v4, %v315_v6  ;;  %v303_v26 = vld [vmem:[#allocation5 + $0x408] sm:$0xff]  ;;  %v8312_v37 = vcombine.low %v439_v11, %v443_v12 }
 0x13f   :  { %5473 = vmatprep.mubr.bf16.mxu1 %v8880_v39  ;;  %5732 = vmatpush1.bf16.msra.mxu1 %v8344_v25  ;;  %v9439_v61 = vadd.f32 %v4857_v55, %v4705_v53  ;;  %v4707_v62 = vadd.f32 %v4706_v59, %v9402_v54  ;;  %v4863_v9 = vpop.f32.mrf.mxu1  ;;  %v8313_v25 = vcombine.high %v439_v11, %v443_v12  ;;  %v435_v34 = vld [vmem:[#allocation5 + $0x828] sm:$0xff]  ;;  %v8883_v53 = vld [vmem:[#allocation2 + $0xf0] ss:$40 sps:$4 sm:$0xff]   ;;  %v8855_v12 = vld [vmem:[#allocation2 + $0x1b4] ss:$40 sps:$4 sm:$0xff]  }
 0x140   :  { %5733 = vmatprep.subr.bf16.mxu1 %v8337_v30  ;;  %v4710_v2 = vpop.f32.mrf.mxu0  ;;  %v8177_v43 = vcombine.high %v303_v26, %v307_v27  ;;  %v423_v46 = vld [vmem:[#allocation5 + $0x7c8] sm:$0xff]  ;;  %v8176_v59 = vcombine.low %v303_v26, %v307_v27 }
 0x141   :  { %5581 = vmatpush1.bf16.msra.mxu0 %v8208_v35  ;;  %v9442_v7 = vadd.f32 %v4859_v63, %v4707_v62  ;;  %v4711_v8 = vadd.f32 %v4710_v2, %v9396_v48  ;;  %v4865_v20 = vpop.f32.mrf.mxu1  ;;  %v551_v55 = vld [vmem:[#allocation5 + $0xbc8] sm:$0xff] }
 0x142   :  { %5582 = vmatprep.subr.bf16.mxu0 %v8201_v41  ;;  %v4712_v13 = vpop.f32.mrf.mxu0  ;;  %v8884_v58 = vld [vmem:[#allocation2 + $0x144] ss:$40 sps:$4 sm:$0xff]  }
 0x143   :  { %5734 = vmatpush1.bf16.msra.mxu1 %v8336_v45  ;;  %v9445_v18 = vadd.f32 %v4863_v9, %v4711_v8  ;;  %v4713_v19 = vadd.f32 %v4712_v13, %v9402_v54  ;;  %v4867_v30 = vpop.f32.mrf.mxu1  ;;  %v8305_v45 = vcombine.high %v431_v33, %v435_v34  ;;  %v415_v6 = vld [vmem:[#allocation5 + $0x788] sm:$0xff] }
 0x144   :  { %5321 = vmatmul.mubr.bf16.gmra.mxu0 %v8848_v47  ;;  %5735 = vmatprep.subr.bf16.mxu1 %v8329_v49  ;;  %v4714_v23 = vpop.f32.mrf.mxu0  ;;  %v427_v47 = vld [vmem:[#allocation5 + $0x7e8] sm:$0xff] }
 0x145   :  { %5330 = vmatprep.mubr.bf16.mxu0 %v8849_v56  ;;  %5583 = vmatpush1.bf16.msra.mxu0 %v8200_v60  ;;  %v9448_v28 = vadd.f32 %v4865_v20, %v4713_v19  ;;  %v4715_v29 = vadd.f32 %v4714_v23, %v9396_v48  ;;  %v4869_v41 = vpop.f32.mrf.mxu1  ;;  %v555_v56 = vld [vmem:[#allocation5 + $0xbe8] sm:$0xff]  ;;  %v8304_v60 = vcombine.low %v431_v33, %v435_v34 }
 0x146   :  { %5474 = vmatmul.mubr.bf16.gmra.mxu1 %v8881_v10  ;;  %5584 = vmatprep.subr.bf16.mxu0 %v8193_v1  ;;  %v4716_v35 = vpop.f32.mrf.mxu0  ;;  %v8297_v1 = vcombine.high %v423_v46, %v427_v47  ;;  %v8425_v4 = vcombine.high %v551_v55, %v555_v56  ;;  %v419_v8 = vld [vmem:[#allocation5 + $0x7a8] sm:$0xff]  ;;  %v8424_v19 = vcombine.low %v551_v55, %v555_v56 }
 0x147   :  { %5483 = vmatprep.mubr.bf16.mxu1 %v8882_v15  ;;  %5736 = vmatpush1.bf16.msra.mxu1 %v8328_v0  ;;  %v9451_v38 = vadd.f32 %v4867_v30, %v4715_v29  ;;  %v4717_v39 = vadd.f32 %v4716_v35, %v9402_v54  ;;  %v543_v13 = vld [vmem:[#allocation5 + $0xb88] sm:$0xff] }
 0x148   :  { %5737 = vmatprep.subr.bf16.mxu1 %v8321_v3  ;;  %v4720_v44 = vpop.f32.mrf.mxu0  ;;  %v8854_v3 = vld [vmem:[#allocation2 + $0x160] ss:$40 sps:$4 sm:$0xff]  }
 0x149   :  { %5585 = vmatpush1.bf16.msra.mxu0 %v8192_v16  ;;  %v9454_v49 = vadd.f32 %v4869_v41, %v4717_v39  ;;  %v4721_v50 = vadd.f32 %v4720_v44, %v9396_v48  ;;  %v4873_v51 = vpop.f32.mrf.mxu1  ;;  %v547_v15 = vld [vmem:[#allocation5 + $0xba8] sm:$0xff]  ;;  %v8886_v39 = vld [vmem:[#allocation2 + $0x194] ss:$40 sps:$4 sm:$0xff]   ;;  %v8288_v41 = vcombine.low %v415_v6, %v419_v8 }
 0x14a   :  { %5586 = vmatprep.subr.bf16.mxu0 %v8185_v21  ;;  %v4722_v57 = vpop.f32.mrf.mxu0  ;;  %v8417_v26 = vcombine.high %v543_v13, %v547_v15  ;;  %v407_v27 = vld [vmem:[#allocation5 + $0x748] sm:$0xff] }
 0x14b   :  { %5738 = vmatpush1.bf16.msra.mxu1 %v8320_v17  ;;  %v9457_v62 = vadd.f32 %v4873_v51, %v4721_v50  ;;  %v4723_v63 = vadd.f32 %v4722_v57, %v9402_v54  ;;  %v4875_v0 = vpop.f32.mrf.mxu1  ;;  %v8296_v17 = vcombine.low %v423_v46, %v427_v47  ;;  %v411_v29 = vld [vmem:[#allocation5 + $0x768] sm:$0xff]  ;;  %v8857_v51 = vld [vmem:[#allocation2 + $0x1b0] ss:$40 sps:$4 sm:$0xff]  }
 0x14c   :  { %5331 = vmatmul.mubr.bf16.gmra.mxu0 %v8851_v24  ;;  %5739 = vmatprep.subr.bf16.mxu1 %v8313_v25  ;;  %v4724_v2 = vpop.f32.mrf.mxu0  ;;  %v8289_v24 = vcombine.high %v415_v6, %v419_v8  ;;  %v8885_v34 = vld [vmem:[#allocation2 + $0x140] ss:$40 sps:$4 sm:$0xff]   ;;  %v8281_v47 = vcombine.high %v407_v27, %v411_v29 }
 0x14d   :  { %5340 = vmatprep.mubr.bf16.mxu0 %v8852_v32  ;;  %5587 = vmatpush1.bf16.msra.mxu0 %v8184_v36  ;;  %v9460_v9 = vadd.f32 %v4875_v0, %v4723_v63  ;;  %v4725_v10 = vadd.f32 %v4724_v2, %v9396_v48  ;;  %v4877_v11 = vpop.f32.mrf.mxu1  ;;  %v535_v35 = vld [vmem:[#allocation5 + $0xb48] sm:$0xff]  ;;  %v8280_v2 = vcombine.low %v407_v27, %v411_v29 }
 0x14e   :  { %5484 = vmatmul.mubr.bf16.gmra.mxu1 %v8883_v53  ;;  %5588 = vmatprep.subr.bf16.mxu0 %v8177_v43  ;;  %v4726_v16 = vpop.f32.mrf.mxu0  ;;  %v539_v36 = vld [vmem:[#allocation5 + $0xb68] sm:$0xff]  ;;  %v8416_v43 = vcombine.low %v543_v13, %v547_v15 }
 0x14f   :  { %5493 = vmatprep.mubr.bf16.mxu1 %v8884_v58  ;;  %5740 = vmatpush1.bf16.msra.mxu1 %v8312_v37  ;;  %v9463_v20 = vadd.f32 %v4877_v11, %v4725_v10  ;;  %v4727_v21 = vadd.f32 %v4726_v16, %v9402_v54  ;;  %v4879_v23 = vpop.f32.mrf.mxu1  ;;  %v8409_v53 = vcombine.high %v535_v35, %v539_v36  ;;  %v399_v55 = vld [vmem:[#allocation5 + $0x708] sm:$0xff] }
 0x150   :  { %5741 = vmatprep.subr.bf16.mxu1 %v8305_v45  ;;  %v403_v56 = vld [vmem:[#allocation5 + $0x728] sm:$0xff] }
 0x151   :  { %5589 = vmatpush1.bf16.msra.mxu0 %v8176_v59  ;;  %v9466_v30 = vadd.f32 %v4879_v23, %v4727_v21  ;;  %v4883_v33 = vpop.f32.mrf.mxu1  ;;  %v527_v63 = vld [vmem:[#allocation5 + $0xb08] sm:$0xff]  ;;  %v8273_v10 = vcombine.high %v399_v55, %v403_v56  ;;  %v8887_v21 = vld [vmem:[#allocation2 + $0x190] ss:$40 sps:$4 sm:$0xff]   ;;  %v8272_v27 = vcombine.low %v399_v55, %v403_v56 }
 0x152   :  { %5590 = vmatprep.subr.bf16.mxu0 %v8297_v1  ;;  %v4730_v25 = vpop.f32.mrf.mxu0  ;;  %v531_v0 = vld [vmem:[#allocation5 + $0xb28] sm:$0xff] }
 0x153   :  { %5742 = vmatpush1.bf16.msra.mxu1 %v8304_v60  ;;  %v4731_v32 = vadd.f32 %v4730_v25, %v9396_v48  ;;  %v4885_v46 = vpop.f32.mrf.mxu1  ;;  %v8858_v60 = vld [vmem:[#allocation2 + $0x204] ss:$40 sps:$4 sm:$0xff]   ;;  %v8400_v29 = vcombine.low %v527_v63, %v531_v0 }
 0x154   :  { %5341 = vmatmul.mubr.bf16.gmra.mxu0 %v8854_v3  ;;  %5743 = vmatprep.subr.bf16.mxu1 %v8425_v4  ;;  %v4732_v37 = vpop.f32.mrf.mxu0  ;;  %v8408_v3 = vcombine.low %v535_v35, %v539_v36  ;;  %v391_v13 = vld [vmem:[#allocation5 + $0x6c8] sm:$0xff] }
 0x155   :  { %5350 = vmatprep.mubr.bf16.mxu0 %v8855_v12  ;;  %5591 = vmatpush2.bf16.msra.mxu0 %v8296_v17  ;;  %v9469_v44 = vadd.f32 %v4883_v33, %v4731_v32  ;;  %v4733_v45 = vadd.f32 %v4732_v37, %v9402_v54  ;;  %v4887_v59 = vpop.f32.mrf.mxu1  ;;  %v8401_v12 = vcombine.high %v527_v63, %v531_v0  ;;  %v395_v15 = vld [vmem:[#allocation5 + $0x6e8] sm:$0xff] }
 0x156   :  { %5494 = vmatmul.mubr.bf16.gmra.mxu1 %v8885_v34  ;;  %5592 = vmatprep.subr.bf16.mxu0 %v8289_v24  ;;  %v4734_v50 = vpop.f32.mrf.mxu0  ;;  %v519_v23 = vld [vmem:[#allocation5 + $0xac8] sm:$0xff]  ;;  %v8265_v35 = vcombine.high %v391_v13, %v395_v15  ;;  %v8264_v56 = vcombine.low %v391_v13, %v395_v15 }
 0x157   :  { %5503 = vmatprep.mubr.bf16.mxu1 %v8886_v39  ;;  %5744 = vmatpush2.bf16.msra.mxu1 %v8424_v19  ;;  %v9472_v57 = vadd.f32 %v4885_v46, %v4733_v45  ;;  %v4735_v58 = vadd.f32 %v4734_v50, %v9396_v48  ;;  %v4889_v8 = vpop.f32.mrf.mxu1  ;;  %v523_v24 = vld [vmem:[#allocation5 + $0xae8] sm:$0xff]  ;;  %v8861_v50 = vld [vmem:[#allocation2 + $0x254] ss:$40 sps:$4 sm:$0xff]  }
 0x158   :  { %5745 = vmatprep.subr.bf16.mxu1 %v8417_v26  ;;  %v4736_v1 = vpop.f32.mrf.mxu0  ;;  %v8888_v26 = vld [vmem:[#allocation2 + $0x1e4] ss:$40 sps:$4 sm:$0xff]   ;;  %v8860_v37 = vld [vmem:[#allocation2 + $0x200] ss:$40 sps:$4 sm:$0xff]   ;;  %v8393_v39 = vcombine.high %v519_v23, %v523_v24 }
 0x159   :  { %5593 = vmatpush2.bf16.msra.mxu0 %v8288_v41  ;;  %v9475_v4 = vadd.f32 %v4887_v59, %v4735_v58  ;;  %v4737_v6 = vadd.f32 %v4736_v1, %v9402_v54  ;;  %v383_v41 = vld [vmem:[#allocation5 + $0x688] sm:$0xff]  ;;  %v8392_v58 = vcombine.low %v519_v23, %v523_v24 }
 0x15a   :  { %5594 = vmatprep.subr.bf16.mxu0 %v8281_v47  ;;  %v4740_v11 = vpop.f32.mrf.mxu0  ;;  %v503_v13 = vld [vmem:[#allocation5 + $0xa48] sm:$0xff] }
 0x15b   :  { %5746 = vmatpush2.bf16.msra.mxu1 %v8416_v43  ;;  %v9478_v16 = vadd.f32 %v4889_v8, %v4737_v6  ;;  %v4741_v17 = vadd.f32 %v4740_v11, %v9396_v48  ;;  %v4893_v19 = vpop.f32.mrf.mxu1  ;;  %v387_v43 = vld [vmem:[#allocation5 + $0x6a8] sm:$0xff] }
 0x15c   :  { %5351 = vmatmul.mubr.bf16.gmra.mxu0 %v8857_v51  ;;  %5747 = vmatprep.subr.bf16.mxu1 %v8409_v53  ;;  %v4742_v25 = vpop.f32.mrf.mxu0  ;;  %v511_v51 = vld [vmem:[#allocation5 + $0xa88] sm:$0xff]  ;;  %v8257_v0 = vcombine.high %v383_v41, %v387_v43 }
 0x15d   :  { %5360 = vmatprep.mubr.bf16.mxu0 %v8858_v60  ;;  %5595 = vmatpush2.bf16.msra.mxu0 %v8280_v2  ;;  %v9481_v32 = vadd.f32 %v4893_v19, %v4741_v17  ;;  %v4743_v33 = vadd.f32 %v4742_v25, %v9402_v54  ;;  %v4895_v34 = vpop.f32.mrf.mxu1  ;;  %v515_v53 = vld [vmem:[#allocation5 + $0xaa8] sm:$0xff]  ;;  %v8890_v19 = vld [vmem:[#allocation2 + $0x234] ss:$40 sps:$4 sm:$0xff]  }
 0x15e   :  { %5504 = vmatmul.mubr.bf16.gmra.mxu1 %v8887_v21  ;;  %5596 = vmatprep.subr.bf16.mxu0 %v8273_v10  ;;  %v4744_v36 = vpop.f32.mrf.mxu0  ;;  %v8385_v2 = vcombine.high %v511_v51, %v515_v53  ;;  %v379_v6 = vld [vmem:[#allocation5 + $0x668] sm:$0xff]  ;;  %v8256_v21 = vcombine.low %v383_v41, %v387_v43  ;;  %v8384_v23 = vcombine.low %v511_v51, %v515_v53 }
 0x15f   :  { %5513 = vmatprep.mubr.bf16.mxu1 %v8888_v26  ;;  %5748 = vmatpush2.bf16.msra.mxu1 %v8408_v3  ;;  %v9484_v45 = vadd.f32 %v4895_v34, %v4743_v33  ;;  %v4745_v46 = vadd.f32 %v4744_v36, %v9396_v48  ;;  %v4897_v47 = vpop.f32.mrf.mxu1  ;;  %v375_v3 = vld [vmem:[#allocation5 + $0x648] sm:$0xff]  ;;  %v8863_v33 = vld [vmem:[#allocation2 + $0x250] ss:$40 sps:$4 sm:$0xff]  }
 0x160   :  { %5749 = vmatprep.subr.bf16.mxu1 %v8401_v12  ;;  %v4746_v55 = vpop.f32.mrf.mxu0  ;;  %v8889_v12 = vld [vmem:[#allocation2 + $0x1e0] ss:$40 sps:$4 sm:$0xff]   ;;  %v8864_v43 = vld [vmem:[#allocation2 + $0x2a4] ss:$40 sps:$4 sm:$0xff]   ;;  %v8248_v51 = vcombine.low %v375_v3, %v379_v6 }
 0x161   :  { %5597 = vmatpush2.bf16.msra.mxu0 %v8272_v27  ;;  %v9487_v59 = vadd.f32 %v4897_v47, %v4745_v46  ;;  %v4747_v60 = vadd.f32 %v4746_v55, %v9402_v54  ;;  %v4899_v63 = vpop.f32.mrf.mxu1  ;;  %v507_v15 = vld [vmem:[#allocation5 + $0xa68] sm:$0xff]  ;;  %v8249_v27 = vcombine.high %v375_v3, %v379_v6 }
 0x162   :  { %5598 = vmatprep.subr.bf16.mxu0 %v8265_v35  ;;  %v8377_v34 = vcombine.high %v503_v13, %v507_v15  ;;  %v367_v35 = vld [vmem:[#allocation5 + $0x608] sm:$0xff]  ;;  %v8376_v53 = vcombine.low %v503_v13, %v507_v15 }
 0x163   :  { %5750 = vmatpush2.bf16.msra.mxu1 %v8400_v29  ;;  %v9490_v8 = vadd.f32 %v4899_v63, %v4747_v60  ;;  %v4903_v11 = vpop.f32.mrf.mxu1  ;;  %v371_v36 = vld [vmem:[#allocation5 + $0x628] sm:$0xff] }
 0x164   :  { %v4750_v1 = vpop.f32.mrf.mxu0  ;;  %5361 = vmatmul.mubr.bf16.gmra.mxu0 %v8860_v37  ;;  %5751 = vmatprep.subr.bf16.mxu1 %v8393_v39  ;;  %v495_v46 = vld [vmem:[#allocation5 + $0xa08] sm:$0xff]  ;;  %v8241_v60 = vcombine.high %v367_v35, %v371_v36 }
 0x165   :  { %v4751_v10 = vadd.f32 %v4750_v1, %v9396_v48  ;;  %5370 = vmatprep.mubr.bf16.mxu0 %v8861_v50  ;;  %5599 = vmatpush2.bf16.msra.mxu0 %v8264_v56  ;;  %v4905_v26 = vpop.f32.mrf.mxu1  ;;  %v499_v47 = vld [vmem:[#allocation5 + $0xa28] sm:$0xff] }
 0x166   :  { %5514 = vmatmul.mubr.bf16.gmra.mxu1 %v8889_v12  ;;  %v4752_v17 = vpop.f32.mrf.mxu0  ;;  %5600 = vmatprep.subr.bf16.mxu0 %v8257_v0  ;;  %v8369_v0 = vcombine.high %v495_v46, %v499_v47  ;;  %v9502_v1 = vld [vmem:[#allocation5 + $0xdc8] sm:$0xff] }
 0x167   :  { %5523 = vmatprep.mubr.bf16.mxu1 %v8890_v19  ;;  %v9493_v24 = vadd.f32 %v4903_v11, %v4751_v10  ;;  %v4753_v25 = vadd.f32 %v4752_v17, %v9402_v54  ;;  %5752 = vmatpush2.bf16.msra.mxu1 %v8392_v58  ;;  %v4907_v41 = vpop.f32.mrf.mxu1  ;;  %v8891_v11 = vld [vmem:[#allocation2 + $0x230] ss:$40 sps:$4 sm:$0xff]   ;;  %v9509_v12 = vld [vmem:[#allocation5 + $0x11c8] sm:$0xff]  ;;  %v8240_v19 = vcombine.low %v367_v35, %v371_v36 }
 0x168   :  { %v4754_v29 = vpop.f32.mrf.mxu0  ;;  %5753 = vmatprep.subr.bf16.mxu1 %v8385_v2  ;;  %v9504_v2 = vld [vmem:[#allocation5 + $0xde8] sm:$0xff] }
 0x169   :  { %v9496_v37 = vadd.f32 %v4905_v26, %v4753_v25  ;;  %v4755_v39 = vadd.f32 %v4754_v29, %v9396_v48  ;;  %5601 = vmatpush2.bf16.msra.mxu0 %v8256_v21  ;;  %v4909_v58 = vpop.f32.mrf.mxu1  ;;  %v9511_v13 = vld [vmem:[#allocation5 + $0x11e8] sm:$0xff]  ;;  %v8368_v21 = vcombine.low %v495_v46, %v499_v47 }
 0x16a   :  { %v4756_v50 = vpop.f32.mrf.mxu0  ;;  %5602 = vmatprep.subr.bf16.mxu0 %v8249_v27  ;;  %v8892_v17 = vld [vmem:[#allocation2 + $0x284] ss:$40 sps:$4 sm:$0xff]   ;;  %v8489_v27 = vcombine.high %v9502_v1, %v9504_v2 }
 0x16b   :  { %v9499_v55 = vadd.f32 %v4907_v41, %v4755_v39  ;;  %v4757_v56 = vadd.f32 %v4756_v50, %v9402_v54  ;;  %5754 = vmatpush2.bf16.msra.mxu1 %v8384_v23  ;;  %v8867_v41 = vld [vmem:[#allocation2 + $0x2f4] ss:$40 sps:$4 sm:$0xff]  }
 0x16c   :  { %v4760_v63 = vpop.f32.mrf.mxu0  ;;  %5371 = vmatmul.mubr.bf16.gmra.mxu0 %v8863_v33  ;;  %5755 = vmatprep.subr.bf16.mxu1 %v8377_v34  ;;  %v8866_v33 = vld [vmem:[#allocation2 + $0x2a0] ss:$40 sps:$4 sm:$0xff]   ;;  %v8617_v34 = vcombine.high %v9509_v12, %v9511_v13 }
 0x16d   :  { %v9506_v10 = vadd.f32 %v4909_v58, %v4757_v56  ;;  %v4761_v3 = vadd.f32 %v4760_v63, %v9396_v48  ;;  %v4913_v6 = vpop.f32.mrf.mxu1  ;;  %5380 = vmatprep.mubr.bf16.mxu0 %v8864_v43  ;;  %5603 = vmatpush2.bf16.msra.mxu0 %v8248_v51 }
 0x16e   :  { %5524 = vmatmul.mubr.bf16.gmra.mxu1 %v8891_v11  ;;  %v4762_v15 = vpop.f32.mrf.mxu0  ;;  %5604 = vmatprep.subr.bf16.mxu0 %v8241_v60  ;;  %v8893_v60 = vld [vmem:[#allocation2 + $0x280] ss:$40 sps:$4 sm:$0xff]  }
 0x16f   :  { %5533 = vmatprep.mubr.bf16.mxu1 %v8892_v17  ;;  %v9513_v23 = vadd.f32 %v4913_v6, %v4761_v3  ;;  %v4763_v25 = vadd.f32 %v4762_v15, %v9402_v54  ;;  %v4915_v26 = vpop.f32.mrf.mxu1  ;;  %5756 = vmatpush2.bf16.msra.mxu1 %v8376_v53  ;;  %v8869_v17 = vld [vmem:[#allocation2 + $0x2f0] ss:$40 sps:$4 sm:$0xff]  }
 0x170   :  { %v4764_v29 = vpop.f32.mrf.mxu0  ;;  %5757 = vmatprep.subr.bf16.mxu1 %v8369_v0  ;;  %v8894_v0 = vld [vmem:[#allocation2 + $0x2d4] ss:$40 sps:$4 sm:$0xff]  }
 0x171   :  { %v9520_v39 = vadd.f32 %v4915_v26, %v4763_v25  ;;  %v4765_v35 = vadd.f32 %v4764_v29, %v9396_v48  ;;  %v4917_v36 = vpop.f32.mrf.mxu1  ;;  %5605 = vmatpush2.bf16.msra.mxu0 %v8240_v19  ;;  %v8870_v26 = vld [vmem:[#allocation2 + $0x344] ss:$40 sps:$4 sm:$0xff]  }
 0x172   :  { %v4766_v43 = vpop.f32.mrf.mxu0  ;;  %5880 = vmatprep.subr.bf16.mxu0 %v8489_v27 }
 0x173   :  { %v9523_v46 = vadd.f32 %v4917_v36, %v4765_v35  ;;  %v4767_v47 = vadd.f32 %v4766_v43, %v9402_v54  ;;  %v4919_v50 = vpop.f32.mrf.mxu1  ;;  %5758 = vmatpush2.bf16.msra.mxu1 %v8368_v21 }
 0x174   :  { %v4770_v51 = vpop.f32.mrf.mxu0  ;;  %5381 = vmatmul.mubr.bf16.gmra.mxu0 %v8866_v33  ;;  %6033 = vmatprep.subr.bf16.mxu1 %v8617_v34 }
 0x175   :  { %v9526_v53 = vadd.f32 %v4919_v50, %v4767_v47  ;;  %v4771_v56 = vadd.f32 %v4770_v51, %v9396_v48  ;;  %5390 = vmatprep.mubr.bf16.mxu0 %v8867_v41  ;;  %v8895_v47 = vld [vmem:[#allocation2 + $0x2d0] ss:$40 sps:$4 sm:$0xff]   ;;  %v8896_v51 = vld [vmem:[#allocation2 + $0x324] ss:$40 sps:$4 sm:$0xff]  }
 0x176   :  { %v4923_v58 = vpop.f32.mrf.mxu1  ;;  %5534 = vmatmul.mubr.bf16.gmra.mxu1 %v8893_v60  ;;  %v4772_v63 = vpop.f32.mrf.mxu0 }
 0x177   :  { %5543 = vmatprep.mubr.bf16.mxu1 %v8894_v0  ;;  %v9529_v3 = vadd.f32 %v4923_v58, %v4771_v56  ;;  %v4773_v6 = vadd.f32 %v4772_v63, %v9402_v54  ;;  %v8872_v0 = vld [vmem:[#allocation2 + $0x340] ss:$40 sps:$4 sm:$0xff]  }
 0x178   :  { %v4925_v11 = vpop.f32.mrf.mxu1  ;;  %v4774_v15 = vpop.f32.mrf.mxu0 }
 0x179   :  { %v9532_v19 = vadd.f32 %v4925_v11, %v4773_v6  ;;  %v4775_v21 = vadd.f32 %v4774_v15, %v9396_v48 }
 0x17a   :  { %v4927_v25 = vpop.f32.mrf.mxu1  ;;  %v4776_v27 = vpop.f32.mrf.mxu0 }
 0x17b   :  { %v9535_v29 = vadd.f32 %v4927_v25, %v4775_v21  ;;  %v4777_v33 = vadd.f32 %v4776_v27, %v9402_v54 }
 0x17c   :  { %v4929_v34 = vpop.f32.mrf.mxu1  ;;  %v4780_v35 = vpop.f32.mrf.mxu0  ;;  %5391 = vmatmul.mubr.bf16.gmra.mxu0 %v8869_v17  ;;  %v8873_v17 = vld [vmem:[#allocation2 + $0x394] ss:$40 sps:$4 sm:$0xff]  }
 0x17d   :  { %v9538_v36 = vadd.f32 %v4929_v34, %v4777_v33  ;;  %v4781_v41 = vadd.f32 %v4780_v35, %v9396_v48  ;;  %5400 = vmatprep.mubr.bf16.mxu0 %v8870_v26 }
 0x17e   :  { %v4933_v43 = vpop.f32.mrf.mxu1  ;;  %5544 = vmatmul.mubr.bf16.gmra.mxu1 %v8895_v47  ;;  %v4782_v50 = vpop.f32.mrf.mxu0 }
 0x17f   :  { %5553 = vmatprep.mubr.bf16.mxu1 %v8896_v51  ;;  %v9541_v56 = vadd.f32 %v4933_v43, %v4781_v41  ;;  %v4783_v58 = vadd.f32 %v4782_v50, %v9402_v54  ;;  %v8897_v43 = vld [vmem:[#allocation2 + $0x320] ss:$40 sps:$4 sm:$0xff]   ;;  %v8898_v50 = vld [vmem:[#allocation2 + $0x374] ss:$40 sps:$4 sm:$0xff]  }
 0x180   :  { %v4935_v60 = vpop.f32.mrf.mxu1  ;;  %v4784_v63 = vpop.f32.mrf.mxu0 }
 0x181   :  { %v9544_v6 = vadd.f32 %v4935_v60, %v4783_v58  ;;  %v4785_v11 = vadd.f32 %v4784_v63, %v9396_v48 }
 0x182   :  { %v4937_v15 = vpop.f32.mrf.mxu1  ;;  %v4786_v21 = vpop.f32.mrf.mxu0 }
 0x183   :  { %11202 = vst [vmem:[#allocation13_spill] sm:$0xff] %v9544_v6  ;;  %v9547_v25 = vadd.f32 %v4937_v15, %v4785_v11  ;;  %v4787_v26 = vadd.f32 %v4786_v21, %v9402_v54  ;;  %v8875_v11 = vld [vmem:[#allocation2 + $0x390] ss:$40 sps:$4 sm:$0xff]   ;;  %v8904_v6 = vld [vmem:[#allocation2 + $0x5c] ss:$40 sps:$4 sm:$0xff]  }
 0x184   :  { %v4939_v27 = vpop.f32.mrf.mxu1  ;;  %v4790_v33 = vpop.f32.mrf.mxu0  ;;  %5401 = vmatmul.mubr.bf16.gmra.mxu0 %v8872_v0 }
 0x185   :  { %11203 = vst [vmem:[#allocation14_spill] sm:$0xff] %v9547_v25  ;;  %v9550_v34 = vadd.f32 %v4939_v27, %v4787_v26  ;;  %v4791_v35 = vadd.f32 %v4790_v33, %v9396_v48  ;;  %5410 = vmatprep.mubr.bf16.mxu0 %v8873_v17 }
 0x186   :  { %v4943_v41 = vpop.f32.mrf.mxu1  ;;  %5554 = vmatmul.mubr.bf16.gmra.mxu1 %v8897_v43  ;;  %v4792_v47 = vpop.f32.mrf.mxu0 }
 0x187   :  { %11204 = vst [vmem:[#allocation15_spill] sm:$0xff] %v9550_v34  ;;  %5563 = vmatprep.mubr.bf16.mxu1 %v8898_v50  ;;  %v9553_v51 = vadd.f32 %v4943_v41, %v4791_v35  ;;  %v4793_v58 = vadd.f32 %v4792_v47, %v9402_v54  ;;  %v8899_v50 = vld [vmem:[#allocation2 + $0x370] ss:$40 sps:$4 sm:$0xff]  }
 0x188   :  { %v4945_v60 = vpop.f32.mrf.mxu1  ;;  %v4794_v63 = vpop.f32.mrf.mxu0 }
 0x189   :  { %11205 = vst [vmem:[#allocation16_spill] sm:$0xff] %v9553_v51  ;;  %v9556_v15 = vadd.f32 %v4945_v60, %v4793_v58  ;;  %v4795_v0 = vadd.f32 %v4794_v63, %v9396_v48  ;;  %v8900_v58 = vld [vmem:[#allocation2 + $0xc] ss:$40 sps:$4 sm:$0xff]  }
 0x18a   :  { %v4947_v21 = vpop.f32.mrf.mxu1  ;;  %v4796_v26 = vpop.f32.mrf.mxu0  ;;  %v8901_v63 = vld [vmem:[#allocation2 + $0x14] ss:$40 sps:$4 sm:$0xff]   ;;  %v9578_v51 = vld [vmem:[#allocation5 + $0x1148] sm:$0xff] }
 0x18b   :  { %11206 = vst [vmem:[#allocation17_spill] sm:$0xff] %v9556_v15  ;;  %v9559_v27 = vadd.f32 %v4947_v21, %v4795_v0  ;;  %v4797_v17 = vadd.f32 %v4796_v26, %v9402_v54  ;;  %v607_v26 = vld [vmem:[#allocation5 + $0xd88] sm:$0xff] }
 0x18c   :  { %v4949_v33 = vpop.f32.mrf.mxu1  ;;  %v4800_v43 = vpop.f32.mrf.mxu0  ;;  %5411 = vmatmul.mubr.bf16.gmra.mxu0 %v8875_v11 }
 0x18d   :  { %11207 = vst [vmem:[#allocation18_spill] sm:$0xff] %v9559_v27  ;;  %v9562_v35 = vadd.f32 %v4949_v33, %v4797_v17  ;;  %v4801_v41 = vadd.f32 %v4800_v43, %v9396_v48  ;;  %5606 = vmatprep.mubr.bf16.mxu0 %v8900_v58  ;;  %v611_v27 = vld [vmem:[#allocation5 + $0xda8] sm:$0xff] }
 0x18e   :  { %v4953_v47 = vpop.f32.mrf.mxu1  ;;  %5564 = vmatmul.mubr.bf16.gmra.mxu1 %v8899_v50  ;;  %v4802_v60 = vpop.f32.mrf.mxu0  ;;  %v8488_v50 = vcombine.low %v9502_v1, %v9504_v2  ;;  %v735_v58 = vld [vmem:[#allocation5 + $0x1188] sm:$0xff] }
 0x18f   :  { %11208 = vst [vmem:[#allocation19_spill] sm:$0xff] %v9562_v35  ;;  %5759 = vmatprep.mubr.bf16.mxu1 %v8901_v63  ;;  %v9565_v40 = vadd.f32 %v4953_v47, %v4801_v41  ;;  %v4803_v0 = vadd.f32 %v4802_v60, %v9402_v54  ;;  %v739_v35 = vld [vmem:[#allocation5 + $0x11a8] sm:$0xff]  ;;  %v8616_v41 = vcombine.low %v9509_v12, %v9511_v13 }
 0x190   :  { %v4955_v21 = vpop.f32.mrf.mxu1  ;;  %v4804_v11 = vpop.f32.mrf.mxu0  ;;  %v8481_v47 = vcombine.high %v607_v26, %v611_v27  ;;  %v9580_v1 = vld [vmem:[#allocation5 + $0x1168] sm:$0xff] }
 0x191   :  { %11209 = vst [vmem:[#allocation20_spill] sm:$0xff] %v9565_v40  ;;  %v9568_v17 = vadd.f32 %v4955_v21, %v4803_v0  ;;  %v4805_v33 = vadd.f32 %v4804_v11, %v9396_v48  ;;  %v599_v0 = vld [vmem:[#allocation5 + $0xd48] sm:$0xff]  ;;  %v8609_v11 = vcombine.high %v735_v58, %v739_v35 }
 0x192   :  { %v4957_v43 = vpop.f32.mrf.mxu1  ;;  %v4806_v15 = vpop.f32.mrf.mxu0  ;;  %v603_v21 = vld [vmem:[#allocation5 + $0xd68] sm:$0xff] }
 0x193   :  { %11210 = vst [vmem:[#allocation21_spill] sm:$0xff] %v9568_v17  ;;  %v9575_v60 = vadd.f32 %v4957_v43, %v4805_v33  ;;  %v4807_v63 = vadd.f32 %v4806_v15, %v9402_v54  ;;  %v8902_v48 = vld [vmem:[#allocation2 + $0x8] ss:$40 sps:$4 sm:$0xff]   ;;  %v8480_v54 = vcombine.low %v607_v26, %v611_v27  ;;  %v8608_v43 = vcombine.low %v735_v58, %v739_v35 }
 0x194   :  { %v4959_v40 = vpop.f32.mrf.mxu1  ;;  %v4996_v17 = vpop.f32.mrf.mxu0  ;;  %5607 = vmatmul.mubr.bf16.vlgmr.msra.gmra.mxu0 %v8902_v48  ;;  %v8903_v33 = vld [vmem:[#allocation2 + $0x10] ss:$40 sps:$4 sm:$0xff]   ;;  %v591_v27 = vld [vmem:[#allocation5 + $0xd08] sm:$0xff] }
 0x195   :  { %11211 = vst [vmem:[#allocation22_spill] sm:$0xff] %v9575_v60  ;;  %v9582_v2 = vadd.f32 %v4959_v40, %v4807_v63  ;;  %v4997_v12 = vadd.f32 %v4996_v17, %v9409_v5  ;;  %5881 = vmatpush1.bf16.msra.mxu0 %v8488_v50  ;;  %v8473_v60 = vcombine.high %v599_v0, %v603_v21  ;;  %v8905_v40 = vld [vmem:[#allocation2 + $0x64] ss:$40 sps:$4 sm:$0xff]  }
 0x196   :  { %v5149_v13 = vpop.f32.mrf.mxu1  ;;  %5760 = vmatmul.mubr.bf16.vlgmr.msra.gmra.mxu1 %v8903_v33  ;;  %v4998_v15 = vpop.f32.mrf.mxu0  ;;  %5882 = vmatprep.subr.bf16.mxu0 %v8481_v47  ;;  %v8601_v5 = vcombine.high %v9578_v51, %v9580_v1  ;;  %v595_v26 = vld [vmem:[#allocation5 + $0xd28] sm:$0xff] }
 0x197   :  { %6034 = vmatpush1.bf16.msra.mxu1 %v8616_v41  ;;  %v9585_v48 = vadd.f32 %v5149_v13, %v4997_v12  ;;  %v4999_v34 = vadd.f32 %v4998_v15, %v9414_v14  ;;  %5616 = vmatprep.mubr.bf16.mxu0 %v8904_v6  ;;  %v8472_v41 = vcombine.low %v599_v0, %v603_v21  ;;  %v719_v14 = vld [vmem:[#allocation5 + $0x1108] sm:$0xff]  ;;  %v8906_v21 = vld [vmem:[#allocation2 + $0x58] ss:$40 sps:$4 sm:$0xff]  }
 0x198   :  { %v5151_v25 = vpop.f32.mrf.mxu1  ;;  %5769 = vmatprep.mubr.bf16.mxu1 %v8905_v40  ;;  %v5000_v17 = vpop.f32.mrf.mxu0  ;;  %6035 = vmatprep.subr.bf16.mxu1 %v8609_v11  ;;  %v723_v47 = vld [vmem:[#allocation5 + $0x1128] sm:$0xff]  ;;  %v8600_v11 = vcombine.low %v9578_v51, %v9580_v1 }
 0x199   :  { %v9590_v50 = vadd.f32 %v5151_v25, %v4999_v34  ;;  %v5001_v35 = vadd.f32 %v5000_v17, %v9417_v22  ;;  %5883 = vmatpush1.bf16.msra.mxu0 %v8480_v54  ;;  %v8465_v25 = vcombine.high %v591_v27, %v595_v26  ;;  %v9598_v34 = vld [vmem:[#allocation5 + $0xcc8] sm:$0xff]  ;;  %v8593_v33 = vcombine.high %v719_v14, %v723_v47  ;;  %v8909_v17 = vld [vmem:[#allocation2 + $0xb4] ss:$40 sps:$4 sm:$0xff]  }
 0x19a   :  { %v5153_v58 = vpop.f32.mrf.mxu1  ;;  %v5002_v63 = vpop.f32.mrf.mxu0  ;;  %5884 = vmatprep.subr.bf16.mxu0 %v8473_v60  ;;  %v9600_v22 = vld [vmem:[#allocation5 + $0xce8] sm:$0xff] }
 0x19b   :  { %6036 = vmatpush1.bf16.msra.mxu1 %v8608_v43  ;;  %v9593_v6 = vadd.f32 %v5153_v58, %v5001_v35  ;;  %v5003_v12 = vadd.f32 %v5002_v63, %v9426_v31  ;;  %v8907_v31 = vld [vmem:[#allocation2 + $0x60] ss:$40 sps:$4 sm:$0xff]   ;;  %v8464_v43 = vcombine.low %v591_v27, %v595_v26  ;;  %v8457_v35 = vcombine.high %v9598_v34, %v9600_v22 }
 0x19c   :  { %v5155_v13 = vpop.f32.mrf.mxu1  ;;  %6037 = vmatprep.subr.bf16.mxu1 %v8601_v5  ;;  %v5006_v0 = vpop.f32.mrf.mxu0  ;;  %5617 = vmatmul.mubr.bf16.gmra.mxu0 %v8906_v21  ;;  %v711_v51 = vld [vmem:[#allocation5 + $0x10c8] sm:$0xff] }
 0x19d   :  { %v9602_v54 = vadd.f32 %v5155_v13, %v5003_v12  ;;  %v5007_v60 = vadd.f32 %v5006_v0, %v9431_v42  ;;  %5885 = vmatpush1.bf16.msra.mxu0 %v8472_v41  ;;  %v715_v1 = vld [vmem:[#allocation5 + $0x10e8] sm:$0xff]  ;;  %v8592_v12 = vcombine.low %v719_v14, %v723_v47 }
 0x19e   :  { %v5159_v15 = vpop.f32.mrf.mxu1  ;;  %5770 = vmatmul.mubr.bf16.gmra.mxu1 %v8907_v31  ;;  %v5008_v40 = vpop.f32.mrf.mxu0  ;;  %v8908_v5 = vld [vmem:[#allocation2 + $0xac] ss:$40 sps:$4 sm:$0xff]   ;;  %5886 = vmatprep.subr.bf16.mxu0 %v8465_v25  ;;  %v8585_v27 = vcombine.high %v711_v51, %v715_v1  ;;  %v8584_v25 = vcombine.low %v711_v51, %v715_v1 }
 0x19f   :  { %5626 = vmatprep.mubr.bf16.mxu0 %v8908_v5  ;;  %5779 = vmatprep.mubr.bf16.mxu1 %v8909_v17  ;;  %v9607_v58 = vadd.f32 %v5159_v15, %v5007_v60  ;;  %v5009_v63 = vadd.f32 %v5008_v40, %v9434_v52  ;;  %v575_v26 = vld [vmem:[#allocation5 + $0xc88] sm:$0xff]  ;;  %v8456_v52 = vcombine.low %v9598_v34, %v9600_v22 }
 0x1a0   :  { %v5161_v42 = vpop.f32.mrf.mxu1  ;;  %6038 = vmatpush1.bf16.msra.mxu1 %v8600_v11  ;;  %v5010_v41 = vpop.f32.mrf.mxu0  ;;  %v579_v13 = vld [vmem:[#allocation5 + $0xca8] sm:$0xff] }
 0x1a1   :  { %6039 = vmatprep.subr.bf16.mxu1 %v8593_v33  ;;  %v9610_v0 = vadd.f32 %v5161_v42, %v5009_v63  ;;  %v5011_v21 = vadd.f32 %v5010_v41, %v9439_v61  ;;  %5887 = vmatpush1.bf16.msra.mxu0 %v8464_v43  ;;  %v703_v5 = vld [vmem:[#allocation5 + $0x1088] sm:$0xff]  ;;  %v8449_v33 = vcombine.high %v575_v26, %v579_v13  ;;  %v8912_v41 = vld [vmem:[#allocation2 + $0xfc] ss:$40 sps:$4 sm:$0xff]  }
 0x1a2   :  { %v5163_v31 = vpop.f32.mrf.mxu1  ;;  %v707_v60 = vld [vmem:[#allocation5 + $0x10a8] sm:$0xff]  ;;  %v5012_v15 = vpop.f32.mrf.mxu0  ;;  %5888 = vmatprep.subr.bf16.mxu0 %v8457_v35  ;;  %v8911_v35 = vld [vmem:[#allocation2 + $0xb0] ss:$40 sps:$4 sm:$0xff]  }
 0x1a3   :  { %v9615_v11 = vadd.f32 %v5163_v31, %v5011_v21  ;;  %v5013_v14 = vadd.f32 %v5012_v15, %v9442_v7  ;;  %v8910_v17 = vld [vmem:[#allocation2 + $0xa8] ss:$40 sps:$4 sm:$0xff]   ;;  %v8577_v61 = vcombine.high %v703_v5, %v707_v60  ;;  %v8913_v1 = vld [vmem:[#allocation2 + $0x104] ss:$40 sps:$4 sm:$0xff]   ;;  %v8448_v21 = vcombine.low %v575_v26, %v579_v13 }
 0x1a4   :  { %v5165_v47 = vpop.f32.mrf.mxu1  ;;  %6040 = vmatpush1.bf16.msra.mxu1 %v8592_v12  ;;  %v5016_v40 = vpop.f32.mrf.mxu0  ;;  %5627 = vmatmul.mubr.bf16.gmra.mxu0 %v8910_v17  ;;  %v567_v43 = vld [vmem:[#allocation5 + $0xc48] sm:$0xff] }
 0x1a5   :  { %6041 = vmatprep.subr.bf16.mxu1 %v8585_v27  ;;  %v571_v63 = vld [vmem:[#allocation5 + $0xc68] sm:$0xff]  ;;  %v9618_v42 = vadd.f32 %v5165_v47, %v5013_v14  ;;  %v5017_v34 = vadd.f32 %v5016_v40, %v9445_v18  ;;  %5636 = vmatprep.mubr.bf16.mxu0 %v8912_v41  ;;  %v8576_v27 = vcombine.low %v703_v5, %v707_v60 }
 0x1a6   :  { %v5169_v22 = vpop.f32.mrf.mxu1  ;;  %5780 = vmatmul.mubr.bf16.gmra.mxu1 %v8911_v35  ;;  %v695_v7 = vld [vmem:[#allocation5 + $0x1048] sm:$0xff]  ;;  %v5018_v51 = vpop.f32.mrf.mxu0  ;;  %5889 = vmatpush1.bf16.msra.mxu0 %v8456_v52  ;;  %v8441_v18 = vcombine.high %v567_v43, %v571_v63  ;;  %v8440_v60 = vcombine.low %v567_v43, %v571_v63 }
 0x1a7   :  { %v699_v12 = vld [vmem:[#allocation5 + $0x1068] sm:$0xff]  ;;  %5789 = vmatprep.mubr.bf16.mxu1 %v8913_v1  ;;  %v9621_v31 = vadd.f32 %v5169_v22, %v5017_v34  ;;  %v5019_v15 = vadd.f32 %v5018_v51, %v9448_v28  ;;  %5890 = vmatprep.subr.bf16.mxu0 %v8449_v33  ;;  %v8914_v51 = vld [vmem:[#allocation2 + $0xf8] ss:$40 sps:$4 sm:$0xff]  }
 0x1a8   :  { %v5171_v14 = vpop.f32.mrf.mxu1  ;;  %6042 = vmatpush1.bf16.msra.mxu1 %v8584_v25  ;;  %v5020_v47 = vpop.f32.mrf.mxu0  ;;  %v8569_v40 = vcombine.high %v695_v7, %v699_v12  ;;  %v559_v17 = vld [vmem:[#allocation5 + $0xc08] sm:$0xff]  ;;  %v8568_v28 = vcombine.low %v695_v7, %v699_v12 }
 0x1a9   :  { %6043 = vmatprep.subr.bf16.mxu1 %v8577_v61  ;;  %v563_v35 = vld [vmem:[#allocation5 + $0xc28] sm:$0xff]  ;;  %v9624_v41 = vadd.f32 %v5171_v14, %v5019_v15  ;;  %v5021_v1 = vadd.f32 %v5020_v47, %v9451_v38 }
 0x1aa   :  { %v5173_v52 = vpop.f32.mrf.mxu1  ;;  %v687_v26 = vld [vmem:[#allocation5 + $0x1008] sm:$0xff]  ;;  %v5022_v5 = vpop.f32.mrf.mxu0  ;;  %5891 = vmatpush1.bf16.msra.mxu0 %v8448_v21  ;;  %v8433_v61 = vcombine.high %v559_v17, %v563_v35 }
 0x1ab   :  { %v691_v13 = vld [vmem:[#allocation5 + $0x1028] sm:$0xff]  ;;  %v9627_v34 = vadd.f32 %v5173_v52, %v5021_v1  ;;  %v5023_v25 = vadd.f32 %v5022_v5, %v9454_v49  ;;  %5892 = vmatprep.subr.bf16.mxu0 %v8441_v18  ;;  %v8917_v18 = vld [vmem:[#allocation2 + $0x154] ss:$40 sps:$4 sm:$0xff]   ;;  %v8432_v1 = vcombine.low %v559_v17, %v563_v35 }
 0x1ac   :  { %v5175_v33 = vpop.f32.mrf.mxu1  ;;  %6044 = vmatpush1.bf16.msra.mxu1 %v8576_v27  ;;  %v5026_v22 = vpop.f32.mrf.mxu0  ;;  %5637 = vmatmul.mubr.bf16.gmra.mxu0 %v8914_v51  ;;  %v8561_v38 = vcombine.high %v687_v26, %v691_v13  ;;  %v679_v15 = vld [vmem:[#allocation5 + $0xfc8] sm:$0xff] }
 0x1ad   :  { %6045 = vmatprep.subr.bf16.mxu1 %v8569_v40  ;;  %v683_v14 = vld [vmem:[#allocation5 + $0xfe8] sm:$0xff]  ;;  %v9630_v47 = vadd.f32 %v5175_v33, %v5023_v25  ;;  %v5027_v43 = vadd.f32 %v5026_v22, %v9457_v62  ;;  %v8560_v40 = vcombine.low %v687_v26, %v691_v13 }
 0x1ae   :  { %v5179_v63 = vpop.f32.mrf.mxu1  ;;  %v8915_v7 = vld [vmem:[#allocation2 + $0x100] ss:$40 sps:$4 sm:$0xff]   ;;  %v8916_v12 = vld [vmem:[#allocation2 + $0x14c] ss:$40 sps:$4 sm:$0xff]   ;;  %v5028_v27 = vpop.f32.mrf.mxu0  ;;  %5893 = vmatpush1.bf16.msra.mxu0 %v8440_v60  ;;  %v8553_v62 = vcombine.high %v679_v15, %v683_v14  ;;  %v8552_v13 = vcombine.low %v679_v15, %v683_v14 }
 0x1af   :  { %5790 = vmatmul.mubr.bf16.gmra.mxu1 %v8915_v7  ;;  %5646 = vmatprep.mubr.bf16.mxu0 %v8916_v12  ;;  %v807_v49 = vld [vmem:[#allocation5 + $0x13c8] sm:$0xff]  ;;  %v9633_v52 = vadd.f32 %v5179_v63, %v5027_v43  ;;  %v5029_v5 = vadd.f32 %v5028_v27, %v9460_v9 }
 0x1b0   :  { %v811_v21 = vld [vmem:[#allocation5 + $0x13e8] sm:$0xff]  ;;  %5799 = vmatprep.mubr.bf16.mxu1 %v8917_v18  ;;  %v5181_v25 = vpop.f32.mrf.mxu1  ;;  %6046 = vmatpush1.bf16.msra.mxu1 %v8568_v28  ;;  %v5030_v33 = vpop.f32.mrf.mxu0 }
 0x1b1   :  { %5894 = vmatprep.subr.bf16.mxu0 %v8433_v61  ;;  %6047 = vmatprep.subr.bf16.mxu1 %v8561_v38  ;;  %v8681_v22 = vcombine.high %v807_v49, %v811_v21  ;;  %v671_v51 = vld [vmem:[#allocation5 + $0xf88] sm:$0xff]  ;;  %v9636_v12 = vadd.f32 %v5181_v25, %v5029_v5  ;;  %v5031_v18 = vadd.f32 %v5030_v33, %v9463_v20 }
 0x1b2   :  { %v675_v7 = vld [vmem:[#allocation5 + $0xfa8] sm:$0xff]  ;;  %v5183_v60 = vpop.f32.mrf.mxu1  ;;  %v5032_v26 = vpop.f32.mrf.mxu0  ;;  %5895 = vmatpush1.bf16.msra.mxu0 %v8432_v1  ;;  %v8680_v9 = vcombine.low %v807_v49, %v811_v21  ;;  %v8919_v49 = vld [vmem:[#allocation2 + $0x150] ss:$40 sps:$4 sm:$0xff]   ;;  %v8920_v21 = vld [vmem:[#allocation2 + $0x19c] ss:$40 sps:$4 sm:$0xff]  }
 0x1b3   :  { %v799_v17 = vld [vmem:[#allocation5 + $0x1388] sm:$0xff]  ;;  %v9639_v43 = vadd.f32 %v5183_v60, %v5031_v18  ;;  %v5033_v28 = vadd.f32 %v5032_v26, %v9466_v30  ;;  %5896 = vmatprep.subr.bf16.mxu0 %v8553_v62  ;;  %v8545_v38 = vcombine.high %v671_v51, %v675_v7  ;;  %v8544_v18 = vcombine.low %v671_v51, %v675_v7 }
 0x1b4   :  { %v803_v35 = vld [vmem:[#allocation5 + $0x13a8] sm:$0xff]  ;;  %v5185_v61 = vpop.f32.mrf.mxu1  ;;  %6048 = vmatpush1.bf16.msra.mxu1 %v8560_v40  ;;  %v5036_v63 = vpop.f32.mrf.mxu0 }
 0x1b5   :  { %v8918_v27 = vld [vmem:[#allocation2 + $0x148] ss:$40 sps:$4 sm:$0xff]   ;;  %6049 = vmatprep.subr.bf16.mxu1 %v8681_v22  ;;  %v8673_v20 = vcombine.high %v799_v17, %v803_v35  ;;  %v9642_v33 = vadd.f32 %v5185_v61, %v5033_v28  ;;  %v5037_v15 = vadd.f32 %v5036_v63, %v9469_v44  ;;  %v8921_v62 = vld [vmem:[#allocation2 + $0x1a4] ss:$40 sps:$4 sm:$0xff]   ;;  %v8672_v22 = vcombine.low %v799_v17, %v803_v35 }
 0x1b6   :  { %5647 = vmatmul.mubr.bf16.gmra.mxu0 %v8918_v27  ;;  %v663_v5 = vld [vmem:[#allocation5 + $0xf48] sm:$0xff]  ;;  %v5189_v14 = vpop.f32.mrf.mxu1  ;;  %v5038_v40 = vpop.f32.mrf.mxu0 }
 0x1b7   :  { %v667_v25 = vld [vmem:[#allocation5 + $0xf68] sm:$0xff]  ;;  %5800 = vmatmul.mubr.bf16.gmra.mxu1 %v8919_v49  ;;  %5656 = vmatprep.mubr.bf16.mxu0 %v8920_v21  ;;  %v9645_v60 = vadd.f32 %v5189_v14, %v5037_v15  ;;  %v5039_v26 = vadd.f32 %v5038_v40, %v9472_v57  ;;  %v8922_v40 = vld [vmem:[#allocation2 + $0x198] ss:$40 sps:$4 sm:$0xff]  }
 0x1b8   :  { %v791_v30 = vld [vmem:[#allocation5 + $0x1348] sm:$0xff]  ;;  %5809 = vmatprep.mubr.bf16.mxu1 %v8921_v62  ;;  %5897 = vmatpush2.bf16.msra.mxu0 %v8552_v13  ;;  %v5191_v28 = vpop.f32.mrf.mxu1  ;;  %v8537_v44 = vcombine.high %v663_v5, %v667_v25  ;;  %v5040_v61 = vpop.f32.mrf.mxu0  ;;  %v8536_v35 = vcombine.low %v663_v5, %v667_v25 }
 0x1b9   :  { %v795_v1 = vld [vmem:[#allocation5 + $0x1368] sm:$0xff]  ;;  %6050 = vmatpush2.bf16.msra.mxu1 %v8680_v9  ;;  %5898 = vmatprep.subr.bf16.mxu0 %v8545_v38  ;;  %v9648_v21 = vadd.f32 %v5191_v28, %v5039_v26  ;;  %v5041_v62 = vadd.f32 %v5040_v61, %v9475_v4 }
 0x1ba   :  { %6051 = vmatprep.subr.bf16.mxu1 %v8673_v20  ;;  %v8665_v63 = vcombine.high %v791_v30, %v795_v1  ;;  %v655_v27 = vld [vmem:[#allocation5 + $0xf08] sm:$0xff]  ;;  %v5193_v13 = vpop.f32.mrf.mxu1  ;;  %v5042_v17 = vpop.f32.mrf.mxu0  ;;  %v8664_v57 = vcombine.low %v791_v30, %v795_v1 }
 0x1bb   :  { %v659_v49 = vld [vmem:[#allocation5 + $0xf28] sm:$0xff]  ;;  %v9651_v15 = vadd.f32 %v5193_v13, %v5041_v62  ;;  %v5043_v9 = vadd.f32 %v5042_v17, %v9478_v16 }
 0x1bc   :  { %v783_v51 = vld [vmem:[#allocation5 + $0x1308] sm:$0xff]  ;;  %5899 = vmatpush2.bf16.msra.mxu0 %v8544_v18  ;;  %v5195_v38 = vpop.f32.mrf.mxu1  ;;  %v8529_v20 = vcombine.high %v655_v27, %v659_v49  ;;  %v5046_v14 = vpop.f32.mrf.mxu0  ;;  %v8528_v62 = vcombine.low %v655_v27, %v659_v49 }
 0x1bd   :  { %v787_v7 = vld [vmem:[#allocation5 + $0x1328] sm:$0xff]  ;;  %6052 = vmatpush2.bf16.msra.mxu1 %v8672_v22  ;;  %5900 = vmatprep.subr.bf16.mxu0 %v8537_v44  ;;  %v9654_v61 = vadd.f32 %v5195_v38, %v5043_v9  ;;  %v5047_v5 = vadd.f32 %v5046_v14, %v9481_v32  ;;  %v8925_v44 = vld [vmem:[#allocation2 + $0x1f4] ss:$40 sps:$4 sm:$0xff]  }
 0x1be   :  { %5657 = vmatmul.mubr.bf16.gmra.mxu0 %v8922_v40  ;;  %6053 = vmatprep.subr.bf16.mxu1 %v8665_v63  ;;  %v8657_v4 = vcombine.high %v783_v51, %v787_v7  ;;  %v647_v26 = vld [vmem:[#allocation5 + $0xec8] sm:$0xff]  ;;  %v5199_v25 = vpop.f32.mrf.mxu1  ;;  %v5048_v22 = vpop.f32.mrf.mxu0  ;;  %v8656_v63 = vcombine.low %v783_v51, %v787_v7 }
 0x1bf   :  { %v651_v28 = vld [vmem:[#allocation5 + $0xee8] sm:$0xff]  ;;  %v9657_v13 = vadd.f32 %v5199_v25, %v5047_v5  ;;  %v5049_v17 = vadd.f32 %v5048_v22, %v9484_v45 }
 0x1c0   :  { %v8923_v30 = vld [vmem:[#allocation2 + $0x1a0] ss:$40 sps:$4 sm:$0xff]   ;;  %v8924_v1 = vld [vmem:[#allocation2 + $0x1ec] ss:$40 sps:$4 sm:$0xff]   ;;  %5901 = vmatpush2.bf16.msra.mxu0 %v8536_v35  ;;  %v5201_v9 = vpop.f32.mrf.mxu1  ;;  %v8521_v32 = vcombine.high %v647_v26, %v651_v28  ;;  %v5050_v38 = vpop.f32.mrf.mxu0  ;;  %v8520_v7 = vcombine.low %v647_v26, %v651_v28 }
 0x1c1   :  { %5810 = vmatmul.mubr.bf16.gmra.mxu1 %v8923_v30  ;;  %5666 = vmatprep.mubr.bf16.mxu0 %v8924_v1  ;;  %v775_v16 = vld [vmem:[#allocation5 + $0x12c8] sm:$0xff]  ;;  %v9660_v1 = vadd.f32 %v5201_v9, %v5049_v17 }
 0x1c2   :  { %v779_v18 = vld [vmem:[#allocation5 + $0x12e8] sm:$0xff]  ;;  %5819 = vmatprep.mubr.bf16.mxu1 %v8925_v44  ;;  %6054 = vmatpush2.bf16.msra.mxu1 %v8664_v57  ;;  %v5051_v44 = vadd.f32 %v5050_v38, %v9487_v59  ;;  %v5203_v35 = vpop.f32.mrf.mxu1  ;;  %v5052_v51 = vpop.f32.mrf.mxu0 }
 0x1c3   :  { %5902 = vmatprep.subr.bf16.mxu0 %v8529_v20  ;;  %6055 = vmatprep.subr.bf16.mxu1 %v8657_v4  ;;  %v8649_v14 = vcombine.high %v775_v16, %v779_v18  ;;  %v639_v40 = vld [vmem:[#allocation5 + $0xe88] sm:$0xff]  ;;  %v8648_v45 = vcombine.low %v775_v16, %v779_v18  ;;  %v5053_v57 = vadd.f32 %v5052_v51, %v9490_v8  ;;  %v8927_v16 = vld [vmem:[#allocation2 + $0x1f0] ss:$40 sps:$4 sm:$0xff]   ;;  %v8928_v18 = vld [vmem:[#allocation2 + $0x23c] ss:$40 sps:$4 sm:$0xff]  }
 0x1c4   :  { %v643_v30 = vld [vmem:[#allocation5 + $0xea8] sm:$0xff]  ;;  %5903 = vmatpush2.bf16.msra.mxu0 %v8528_v62  ;;  %v9663_v5 = vadd.f32 %v5203_v35, %v5051_v44  ;;  %v5205_v20 = vpop.f32.mrf.mxu1  ;;  %v5056_v25 = vpop.f32.mrf.mxu0 }
 0x1c5   :  { %v767_v27 = vld [vmem:[#allocation5 + $0x1288] sm:$0xff]  ;;  %5904 = vmatprep.subr.bf16.mxu0 %v8521_v32  ;;  %v8513_v4 = vcombine.high %v639_v40, %v643_v30  ;;  %v9666_v38 = vadd.f32 %v5205_v20, %v5053_v57  ;;  %v5057_v26 = vadd.f32 %v5056_v25, %v9493_v24  ;;  %v8512_v44 = vcombine.low %v639_v40, %v643_v30 }
 0x1c6   :  { %v771_v49 = vld [vmem:[#allocation5 + $0x12a8] sm:$0xff]  ;;  %6056 = vmatpush2.bf16.msra.mxu1 %v8656_v63  ;;  %v5209_v28 = vpop.f32.mrf.mxu1  ;;  %v5058_v63 = vpop.f32.mrf.mxu0 }
 0x1c7   :  { %v8926_v22 = vld [vmem:[#allocation2 + $0x1e8] ss:$40 sps:$4 sm:$0xff]   ;;  %6057 = vmatprep.subr.bf16.mxu1 %v8649_v14  ;;  %v8641_v59 = vcombine.high %v767_v27, %v771_v49  ;;  %v8929_v32 = vld [vmem:[#allocation2 + $0x244] ss:$40 sps:$4 sm:$0xff]   ;;  %v8640_v14 = vcombine.low %v767_v27, %v771_v49  ;;  %v9669_v35 = vadd.f32 %v5209_v28, %v5057_v26  ;;  %v5059_v51 = vadd.f32 %v5058_v63, %v9496_v37  ;;  %v8930_v63 = vld [vmem:[#allocation2 + $0x238] ss:$40 sps:$4 sm:$0xff]  }
 0x1c8   :  { %5667 = vmatmul.mubr.bf16.gmra.mxu0 %v8926_v22  ;;  %v631_v17 = vld [vmem:[#allocation5 + $0xe48] sm:$0xff]  ;;  %v5211_v57 = vpop.f32.mrf.mxu1  ;;  %v5060_v20 = vpop.f32.mrf.mxu0 }
 0x1c9   :  { %v635_v9 = vld [vmem:[#allocation5 + $0xe68] sm:$0xff]  ;;  %5820 = vmatmul.mubr.bf16.gmra.mxu1 %v8927_v16  ;;  %5676 = vmatprep.mubr.bf16.mxu0 %v8928_v18  ;;  %v9672_v18 = vadd.f32 %v5211_v57, %v5059_v51  ;;  %v9678_v51 = vld [vmem:[#allocation5 + $0x1d0] sm:$0xff] }
 0x1ca   :  { %v759_v8 = vld [vmem:[#allocation5 + $0x1248] sm:$0xff]  ;;  %5829 = vmatprep.mubr.bf16.mxu1 %v8929_v32  ;;  %5905 = vmatpush2.bf16.msra.mxu0 %v8520_v7  ;;  %v8505_v24 = vcombine.high %v631_v17, %v635_v9  ;;  %v5061_v32 = vadd.f32 %v5060_v20, %v9499_v55  ;;  %v5213_v7 = vpop.f32.mrf.mxu1  ;;  %v5062_v27 = vpop.f32.mrf.mxu0  ;;  %v8504_v49 = vcombine.low %v631_v17, %v635_v9  ;;  %v9680_v57 = vld [vmem:[#allocation5 + $0x1f0] sm:$0xff] }
 0x1cb   :  { %v763_v62 = vld [vmem:[#allocation5 + $0x1268] sm:$0xff]  ;;  %6058 = vmatpush2.bf16.msra.mxu1 %v8648_v45  ;;  %5906 = vmatprep.subr.bf16.mxu0 %v8513_v4  ;;  %v5063_v45 = vadd.f32 %v5062_v27, %v9506_v10  ;;  %v8933_v20 = vld [vmem:[#allocation2 + $0x294] ss:$40 sps:$4 sm:$0xff]  }
 0x1cc   :  { %6059 = vmatprep.subr.bf16.mxu1 %v8641_v59  ;;  %v8633_v25 = vcombine.high %v759_v8, %v763_v62  ;;  %v623_v22 = vld [vmem:[#allocation5 + $0xe08] sm:$0xff]  ;;  %v8632_v37 = vcombine.low %v759_v8, %v763_v62  ;;  %v9675_v26 = vadd.f32 %v5213_v7, %v5061_v32  ;;  %v5215_v4 = vpop.f32.mrf.mxu1  ;;  %v5066_v28 = vpop.f32.mrf.mxu0  ;;  %v9685_v62 = vld [vmem:[#allocation5 + $0x5d0] sm:$0xff] }
 0x1cd   :  { %v627_v16 = vld [vmem:[#allocation5 + $0xe28] sm:$0xff]  ;;  %v5067_v17 = vadd.f32 %v5066_v28, %v9513_v23 }
 0x1ce   :  { %v751_v40 = vld [vmem:[#allocation5 + $0x1208] sm:$0xff]  ;;  %5907 = vmatpush2.bf16.msra.mxu0 %v8512_v44  ;;  %v8497_v59 = vcombine.high %v623_v22, %v627_v16  ;;  %v9682_v44 = vadd.f32 %v5215_v4, %v5063_v45  ;;  %v5219_v9 = vpop.f32.mrf.mxu1  ;;  %v8107_v45 = vcombine.high %v9678_v51, %v9680_v57 }
 0x1cf   :  { %v755_v30 = vld [vmem:[#allocation5 + $0x1228] sm:$0xff]  ;;  %6060 = vmatpush2.bf16.msra.mxu1 %v8640_v14  ;;  %5908 = vmatprep.subr.bf16.mxu0 %v8505_v24  ;;  %v9687_v14 = vld [vmem:[#allocation5 + $0x5f0] sm:$0xff]  ;;  %v5068_v24 = vpop.f32.mrf.mxu0  ;;  %v9689_v7 = vadd.f32 %v5219_v9, %v5067_v17 }
 0x1d0   :  { %5677 = vmatmul.mubr.bf16.gmra.mxu0 %v8930_v63  ;;  %6061 = vmatprep.subr.bf16.mxu1 %v8633_v25  ;;  %v8625_v55 = vcombine.high %v751_v40, %v755_v30  ;;  %v8931_v8 = vld [vmem:[#allocation2 + $0x240] ss:$40 sps:$4 sm:$0xff]   ;;  %v8932_v10 = vld [vmem:[#allocation2 + $0x28c] ss:$40 sps:$4 sm:$0xff]   ;;  %v8496_v25 = vcombine.low %v623_v22, %v627_v16  ;;  %v8624_v32 = vcombine.low %v751_v40, %v755_v30  ;;  %v5221_v23 = vpop.f32.mrf.mxu1 }
 0x1d1   :  { %5830 = vmatmul.mubr.bf16.gmra.mxu1 %v8931_v8  ;;  %5686 = vmatprep.mubr.bf16.mxu0 %v8932_v10  ;;  %v5069_v27 = vadd.f32 %v5068_v24, %v9520_v39  ;;  %v5070_v4 = vpop.f32.mrf.mxu0  ;;  %v8235_v28 = vcombine.high %v9685_v62, %v9687_v14  ;;  %v8936_v8 = vld [vmem:[#allocation2 + $0x2dc] ss:$40 sps:$4 sm:$0xff]  }
 0x1d2   :  { %5839 = vmatprep.mubr.bf16.mxu1 %v8933_v20  ;;  %5909 = vmatpush2.bf16.msra.mxu0 %v8504_v49  ;;  %v5071_v22 = vadd.f32 %v5070_v4, %v9523_v46  ;;  %v5223_v16 = vpop.f32.mrf.mxu1  ;;  %v8935_v46 = vld [vmem:[#allocation2 + $0x290] ss:$40 sps:$4 sm:$0xff]   ;;  %v8937_v24 = vld [vmem:[#allocation2 + $0x2e4] ss:$40 sps:$4 sm:$0xff]  }
 0x1d3   :  { %6062 = vmatpush2.bf16.msra.mxu1 %v8632_v37  ;;  %5910 = vmatprep.subr.bf16.mxu0 %v8497_v59  ;;  %v9696_v63 = vadd.f32 %v5221_v23, %v5069_v27  ;;  %v5072_v40 = vpop.f32.mrf.mxu0  ;;  %v8934_v59 = vld [vmem:[#allocation2 + $0x288] ss:$40 sps:$4 sm:$0xff]  }
 0x1d4   :  { %6063 = vmatprep.subr.bf16.mxu1 %v8625_v55  ;;  %v9699_v30 = vadd.f32 %v5223_v16, %v5071_v22  ;;  %v5073_v39 = vadd.f32 %v5072_v40, %v9526_v53  ;;  %v5225_v49 = vpop.f32.mrf.mxu1  ;;  %v8938_v40 = vld [vmem:[#allocation2 + $0x2d8] ss:$40 sps:$4 sm:$0xff]  }
 0x1d5   :  { %v5076_v37 = vpop.f32.mrf.mxu0 }
 0x1d6   :  { %5911 = vmatpush2.bf16.msra.mxu0 %v8496_v25  ;;  %v9702_v55 = vadd.f32 %v5225_v49, %v5073_v39  ;;  %v5077_v17 = vadd.f32 %v5076_v37, %v9529_v3  ;;  %v5229_v9 = vpop.f32.mrf.mxu1  ;;  %v8939_v37 = vld [vmem:[#allocation2 + $0x2e0] ss:$40 sps:$4 sm:$0xff]  }
 0x1d7   :  { %6064 = vmatpush2.bf16.msra.mxu1 %v8624_v32  ;;  %6186 = vmatprep.subr.bf16.mxu0 %v8107_v45  ;;  %v5078_v10 = vpop.f32.mrf.mxu0 }
 0x1d8   :  { %5687 = vmatmul.mubr.bf16.gmra.mxu0 %v8934_v59  ;;  %6339 = vmatprep.subr.bf16.mxu1 %v8235_v28  ;;  %v9705_v53 = vadd.f32 %v5229_v9, %v5077_v17  ;;  %v5079_v20 = vadd.f32 %v5078_v10, %v9532_v19  ;;  %v5231_v25 = vpop.f32.mrf.mxu1  ;;  %v8940_v59 = vld [vmem:[#allocation2 + $0x32c] ss:$40 sps:$4 sm:$0xff]  }
 0x1d9   :  { %5840 = vmatmul.mubr.bf16.gmra.mxu1 %v8935_v46  ;;  %5696 = vmatprep.mubr.bf16.mxu0 %v8936_v8  ;;  %v5080_v32 = vpop.f32.mrf.mxu0  ;;  %v8941_v17 = vld [vmem:[#allocation2 + $0x334] ss:$40 sps:$4 sm:$0xff]  }
 0x1da   :  { %5849 = vmatprep.mubr.bf16.mxu1 %v8937_v24  ;;  %v9708_v27 = vadd.f32 %v5231_v25, %v5079_v20  ;;  %v5081_v23 = vadd.f32 %v5080_v32, %v9535_v29  ;;  %v5233_v45 = vpop.f32.mrf.mxu1  ;;  %v11212_v46 = vld [vmem:[#allocation13_spill] sm:$0xff]  ;;  %v11213_v20 = vld [vmem:[#allocation14_spill] sm:$0xff] }
 0x1db   :  { %v5082_v3 = vpop.f32.mrf.mxu0 }
 0x1dc   :  { %v9711_v4 = vadd.f32 %v5233_v45, %v5081_v23  ;;  %v5083_v28 = vadd.f32 %v5082_v3, %v9538_v36  ;;  %v5235_v22 = vpop.f32.mrf.mxu1  ;;  %v11214_v45 = vld [vmem:[#allocation15_spill] sm:$0xff] }
 0x1dd   :  { %v5086_v16 = vpop.f32.mrf.mxu0 }
 0x1de   :  { %v9714_v39 = vadd.f32 %v5235_v22, %v5083_v28  ;;  %v5087_v19 = vadd.f32 %v5086_v16, %v9541_v56  ;;  %v5239_v49 = vpop.f32.mrf.mxu1  ;;  %v8942_v16 = vld [vmem:[#allocation2 + $0x328] ss:$40 sps:$4 sm:$0xff]  }
 0x1df   :  { %v5088_v29 = vpop.f32.mrf.mxu0 }
 0x1e0   :  { %5697 = vmatmul.mubr.bf16.gmra.mxu0 %v8938_v40  ;;  %v9717_v9 = vadd.f32 %v5239_v49, %v5087_v19  ;;  %v5089_v36 = vadd.f32 %v5088_v29, %v11212_v46  ;;  %v5241_v8 = vpop.f32.mrf.mxu1  ;;  %v11216_v19 = vld [vmem:[#allocation16_spill] sm:$0xff]  ;;  %v8944_v29 = vld [vmem:[#allocation2 + $0x37c] ss:$40 sps:$4 sm:$0xff]  }
 0x1e1   :  { %5850 = vmatmul.mubr.bf16.gmra.mxu1 %v8939_v37  ;;  %5706 = vmatprep.mubr.bf16.mxu0 %v8940_v59  ;;  %v5090_v10 = vpop.f32.mrf.mxu0  ;;  %v8943_v59 = vld [vmem:[#allocation2 + $0x330] ss:$40 sps:$4 sm:$0xff]   ;;  %v8945_v46 = vld [vmem:[#allocation2 + $0x384] ss:$40 sps:$4 sm:$0xff]  }
 0x1e2   :  { %5859 = vmatprep.mubr.bf16.mxu1 %v8941_v17  ;;  %v9720_v24 = vadd.f32 %v5241_v8, %v5089_v36  ;;  %v5091_v25 = vadd.f32 %v5090_v10, %v11213_v20  ;;  %v5243_v32 = vpop.f32.mrf.mxu1  ;;  %v11218_v8 = vld [vmem:[#allocation17_spill] sm:$0xff] }
 0x1e3   :  { %v5092_v56 = vpop.f32.mrf.mxu0 }
 0x1e4   :  { %v9723_v23 = vadd.f32 %v5243_v32, %v5091_v25  ;;  %v5093_v3 = vadd.f32 %v5092_v56, %v11214_v45  ;;  %v5245_v28 = vpop.f32.mrf.mxu1  ;;  %v11220_v56 = vld [vmem:[#allocation18_spill] sm:$0xff] }
 0x1e5   :  { %v5096_v22 = vpop.f32.mrf.mxu0 }
 0x1e6   :  { %v9726_v40 = vadd.f32 %v5245_v28, %v5093_v3  ;;  %v5097_v49 = vadd.f32 %v5096_v22, %v11216_v19  ;;  %v5249_v37 = vpop.f32.mrf.mxu1 }
 0x1e7   :  { %v5098_v17 = vpop.f32.mrf.mxu0 }
 0x1e8   :  { %5707 = vmatmul.mubr.bf16.gmra.mxu0 %v8942_v16  ;;  %11215 = vst [vmem:[#allocation13_spill] sm:$0xff] %v9726_v40  ;;  %v9729_v36 = vadd.f32 %v5249_v37, %v5097_v49  ;;  %v5099_v10 = vadd.f32 %v5098_v17, %v11218_v8  ;;  %v5251_v20 = vpop.f32.mrf.mxu1  ;;  %v11222_v16 = vld [vmem:[#allocation19_spill] sm:$0xff]  ;;  %v11224_v37 = vld [vmem:[#allocation20_spill] sm:$0xff] }
 0x1e9   :  { %5860 = vmatmul.mubr.bf16.gmra.mxu1 %v8943_v59  ;;  %5716 = vmatprep.mubr.bf16.mxu0 %v8944_v29  ;;  %v5100_v25 = vpop.f32.mrf.mxu0  ;;  %v8946_v40 = vld [vmem:[#allocation2 + $0x378] ss:$40 sps:$4 sm:$0xff]  }
 0x1ea   :  { %5869 = vmatprep.mubr.bf16.mxu1 %v8945_v46  ;;  %11217 = vst [vmem:[#allocation14_spill] sm:$0xff] %v9729_v36  ;;  %v9732_v32 = vadd.f32 %v5251_v20, %v5099_v10  ;;  %v5101_v45 = vadd.f32 %v5100_v25, %v11220_v56  ;;  %v5253_v3 = vpop.f32.mrf.mxu1  ;;  %v8947_v8 = vld [vmem:[#allocation2 + $0x380] ss:$40 sps:$4 sm:$0xff]   ;;  %v8948_v10 = vld [vmem:[#allocation2 + $0x1c] ss:$40 sps:$4 sm:$0xff]  }
 0x1eb   :  { %v5102_v28 = vpop.f32.mrf.mxu0  ;;  %v8949_v25 = vld [vmem:[#allocation2 + $0x24] ss:$40 sps:$4 sm:$0xff]  }
 0x1ec   :  { %11219 = vst [vmem:[#allocation15_spill] sm:$0xff] %v9732_v32  ;;  %v9735_v22 = vadd.f32 %v5253_v3, %v5101_v45  ;;  %v5103_v19 = vadd.f32 %v5102_v28, %v11222_v16  ;;  %v5255_v59 = vpop.f32.mrf.mxu1  ;;  %v11226_v45 = vld [vmem:[#allocation21_spill] sm:$0xff] }
 0x1ed   :  { %v5106_v29 = vpop.f32.mrf.mxu0  ;;  %v224_v16 = vld [vmem:[#allocation5 + $0x190] sm:$0xff] }
 0x1ee   :  { %11221 = vst [vmem:[#allocation16_spill] sm:$0xff] %v9735_v22  ;;  %v9738_v49 = vadd.f32 %v5255_v59, %v5103_v19  ;;  %v5107_v17 = vadd.f32 %v5106_v29, %v11224_v37  ;;  %v5259_v46 = vpop.f32.mrf.mxu1  ;;  %v228_v22 = vld [vmem:[#allocation5 + $0x1b0] sm:$0xff]  ;;  %v11228_v59 = vld [vmem:[#allocation22_spill] sm:$0xff] }
 0x1ef   :  { %v5108_v20 = vpop.f32.mrf.mxu0 }
 0x1f0   :  { %5717 = vmatmul.mubr.bf16.gmra.mxu0 %v8946_v40  ;;  %11223 = vst [vmem:[#allocation17_spill] sm:$0xff] %v9738_v49  ;;  %v9741_v56 = vadd.f32 %v5259_v46, %v5107_v17  ;;  %v5109_v3 = vadd.f32 %v5108_v20, %v11226_v45  ;;  %v5261_v28 = vpop.f32.mrf.mxu1  ;;  %v356_v49 = vld [vmem:[#allocation5 + $0x5b0] sm:$0xff]  ;;  %v8234_v17 = vcombine.low %v9685_v62, %v9687_v14 }
 0x1f1   :  { %5870 = vmatmul.mubr.bf16.gmra.mxu1 %v8947_v8  ;;  %5912 = vmatprep.mubr.bf16.mxu0 %v8948_v10  ;;  %v5110_v40 = vpop.f32.mrf.mxu0  ;;  %v8106_v8 = vcombine.low %v9678_v51, %v9680_v57  ;;  %v352_v10 = vld [vmem:[#allocation5 + $0x590] sm:$0xff]  ;;  %v8099_v46 = vcombine.high %v224_v16, %v228_v22 }
 0x1f2   :  { %6065 = vmatprep.mubr.bf16.mxu1 %v8949_v25  ;;  %11225 = vst [vmem:[#allocation18_spill] sm:$0xff] %v9741_v56  ;;  %v9744_v19 = vadd.f32 %v5261_v28, %v5109_v3  ;;  %v5111_v29 = vadd.f32 %v5110_v40, %v11228_v59  ;;  %v5263_v37 = vpop.f32.mrf.mxu1  ;;  %v216_v3 = vld [vmem:[#allocation5 + $0x150] sm:$0xff]  ;;  %v8950_v40 = vld [vmem:[#allocation2 + $0x18] ss:$40 sps:$4 sm:$0xff]   ;;  %v8227_v59 = vcombine.high %v352_v10, %v356_v49 }
 0x1f3   :  { %v5112_v32 = vpop.f32.mrf.mxu0  ;;  %v220_v28 = vld [vmem:[#allocation5 + $0x170] sm:$0xff] }
 0x1f4   :  { %11227 = vst [vmem:[#allocation19_spill] sm:$0xff] %v9744_v19  ;;  %v9751_v20 = vadd.f32 %v5263_v37, %v5111_v29  ;;  %v5113_v25 = vadd.f32 %v5112_v32, %v9582_v2  ;;  %v5265_v45 = vpop.f32.mrf.mxu1  ;;  %v9754_v56 = vld [vmem:[#allocation5 + $0x550] sm:$0xff]  ;;  %v8951_v29 = vld [vmem:[#allocation2 + $0x20] ss:$40 sps:$4 sm:$0xff]   ;;  %v8098_v2 = vcombine.low %v224_v16, %v228_v22  ;;  %v8226_v37 = vcombine.low %v352_v10, %v356_v49 }
 0x1f5   :  { %v5302_v19 = vpop.f32.mrf.mxu0  ;;  %v9756_v51 = vld [vmem:[#allocation5 + $0x570] sm:$0xff] }
 0x1f6   :  { %11229 = vst [vmem:[#allocation20_spill] sm:$0xff] %v9751_v20  ;;  %v9758_v57 = vadd.f32 %v5265_v45, %v5113_v25  ;;  %v5303_v62 = vadd.f32 %v5302_v19, %v9585_v48  ;;  %v9761_v14 = vpop.f32.mrf.mxu1  ;;  %v8952_v25 = vld [vmem:[#allocation2 + $0x6c] ss:$40 sps:$4 sm:$0xff]   ;;  %v8219_v48 = vcombine.high %v9754_v56, %v9756_v51 }
 0x1f7   :  { %v5304_v32 = vpop.f32.mrf.mxu0  ;;  %v8953_v45 = vld [vmem:[#allocation2 + $0x74] ss:$40 sps:$4 sm:$0xff]  }
 0x1f8   :  { %5913 = vmatmul.mubr.bf16.vlgmr.msra.gmra.mxu0 %v8950_v40  ;;  %v8091_v40 = vcombine.high %v216_v3, %v220_v28  ;;  %7716 = vst [vmem:[#allocation8] sm:$0xff] %v5303_v62  ;;  %v5305_v20 = vadd.f32 %v5304_v32, %v9590_v50  ;;  %v9764_v36 = vpop.f32.mrf.mxu1  ;;  %v208_v22 = vld [vmem:[#allocation5 + $0x110] sm:$0xff]  ;;  %v8090_v50 = vcombine.low %v216_v3, %v220_v28 }
 0x1f9   :  { %6066 = vmatmul.mubr.bf16.vlgmr.msra.gmra.mxu1 %v8951_v29  ;;  %6187 = vmatpush1.bf16.msra.mxu0 %v8106_v8  ;;  %v5306_v19 = vpop.f32.mrf.mxu0  ;;  %v212_v16 = vld [vmem:[#allocation5 + $0x130] sm:$0xff] }
 0x1fa   :  { %6340 = vmatpush1.bf16.msra.mxu1 %v8234_v17  ;;  %6188 = vmatprep.subr.bf16.mxu0 %v8099_v46  ;;  %7717 = vst [vmem:[#allocation8 + $0x8] sm:$0xff] %v5305_v20  ;;  %v5307_v49 = vadd.f32 %v5306_v19, %v9593_v6  ;;  %v9769_v8 = vpop.f32.mrf.mxu1  ;;  %v336_v10 = vld [vmem:[#allocation5 + $0x510] sm:$0xff]  ;;  %v8083_v20 = vcombine.high %v208_v22, %v212_v16  ;;  %v8957_v19 = vld [vmem:[#allocation2 + $0xc4] ss:$40 sps:$4 sm:$0xff]  }
 0x1fb   :  { %5922 = vmatprep.mubr.bf16.mxu0 %v8952_v25  ;;  %6075 = vmatprep.mubr.bf16.mxu1 %v8953_v45  ;;  %v340_v17 = vld [vmem:[#allocation5 + $0x530] sm:$0xff]  ;;  %v5308_v46 = vpop.f32.mrf.mxu0  ;;  %v8082_v25 = vcombine.low %v208_v22, %v212_v16 }
 0x1fc   :  { %6341 = vmatprep.subr.bf16.mxu1 %v8227_v59  ;;  %7724 = vst [vmem:[#allocation8 + $0x40] sm:$0xff] %v5307_v49  ;;  %v5309_v62 = vadd.f32 %v5308_v46, %v9602_v54  ;;  %v9772_v29 = vpop.f32.mrf.mxu1  ;;  %v8218_v59 = vcombine.low %v9754_v56, %v9756_v51  ;;  %v9776_v6 = vld [vmem:[#allocation5 + $0xd0] sm:$0xff] }
 0x1fd   :  { %6189 = vmatpush1.bf16.msra.mxu0 %v8098_v2  ;;  %v9778_v32 = vld [vmem:[#allocation5 + $0xf0] sm:$0xff]  ;;  %v5312_v3 = vpop.f32.mrf.mxu0  ;;  %v8211_v2 = vcombine.high %v336_v10, %v340_v17 }
 0x1fe   :  { %6342 = vmatpush1.bf16.msra.mxu1 %v8226_v37  ;;  %6190 = vmatprep.subr.bf16.mxu0 %v8091_v40  ;;  %v8954_v28 = vld [vmem:[#allocation2 + $0x68] ss:$40 sps:$4 sm:$0xff]   ;;  %7725 = vst [vmem:[#allocation8 + $0x48] sm:$0xff] %v5309_v62  ;;  %v5313_v37 = vadd.f32 %v5312_v3, %v9607_v58  ;;  %v9781_v40 = vpop.f32.mrf.mxu1  ;;  %v8075_v49 = vcombine.high %v9776_v6, %v9778_v32 }
 0x1ff   :  { %6343 = vmatprep.subr.bf16.mxu1 %v8219_v48  ;;  %v8955_v54 = vld [vmem:[#allocation2 + $0x70] ss:$40 sps:$4 sm:$0xff]   ;;  %v5314_v45 = vpop.f32.mrf.mxu0  ;;  %v8956_v48 = vld [vmem:[#allocation2 + $0xbc] ss:$40 sps:$4 sm:$0xff]   ;;  %v8210_v62 = vcombine.low %v336_v10, %v340_v17 }
 0x200   :  { %5923 = vmatmul.mubr.bf16.gmra.mxu0 %v8954_v28  ;;  %v328_v56 = vld [vmem:[#allocation5 + $0x4d0] sm:$0xff]  ;;  %7732 = vst [vmem:[#allocation8 + $0x80] sm:$0xff] %v5313_v37  ;;  %v5315_v46 = vadd.f32 %v5314_v45, %v9610_v0  ;;  %v9786_v58 = vpop.f32.mrf.mxu1  ;;  %v8074_v0 = vcombine.low %v9776_v6, %v9778_v32  ;;  %v8959_v32 = vld [vmem:[#allocation2 + $0xc0] ss:$40 sps:$4 sm:$0xff]  }
 0x201   :  { %6076 = vmatmul.mubr.bf16.gmra.mxu1 %v8955_v54  ;;  %6191 = vmatpush1.bf16.msra.mxu0 %v8090_v50  ;;  %v332_v51 = vld [vmem:[#allocation5 + $0x4f0] sm:$0xff]  ;;  %v5316_v50 = vpop.f32.mrf.mxu0 }
 0x202   :  { %5932 = vmatprep.mubr.bf16.mxu0 %v8956_v48  ;;  %6085 = vmatprep.mubr.bf16.mxu1 %v8957_v19  ;;  %v8203_v22 = vcombine.high %v328_v56, %v332_v51  ;;  %v192_v16 = vld [vmem:[#allocation5 + $0x90] sm:$0xff]  ;;  %7733 = vst [vmem:[#allocation8 + $0x88] sm:$0xff] %v5315_v46  ;;  %v5317_v28 = vadd.f32 %v5316_v50, %v9615_v11  ;;  %v9789_v54 = vpop.f32.mrf.mxu1  ;;  %v8958_v11 = vld [vmem:[#allocation2 + $0xb8] ss:$40 sps:$4 sm:$0xff]  }
 0x203   :  { %6344 = vmatpush1.bf16.msra.mxu1 %v8218_v59  ;;  %6192 = vmatprep.subr.bf16.mxu0 %v8083_v20  ;;  %v196_v3 = vld [vmem:[#allocation5 + $0xb0] sm:$0xff]  ;;  %v5318_v19 = vpop.f32.mrf.mxu0  ;;  %v8202_v59 = vcombine.low %v328_v56, %v332_v51 }
 0x204   :  { %6345 = vmatprep.subr.bf16.mxu1 %v8211_v2  ;;  %v320_v48 = vld [vmem:[#allocation5 + $0x490] sm:$0xff]  ;;  %7740 = vst [vmem:[#allocation8 + $0xc0] sm:$0xff] %v5317_v28  ;;  %v5319_v10 = vadd.f32 %v5318_v19, %v9618_v42  ;;  %v9794_v17 = vpop.f32.mrf.mxu1  ;;  %v8067_v20 = vcombine.high %v192_v16, %v196_v3  ;;  %v8066_v28 = vcombine.low %v192_v16, %v196_v3 }
 0x205   :  { %6193 = vmatpush1.bf16.msra.mxu0 %v8082_v25  ;;  %v324_v37 = vld [vmem:[#allocation5 + $0x4b0] sm:$0xff]  ;;  %v5322_v2 = vpop.f32.mrf.mxu0 }
 0x206   :  { %6194 = vmatprep.subr.bf16.mxu0 %v8075_v49  ;;  %v8195_v25 = vcombine.high %v320_v48, %v324_v37  ;;  %v184_v45 = vld [vmem:[#allocation5 + $0x50] sm:$0xff]  ;;  %7741 = vst [vmem:[#allocation8 + $0xc8] sm:$0xff] %v5319_v10  ;;  %v5323_v50 = vadd.f32 %v5322_v2, %v9621_v31  ;;  %v9797_v6 = vpop.f32.mrf.mxu1  ;;  %v8194_v31 = vcombine.low %v320_v48, %v324_v37 }
 0x207   :  { %6346 = vmatpush1.bf16.msra.mxu1 %v8210_v62  ;;  %v188_v46 = vld [vmem:[#allocation5 + $0x70] sm:$0xff]  ;;  %11230 = vst [vmem:[#allocation21_spill] sm:$0xff] %v9797_v6  ;;  %v5324_v56 = vpop.f32.mrf.mxu0 }
 0x208   :  { %5933 = vmatmul.mubr.bf16.gmra.mxu0 %v8958_v11  ;;  %6347 = vmatprep.subr.bf16.mxu1 %v8203_v22  ;;  %v8960_v42 = vld [vmem:[#allocation2 + $0x10c] ss:$40 sps:$4 sm:$0xff]   ;;  %7748 = vst [vmem:[#allocation8 + $0x100] sm:$0xff] %v5323_v50  ;;  %v5325_v22 = vadd.f32 %v5324_v56, %v9624_v41  ;;  %v9800_v19 = vpop.f32.mrf.mxu1  ;;  %v8059_v10 = vcombine.high %v184_v45, %v188_v46  ;;  %v8962_v50 = vld [vmem:[#allocation2 + $0x108] ss:$40 sps:$4 sm:$0xff]  }
 0x209   :  { %6086 = vmatmul.mubr.bf16.gmra.mxu1 %v8959_v32  ;;  %5942 = vmatprep.mubr.bf16.mxu0 %v8960_v42  ;;  %v312_v49 = vld [vmem:[#allocation5 + $0x450] sm:$0xff]  ;;  %v5326_v2 = vpop.f32.mrf.mxu0  ;;  %v8058_v41 = vcombine.low %v184_v45, %v188_v46 }
 0x20a   :  { %v316_v62 = vld [vmem:[#allocation5 + $0x470] sm:$0xff]  ;;  %6195 = vmatpush1.bf16.msra.mxu0 %v8074_v0  ;;  %7749 = vst [vmem:[#allocation8 + $0x108] sm:$0xff] %v5325_v22  ;;  %v5327_v6 = vadd.f32 %v5326_v2, %v9627_v34 }
 0x20b   :  { %v8961_v51 = vld [vmem:[#allocation2 + $0x114] ss:$40 sps:$4 sm:$0xff]   ;;  %6348 = vmatpush1.bf16.msra.mxu1 %v8202_v59  ;;  %6196 = vmatprep.subr.bf16.mxu0 %v8067_v20  ;;  %v8187_v11 = vcombine.high %v312_v49, %v316_v62  ;;  %v5328_v0 = vpop.f32.mrf.mxu0  ;;  %v8186_v37 = vcombine.low %v312_v49, %v316_v62  ;;  %v8963_v46 = vld [vmem:[#allocation2 + $0x110] ss:$40 sps:$4 sm:$0xff]   ;;  %v8965_v62 = vld [vmem:[#allocation2 + $0x164] ss:$40 sps:$4 sm:$0xff]  }
 0x20c   :  { %6095 = vmatprep.mubr.bf16.mxu1 %v8961_v51  ;;  %6349 = vmatprep.subr.bf16.mxu1 %v8195_v25  ;;  %v176_v32 = vld [vmem:[#allocation5 + $0x10] sm:$0xff]  ;;  %v9803_v51 = vpop.f32.mrf.mxu1  ;;  %7756 = vst [vmem:[#allocation8 + $0x140] sm:$0xff] %v5327_v6  ;;  %v5329_v59 = vadd.f32 %v5328_v0, %v9630_v47  ;;  %v8964_v47 = vld [vmem:[#allocation2 + $0x15c] ss:$40 sps:$4 sm:$0xff]  }
 0x20d   :  { %v180_v42 = vld [vmem:[#allocation5 + $0x30] sm:$0xff]  ;;  %v5332_v25 = vpop.f32.mrf.mxu0 }
 0x20e   :  { %v304_v16 = vld [vmem:[#allocation5 + $0x410] sm:$0xff]  ;;  %6197 = vmatpush1.bf16.msra.mxu0 %v8066_v28  ;;  %v9806_v48 = vpop.f32.mrf.mxu1  ;;  %v8051_v20 = vcombine.high %v176_v32, %v180_v42  ;;  %7757 = vst [vmem:[#allocation8 + $0x148] sm:$0xff] %v5329_v59  ;;  %v5333_v28 = vadd.f32 %v5332_v25, %v9633_v52 }
 0x20f   :  { %v308_v3 = vld [vmem:[#allocation5 + $0x430] sm:$0xff]  ;;  %6350 = vmatpush1.bf16.msra.mxu1 %v8194_v31  ;;  %6198 = vmatprep.subr.bf16.mxu0 %v8059_v10  ;;  %v5334_v49 = vpop.f32.mrf.mxu0  ;;  %v8050_v10 = vcombine.low %v176_v32, %v180_v42 }
 0x210   :  { %5943 = vmatmul.mubr.bf16.gmra.mxu0 %v8962_v50  ;;  %6351 = vmatprep.subr.bf16.mxu1 %v8187_v11  ;;  %v8179_v34 = vcombine.high %v304_v16, %v308_v3  ;;  %v296_v56 = vld [vmem:[#allocation5 + $0x3d0] sm:$0xff]  ;;  %v9809_v45 = vpop.f32.mrf.mxu1  ;;  %7764 = vst [vmem:[#allocation8 + $0x180] sm:$0xff] %v5333_v28  ;;  %v5335_v2 = vadd.f32 %v5334_v49, %v9636_v12  ;;  %v8966_v28 = vld [vmem:[#allocation2 + $0x158] ss:$40 sps:$4 sm:$0xff]  }
 0x211   :  { %v300_v22 = vld [vmem:[#allocation5 + $0x3f0] sm:$0xff]  ;;  %6096 = vmatmul.mubr.bf16.gmra.mxu1 %v8963_v46  ;;  %5952 = vmatprep.mubr.bf16.mxu0 %v8964_v47  ;;  %v8178_v52 = vcombine.low %v304_v16, %v308_v3  ;;  %v5336_v59 = vpop.f32.mrf.mxu0 }
 0x212   :  { %v424_v6 = vld [vmem:[#allocation5 + $0x7d0] sm:$0xff]  ;;  %6105 = vmatprep.mubr.bf16.mxu1 %v8965_v62  ;;  %6199 = vmatpush1.bf16.msra.mxu0 %v8058_v41  ;;  %v9812_v11 = vpop.f32.mrf.mxu1  ;;  %v8171_v0 = vcombine.high %v296_v56, %v300_v22  ;;  %7765 = vst [vmem:[#allocation8 + $0x188] sm:$0xff] %v5335_v2  ;;  %v5337_v47 = vadd.f32 %v5336_v59, %v9639_v43 }
 0x213   :  { %v428_v31 = vld [vmem:[#allocation5 + $0x7f0] sm:$0xff]  ;;  %6352 = vmatpush1.bf16.msra.mxu1 %v8186_v37  ;;  %6200 = vmatprep.subr.bf16.mxu0 %v8051_v20  ;;  %v5338_v41 = vpop.f32.mrf.mxu0  ;;  %v8170_v12 = vcombine.low %v296_v56, %v300_v22  ;;  %v8967_v22 = vld [vmem:[#allocation2 + $0x160] ss:$40 sps:$4 sm:$0xff]  }
 0x214   :  { %6353 = vmatprep.subr.bf16.mxu1 %v8179_v34  ;;  %v8299_v25 = vcombine.high %v424_v6, %v428_v31  ;;  %v288_v50 = vld [vmem:[#allocation5 + $0x390] sm:$0xff]  ;;  %v9815_v62 = vpop.f32.mrf.mxu1  ;;  %7772 = vst [vmem:[#allocation8 + $0x1c0] sm:$0xff] %v5337_v47  ;;  %v5339_v37 = vadd.f32 %v5338_v41, %v9642_v33  ;;  %v8298_v3 = vcombine.low %v424_v6, %v428_v31 }
 0x215   :  { %v292_v46 = vld [vmem:[#allocation5 + $0x3b0] sm:$0xff]  ;;  %v5342_v34 = vpop.f32.mrf.mxu0 }
 0x216   :  { %v416_v32 = vld [vmem:[#allocation5 + $0x790] sm:$0xff]  ;;  %6201 = vmatpush1.bf16.msra.mxu0 %v8050_v10  ;;  %v9818_v16 = vpop.f32.mrf.mxu1  ;;  %v8163_v20 = vcombine.high %v288_v50, %v292_v46  ;;  %7773 = vst [vmem:[#allocation8 + $0x1c8] sm:$0xff] %v5339_v37  ;;  %v5343_v10 = vadd.f32 %v5342_v34, %v9645_v60  ;;  %v8162_v59 = vcombine.low %v288_v50, %v292_v46 }
 0x217   :  { %v420_v42 = vld [vmem:[#allocation5 + $0x7b0] sm:$0xff]  ;;  %6354 = vmatpush1.bf16.msra.mxu1 %v8178_v52  ;;  %6202 = vmatprep.subr.bf16.mxu0 %v8171_v0  ;;  %v5344_v6 = vpop.f32.mrf.mxu0 }
 0x218   :  { %5953 = vmatmul.mubr.bf16.gmra.mxu0 %v8966_v28  ;;  %6355 = vmatprep.subr.bf16.mxu1 %v8299_v25  ;;  %v8291_v43 = vcombine.high %v416_v32, %v420_v42  ;;  %v280_v49 = vld [vmem:[#allocation5 + $0x350] sm:$0xff]  ;;  %v9821_v56 = vpop.f32.mrf.mxu1  ;;  %7780 = vst [vmem:[#allocation8 + $0x200] sm:$0xff] %v5343_v10  ;;  %v5345_v25 = vadd.f32 %v5344_v6, %v9648_v21 }
 0x219   :  { %v284_v2 = vld [vmem:[#allocation5 + $0x370] sm:$0xff]  ;;  %6106 = vmatmul.mubr.bf16.gmra.mxu1 %v8967_v22  ;;  %v8290_v60 = vcombine.low %v416_v32, %v420_v42  ;;  %v5346_v37 = vpop.f32.mrf.mxu0 }
 0x21a   :  { %v8968_v33 = vld [vmem:[#allocation2 + $0x1ac] ss:$40 sps:$4 sm:$0xff]   ;;  %6203 = vmatpush2.bf16.msra.mxu0 %v8170_v12  ;;  %v9824_v47 = vpop.f32.mrf.mxu1  ;;  %v8155_v41 = vcombine.high %v280_v49, %v284_v2  ;;  %7781 = vst [vmem:[#allocation8 + $0x208] sm:$0xff] %v5345_v25  ;;  %v8154_v21 = vcombine.low %v280_v49, %v284_v2  ;;  %v8970_v10 = vld [vmem:[#allocation2 + $0x1a8] ss:$40 sps:$4 sm:$0xff]  }
 0x21b   :  { %5962 = vmatprep.mubr.bf16.mxu0 %v8968_v33  ;;  %v408_v52 = vld [vmem:[#allocation5 + $0x750] sm:$0xff]  ;;  %6356 = vmatpush2.bf16.msra.mxu1 %v8298_v3  ;;  %v5347_v33 = vadd.f32 %v5346_v37, %v9651_v15  ;;  %v5348_v12 = vpop.f32.mrf.mxu0 }
 0x21c   :  { %v412_v0 = vld [vmem:[#allocation5 + $0x770] sm:$0xff]  ;;  %6204 = vmatprep.subr.bf16.mxu0 %v8163_v20  ;;  %6357 = vmatprep.subr.bf16.mxu1 %v8291_v43  ;;  %v5349_v3 = vadd.f32 %v5348_v12, %v9654_v61  ;;  %v8972_v61 = vld [vmem:[#allocation2 + $0x1fc] ss:$40 sps:$4 sm:$0xff]  }
 0x21d   :  { %v8969_v31 = vld [vmem:[#allocation2 + $0x1b4] ss:$40 sps:$4 sm:$0xff]   ;;  %v8283_v34 = vcombine.high %v408_v52, %v412_v0  ;;  %7788 = vst [vmem:[#allocation8 + $0x240] sm:$0xff] %v5347_v33  ;;  %v8282_v42 = vcombine.low %v408_v52, %v412_v0  ;;  %v5352_v43 = vpop.f32.mrf.mxu0  ;;  %v8971_v2 = vld [vmem:[#allocation2 + $0x1b0] ss:$40 sps:$4 sm:$0xff]  }
 0x21e   :  { %6115 = vmatprep.mubr.bf16.mxu1 %v8969_v31  ;;  %v272_v28 = vld [vmem:[#allocation5 + $0x310] sm:$0xff]  ;;  %v9827_v31 = vpop.f32.mrf.mxu1  ;;  %6205 = vmatpush2.bf16.msra.mxu0 %v8162_v59  ;;  %7789 = vst [vmem:[#allocation8 + $0x248] sm:$0xff] %v5349_v3  ;;  %v5353_v59 = vadd.f32 %v5352_v43, %v9657_v13  ;;  %v8973_v0 = vld [vmem:[#allocation2 + $0x204] ss:$40 sps:$4 sm:$0xff]  }
 0x21f   :  { %v276_v22 = vld [vmem:[#allocation5 + $0x330] sm:$0xff]  ;;  %6358 = vmatpush2.bf16.msra.mxu1 %v8290_v60  ;;  %6206 = vmatprep.subr.bf16.mxu0 %v8155_v41  ;;  %v5354_v52 = vpop.f32.mrf.mxu0 }
 0x220   :  { %v400_v50 = vld [vmem:[#allocation5 + $0x710] sm:$0xff]  ;;  %v9830_v32 = vpop.f32.mrf.mxu1  ;;  %v8147_v20 = vcombine.high %v272_v28, %v276_v22  ;;  %5963 = vmatmul.mubr.bf16.gmra.mxu0 %v8970_v10  ;;  %6359 = vmatprep.subr.bf16.mxu1 %v8283_v34  ;;  %v8146_v37 = vcombine.low %v272_v28, %v276_v22  ;;  %7796 = vst [vmem:[#allocation8 + $0x280] sm:$0xff] %v5353_v59  ;;  %v8974_v59 = vld [vmem:[#allocation2 + $0x1f8] ss:$40 sps:$4 sm:$0xff]  }
 0x221   :  { %v404_v46 = vld [vmem:[#allocation5 + $0x730] sm:$0xff]  ;;  %6116 = vmatmul.mubr.bf16.gmra.mxu1 %v8971_v2  ;;  %5972 = vmatprep.mubr.bf16.mxu0 %v8972_v61  ;;  %v5355_v34 = vadd.f32 %v5354_v52, %v9660_v1  ;;  %v5356_v3 = vpop.f32.mrf.mxu0 }
 0x222   :  { %v8275_v15 = vcombine.high %v400_v50, %v404_v46  ;;  %v264_v6 = vld [vmem:[#allocation5 + $0x2d0] sm:$0xff]  ;;  %v9833_v49 = vpop.f32.mrf.mxu1  ;;  %6125 = vmatprep.mubr.bf16.mxu1 %v8973_v0  ;;  %6207 = vmatpush2.bf16.msra.mxu0 %v8154_v21  ;;  %v8274_v13 = vcombine.low %v400_v50, %v404_v46  ;;  %v5357_v61 = vadd.f32 %v5356_v3, %v9663_v5 }
 0x223   :  { %v268_v25 = vld [vmem:[#allocation5 + $0x2f0] sm:$0xff]  ;;  %6360 = vmatpush2.bf16.msra.mxu1 %v8282_v42  ;;  %6208 = vmatprep.subr.bf16.mxu0 %v8147_v20  ;;  %7797 = vst [vmem:[#allocation8 + $0x288] sm:$0xff] %v5355_v34  ;;  %v5358_v21 = vpop.f32.mrf.mxu0 }
 0x224   :  { %v392_v60 = vld [vmem:[#allocation5 + $0x6d0] sm:$0xff]  ;;  %v9836_v33 = vpop.f32.mrf.mxu1  ;;  %v8139_v12 = vcombine.high %v264_v6, %v268_v25  ;;  %6361 = vmatprep.subr.bf16.mxu1 %v8275_v15  ;;  %v8138_v1 = vcombine.low %v264_v6, %v268_v25  ;;  %7804 = vst [vmem:[#allocation8 + $0x2c0] sm:$0xff] %v5357_v61  ;;  %v5359_v42 = vadd.f32 %v5358_v21, %v9666_v38  ;;  %v8975_v25 = vld [vmem:[#allocation2 + $0x200] ss:$40 sps:$4 sm:$0xff]  }
 0x225   :  { %v396_v41 = vld [vmem:[#allocation5 + $0x6f0] sm:$0xff]  ;;  %v5362_v15 = vpop.f32.mrf.mxu0 }
 0x226   :  { %v8267_v43 = vcombine.high %v392_v60, %v396_v41  ;;  %v256_v10 = vld [vmem:[#allocation5 + $0x290] sm:$0xff]  ;;  %v9839_v0 = vpop.f32.mrf.mxu1  ;;  %6209 = vmatpush2.bf16.msra.mxu0 %v8146_v37  ;;  %v8266_v46 = vcombine.low %v392_v60, %v396_v41  ;;  %7805 = vst [vmem:[#allocation8 + $0x2c8] sm:$0xff] %v5359_v42  ;;  %v5363_v37 = vadd.f32 %v5362_v15, %v9669_v35 }
 0x227   :  { %v260_v2 = vld [vmem:[#allocation5 + $0x2b0] sm:$0xff]  ;;  %6362 = vmatpush2.bf16.msra.mxu1 %v8274_v13  ;;  %6210 = vmatprep.subr.bf16.mxu0 %v8139_v12  ;;  %v5364_v60 = vpop.f32.mrf.mxu0 }
 0x228   :  { %v384_v28 = vld [vmem:[#allocation5 + $0x690] sm:$0xff]  ;;  %v9842_v50 = vpop.f32.mrf.mxu1  ;;  %v8131_v20 = vcombine.high %v256_v10, %v260_v2  ;;  %5973 = vmatmul.mubr.bf16.gmra.mxu0 %v8974_v59  ;;  %6363 = vmatprep.subr.bf16.mxu1 %v8267_v43  ;;  %v8130_v3 = vcombine.low %v256_v10, %v260_v2  ;;  %7812 = vst [vmem:[#allocation8 + $0x300] sm:$0xff] %v5363_v37 }
 0x229   :  { %v388_v22 = vld [vmem:[#allocation5 + $0x6b0] sm:$0xff]  ;;  %6126 = vmatmul.mubr.bf16.gmra.mxu1 %v8975_v25  ;;  %v5365_v43 = vadd.f32 %v5364_v60, %v9672_v18  ;;  %v5366_v42 = vpop.f32.mrf.mxu0 }
 0x22a   :  { %v8259_v5 = vcombine.high %v384_v28, %v388_v22  ;;  %v248_v52 = vld [vmem:[#allocation5 + $0x250] sm:$0xff]  ;;  %v9845_v6 = vpop.f32.mrf.mxu1  ;;  %6211 = vmatpush2.bf16.msra.mxu0 %v8138_v1  ;;  %v8258_v35 = vcombine.low %v384_v28, %v388_v22 }
 0x22b   :  { %v252_v34 = vld [vmem:[#allocation5 + $0x270] sm:$0xff]  ;;  %6364 = vmatpush2.bf16.msra.mxu1 %v8266_v46  ;;  %6212 = vmatprep.subr.bf16.mxu0 %v8131_v20  ;;  %7813 = vst [vmem:[#allocation8 + $0x308] sm:$0xff] %v5365_v43  ;;  %v5368_v1 = vpop.f32.mrf.mxu0 }
 0x22c   :  { %v8976_v38 = vld [vmem:[#allocation2 + $0x24c] ss:$40 sps:$4 sm:$0xff]   ;;  %v9848_v61 = vpop.f32.mrf.mxu1  ;;  %v8123_v21 = vcombine.high %v248_v52, %v252_v34  ;;  %6365 = vmatprep.subr.bf16.mxu1 %v8259_v5  ;;  %v8122_v18 = vcombine.low %v248_v52, %v252_v34  ;;  %v5369_v46 = vadd.f32 %v5368_v1, %v9682_v44  ;;  %v8978_v37 = vld [vmem:[#allocation2 + $0x248] ss:$40 sps:$4 sm:$0xff]  }
 0x22d   :  { %5982 = vmatprep.mubr.bf16.mxu0 %v8976_v38  ;;  %v376_v13 = vld [vmem:[#allocation5 + $0x650] sm:$0xff]  ;;  %v5367_v38 = vadd.f32 %v5366_v42, %v9675_v26  ;;  %v5372_v5 = vpop.f32.mrf.mxu0 }
 0x22e   :  { %v380_v12 = vld [vmem:[#allocation5 + $0x670] sm:$0xff]  ;;  %6213 = vmatpush2.bf16.msra.mxu0 %v8130_v3  ;;  %7821 = vst [vmem:[#allocation8 + $0x348] sm:$0xff] %v5369_v46  ;;  %v5373_v52 = vadd.f32 %v5372_v5, %v9689_v7  ;;  %v8980_v3 = vld [vmem:[#allocation2 + $0x29c] ss:$40 sps:$4 sm:$0xff]  }
 0x22f   :  { %v8977_v41 = vld [vmem:[#allocation2 + $0x254] ss:$40 sps:$4 sm:$0xff]   ;;  %v8251_v15 = vcombine.high %v376_v13, %v380_v12  ;;  %7820 = vst [vmem:[#allocation8 + $0x340] sm:$0xff] %v5367_v38  ;;  %6366 = vmatpush2.bf16.msra.mxu1 %v8258_v35  ;;  %6214 = vmatprep.subr.bf16.mxu0 %v8123_v21  ;;  %v8250_v22 = vcombine.low %v376_v13, %v380_v12  ;;  %v8979_v44 = vld [vmem:[#allocation2 + $0x250] ss:$40 sps:$4 sm:$0xff]   ;;  %v5374_v35 = vpop.f32.mrf.mxu0 }
 0x230   :  { %6135 = vmatprep.mubr.bf16.mxu1 %v8977_v41  ;;  %v240_v59 = vld [vmem:[#allocation5 + $0x210] sm:$0xff]  ;;  %v9851_v41 = vpop.f32.mrf.mxu1  ;;  %5983 = vmatmul.mubr.bf16.gmra.mxu0 %v8978_v37  ;;  %v8981_v21 = vld [vmem:[#allocation2 + $0x2a4] ss:$40 sps:$4 sm:$0xff]   ;;  %7828 = vst [vmem:[#allocation8 + $0x380] sm:$0xff] %v5373_v52 }
 0x231   :  { %v244_v25 = vld [vmem:[#allocation5 + $0x230] sm:$0xff]  ;;  %6367 = vmatprep.subr.bf16.mxu1 %v8251_v15  ;;  %6136 = vmatmul.mubr.bf16.gmra.mxu1 %v8979_v44  ;;  %v5375_v15 = vadd.f32 %v5374_v35, %v9696_v63  ;;  %v5376_v46 = vpop.f32.mrf.mxu0 }
 0x232   :  { %v368_v10 = vld [vmem:[#allocation5 + $0x610] sm:$0xff]  ;;  %v9854_v28 = vpop.f32.mrf.mxu1  ;;  %v8115_v20 = vcombine.high %v240_v59, %v244_v25  ;;  %5992 = vmatprep.mubr.bf16.mxu0 %v8980_v3  ;;  %6145 = vmatprep.mubr.bf16.mxu1 %v8981_v21  ;;  %v8114_v42 = vcombine.low %v240_v59, %v244_v25 }
 0x233   :  { %v372_v2 = vld [vmem:[#allocation5 + $0x630] sm:$0xff]  ;;  %6215 = vmatpush2.bf16.msra.mxu0 %v8122_v18  ;;  %6368 = vmatpush2.bf16.msra.mxu1 %v8250_v22  ;;  %7829 = vst [vmem:[#allocation8 + $0x388] sm:$0xff] %v5375_v15  ;;  %v5377_v18 = vadd.f32 %v5376_v46, %v9699_v30  ;;  %v5378_v25 = vpop.f32.mrf.mxu0  ;;  %v8983_v30 = vld [vmem:[#allocation2 + $0x2a0] ss:$40 sps:$4 sm:$0xff]  }
 0x234   :  { %v8243_v26 = vcombine.high %v368_v10, %v372_v2  ;;  %v9856_v60 = vld [vmem:[#allocation5 + $0x9d0] sm:$0xff]  ;;  %v9861_v34 = vpop.f32.mrf.mxu1  ;;  %6216 = vmatprep.subr.bf16.mxu0 %v8115_v20  ;;  %v8242_v7 = vcombine.low %v368_v10, %v372_v2  ;;  %v5379_v63 = vadd.f32 %v5378_v25, %v9702_v55  ;;  %v8982_v2 = vld [vmem:[#allocation2 + $0x298] ss:$40 sps:$4 sm:$0xff]   ;;  %v8988_v25 = vld [vmem:[#allocation2 + $0x33c] ss:$40 sps:$4 sm:$0xff]  }
 0x235   :  { %v9858_v43 = vld [vmem:[#allocation5 + $0x9f0] sm:$0xff]  ;;  %7836 = vst [vmem:[#allocation8 + $0x3c0] sm:$0xff] %v5377_v18  ;;  %v5382_v10 = vpop.f32.mrf.mxu0 }
 0x236   :  { %v9863_v13 = vld [vmem:[#allocation5 + $0xdd0] sm:$0xff]  ;;  %v9868_v38 = vpop.f32.mrf.mxu1  ;;  %v8363_v1 = vcombine.high %v9856_v60, %v9858_v43  ;;  %6369 = vmatprep.subr.bf16.mxu1 %v8243_v26  ;;  %7837 = vst [vmem:[#allocation8 + $0x3c8] sm:$0xff] %v5379_v63  ;;  %v5383_v20 = vadd.f32 %v5382_v10, %v9705_v53  ;;  %v8989_v63 = vld [vmem:[#allocation2 + $0x344] ss:$40 sps:$4 sm:$0xff]  }
 0x237   :  { %v9865_v12 = vld [vmem:[#allocation5 + $0xdf0] sm:$0xff]  ;;  %6217 = vmatpush2.bf16.msra.mxu0 %v8114_v42  ;;  %6370 = vmatpush2.bf16.msra.mxu1 %v8242_v7  ;;  %v5384_v52 = vpop.f32.mrf.mxu0 }
 0x238   :  { %v8491_v5 = vcombine.high %v9863_v13, %v9865_v12  ;;  %v9875_v59 = vpop.f32.mrf.mxu1  ;;  %6492 = vmatprep.subr.bf16.mxu0 %v8363_v1  ;;  %5993 = vmatmul.mubr.bf16.gmra.mxu0 %v8982_v2  ;;  %v8984_v26 = vld [vmem:[#allocation2 + $0x2ec] ss:$40 sps:$4 sm:$0xff]   ;;  %7844 = vst [vmem:[#allocation8 + $0x400] sm:$0xff] %v5383_v20  ;;  %v5385_v55 = vadd.f32 %v5384_v52, %v9708_v27  ;;  %v8986_v46 = vld [vmem:[#allocation2 + $0x2e8] ss:$40 sps:$4 sm:$0xff]  }
 0x239   :  { %6146 = vmatmul.mubr.bf16.gmra.mxu1 %v8983_v30  ;;  %6002 = vmatprep.mubr.bf16.mxu0 %v8984_v26  ;;  %v8985_v44 = vld [vmem:[#allocation2 + $0x2f4] ss:$40 sps:$4 sm:$0xff]   ;;  %v5386_v35 = vpop.f32.mrf.mxu0  ;;  %v8987_v18 = vld [vmem:[#allocation2 + $0x2f0] ss:$40 sps:$4 sm:$0xff]  }
 0x23a   :  { %v9878_v22 = vpop.f32.mrf.mxu1  ;;  %6645 = vmatprep.subr.bf16.mxu1 %v8491_v5  ;;  %6155 = vmatprep.mubr.bf16.mxu1 %v8985_v44  ;;  %7845 = vst [vmem:[#allocation8 + $0x408] sm:$0xff] %v5385_v55  ;;  %v5387_v21 = vadd.f32 %v5386_v35, %v9711_v4  ;;  %v11231_v26 = vld [vmem:[#allocation13_spill] sm:$0xff]  ;;  %v8990_v35 = vld [vmem:[#allocation2 + $0x338] ss:$40 sps:$4 sm:$0xff]  }
 0x23b   :  { %v5388_v53 = vpop.f32.mrf.mxu0 }
 0x23c   :  { %v9881_v37 = vpop.f32.mrf.mxu1  ;;  %7852 = vst [vmem:[#allocation8 + $0x440] sm:$0xff] %v5387_v21  ;;  %v5389_v15 = vadd.f32 %v5388_v53, %v9714_v39  ;;  %v11233_v21 = vld [vmem:[#allocation14_spill] sm:$0xff] }
 0x23d   :  { %v5392_v1 = vpop.f32.mrf.mxu0 }
 0x23e   :  { %v9884_v3 = vpop.f32.mrf.mxu1  ;;  %7853 = vst [vmem:[#allocation8 + $0x448] sm:$0xff] %v5389_v15  ;;  %v5393_v27 = vadd.f32 %v5392_v1, %v9717_v9  ;;  %v8991_v15 = vld [vmem:[#allocation2 + $0x340] ss:$40 sps:$4 sm:$0xff]   ;;  %v8992_v1 = vld [vmem:[#allocation2 + $0x38c] ss:$40 sps:$4 sm:$0xff]  }
 0x23f   :  { %v5394_v4 = vpop.f32.mrf.mxu0 }
 0x240   :  { %v9887_v42 = vpop.f32.mrf.mxu1  ;;  %6003 = vmatmul.mubr.bf16.gmra.mxu0 %v8986_v46  ;;  %7860 = vst [vmem:[#allocation8 + $0x480] sm:$0xff] %v5393_v27  ;;  %v5395_v39 = vadd.f32 %v5394_v4, %v9720_v24  ;;  %v8993_v46 = vld [vmem:[#allocation2 + $0x394] ss:$40 sps:$4 sm:$0xff]   ;;  %v11235_v27 = vld [vmem:[#allocation15_spill] sm:$0xff] }
 0x241   :  { %6156 = vmatmul.mubr.bf16.gmra.mxu1 %v8987_v18  ;;  %6012 = vmatprep.mubr.bf16.mxu0 %v8988_v25  ;;  %v5396_v2 = vpop.f32.mrf.mxu0 }
 0x242   :  { %v9890_v7 = vpop.f32.mrf.mxu1  ;;  %6165 = vmatprep.mubr.bf16.mxu1 %v8989_v63  ;;  %7861 = vst [vmem:[#allocation8 + $0x488] sm:$0xff] %v5395_v39  ;;  %v5397_v20 = vadd.f32 %v5396_v2, %v9723_v23  ;;  %v11237_v63 = vld [vmem:[#allocation16_spill] sm:$0xff] }
 0x243   :  { %v5398_v9 = vpop.f32.mrf.mxu0 }
 0x244   :  { %v9893_v5 = vpop.f32.mrf.mxu1  ;;  %7868 = vst [vmem:[#allocation8 + $0x4c0] sm:$0xff] %v5397_v20  ;;  %v5399_v52 = vadd.f32 %v5398_v9, %v11231_v26  ;;  %v11239_v9 = vld [vmem:[#allocation12_spill] sm:$0xff] }
 0x245   :  { %v5402_v55 = vpop.f32.mrf.mxu0  ;;  %v826_v26 = vsub.s32 2, %v11239_v9 }
 0x246   :  { %v9896_v10 = vpop.f32.mrf.mxu1  ;;  %7869 = vst [vmem:[#allocation8 + $0x4c8] sm:$0xff] %v5399_v52  ;;  %v5403_v24 = vadd.f32 %v5402_v55, %v11233_v21  ;;  %v11240_v52 = vld [vmem:[#allocation17_spill] sm:$0xff] }
 0x247   :  { %v5404_v23 = vpop.f32.mrf.mxu0 }
 0x248   :  { %v9899_v30 = vpop.f32.mrf.mxu1  ;;  %6013 = vmatmul.mubr.bf16.gmra.mxu0 %v8990_v35  ;;  %7876 = vst [vmem:[#allocation8 + $0x500] sm:$0xff] %v5403_v24  ;;  %v5405_v18 = vadd.f32 %v5404_v23, %v11235_v27  ;;  %v8994_v24 = vld [vmem:[#allocation2 + $0x388] ss:$40 sps:$4 sm:$0xff]  }
 0x249   :  { %6166 = vmatmul.mubr.bf16.gmra.mxu1 %v8991_v15  ;;  %6022 = vmatprep.mubr.bf16.mxu0 %v8992_v1  ;;  %v5406_v4 = vpop.f32.mrf.mxu0  ;;  %v830_v15 = vsub.s32 3, %v11239_v9  ;;  %v11242_v1 = vld [vmem:[#allocation18_spill] sm:$0xff]  ;;  %v484_v9 = vld [vmem:[#allocation5 + $0x9b0] sm:$0xff] }
 0x24a   :  { %v9902_v44 = vpop.f32.mrf.mxu1  ;;  %6175 = vmatprep.mubr.bf16.mxu1 %v8993_v46  ;;  %7877 = vst [vmem:[#allocation8 + $0x508] sm:$0xff] %v5405_v18  ;;  %v5407_v39 = vadd.f32 %v5406_v4, %v11237_v63  ;;  %v8995_v27 = vld [vmem:[#allocation2 + $0x390] ss:$40 sps:$4 sm:$0xff]   ;;  %v8996_v18 = vld [vmem:[#allocation2 + $0x4] ss:$40 sps:$4 sm:$0xff]  }
 0x24b   :  { %11232 = vst [vmem:[#allocation22_spill] sm:$0xff] %v9902_v44  ;;  %v5408_v20 = vpop.f32.mrf.mxu0  ;;  %v8997_v63 = vld [vmem:[#allocation2 + $0xc] ss:$40 sps:$4 sm:$0xff]  }
 0x24c   :  { %v9905_v53 = vpop.f32.mrf.mxu1  ;;  %7884 = vst [vmem:[#allocation8 + $0x540] sm:$0xff] %v5407_v39  ;;  %v5409_v55 = vadd.f32 %v5408_v20, %v11240_v52  ;;  %v8998_v39 = vld [vmem:[#allocation7] sm:$0xff] }
 0x24d   :  { %11234 = vst [vmem:[#allocation13_spill] sm:$0xff] %v9905_v53  ;;  %v5412_v21 = vpop.f32.mrf.mxu0  ;;  %v9921_v20 = vrot.slane %v8998_v39, %v826_v26  ;;  %v11244_v52 = vld [vmem:[#allocation19_spill] sm:$0xff]  ;;  %v608_v26 = vld [vmem:[#allocation5 + $0xd90] sm:$0xff] }
 0x24e   :  { %v9908_v25 = vpop.f32.mrf.mxu1  ;;  %7885 = vst [vmem:[#allocation8 + $0x548] sm:$0xff] %v5409_v55  ;;  %v5413_v23 = vadd.f32 %v5412_v21, %v11242_v1  ;;  %v480_v55 = vld [vmem:[#allocation5 + $0x990] sm:$0xff]  ;;  %v9926_v1 = vrot.slane %v8998_v39, %v830_v15 }
 0x24f   :  { %11236 = vst [vmem:[#allocation14_spill] sm:$0xff] %v9908_v25  ;;  %v5414_v4 = vpop.f32.mrf.mxu0  ;;  %v5456_v15 = vadd.f32 %v9761_v14, %v9921_v20  ;;  %v9000_v25 = vld [vmem:[#allocation2 + $0x8] ss:$40 sps:$4 sm:$0xff]  }
 0x250   :  { %v9911_v2 = vpop.f32.mrf.mxu1  ;;  %6023 = vmatmul.mubr.bf16.gmra.mxu0 %v8994_v24  ;;  %7892 = vst [vmem:[#allocation8 + $0x580] sm:$0xff] %v5413_v23  ;;  %v5415_v24 = vadd.f32 %v5414_v4, %v11244_v52  ;;  %v8490_v4 = vcombine.low %v9863_v13, %v9865_v12  ;;  %v8355_v52 = vcombine.high %v480_v55, %v484_v9 }
 0x251   :  { %11238 = vst [vmem:[#allocation15_spill] sm:$0xff] %v9911_v2  ;;  %6176 = vmatmul.mubr.bf16.gmra.mxu1 %v8995_v27  ;;  %6218 = vmatprep.mubr.bf16.mxu0 %v8996_v18  ;;  %v5416_v21 = vpop.f32.mrf.mxu0  ;;  %v11246_v27 = vld [vmem:[#allocation20_spill] sm:$0xff]  ;;  %v612_v2 = vld [vmem:[#allocation5 + $0xdb0] sm:$0xff]  ;;  %v5458_v12 = vadd.f32 %v9764_v36, %v9926_v1  ;;  %v5460_v36 = vadd.f32 %v9769_v8, %v9921_v20 }
 0x252   :  { %v9915_v35 = vpop.f32.mrf.mxu1  ;;  %6371 = vmatprep.mubr.bf16.mxu1 %v8997_v63  ;;  %7893 = vst [vmem:[#allocation8 + $0x588] sm:$0xff] %v5415_v24  ;;  %v8362_v63 = vcombine.low %v9856_v60, %v9858_v43  ;;  %v9944_v60 = vld [vmem:[#allocation5 + $0xd50] sm:$0xff]  ;;  %v8483_v13 = vcombine.high %v608_v26, %v612_v2 }
 0x253   :  { %11241 = vst [vmem:[#allocation16_spill] sm:$0xff] %v9915_v35  ;;  %v5418_v23 = vpop.f32.mrf.mxu0  ;;  %v9946_v43 = vld [vmem:[#allocation5 + $0xd70] sm:$0xff] }
 0x254   :  { %v9919_v46 = vpop.f32.mrf.mxu1  ;;  %v5419_v39 = vadd.f32 %v5418_v23, %v9758_v57  ;;  %v8354_v57 = vcombine.low %v480_v55, %v484_v9  ;;  %v9002_v9 = vld [vmem:[#allocation2 + $0x5c] ss:$40 sps:$4 sm:$0xff]  }
 0x255   :  { %11243 = vst [vmem:[#allocation17_spill] sm:$0xff] %v9919_v46  ;;  %v5417_v46 = vadd.f32 %v5416_v21, %v11246_v27  ;;  %v9942_v21 = vld [vmem:[#allocation5 + $0x970] sm:$0xff]  ;;  %v5608_v27 = vpop.f32.mrf.mxu0 }
 0x256   :  { %v9924_v35 = vpop.f32.mrf.mxu1  ;;  %7901 = vst [vmem:[#allocation8 + $0x5c8] sm:$0xff] %v5419_v39  ;;  %v5609_v14 = vadd.f32 %v5608_v27, %v5456_v15 }
 0x257   :  { %11245 = vst [vmem:[#allocation18_spill] sm:$0xff] %v9924_v35  ;;  %v9935_v35 = vld [vmem:[#allocation5 + $0x950] sm:$0xff]  ;;  %7900 = vst [vmem:[#allocation8 + $0x5c0] sm:$0xff] %v5417_v46  ;;  %v5610_v23 = vpop.f32.mrf.mxu0 }
 0x258   :  { %v9929_v18 = vpop.f32.mrf.mxu1  ;;  %v8347_v53 = vcombine.high %v9935_v35, %v9942_v21  ;;  %v5611_v15 = vadd.f32 %v5610_v23, %v5458_v12  ;;  %v8346_v8 = vcombine.low %v9935_v35, %v9942_v21  ;;  %v592_v12 = vld [vmem:[#allocation5 + $0xd10] sm:$0xff]  ;;  %v5466_v23 = vadd.f32 %v9781_v40, %v9921_v20 }
 0x259   :  { %11247 = vst [vmem:[#allocation19_spill] sm:$0xff] %v9929_v18  ;;  %v8999_v18 = vld [vmem:[#allocation2] ss:$40 sps:$4 sm:$0xff]   ;;  %6372 = vmatmul.mubr.bf16.vlgmr.msra.gmra.mxu1 %v9000_v25  ;;  %v9001_v25 = vld [vmem:[#allocation2 + $0x54] ss:$40 sps:$4 sm:$0xff]   ;;  %v5612_v55 = vpop.f32.mrf.mxu0 }
 0x25a   :  { %v9940_v24 = vpop.f32.mrf.mxu1  ;;  %6219 = vmatmul.mubr.bf16.vlgmr.msra.gmra.mxu0 %v8999_v18  ;;  %6646 = vmatpush1.bf16.msra.mxu1 %v8490_v4  ;;  %v8475_v18 = vcombine.high %v9944_v60, %v9946_v43  ;;  %v9972_v35 = vld [vmem:[#allocation5 + $0x8f0] sm:$0xff] }
 0x25b   :  { %11248 = vst [vmem:[#allocation20_spill] sm:$0xff] %v9940_v24  ;;  %6493 = vmatpush1.bf16.msra.mxu0 %v8362_v63  ;;  %v8482_v24 = vcombine.low %v608_v26, %v612_v2  ;;  %6228 = vmatprep.mubr.bf16.mxu0 %v9001_v25  ;;  %v464_v2 = vld [vmem:[#allocation5 + $0x910] sm:$0xff]  ;;  %v5462_v26 = vadd.f32 %v9772_v29, %v9926_v1 }
 0x25c   :  { %v5761_v46 = vpop.f32.mrf.mxu1  ;;  %6494 = vmatprep.subr.bf16.mxu0 %v8355_v52  ;;  %6381 = vmatprep.mubr.bf16.mxu1 %v9002_v9  ;;  %v468_v63 = vld [vmem:[#allocation5 + $0x930] sm:$0xff]  ;;  %v5613_v52 = vadd.f32 %v5612_v55, %v5460_v36  ;;  %v9004_v9 = vld [vmem:[#allocation2 + $0x58] ss:$40 sps:$4 sm:$0xff]  }
 0x25d   :  { %v9956_v39 = vadd.f32 %v5761_v46, %v5609_v14  ;;  %6647 = vmatprep.subr.bf16.mxu1 %v8483_v13  ;;  %v596_v14 = vld [vmem:[#allocation5 + $0xd30] sm:$0xff]  ;;  %v5614_v46 = vpop.f32.mrf.mxu0  ;;  %v8474_v13 = vcombine.low %v9944_v60, %v9946_v43  ;;  %v5468_v60 = vadd.f32 %v9786_v58, %v9926_v1 }
 0x25e   :  { %v5763_v27 = vpop.f32.mrf.mxu1  ;;  %6648 = vmatpush1.bf16.msra.mxu1 %v8482_v24  ;;  %v9003_v25 = vld [vmem:[#allocation2 + $0x50] ss:$40 sps:$4 sm:$0xff]   ;;  %v8467_v24 = vcombine.high %v592_v12, %v596_v14 }
 0x25f   :  { %v9960_v4 = vadd.f32 %v5763_v27, %v5611_v15  ;;  %6495 = vmatpush1.bf16.msra.mxu0 %v8354_v57  ;;  %v5615_v15 = vadd.f32 %v5614_v46, %v5462_v26  ;;  %6649 = vmatprep.subr.bf16.mxu1 %v8475_v18  ;;  %v8339_v57 = vcombine.high %v464_v2, %v468_v63  ;;  %v9970_v27 = vld [vmem:[#allocation5 + $0x8d0] sm:$0xff]  ;;  %v5618_v21 = vpop.f32.mrf.mxu0 }
 0x260   :  { %v5765_v44 = vpop.f32.mrf.mxu1  ;;  %6496 = vmatprep.subr.bf16.mxu0 %v8347_v53  ;;  %v8338_v53 = vcombine.low %v464_v2, %v468_v63  ;;  %v5619_v40 = vadd.f32 %v5618_v21, %v5466_v23  ;;  %v9978_v18 = vld [vmem:[#allocation5 + $0xcd0] sm:$0xff]  ;;  %v8466_v2 = vcombine.low %v592_v12, %v596_v14  ;;  %v8331_v58 = vcombine.high %v9970_v27, %v9972_v35 }
 0x261   :  { %v9968_v29 = vadd.f32 %v5765_v44, %v5613_v52  ;;  %6382 = vmatmul.mubr.bf16.gmra.mxu1 %v9004_v9  ;;  %v9980_v55 = vld [vmem:[#allocation5 + $0xcf0] sm:$0xff]  ;;  %v5620_v26 = vpop.f32.mrf.mxu0  ;;  %v9005_v52 = vld [vmem:[#allocation2 + $0xa4] ss:$40 sps:$4 sm:$0xff]   ;;  %v5470_v63 = vadd.f32 %v9789_v54, %v9921_v20  ;;  %v5472_v12 = vadd.f32 %v9794_v17, %v9926_v1 }
 0x262   :  { %v5767_v36 = vpop.f32.mrf.mxu1  ;;  %6229 = vmatmul.mubr.bf16.gmra.mxu0 %v9003_v25  ;;  %v9006_v46 = vld [vmem:[#allocation2 + $0xac] ss:$40 sps:$4 sm:$0xff]   ;;  %6650 = vmatpush1.bf16.msra.mxu1 %v8474_v13  ;;  %v8459_v21 = vcombine.high %v9978_v18, %v9980_v55  ;;  %v8330_v13 = vcombine.low %v9970_v27, %v9972_v35  ;;  %v5478_v35 = vadd.f32 %v9800_v19, %v9926_v1 }
 0x263   :  { %v9976_v43 = vadd.f32 %v5767_v36, %v5615_v15  ;;  %6497 = vmatpush1.bf16.msra.mxu0 %v8346_v8  ;;  %6238 = vmatprep.mubr.bf16.mxu0 %v9005_v52  ;;  %v5621_v15 = vadd.f32 %v5620_v26, %v5468_v60  ;;  %v5622_v36 = vpop.f32.mrf.mxu0  ;;  %v448_v25 = vld [vmem:[#allocation5 + $0x890] sm:$0xff] }
 0x264   :  { %v5771_v44 = vpop.f32.mrf.mxu1  ;;  %6391 = vmatprep.mubr.bf16.mxu1 %v9006_v46  ;;  %6498 = vmatprep.subr.bf16.mxu0 %v8339_v57  ;;  %v452_v9 = vld [vmem:[#allocation5 + $0x8b0] sm:$0xff]  ;;  %v5623_v52 = vadd.f32 %v5622_v36, %v5470_v63  ;;  %v8458_v57 = vcombine.low %v9978_v18, %v9980_v55 }
 0x265   :  { %v9986_v23 = vadd.f32 %v5771_v44, %v5619_v40  ;;  %6651 = vmatprep.subr.bf16.mxu1 %v8467_v24  ;;  %v576_v40 = vld [vmem:[#allocation5 + $0xc90] sm:$0xff]  ;;  %v5624_v44 = vpop.f32.mrf.mxu0  ;;  %v8323_v63 = vcombine.high %v448_v25, %v452_v9 }
 0x266   :  { %v5773_v8 = vpop.f32.mrf.mxu1  ;;  %v580_v60 = vld [vmem:[#allocation5 + $0xcb0] sm:$0xff]  ;;  %v5625_v17 = vadd.f32 %v5624_v44, %v5472_v12  ;;  %6652 = vmatpush1.bf16.msra.mxu1 %v8466_v2 }
 0x267   :  { %v9992_v14 = vadd.f32 %v5773_v8, %v5621_v15  ;;  %6499 = vmatpush1.bf16.msra.mxu0 %v8338_v53  ;;  %v11250_v24 = vld [vmem:[#allocation21_spill] sm:$0xff]  ;;  %v5628_v36 = vpop.f32.mrf.mxu0  ;;  %6653 = vmatprep.subr.bf16.mxu1 %v8459_v21  ;;  %v8451_v27 = vcombine.high %v576_v40, %v580_v60  ;;  %v8322_v21 = vcombine.low %v448_v25, %v452_v9 }
 0x268   :  { %v5775_v54 = vpop.f32.mrf.mxu1  ;;  %6500 = vmatprep.subr.bf16.mxu0 %v8331_v58  ;;  %v5476_v26 = vadd.f32 %v11250_v24, %v9921_v20  ;;  %v10002_v53 = vld [vmem:[#allocation5 + $0x850] sm:$0xff]  ;;  %v9010_v24 = vld [vmem:[#allocation2 + $0xfc] ss:$40 sps:$4 sm:$0xff]   ;;  %v5482_v9 = vadd.f32 %v9806_v48, %v9926_v1  ;;  %v5486_v48 = vadd.f32 %v9809_v45, %v9921_v20 }
 0x269   :  { %11249 = vst [vmem:[#allocation23_spill] sm:$0xff] %v9992_v14  ;;  %v10000_v46 = vadd.f32 %v5775_v54, %v5623_v52  ;;  %v10004_v8 = vld [vmem:[#allocation5 + $0x870] sm:$0xff]  ;;  %v9007_v14 = vld [vmem:[#allocation2 + $0xa0] ss:$40 sps:$4 sm:$0xff]   ;;  %v5630_v44 = vpop.f32.mrf.mxu0 }
 0x26a   :  { %v5777_v15 = vpop.f32.mrf.mxu1  ;;  %6239 = vmatmul.mubr.bf16.gmra.mxu0 %v9007_v14  ;;  %v5629_v55 = vadd.f32 %v5628_v36, %v5476_v26  ;;  %v9008_v12 = vld [vmem:[#allocation2 + $0xa8] ss:$40 sps:$4 sm:$0xff]   ;;  %v9009_v2 = vld [vmem:[#allocation2 + $0xf4] ss:$40 sps:$4 sm:$0xff]   ;;  %v8450_v14 = vcombine.low %v576_v40, %v580_v60  ;;  %v8315_v19 = vcombine.high %v10002_v53, %v10004_v8  ;;  %v5480_v26 = vadd.f32 %v9803_v51, %v9921_v20 }
 0x26b   :  { %v10008_v18 = vadd.f32 %v5777_v15, %v5625_v17  ;;  %6392 = vmatmul.mubr.bf16.gmra.mxu1 %v9008_v12  ;;  %6248 = vmatprep.mubr.bf16.mxu0 %v9009_v2  ;;  %v10010_v52 = vld [vmem:[#allocation5 + $0xc50] sm:$0xff]  ;;  %v5631_v15 = vadd.f32 %v5630_v44, %v5478_v35  ;;  %v8314_v35 = vcombine.low %v10002_v53, %v10004_v8 }
 0x26c   :  { %v5781_v58 = vpop.f32.mrf.mxu1  ;;  %v10012_v54 = vld [vmem:[#allocation5 + $0xc70] sm:$0xff]  ;;  %6401 = vmatprep.mubr.bf16.mxu1 %v9010_v24  ;;  %6501 = vmatpush1.bf16.msra.mxu0 %v8330_v13  ;;  %v5632_v24 = vpop.f32.mrf.mxu0 }
 0x26d   :  { %v10018_v17 = vadd.f32 %v5781_v58, %v5629_v55  ;;  %6654 = vmatpush1.bf16.msra.mxu1 %v8458_v57  ;;  %6502 = vmatprep.subr.bf16.mxu0 %v8323_v63  ;;  %v10020_v12 = vld [vmem:[#allocation5 + $0x810] sm:$0xff]  ;;  %v8443_v25 = vcombine.high %v10010_v52, %v10012_v54  ;;  %v5633_v51 = vadd.f32 %v5632_v24, %v5480_v26 }
 0x26e   :  { %v5783_v36 = vpop.f32.mrf.mxu1  ;;  %v10022_v2 = vld [vmem:[#allocation5 + $0x830] sm:$0xff]  ;;  %6655 = vmatprep.subr.bf16.mxu1 %v8451_v27  ;;  %v5634_v63 = vpop.f32.mrf.mxu0  ;;  %v8442_v27 = vcombine.low %v10010_v52, %v10012_v54  ;;  %v5488_v54 = vadd.f32 %v9812_v11, %v9926_v1 }
 0x26f   :  { %v10028_v40 = vadd.f32 %v5783_v36, %v5631_v15  ;;  %v10030_v13 = vld [vmem:[#allocation5 + $0xc10] sm:$0xff]  ;;  %v8307_v55 = vcombine.high %v10020_v12, %v10022_v2  ;;  %v5635_v44 = vadd.f32 %v5634_v63, %v5482_v9  ;;  %v9012_v9 = vld [vmem:[#allocation2 + $0xf8] ss:$40 sps:$4 sm:$0xff]  }
 0x270   :  { %v5785_v60 = vpop.f32.mrf.mxu1  ;;  %v564_v57 = vld [vmem:[#allocation5 + $0xc30] sm:$0xff]  ;;  %6503 = vmatpush1.bf16.msra.mxu0 %v8322_v21  ;;  %v5638_v53 = vpop.f32.mrf.mxu0 }
 0x271   :  { %v10040_v58 = vadd.f32 %v5785_v60, %v5633_v51  ;;  %6656 = vmatpush1.bf16.msra.mxu1 %v8450_v14  ;;  %6504 = vmatprep.subr.bf16.mxu0 %v8315_v19  ;;  %v10042_v15 = vld [vmem:[#allocation5 + $0xbd0] sm:$0xff]  ;;  %v8435_v52 = vcombine.high %v10030_v13, %v564_v57  ;;  %v5639_v36 = vadd.f32 %v5638_v53, %v5486_v48  ;;  %v9013_v14 = vld [vmem:[#allocation2 + $0x144] ss:$40 sps:$4 sm:$0xff]  }
 0x272   :  { %v5787_v26 = vpop.f32.mrf.mxu1  ;;  %v10044_v21 = vld [vmem:[#allocation5 + $0xbf0] sm:$0xff]  ;;  %6657 = vmatprep.subr.bf16.mxu1 %v8443_v25  ;;  %v5640_v60 = vpop.f32.mrf.mxu0  ;;  %v8306_v25 = vcombine.low %v10020_v12, %v10022_v2  ;;  %v8434_v11 = vcombine.low %v10030_v13, %v564_v57  ;;  %v5492_v2 = vadd.f32 %v9818_v16, %v9926_v1  ;;  %v5496_v16 = vadd.f32 %v9821_v56, %v9921_v20 }
 0x273   :  { %v9011_v8 = vld [vmem:[#allocation2 + $0xf0] ss:$40 sps:$4 sm:$0xff]   ;;  %v10049_v45 = vadd.f32 %v5787_v26, %v5635_v44  ;;  %6402 = vmatmul.mubr.bf16.gmra.mxu1 %v9012_v9  ;;  %v9014_v63 = vld [vmem:[#allocation2 + $0x14c] ss:$40 sps:$4 sm:$0xff]   ;;  %v8427_v48 = vcombine.high %v10042_v15, %v10044_v21  ;;  %v5490_v44 = vadd.f32 %v9815_v62, %v9921_v20  ;;  %v5641_v53 = vadd.f32 %v5640_v60, %v5488_v54 }
 0x274   :  { %6249 = vmatmul.mubr.bf16.gmra.mxu0 %v9011_v8  ;;  %v5791_v24 = vpop.f32.mrf.mxu1  ;;  %v10051_v19 = vld [vmem:[#allocation5 + $0xfd0] sm:$0xff]  ;;  %6411 = vmatprep.mubr.bf16.mxu1 %v9014_v63 }
 0x275   :  { %6258 = vmatprep.mubr.bf16.mxu0 %v9013_v14  ;;  %v10053_v51 = vld [vmem:[#allocation5 + $0xff0] sm:$0xff]  ;;  %6505 = vmatpush1.bf16.msra.mxu0 %v8314_v35  ;;  %v10062_v26 = vadd.f32 %v5791_v24, %v5639_v36  ;;  %v5642_v14 = vpop.f32.mrf.mxu0  ;;  %v8426_v36 = vcombine.low %v10042_v15, %v10044_v21  ;;  %v9015_v21 = vld [vmem:[#allocation2 + $0x140] ss:$40 sps:$4 sm:$0xff]  }
 0x276   :  { %v5793_v8 = vpop.f32.mrf.mxu1  ;;  %6658 = vmatpush1.bf16.msra.mxu1 %v8442_v27  ;;  %6506 = vmatprep.subr.bf16.mxu0 %v8307_v55  ;;  %v10064_v9 = vld [vmem:[#allocation5 + $0xb90] sm:$0xff]  ;;  %v8555_v12 = vcombine.high %v10051_v19, %v10053_v51  ;;  %v5643_v62 = vadd.f32 %v5642_v14, %v5490_v44 }
 0x277   :  { %v10066_v35 = vld [vmem:[#allocation5 + $0xbb0] sm:$0xff]  ;;  %6659 = vmatprep.subr.bf16.mxu1 %v8435_v52  ;;  %v10072_v13 = vadd.f32 %v5793_v8, %v5641_v53  ;;  %v5644_v55 = vpop.f32.mrf.mxu0  ;;  %v8554_v52 = vcombine.low %v10051_v19, %v10053_v51  ;;  %v5498_v51 = vadd.f32 %v9824_v47, %v9926_v1 }
 0x278   :  { %v5795_v57 = vpop.f32.mrf.mxu1  ;;  %v10074_v54 = vld [vmem:[#allocation5 + $0xf90] sm:$0xff]  ;;  %v8419_v24 = vcombine.high %v10064_v9, %v10066_v35  ;;  %v5645_v63 = vadd.f32 %v5644_v55, %v5492_v2  ;;  %v9018_v55 = vld [vmem:[#allocation2 + $0x19c] ss:$40 sps:$4 sm:$0xff]  }
 0x279   :  { %v676_v27 = vld [vmem:[#allocation5 + $0xfb0] sm:$0xff]  ;;  %6507 = vmatpush1.bf16.msra.mxu0 %v8306_v25  ;;  %v10084_v60 = vadd.f32 %v5795_v57, %v5643_v62  ;;  %v5648_v15 = vpop.f32.mrf.mxu0 }
 0x27a   :  { %v5797_v44 = vpop.f32.mrf.mxu1  ;;  %6660 = vmatpush1.bf16.msra.mxu1 %v8434_v11  ;;  %6508 = vmatprep.subr.bf16.mxu0 %v8427_v48  ;;  %v10086_v53 = vld [vmem:[#allocation5 + $0xb50] sm:$0xff]  ;;  %v8547_v19 = vcombine.high %v10074_v54, %v676_v27  ;;  %v5649_v8 = vadd.f32 %v5648_v15, %v5496_v16  ;;  %v8546_v47 = vcombine.low %v10074_v54, %v676_v27 }
 0x27b   :  { %v10088_v25 = vld [vmem:[#allocation5 + $0xb70] sm:$0xff]  ;;  %6661 = vmatprep.subr.bf16.mxu1 %v8555_v12  ;;  %v10093_v56 = vadd.f32 %v5797_v44, %v5645_v63  ;;  %v5650_v57 = vpop.f32.mrf.mxu0  ;;  %v8418_v12 = vcombine.low %v10064_v9, %v10066_v35  ;;  %v5500_v63 = vadd.f32 %v9827_v31, %v9921_v20  ;;  %v5502_v35 = vadd.f32 %v9830_v32, %v9926_v1 }
 0x27c   :  { %6259 = vmatmul.mubr.bf16.gmra.mxu0 %v9015_v21  ;;  %v5801_v14 = vpop.f32.mrf.mxu1  ;;  %v9016_v2 = vld [vmem:[#allocation2 + $0x148] ss:$40 sps:$4 sm:$0xff]   ;;  %v9017_v11 = vld [vmem:[#allocation2 + $0x194] ss:$40 sps:$4 sm:$0xff]   ;;  %v8411_v16 = vcombine.high %v10086_v53, %v10088_v25  ;;  %v5651_v15 = vadd.f32 %v5650_v57, %v5498_v51  ;;  %v5506_v32 = vadd.f32 %v9833_v49, %v9921_v20 }
 0x27d   :  { %6412 = vmatmul.mubr.bf16.gmra.mxu1 %v9016_v2  ;;  %6268 = vmatprep.mubr.bf16.mxu0 %v9017_v11  ;;  %v10095_v48 = vld [vmem:[#allocation5 + $0xf50] sm:$0xff]  ;;  %v10106_v44 = vadd.f32 %v5801_v14, %v5649_v8  ;;  %v5652_v11 = vpop.f32.mrf.mxu0 }
 0x27e   :  { %v10097_v62 = vld [vmem:[#allocation5 + $0xf70] sm:$0xff]  ;;  %6421 = vmatprep.mubr.bf16.mxu1 %v9018_v55  ;;  %6509 = vmatpush2.bf16.msra.mxu0 %v8426_v36  ;;  %v5803_v21 = vpop.f32.mrf.mxu1  ;;  %v5653_v31 = vadd.f32 %v5652_v11, %v5500_v63 }
 0x27f   :  { %6662 = vmatpush2.bf16.msra.mxu1 %v8554_v52  ;;  %6510 = vmatprep.subr.bf16.mxu0 %v8419_v24  ;;  %v10108_v2 = vld [vmem:[#allocation5 + $0xb10] sm:$0xff]  ;;  %v8539_v9 = vcombine.high %v10095_v48, %v10097_v62  ;;  %v10116_v54 = vadd.f32 %v5803_v21, %v5651_v15  ;;  %v5654_v52 = vpop.f32.mrf.mxu0  ;;  %v8410_v24 = vcombine.low %v10086_v53, %v10088_v25 }
 0x280   :  { %v10110_v36 = vld [vmem:[#allocation5 + $0xb30] sm:$0xff]  ;;  %6663 = vmatprep.subr.bf16.mxu1 %v8547_v19  ;;  %v5805_v27 = vpop.f32.mrf.mxu1  ;;  %v8538_v19 = vcombine.low %v10095_v48, %v10097_v62  ;;  %v5655_v55 = vadd.f32 %v5654_v52, %v5502_v35  ;;  %v5508_v62 = vadd.f32 %v9836_v33, %v9926_v1  ;;  %v9020_v35 = vld [vmem:[#allocation2 + $0x198] ss:$40 sps:$4 sm:$0xff]  }
 0x281   :  { %v656_v51 = vld [vmem:[#allocation5 + $0xf10] sm:$0xff]  ;;  %v8403_v14 = vcombine.high %v10108_v2, %v10110_v36  ;;  %v10126_v57 = vadd.f32 %v5805_v27, %v5653_v31  ;;  %v5658_v53 = vpop.f32.mrf.mxu0 }
 0x282   :  { %v660_v8 = vld [vmem:[#allocation5 + $0xf30] sm:$0xff]  ;;  %6511 = vmatpush2.bf16.msra.mxu0 %v8418_v12  ;;  %v5807_v63 = vpop.f32.mrf.mxu1  ;;  %v5659_v49 = vadd.f32 %v5658_v53, %v5506_v32 }
 0x283   :  { %6664 = vmatpush2.bf16.msra.mxu1 %v8546_v47  ;;  %6512 = vmatprep.subr.bf16.mxu0 %v8411_v16  ;;  %v10128_v15 = vld [vmem:[#allocation5 + $0xad0] sm:$0xff]  ;;  %v8531_v48 = vcombine.high %v656_v51, %v660_v8  ;;  %v10134_v21 = vadd.f32 %v5807_v63, %v5655_v55  ;;  %v9021_v47 = vld [vmem:[#allocation2 + $0x1e4] ss:$40 sps:$4 sm:$0xff]   ;;  %v5660_v27 = vpop.f32.mrf.mxu0  ;;  %v8530_v33 = vcombine.low %v656_v51, %v660_v8 }
 0x284   :  { %v10130_v12 = vld [vmem:[#allocation5 + $0xaf0] sm:$0xff]  ;;  %6665 = vmatprep.subr.bf16.mxu1 %v8539_v9  ;;  %v5811_v11 = vpop.f32.mrf.mxu1  ;;  %v8402_v9 = vcombine.low %v10108_v2, %v10110_v36  ;;  %v5510_v55 = vadd.f32 %v9839_v0, %v9921_v20  ;;  %v5661_v53 = vadd.f32 %v5660_v27, %v5508_v62  ;;  %v5512_v36 = vadd.f32 %v9842_v50, %v9926_v1 }
 0x285   :  { %v9019_v25 = vld [vmem:[#allocation2 + $0x190] ss:$40 sps:$4 sm:$0xff]   ;;  %6422 = vmatmul.mubr.bf16.gmra.mxu1 %v9020_v35  ;;  %v9022_v52 = vld [vmem:[#allocation2 + $0x1ec] ss:$40 sps:$4 sm:$0xff]   ;;  %v8395_v32 = vcombine.high %v10128_v15, %v10130_v12  ;;  %v10146_v63 = vadd.f32 %v5811_v11, %v5659_v49  ;;  %v5662_v35 = vpop.f32.mrf.mxu0 }
 0x286   :  { %6269 = vmatmul.mubr.bf16.gmra.mxu0 %v9019_v25  ;;  %v10136_v16 = vld [vmem:[#allocation5 + $0xed0] sm:$0xff]  ;;  %6431 = vmatprep.mubr.bf16.mxu1 %v9022_v52  ;;  %v5813_v25 = vpop.f32.mrf.mxu1  ;;  %v5663_v8 = vadd.f32 %v5662_v35, %v5510_v55 }
 0x287   :  { %6278 = vmatprep.mubr.bf16.mxu0 %v9021_v47  ;;  %v10138_v31 = vld [vmem:[#allocation5 + $0xef0] sm:$0xff]  ;;  %6513 = vmatpush2.bf16.msra.mxu0 %v8410_v24  ;;  %v10152_v51 = vadd.f32 %v5813_v25, %v5661_v53  ;;  %v9023_v25 = vld [vmem:[#allocation2 + $0x1e0] ss:$40 sps:$4 sm:$0xff]  }
 0x288   :  { %6666 = vmatpush2.bf16.msra.mxu1 %v8538_v19  ;;  %6514 = vmatprep.subr.bf16.mxu0 %v8403_v14  ;;  %v8523_v24 = vcombine.high %v10136_v16, %v10138_v31  ;;  %v512_v47 = vld [vmem:[#allocation5 + $0xa90] sm:$0xff]  ;;  %v5815_v0 = vpop.f32.mrf.mxu1  ;;  %v5516_v19 = vadd.f32 %v9845_v6, %v9921_v20  ;;  %v5664_v14 = vpop.f32.mrf.mxu0  ;;  %v8522_v62 = vcombine.low %v10136_v16, %v10138_v31 }
 0x289   :  { %6667 = vmatprep.subr.bf16.mxu1 %v8531_v48  ;;  %v516_v2 = vld [vmem:[#allocation5 + $0xab0] sm:$0xff]  ;;  %v8394_v48 = vcombine.low %v10128_v15, %v10130_v12  ;;  %v10160_v27 = vadd.f32 %v5815_v0, %v5663_v8  ;;  %v5665_v50 = vadd.f32 %v5664_v14, %v5512_v36  ;;  %v5518_v15 = vadd.f32 %v9848_v61, %v9926_v1  ;;  %v9026_v14 = vld [vmem:[#allocation2 + $0x23c] ss:$40 sps:$4 sm:$0xff]  }
 0x28a   :  { %v640_v49 = vld [vmem:[#allocation5 + $0xe90] sm:$0xff]  ;;  %v5817_v52 = vpop.f32.mrf.mxu1  ;;  %v8387_v55 = vcombine.high %v512_v47, %v516_v2  ;;  %v5668_v53 = vpop.f32.mrf.mxu0  ;;  %v8386_v61 = vcombine.low %v512_v47, %v516_v2  ;;  %v5522_v47 = vadd.f32 %v9854_v28, %v9926_v1 }
 0x28b   :  { %v644_v11 = vld [vmem:[#allocation5 + $0xeb0] sm:$0xff]  ;;  %6515 = vmatpush2.bf16.msra.mxu0 %v8402_v9  ;;  %v10168_v12 = vadd.f32 %v5817_v52, %v5665_v50  ;;  %v5669_v16 = vadd.f32 %v5668_v53, %v5516_v19 }
 0x28c   :  { %6668 = vmatpush2.bf16.msra.mxu1 %v8530_v33  ;;  %6516 = vmatprep.subr.bf16.mxu0 %v8395_v32  ;;  %v8515_v6 = vcombine.high %v640_v49, %v644_v11  ;;  %v10162_v35 = vld [vmem:[#allocation5 + $0xa50] sm:$0xff]  ;;  %v5821_v31 = vpop.f32.mrf.mxu1  ;;  %v5670_v0 = vpop.f32.mrf.mxu0  ;;  %v8514_v50 = vcombine.low %v640_v49, %v644_v11 }
 0x28d   :  { %6669 = vmatprep.subr.bf16.mxu1 %v8523_v24  ;;  %v10164_v9 = vld [vmem:[#allocation5 + $0xa70] sm:$0xff]  ;;  %11251 = vst [vmem:[#allocation21_spill] sm:$0xff] %v10168_v12  ;;  %v5520_v24 = vadd.f32 %v9851_v41, %v9921_v20  ;;  %v10176_v52 = vadd.f32 %v5821_v31, %v5669_v16  ;;  %v5671_v19 = vadd.f32 %v5670_v0, %v5518_v15 }
 0x28e   :  { %6279 = vmatmul.mubr.bf16.gmra.mxu0 %v9023_v25  ;;  %v9024_v36 = vld [vmem:[#allocation2 + $0x1e8] ss:$40 sps:$4 sm:$0xff]   ;;  %v9025_v33 = vld [vmem:[#allocation2 + $0x234] ss:$40 sps:$4 sm:$0xff]   ;;  %v5823_v53 = vpop.f32.mrf.mxu1  ;;  %v8379_v25 = vcombine.high %v10162_v35, %v10164_v9 }
 0x28f   :  { %6432 = vmatmul.mubr.bf16.gmra.mxu1 %v9024_v36  ;;  %6288 = vmatprep.mubr.bf16.mxu0 %v9025_v33  ;;  %v10170_v32 = vld [vmem:[#allocation5 + $0xe50] sm:$0xff]  ;;  %v5672_v36 = vpop.f32.mrf.mxu0  ;;  %v10184_v2 = vadd.f32 %v5823_v53, %v5671_v19 }
 0x290   :  { %v10172_v8 = vld [vmem:[#allocation5 + $0xe70] sm:$0xff]  ;;  %6441 = vmatprep.mubr.bf16.mxu1 %v9026_v14  ;;  %6517 = vmatpush2.bf16.msra.mxu0 %v8394_v48  ;;  %v5673_v49 = vadd.f32 %v5672_v36, %v5520_v24  ;;  %v5825_v11 = vpop.f32.mrf.mxu1  ;;  %v9028_v36 = vld [vmem:[#allocation2 + $0x238] ss:$40 sps:$4 sm:$0xff]  }
 0x291   :  { %6670 = vmatpush2.bf16.msra.mxu1 %v8522_v62  ;;  %6518 = vmatprep.subr.bf16.mxu0 %v8387_v55  ;;  %v8507_v41 = vcombine.high %v10170_v32, %v10172_v8  ;;  %v496_v33 = vld [vmem:[#allocation5 + $0xa10] sm:$0xff]  ;;  %v5526_v55 = vadd.f32 %v9861_v34, %v9921_v20  ;;  %v5674_v15 = vpop.f32.mrf.mxu0  ;;  %v8506_v16 = vcombine.low %v10170_v32, %v10172_v8 }
 0x292   :  { %6671 = vmatprep.subr.bf16.mxu1 %v8515_v6  ;;  %v500_v12 = vld [vmem:[#allocation5 + $0xa30] sm:$0xff]  ;;  %v8378_v6 = vcombine.low %v10162_v35, %v10164_v9  ;;  %v10192_v31 = vadd.f32 %v5825_v11, %v5673_v49  ;;  %v5675_v28 = vadd.f32 %v5674_v15, %v5522_v47  ;;  %v5827_v0 = vpop.f32.mrf.mxu1  ;;  %v5528_v35 = vadd.f32 %v9868_v38, %v9926_v1  ;;  %v10204_v47 = vld [vmem:[#allocation5 + $0x1f8] sm:$0xff] }
 0x293   :  { %v624_v48 = vld [vmem:[#allocation5 + $0xe10] sm:$0xff]  ;;  %v8371_v24 = vcombine.high %v496_v33, %v500_v12  ;;  %v5678_v14 = vpop.f32.mrf.mxu0  ;;  %v8370_v38 = vcombine.low %v496_v33, %v500_v12 }
 0x294   :  { %v628_v62 = vld [vmem:[#allocation5 + $0xe30] sm:$0xff]  ;;  %6519 = vmatpush2.bf16.msra.mxu0 %v8386_v61  ;;  %v10200_v9 = vadd.f32 %v5827_v0, %v5675_v28  ;;  %v5679_v32 = vadd.f32 %v5678_v14, %v5526_v55  ;;  %v5831_v8 = vpop.f32.mrf.mxu1 }
 0x295   :  { %6672 = vmatpush2.bf16.msra.mxu1 %v8514_v50  ;;  %6520 = vmatprep.subr.bf16.mxu0 %v8379_v25  ;;  %v9027_v19 = vld [vmem:[#allocation2 + $0x230] ss:$40 sps:$4 sm:$0xff]   ;;  %v8499_v34 = vcombine.high %v624_v48, %v628_v62  ;;  %v9029_v50 = vld [vmem:[#allocation2 + $0x284] ss:$40 sps:$4 sm:$0xff]   ;;  %v5680_v49 = vpop.f32.mrf.mxu0  ;;  %v8498_v15 = vcombine.low %v624_v48, %v628_v62  ;;  %v5536_v62 = vadd.f32 %v9881_v37, %v9921_v20  ;;  %v9033_v37 = vld [vmem:[#allocation2 + $0x2d4] ss:$40 sps:$4 sm:$0xff]  }
 0x296   :  { %6289 = vmatmul.mubr.bf16.gmra.mxu0 %v9027_v19  ;;  %6673 = vmatprep.subr.bf16.mxu1 %v8507_v41  ;;  %v10194_v53 = vld [vmem:[#allocation5 + $0x11d0] sm:$0xff]  ;;  %v10202_v25 = vld [vmem:[#allocation5 + $0x1d8] sm:$0xff]  ;;  %v5530_v41 = vadd.f32 %v9875_v59, %v9921_v20  ;;  %v10208_v28 = vadd.f32 %v5831_v8, %v5679_v32  ;;  %v5681_v55 = vadd.f32 %v5680_v49, %v5528_v35  ;;  %v5833_v0 = vpop.f32.mrf.mxu1  ;;  %v9031_v32 = vld [vmem:[#allocation2 + $0x280] ss:$40 sps:$4 sm:$0xff]  }
 0x297   :  { %v10196_v61 = vld [vmem:[#allocation5 + $0x11f0] sm:$0xff]  ;;  %6442 = vmatmul.mubr.bf16.gmra.mxu1 %v9028_v36  ;;  %6298 = vmatprep.mubr.bf16.mxu0 %v9029_v50  ;;  %v5682_v19 = vpop.f32.mrf.mxu0  ;;  %v8109_v59 = vcombine.high %v10202_v25, %v10204_v47  ;;  %v5532_v36 = vadd.f32 %v9878_v22, %v9926_v1  ;;  %v5538_v22 = vadd.f32 %v9884_v3, %v9926_v1 }
 0x298   :  { %v9030_v11 = vld [vmem:[#allocation2 + $0x28c] ss:$40 sps:$4 sm:$0xff]   ;;  %6521 = vmatpush2.bf16.msra.mxu0 %v8378_v6  ;;  %v8619_v14 = vcombine.high %v10194_v53, %v10196_v61  ;;  %v10216_v6 = vadd.f32 %v5833_v0, %v5681_v55  ;;  %v5683_v12 = vadd.f32 %v5682_v19, %v5530_v41  ;;  %v5835_v33 = vpop.f32.mrf.mxu1  ;;  %v9032_v49 = vld [vmem:[#allocation2 + $0x288] ss:$40 sps:$4 sm:$0xff]   ;;  %v5542_v3 = vadd.f32 %v9890_v7, %v9926_v1 }
 0x299   :  { %6451 = vmatprep.mubr.bf16.mxu1 %v9030_v11  ;;  %6674 = vmatpush2.bf16.msra.mxu1 %v8506_v16  ;;  %v5684_v48 = vpop.f32.mrf.mxu0 }
 0x29a   :  { %6522 = vmatprep.subr.bf16.mxu0 %v8371_v24  ;;  %6675 = vmatprep.subr.bf16.mxu1 %v8499_v34  ;;  %v10220_v16 = vadd.f32 %v5835_v33, %v5683_v12  ;;  %v5685_v24 = vadd.f32 %v5684_v48, %v5532_v36  ;;  %v5837_v35 = vpop.f32.mrf.mxu1  ;;  %v5546_v48 = vadd.f32 %v9893_v5, %v9921_v20  ;;  %v9038_v5 = vld [vmem:[#allocation2 + $0x32c] ss:$40 sps:$4 sm:$0xff]  }
 0x29b   :  { %v5688_v34 = vpop.f32.mrf.mxu0 }
 0x29c   :  { %6523 = vmatpush2.bf16.msra.mxu0 %v8370_v38  ;;  %v10224_v8 = vadd.f32 %v5837_v35, %v5685_v24  ;;  %v5689_v50 = vadd.f32 %v5688_v34, %v5536_v62  ;;  %v5841_v41 = vpop.f32.mrf.mxu1  ;;  %v9034_v38 = vld [vmem:[#allocation2 + $0x2dc] ss:$40 sps:$4 sm:$0xff]   ;;  %v9035_v34 = vld [vmem:[#allocation2 + $0x2d0] ss:$40 sps:$4 sm:$0xff]  }
 0x29d   :  { %6676 = vmatpush2.bf16.msra.mxu1 %v8498_v15  ;;  %6798 = vmatprep.subr.bf16.mxu0 %v8619_v14  ;;  %v5690_v11 = vpop.f32.mrf.mxu0  ;;  %v5540_v15 = vadd.f32 %v9887_v42, %v9921_v20 }
 0x29e   :  { %6299 = vmatmul.mubr.bf16.gmra.mxu0 %v9031_v32  ;;  %6951 = vmatprep.subr.bf16.mxu1 %v8109_v59  ;;  %v10228_v55 = vadd.f32 %v5841_v41, %v5689_v50  ;;  %v5691_v0 = vadd.f32 %v5690_v11, %v5538_v22  ;;  %v5843_v14 = vpop.f32.mrf.mxu1  ;;  %v5548_v32 = vadd.f32 %v9896_v10, %v9926_v1  ;;  %v9036_v41 = vld [vmem:[#allocation2 + $0x2d8] ss:$40 sps:$4 sm:$0xff]  }
 0x29f   :  { %6452 = vmatmul.mubr.bf16.gmra.mxu1 %v9032_v49  ;;  %6308 = vmatprep.mubr.bf16.mxu0 %v9033_v37  ;;  %v5692_v19 = vpop.f32.mrf.mxu0  ;;  %v9037_v49 = vld [vmem:[#allocation2 + $0x324] ss:$40 sps:$4 sm:$0xff]   ;;  %v5550_v11 = vadd.f32 %v9899_v30, %v9921_v20  ;;  %v11252_v10 = vld [vmem:[#allocation22_spill] sm:$0xff] }
 0x2a0   :  { %6461 = vmatprep.mubr.bf16.mxu1 %v9034_v38  ;;  %v10232_v59 = vadd.f32 %v5843_v14, %v5691_v0  ;;  %v5693_v36 = vadd.f32 %v5692_v19, %v5540_v15  ;;  %v5845_v12 = vpop.f32.mrf.mxu1  ;;  %v5552_v19 = vadd.f32 %v11252_v10, %v9926_v1 }
 0x2a1   :  { %v5694_v33 = vpop.f32.mrf.mxu0 }
 0x2a2   :  { %v10236_v62 = vadd.f32 %v5845_v12, %v5693_v36  ;;  %v5695_v24 = vadd.f32 %v5694_v33, %v5542_v3  ;;  %v5847_v42 = vpop.f32.mrf.mxu1 }
 0x2a3   :  { %v5698_v35 = vpop.f32.mrf.mxu0 }
 0x2a4   :  { %v10240_v22 = vadd.f32 %v5847_v42, %v5695_v24  ;;  %v5699_v7 = vadd.f32 %v5698_v35, %v5546_v48  ;;  %v5851_v50 = vpop.f32.mrf.mxu1  ;;  %v11253_v48 = vld [vmem:[#allocation13_spill] sm:$0xff] }
 0x2a5   :  { %v5700_v37 = vpop.f32.mrf.mxu0  ;;  %v5556_v24 = vadd.f32 %v11253_v48, %v9921_v20  ;;  %v11258_v48 = vld [vmem:[#allocation16_spill] sm:$0xff] }
 0x2a6   :  { %6309 = vmatmul.mubr.bf16.gmra.mxu0 %v9035_v34  ;;  %v10244_v38 = vadd.f32 %v5851_v50, %v5699_v7  ;;  %v5701_v15 = vadd.f32 %v5700_v37, %v5548_v32  ;;  %v5853_v0 = vpop.f32.mrf.mxu1  ;;  %v9039_v7 = vld [vmem:[#allocation2 + $0x320] ss:$40 sps:$4 sm:$0xff]   ;;  %v11254_v32 = vld [vmem:[#allocation14_spill] sm:$0xff] }
 0x2a7   :  { %6462 = vmatmul.mubr.bf16.gmra.mxu1 %v9036_v41  ;;  %6318 = vmatprep.mubr.bf16.mxu0 %v9037_v49  ;;  %v5702_v14 = vpop.f32.mrf.mxu0  ;;  %v5558_v50 = vadd.f32 %v11254_v32, %v9926_v1  ;;  %v11260_v32 = vld [vmem:[#allocation17_spill] sm:$0xff] }
 0x2a8   :  { %6471 = vmatprep.mubr.bf16.mxu1 %v9038_v5  ;;  %v10248_v3 = vadd.f32 %v5853_v0, %v5701_v15  ;;  %v5703_v36 = vadd.f32 %v5702_v14, %v5550_v11  ;;  %v5855_v12 = vpop.f32.mrf.mxu1  ;;  %v9040_v5 = vld [vmem:[#allocation2 + $0x328] ss:$40 sps:$4 sm:$0xff]   ;;  %v9041_v11 = vld [vmem:[#allocation2 + $0x374] ss:$40 sps:$4 sm:$0xff]   ;;  %v11256_v14 = vld [vmem:[#allocation15_spill] sm:$0xff] }
 0x2a9   :  { %v5704_v33 = vpop.f32.mrf.mxu0  ;;  %v9042_v0 = vld [vmem:[#allocation2 + $0x37c] ss:$40 sps:$4 sm:$0xff]   ;;  %v5560_v10 = vadd.f32 %v11256_v14, %v9921_v20 }
 0x2aa   :  { %v10252_v42 = vadd.f32 %v5855_v12, %v5703_v36  ;;  %v5705_v35 = vadd.f32 %v5704_v33, %v5552_v19  ;;  %v5857_v30 = vpop.f32.mrf.mxu1 }
 0x2ab   :  { %v5708_v34 = vpop.f32.mrf.mxu0 }
 0x2ac   :  { %v10256_v41 = vadd.f32 %v5857_v30, %v5705_v35  ;;  %v5709_v49 = vadd.f32 %v5708_v34, %v5556_v24  ;;  %v5861_v37 = vpop.f32.mrf.mxu1  ;;  %v5562_v35 = vadd.f32 %v11258_v48, %v9926_v1 }
 0x2ad   :  { %v5710_v15 = vpop.f32.mrf.mxu0 }
 0x2ae   :  { %6319 = vmatmul.mubr.bf16.gmra.mxu0 %v9039_v7  ;;  %11255 = vst [vmem:[#allocation22_spill] sm:$0xff] %v10256_v41  ;;  %v10260_v19 = vadd.f32 %v5861_v37, %v5709_v49  ;;  %v5711_v36 = vadd.f32 %v5710_v15, %v5558_v50  ;;  %v5863_v12 = vpop.f32.mrf.mxu1  ;;  %v9043_v37 = vld [vmem:[#allocation2 + $0x370] ss:$40 sps:$4 sm:$0xff]   ;;  %v9049_v41 = vld [vmem:[#allocation2 + $0x64] ss:$40 sps:$4 sm:$0xff]  }
 0x2af   :  { %6472 = vmatmul.mubr.bf16.gmra.mxu1 %v9040_v5  ;;  %6328 = vmatprep.mubr.bf16.mxu0 %v9041_v11  ;;  %v5712_v33 = vpop.f32.mrf.mxu0  ;;  %v5566_v5 = vadd.f32 %v11260_v32, %v9921_v20  ;;  %v11262_v50 = vld [vmem:[#allocation18_spill] sm:$0xff] }
 0x2b0   :  { %6481 = vmatprep.mubr.bf16.mxu1 %v9042_v0  ;;  %11257 = vst [vmem:[#allocation13_spill] sm:$0xff] %v10260_v19  ;;  %v10264_v24 = vadd.f32 %v5863_v12, %v5711_v36  ;;  %v5713_v30 = vadd.f32 %v5712_v33, %v5560_v10  ;;  %v5865_v34 = vpop.f32.mrf.mxu1  ;;  %v5568_v15 = vadd.f32 %v11262_v50, %v9926_v1  ;;  %v9044_v10 = vld [vmem:[#allocation2 + $0x378] ss:$40 sps:$4 sm:$0xff]   ;;  %v9045_v33 = vld [vmem:[#allocation2 + $0x14] ss:$40 sps:$4 sm:$0xff]  }
 0x2b1   :  { %v5714_v7 = vpop.f32.mrf.mxu0  ;;  %v9046_v32 = vld [vmem:[#allocation2 + $0x1c] ss:$40 sps:$4 sm:$0xff]   ;;  %v740_v50 = vld [vmem:[#allocation5 + $0x11b0] sm:$0xff] }
 0x2b2   :  { %11259 = vst [vmem:[#allocation14_spill] sm:$0xff] %v10264_v24  ;;  %v10268_v11 = vadd.f32 %v5865_v34, %v5713_v30  ;;  %v5715_v0 = vadd.f32 %v5714_v7, %v5562_v35  ;;  %v5867_v14 = vpop.f32.mrf.mxu1  ;;  %v11264_v35 = vld [vmem:[#allocation19_spill] sm:$0xff]  ;;  %v229_v24 = vld [vmem:[#allocation5 + $0x1b8] sm:$0xff] }
 0x2b3   :  { %v5718_v49 = vpop.f32.mrf.mxu0  ;;  %v5570_v30 = vadd.f32 %v11264_v35, %v9921_v20 }
 0x2b4   :  { %11261 = vst [vmem:[#allocation15_spill] sm:$0xff] %v10268_v11  ;;  %v10272_v19 = vadd.f32 %v5867_v14, %v5715_v0  ;;  %v5719_v36 = vadd.f32 %v5718_v49, %v5566_v5  ;;  %v5871_v12 = vpop.f32.mrf.mxu1  ;;  %v736_v11 = vld [vmem:[#allocation5 + $0x1190] sm:$0xff]  ;;  %v11266_v5 = vld [vmem:[#allocation20_spill] sm:$0xff] }
 0x2b5   :  { %v5720_v48 = vpop.f32.mrf.mxu0  ;;  %v5572_v14 = vadd.f32 %v11266_v5, %v9926_v1  ;;  %v732_v1 = vld [vmem:[#allocation5 + $0x1170] sm:$0xff] }
 0x2b6   :  { %6329 = vmatmul.mubr.bf16.gmra.mxu0 %v9043_v37  ;;  %11263 = vst [vmem:[#allocation16_spill] sm:$0xff] %v10272_v19  ;;  %v10276_v34 = vadd.f32 %v5871_v12, %v5719_v36  ;;  %v5721_v7 = vadd.f32 %v5720_v48, %v5568_v15  ;;  %v5873_v37 = vpop.f32.mrf.mxu1  ;;  %v225_v19 = vld [vmem:[#allocation5 + $0x198] sm:$0xff]  ;;  %v8108_v15 = vcombine.low %v10202_v25, %v10204_v47 }
 0x2b7   :  { %6482 = vmatmul.mubr.bf16.gmra.mxu1 %v9044_v10  ;;  %6524 = vmatprep.mubr.bf16.mxu0 %v9045_v33  ;;  %v5722_v0 = vpop.f32.mrf.mxu0  ;;  %v8611_v36 = vcombine.high %v736_v11, %v740_v50  ;;  %v9048_v47 = vld [vmem:[#allocation2 + $0x18] ss:$40 sps:$4 sm:$0xff]  }
 0x2b8   :  { %6677 = vmatprep.mubr.bf16.mxu1 %v9046_v32  ;;  %11265 = vst [vmem:[#allocation17_spill] sm:$0xff] %v10276_v34  ;;  %v10280_v49 = vadd.f32 %v5873_v37, %v5721_v7  ;;  %v5723_v10 = vadd.f32 %v5722_v0, %v5570_v30  ;;  %v5875_v33 = vpop.f32.mrf.mxu1  ;;  %v8618_v32 = vcombine.low %v10194_v53, %v10196_v61  ;;  %v728_v34 = vld [vmem:[#allocation5 + $0x1150] sm:$0xff]  ;;  %v10288_v0 = vld [vmem:[#allocation5 + $0x158] sm:$0xff] }
 0x2b9   :  { %v5724_v20 = vpop.f32.mrf.mxu0  ;;  %v9047_v37 = vld [vmem:[#allocation2 + $0x10] ss:$40 sps:$4 sm:$0xff]   ;;  %v8101_v30 = vcombine.high %v225_v19, %v229_v24 }
 0x2ba   :  { %11267 = vst [vmem:[#allocation18_spill] sm:$0xff] %v10280_v49  ;;  %v10286_v12 = vadd.f32 %v5875_v33, %v5723_v10  ;;  %v5725_v48 = vadd.f32 %v5724_v20, %v5572_v14  ;;  %v5877_v35 = vpop.f32.mrf.mxu1  ;;  %v10290_v53 = vld [vmem:[#allocation5 + $0x178] sm:$0xff]  ;;  %v8610_v14 = vcombine.low %v736_v11, %v740_v50  ;;  %v8100_v33 = vcombine.low %v225_v19, %v229_v24  ;;  %v724_v11 = vld [vmem:[#allocation5 + $0x1130] sm:$0xff] }
 0x2bb   :  { %v5914_v7 = vpop.f32.mrf.mxu0  ;;  %v8603_v20 = vcombine.high %v728_v34, %v732_v1 }
 0x2bc   :  { %11268 = vst [vmem:[#allocation19_spill] sm:$0xff] %v10286_v12  ;;  %v10292_v61 = vadd.f32 %v5877_v35, %v5725_v48  ;;  %v5915_v5 = vadd.f32 %v5914_v7, %v9956_v39  ;;  %v6067_v25 = vpop.f32.mrf.mxu1  ;;  %v9050_v48 = vld [vmem:[#allocation2 + $0x6c] ss:$40 sps:$4 sm:$0xff]   ;;  %v8093_v39 = vcombine.high %v10288_v0, %v10290_v53 }
 0x2bd   :  { %v5916_v10 = vpop.f32.mrf.mxu0 }
 0x2be   :  { %6525 = vmatmul.mubr.bf16.vlgmr.msra.gmra.mxu0 %v9047_v37  ;;  %v6068_v37 = vadd.f32 %v6067_v25, %v5915_v5  ;;  %v5917_v12 = vadd.f32 %v5916_v10, %v9960_v4  ;;  %v6069_v49 = vpop.f32.mrf.mxu1  ;;  %v209_v4 = vld [vmem:[#allocation5 + $0x118] sm:$0xff] }
 0x2bf   :  { %6678 = vmatmul.mubr.bf16.vlgmr.msra.gmra.mxu1 %v9048_v47  ;;  %6799 = vmatpush1.bf16.msra.mxu0 %v8618_v32  ;;  %v5918_v35 = vpop.f32.mrf.mxu0  ;;  %v720_v32 = vld [vmem:[#allocation5 + $0x1110] sm:$0xff] }
 0x2c0   :  { %6952 = vmatpush1.bf16.msra.mxu1 %v8108_v15  ;;  %6800 = vmatprep.subr.bf16.mxu0 %v8611_v36  ;;  %7718 = vst [vmem:[#allocation8 + $0x10] sm:$0xff] %v6068_v37  ;;  %v6070_v50 = vadd.f32 %v6069_v49, %v5917_v12  ;;  %v5919_v19 = vadd.f32 %v5918_v35, %v9968_v29  ;;  %v6071_v24 = vpop.f32.mrf.mxu1  ;;  %v213_v36 = vld [vmem:[#allocation5 + $0x138] sm:$0xff]  ;;  %v10302_v12 = vld [vmem:[#allocation5 + $0x10d0] sm:$0xff] }
 0x2c1   :  { %6534 = vmatprep.mubr.bf16.mxu0 %v9049_v41  ;;  %6687 = vmatprep.mubr.bf16.mxu1 %v9050_v48  ;;  %v8602_v15 = vcombine.low %v728_v34, %v732_v1  ;;  %v5920_v7 = vpop.f32.mrf.mxu0  ;;  %v8595_v49 = vcombine.high %v720_v32, %v724_v11  ;;  %v10304_v29 = vld [vmem:[#allocation5 + $0x10f0] sm:$0xff]  ;;  %v9051_v1 = vld [vmem:[#allocation2 + $0x60] ss:$40 sps:$4 sm:$0xff]   ;;  %v8085_v47 = vcombine.high %v209_v4, %v213_v36 }
 0x2c2   :  { %6953 = vmatprep.subr.bf16.mxu1 %v8101_v30  ;;  %7719 = vst [vmem:[#allocation8 + $0x18] sm:$0xff] %v6070_v50  ;;  %v6072_v41 = vadd.f32 %v6071_v24, %v5919_v19  ;;  %v5921_v5 = vadd.f32 %v5920_v7, %v9976_v43  ;;  %v6073_v25 = vpop.f32.mrf.mxu1  ;;  %v8092_v30 = vcombine.low %v10288_v0, %v10290_v53  ;;  %v9052_v43 = vld [vmem:[#allocation2 + $0x68] ss:$40 sps:$4 sm:$0xff]   ;;  %v10307_v0 = vld [vmem:[#allocation5 + $0xd8] sm:$0xff] }
 0x2c3   :  { %6801 = vmatpush1.bf16.msra.mxu0 %v8610_v14  ;;  %v5924_v34 = vpop.f32.mrf.mxu0  ;;  %v10309_v53 = vld [vmem:[#allocation5 + $0xf8] sm:$0xff]  ;;  %v8587_v35 = vcombine.high %v10302_v12, %v10304_v29  ;;  %v704_v7 = vld [vmem:[#allocation5 + $0x1090] sm:$0xff] }
 0x2c4   :  { %6954 = vmatpush1.bf16.msra.mxu1 %v8100_v33  ;;  %6802 = vmatprep.subr.bf16.mxu0 %v8603_v20  ;;  %7726 = vst [vmem:[#allocation8 + $0x50] sm:$0xff] %v6072_v41  ;;  %v6074_v14 = vadd.f32 %v6073_v25, %v5921_v5  ;;  %v5925_v10 = vadd.f32 %v5924_v34, %v9986_v23  ;;  %v6077_v33 = vpop.f32.mrf.mxu1  ;;  %v9053_v48 = vld [vmem:[#allocation2 + $0xb4] ss:$40 sps:$4 sm:$0xff]   ;;  %v11269_v23 = vld [vmem:[#allocation23_spill] sm:$0xff] }
 0x2c5   :  { %6955 = vmatprep.subr.bf16.mxu1 %v8093_v39  ;;  %v8594_v20 = vcombine.low %v720_v32, %v724_v11  ;;  %v5926_v37 = vpop.f32.mrf.mxu0  ;;  %v9054_v39 = vld [vmem:[#allocation2 + $0xbc] ss:$40 sps:$4 sm:$0xff]   ;;  %v8084_v32 = vcombine.low %v209_v4, %v213_v36  ;;  %v708_v41 = vld [vmem:[#allocation5 + $0x10b0] sm:$0xff] }
 0x2c6   :  { %6535 = vmatmul.mubr.bf16.gmra.mxu0 %v9051_v1  ;;  %7727 = vst [vmem:[#allocation8 + $0x58] sm:$0xff] %v6074_v14  ;;  %v6078_v50 = vadd.f32 %v6077_v33, %v5925_v10  ;;  %v5927_v19 = vadd.f32 %v5926_v37, %v11269_v23  ;;  %v6079_v24 = vpop.f32.mrf.mxu1  ;;  %v193_v1 = vld [vmem:[#allocation5 + $0x98] sm:$0xff]  ;;  %v8579_v33 = vcombine.high %v704_v7, %v708_v41  ;;  %v10322_v37 = vld [vmem:[#allocation5 + $0x1050] sm:$0xff] }
 0x2c7   :  { %6688 = vmatmul.mubr.bf16.gmra.mxu1 %v9052_v43  ;;  %6803 = vmatpush1.bf16.msra.mxu0 %v8602_v15  ;;  %v5928_v11 = vpop.f32.mrf.mxu0  ;;  %v8077_v15 = vcombine.high %v10307_v0, %v10309_v53  ;;  %v197_v14 = vld [vmem:[#allocation5 + $0xb8] sm:$0xff]  ;;  %v9058_v23 = vld [vmem:[#allocation2 + $0x10c] ss:$40 sps:$4 sm:$0xff]  }
 0x2c8   :  { %6544 = vmatprep.mubr.bf16.mxu0 %v9053_v48  ;;  %6697 = vmatprep.mubr.bf16.mxu1 %v9054_v39  ;;  %7734 = vst [vmem:[#allocation8 + $0x90] sm:$0xff] %v6078_v50  ;;  %v6080_v5 = vadd.f32 %v6079_v24, %v5927_v19  ;;  %v5929_v25 = vadd.f32 %v5928_v11, %v10000_v46  ;;  %v6081_v34 = vpop.f32.mrf.mxu1  ;;  %v9055_v43 = vld [vmem:[#allocation2 + $0xb0] ss:$40 sps:$4 sm:$0xff]  }
 0x2c9   :  { %6956 = vmatpush1.bf16.msra.mxu1 %v8092_v30  ;;  %6804 = vmatprep.subr.bf16.mxu0 %v8595_v49  ;;  %v5930_v10 = vpop.f32.mrf.mxu0  ;;  %v8586_v30 = vcombine.low %v10302_v12, %v10304_v29  ;;  %v10324_v48 = vld [vmem:[#allocation5 + $0x1070] sm:$0xff]  ;;  %v9056_v39 = vld [vmem:[#allocation2 + $0xb8] ss:$40 sps:$4 sm:$0xff]   ;;  %v8578_v19 = vcombine.low %v704_v7, %v708_v41  ;;  %v8068_v24 = vcombine.low %v193_v1, %v197_v14 }
 0x2ca   :  { %6957 = vmatprep.subr.bf16.mxu1 %v8085_v47  ;;  %7735 = vst [vmem:[#allocation8 + $0x98] sm:$0xff] %v6080_v5  ;;  %v6082_v4 = vadd.f32 %v6081_v34, %v5929_v25  ;;  %v5931_v36 = vadd.f32 %v5930_v10, %v10008_v18  ;;  %v6083_v49 = vpop.f32.mrf.mxu1  ;;  %v8076_v47 = vcombine.low %v10307_v0, %v10309_v53  ;;  %v10327_v0 = vld [vmem:[#allocation5 + $0x58] sm:$0xff]  ;;  %v688_v34 = vld [vmem:[#allocation5 + $0x1010] sm:$0xff] }
 0x2cb   :  { %6805 = vmatpush1.bf16.msra.mxu0 %v8594_v20  ;;  %v5934_v46 = vpop.f32.mrf.mxu0  ;;  %v8069_v20 = vcombine.high %v193_v1, %v197_v14  ;;  %v10329_v53 = vld [vmem:[#allocation5 + $0x78] sm:$0xff]  ;;  %v692_v10 = vld [vmem:[#allocation5 + $0x1030] sm:$0xff] }
 0x2cc   :  { %6806 = vmatprep.subr.bf16.mxu0 %v8587_v35  ;;  %7742 = vst [vmem:[#allocation8 + $0xd0] sm:$0xff] %v6082_v4  ;;  %v6084_v12 = vadd.f32 %v6083_v49, %v5931_v36  ;;  %v5935_v29 = vadd.f32 %v5934_v46, %v10018_v17  ;;  %v6087_v18 = vpop.f32.mrf.mxu1  ;;  %v9057_v35 = vld [vmem:[#allocation2 + $0x104] ss:$40 sps:$4 sm:$0xff]   ;;  %v8061_v25 = vcombine.high %v10327_v0, %v10329_v53  ;;  %v177_v14 = vld [vmem:[#allocation5 + $0x18] sm:$0xff] }
 0x2cd   :  { %6958 = vmatpush1.bf16.msra.mxu1 %v8084_v32  ;;  %v5936_v50 = vpop.f32.mrf.mxu0  ;;  %v8570_v4 = vcombine.low %v10322_v37, %v10324_v48  ;;  %v8060_v36 = vcombine.low %v10327_v0, %v10329_v53  ;;  %v8563_v46 = vcombine.high %v688_v34, %v692_v10  ;;  %v10349_v0 = vld [vmem:[#allocation5 + $0x3f8] sm:$0xff] }
 0x2ce   :  { %6545 = vmatmul.mubr.bf16.gmra.mxu0 %v9055_v43  ;;  %6959 = vmatprep.subr.bf16.mxu1 %v8077_v15  ;;  %7743 = vst [vmem:[#allocation8 + $0xd8] sm:$0xff] %v6084_v12  ;;  %v6088_v32 = vadd.f32 %v6087_v18, %v5935_v29  ;;  %v5937_v11 = vadd.f32 %v5936_v50, %v10028_v40  ;;  %v6089_v17 = vpop.f32.mrf.mxu1  ;;  %v181_v40 = vld [vmem:[#allocation5 + $0x38] sm:$0xff]  ;;  %v9059_v43 = vld [vmem:[#allocation2 + $0x100] ss:$40 sps:$4 sm:$0xff]   ;;  %v10342_v12 = vld [vmem:[#allocation5 + $0x13d0] sm:$0xff] }
 0x2cf   :  { %6698 = vmatmul.mubr.bf16.gmra.mxu1 %v9056_v39  ;;  %6554 = vmatprep.mubr.bf16.mxu0 %v9057_v35  ;;  %v8571_v15 = vcombine.high %v10322_v37, %v10324_v48  ;;  %v5938_v5 = vpop.f32.mrf.mxu0  ;;  %v10344_v29 = vld [vmem:[#allocation5 + $0x13f0] sm:$0xff]  ;;  %v10347_v35 = vld [vmem:[#allocation5 + $0x3d8] sm:$0xff] }
 0x2d0   :  { %6707 = vmatprep.mubr.bf16.mxu1 %v9058_v23  ;;  %6807 = vmatpush1.bf16.msra.mxu0 %v8586_v30  ;;  %7750 = vst [vmem:[#allocation8 + $0x110] sm:$0xff] %v6088_v32  ;;  %v6090_v7 = vadd.f32 %v6089_v17, %v5937_v11  ;;  %v5939_v41 = vadd.f32 %v5938_v5, %v10040_v58  ;;  %v6091_v1 = vpop.f32.mrf.mxu1  ;;  %v9060_v39 = vld [vmem:[#allocation2 + $0x108] ss:$40 sps:$4 sm:$0xff]   ;;  %v9062_v50 = vld [vmem:[#allocation2 + $0x15c] ss:$40 sps:$4 sm:$0xff]  }
 0x2d1   :  { %6960 = vmatpush1.bf16.msra.mxu1 %v8076_v47  ;;  %6808 = vmatprep.subr.bf16.mxu0 %v8579_v33  ;;  %v5940_v30 = vpop.f32.mrf.mxu0  ;;  %v8562_v23 = vcombine.low %v688_v34, %v692_v10  ;;  %v8683_v11 = vcombine.high %v10342_v12, %v10344_v29  ;;  %v800_v5 = vld [vmem:[#allocation5 + $0x1390] sm:$0xff] }
 0x2d2   :  { %6961 = vmatprep.subr.bf16.mxu1 %v8069_v20  ;;  %7751 = vst [vmem:[#allocation8 + $0x118] sm:$0xff] %v6090_v7  ;;  %v6092_v49 = vadd.f32 %v6091_v1, %v5939_v41  ;;  %v5941_v47 = vadd.f32 %v5940_v30, %v10049_v45  ;;  %v6093_v33 = vpop.f32.mrf.mxu1  ;;  %v8053_v20 = vcombine.high %v177_v14, %v181_v40  ;;  %v9061_v45 = vld [vmem:[#allocation2 + $0x154] ss:$40 sps:$4 sm:$0xff]  }
 0x2d3   :  { %v5944_v58 = vpop.f32.mrf.mxu0  ;;  %v289_v41 = vld [vmem:[#allocation5 + $0x398] sm:$0xff] }
 0x2d4   :  { %6809 = vmatpush1.bf16.msra.mxu0 %v8578_v19  ;;  %7758 = vst [vmem:[#allocation8 + $0x150] sm:$0xff] %v6092_v49  ;;  %v6094_v37 = vadd.f32 %v6093_v33, %v5941_v47  ;;  %v5945_v48 = vadd.f32 %v5944_v58, %v10062_v26  ;;  %v6097_v18 = vpop.f32.mrf.mxu1  ;;  %v8052_v19 = vcombine.low %v177_v14, %v181_v40  ;;  %v9063_v47 = vld [vmem:[#allocation2 + $0x150] ss:$40 sps:$4 sm:$0xff]  }
 0x2d5   :  { %6962 = vmatpush1.bf16.msra.mxu1 %v8068_v24  ;;  %6810 = vmatprep.subr.bf16.mxu0 %v8571_v15  ;;  %v5946_v53 = vpop.f32.mrf.mxu0  ;;  %v8173_v15 = vcombine.high %v10347_v35, %v10349_v0  ;;  %v8682_v14 = vcombine.low %v10342_v12, %v10344_v29  ;;  %v8172_v40 = vcombine.low %v10347_v35, %v10349_v0  ;;  %v10364_v58 = vld [vmem:[#allocation5 + $0x1370] sm:$0xff]  ;;  %v9064_v29 = vld [vmem:[#allocation2 + $0x158] ss:$40 sps:$4 sm:$0xff]  }
 0x2d6   :  { %6555 = vmatmul.mubr.bf16.gmra.mxu0 %v9059_v43  ;;  %6963 = vmatprep.subr.bf16.mxu1 %v8061_v25  ;;  %7759 = vst [vmem:[#allocation8 + $0x158] sm:$0xff] %v6094_v37  ;;  %v6098_v24 = vadd.f32 %v6097_v18, %v5945_v48  ;;  %v5947_v32 = vadd.f32 %v5946_v53, %v10072_v13  ;;  %v6099_v26 = vpop.f32.mrf.mxu1  ;;  %v804_v25 = vld [vmem:[#allocation5 + $0x13b0] sm:$0xff]  ;;  %v293_v13 = vld [vmem:[#allocation5 + $0x3b8] sm:$0xff] }
 0x2d7   :  { %6708 = vmatmul.mubr.bf16.gmra.mxu1 %v9060_v39  ;;  %6564 = vmatprep.mubr.bf16.mxu0 %v9061_v45  ;;  %v5948_v17 = vpop.f32.mrf.mxu0  ;;  %v8675_v49 = vcombine.high %v800_v5, %v804_v25  ;;  %v8165_v33 = vcombine.high %v289_v41, %v293_v13  ;;  %v10367_v37 = vld [vmem:[#allocation5 + $0x358] sm:$0xff]  ;;  %v9066_v39 = vld [vmem:[#allocation2 + $0x1ac] ss:$40 sps:$4 sm:$0xff]   ;;  %v8674_v45 = vcombine.low %v800_v5, %v804_v25 }
 0x2d8   :  { %6717 = vmatprep.mubr.bf16.mxu1 %v9062_v50  ;;  %6811 = vmatpush1.bf16.msra.mxu0 %v8570_v4  ;;  %7766 = vst [vmem:[#allocation8 + $0x190] sm:$0xff] %v6098_v24  ;;  %v6100_v34 = vadd.f32 %v6099_v26, %v5947_v32  ;;  %v5949_v10 = vadd.f32 %v5948_v17, %v10084_v60  ;;  %v6101_v7 = vpop.f32.mrf.mxu1  ;;  %v10369_v48 = vld [vmem:[#allocation5 + $0x378] sm:$0xff]  ;;  %v784_v24 = vld [vmem:[#allocation5 + $0x1310] sm:$0xff] }
 0x2d9   :  { %6964 = vmatpush1.bf16.msra.mxu1 %v8060_v36  ;;  %6812 = vmatprep.subr.bf16.mxu0 %v8563_v46  ;;  %v5950_v1 = vpop.f32.mrf.mxu0  ;;  %v10362_v46 = vld [vmem:[#allocation5 + $0x1350] sm:$0xff]  ;;  %v8164_v35 = vcombine.low %v289_v41, %v293_v13 }
 0x2da   :  { %6965 = vmatprep.subr.bf16.mxu1 %v8053_v20  ;;  %7767 = vst [vmem:[#allocation8 + $0x198] sm:$0xff] %v6100_v34  ;;  %v6102_v30 = vadd.f32 %v6101_v7, %v5949_v10  ;;  %v5951_v4 = vadd.f32 %v5950_v1, %v10093_v56  ;;  %v6103_v36 = vpop.f32.mrf.mxu1  ;;  %v9065_v56 = vld [vmem:[#allocation2 + $0x1a4] ss:$40 sps:$4 sm:$0xff]   ;;  %v8667_v50 = vcombine.high %v10362_v46, %v10364_v58  ;;  %v788_v32 = vld [vmem:[#allocation5 + $0x1330] sm:$0xff]  ;;  %v9067_v1 = vld [vmem:[#allocation2 + $0x1a0] ss:$40 sps:$4 sm:$0xff]  }
 0x2db   :  { %v5954_v60 = vpop.f32.mrf.mxu0  ;;  %v8666_v25 = vcombine.low %v10362_v46, %v10364_v58  ;;  %v8156_v34 = vcombine.low %v10367_v37, %v10369_v48  ;;  %v8659_v13 = vcombine.high %v784_v24, %v788_v32  ;;  %v9070_v58 = vld [vmem:[#allocation2 + $0x1fc] ss:$40 sps:$4 sm:$0xff]  }
 0x2dc   :  { %6813 = vmatpush1.bf16.msra.mxu0 %v8562_v23  ;;  %7774 = vst [vmem:[#allocation8 + $0x1d0] sm:$0xff] %v6102_v30  ;;  %v6104_v43 = vadd.f32 %v6103_v36, %v5951_v4  ;;  %v5955_v20 = vadd.f32 %v5954_v60, %v10106_v44  ;;  %v6107_v12 = vpop.f32.mrf.mxu1  ;;  %v10384_v30 = vld [vmem:[#allocation5 + $0x12f0] sm:$0xff] }
 0x2dd   :  { %6966 = vmatpush1.bf16.msra.mxu1 %v8052_v19  ;;  %6814 = vmatprep.subr.bf16.mxu0 %v8683_v11  ;;  %v5956_v18 = vpop.f32.mrf.mxu0  ;;  %v8157_v19 = vcombine.high %v10367_v37, %v10369_v48  ;;  %v9068_v60 = vld [vmem:[#allocation2 + $0x1a8] ss:$40 sps:$4 sm:$0xff]  }
 0x2de   :  { %6565 = vmatmul.mubr.bf16.gmra.mxu0 %v9063_v47  ;;  %6967 = vmatprep.subr.bf16.mxu1 %v8173_v15  ;;  %7775 = vst [vmem:[#allocation8 + $0x1d8] sm:$0xff] %v6104_v43  ;;  %v6108_v0 = vadd.f32 %v6107_v12, %v5955_v20  ;;  %v5957_v53 = vadd.f32 %v5956_v18, %v10116_v54  ;;  %v6109_v44 = vpop.f32.mrf.mxu1  ;;  %v273_v15 = vld [vmem:[#allocation5 + $0x318] sm:$0xff]  ;;  %v768_v18 = vld [vmem:[#allocation5 + $0x1290] sm:$0xff] }
 0x2df   :  { %6718 = vmatmul.mubr.bf16.gmra.mxu1 %v9064_v29  ;;  %6574 = vmatprep.mubr.bf16.mxu0 %v9065_v56  ;;  %v5958_v23 = vpop.f32.mrf.mxu0  ;;  %v277_v54 = vld [vmem:[#allocation5 + $0x338] sm:$0xff]  ;;  %v8658_v43 = vcombine.low %v784_v24, %v788_v32  ;;  %v11270_v24 = vld [vmem:[#allocation21_spill] sm:$0xff] }
 0x2e0   :  { %6727 = vmatprep.mubr.bf16.mxu1 %v9066_v39  ;;  %6815 = vmatpush2.bf16.msra.mxu0 %v8682_v14  ;;  %7782 = vst [vmem:[#allocation8 + $0x210] sm:$0xff] %v6108_v0  ;;  %v6110_v26 = vadd.f32 %v6109_v44, %v5957_v53  ;;  %v5959_v11 = vadd.f32 %v5958_v23, %v10126_v57  ;;  %v6111_v17 = vpop.f32.mrf.mxu1  ;;  %v10387_v47 = vld [vmem:[#allocation5 + $0x2d8] sm:$0xff]  ;;  %v772_v39 = vld [vmem:[#allocation5 + $0x12b0] sm:$0xff] }
 0x2e1   :  { %6968 = vmatpush2.bf16.msra.mxu1 %v8172_v40  ;;  %6816 = vmatprep.subr.bf16.mxu0 %v8675_v49  ;;  %v5960_v5 = vpop.f32.mrf.mxu0  ;;  %v8149_v14 = vcombine.high %v273_v15, %v277_v54  ;;  %v10382_v40 = vld [vmem:[#allocation5 + $0x12d0] sm:$0xff]  ;;  %v8148_v20 = vcombine.low %v273_v15, %v277_v54  ;;  %v257_v53 = vld [vmem:[#allocation5 + $0x298] sm:$0xff] }
 0x2e2   :  { %6969 = vmatprep.subr.bf16.mxu1 %v8165_v33  ;;  %7783 = vst [vmem:[#allocation8 + $0x218] sm:$0xff] %v6110_v26  ;;  %v6112_v10 = vadd.f32 %v6111_v17, %v5959_v11  ;;  %v5961_v7 = vadd.f32 %v5960_v5, %v10134_v21  ;;  %v6113_v41 = vpop.f32.mrf.mxu1  ;;  %v9069_v21 = vld [vmem:[#allocation2 + $0x1f4] ss:$40 sps:$4 sm:$0xff]   ;;  %v8651_v56 = vcombine.high %v10382_v40, %v10384_v30  ;;  %v9071_v17 = vld [vmem:[#allocation2 + $0x1f0] ss:$40 sps:$4 sm:$0xff]  }
 0x2e3   :  { %v5964_v57 = vpop.f32.mrf.mxu0  ;;  %v10389_v33 = vld [vmem:[#allocation5 + $0x2f8] sm:$0xff]  ;;  %v8643_v11 = vcombine.high %v768_v18, %v772_v39  ;;  %v10402_v54 = vld [vmem:[#allocation5 + $0x1250] sm:$0xff] }
 0x2e4   :  { %6817 = vmatpush2.bf16.msra.mxu0 %v8674_v45  ;;  %7790 = vst [vmem:[#allocation8 + $0x250] sm:$0xff] %v6112_v10  ;;  %v6114_v4 = vadd.f32 %v6113_v41, %v5961_v7  ;;  %v5965_v36 = vadd.f32 %v5964_v57, %v10146_v63  ;;  %v6117_v49 = vpop.f32.mrf.mxu1  ;;  %v8141_v48 = vcombine.high %v10387_v47, %v10389_v33  ;;  %v10404_v5 = vld [vmem:[#allocation5 + $0x1270] sm:$0xff]  ;;  %v9072_v7 = vld [vmem:[#allocation2 + $0x1f8] ss:$40 sps:$4 sm:$0xff]   ;;  %v9073_v41 = vld [vmem:[#allocation2 + $0x244] ss:$40 sps:$4 sm:$0xff]  }
 0x2e5   :  { %6970 = vmatpush2.bf16.msra.mxu1 %v8164_v35  ;;  %6818 = vmatprep.subr.bf16.mxu0 %v8667_v50  ;;  %v5966_v46 = vpop.f32.mrf.mxu0  ;;  %v8650_v50 = vcombine.low %v10382_v40, %v10384_v30  ;;  %v8140_v23 = vcombine.low %v10387_v47, %v10389_v33  ;;  %v10409_v57 = vld [vmem:[#allocation5 + $0x278] sm:$0xff]  ;;  %v8642_v40 = vcombine.low %v768_v18, %v772_v39  ;;  %v752_v47 = vld [vmem:[#allocation5 + $0x1210] sm:$0xff]  ;;  %v9075_v39 = vld [vmem:[#allocation2 + $0x240] ss:$40 sps:$4 sm:$0xff]  }
 0x2e6   :  { %6575 = vmatmul.mubr.bf16.gmra.mxu0 %v9067_v1  ;;  %6971 = vmatprep.subr.bf16.mxu1 %v8157_v19  ;;  %7791 = vst [vmem:[#allocation8 + $0x258] sm:$0xff] %v6114_v4  ;;  %v6118_v12 = vadd.f32 %v6117_v49, %v5965_v36  ;;  %v5967_v29 = vadd.f32 %v5966_v46, %v10152_v51  ;;  %v6119_v63 = vpop.f32.mrf.mxu1  ;;  %v261_v51 = vld [vmem:[#allocation5 + $0x2b8] sm:$0xff]  ;;  %v756_v33 = vld [vmem:[#allocation5 + $0x1230] sm:$0xff] }
 0x2e7   :  { %6728 = vmatmul.mubr.bf16.gmra.mxu1 %v9068_v60  ;;  %6584 = vmatprep.mubr.bf16.mxu0 %v9069_v21  ;;  %v5968_v37 = vpop.f32.mrf.mxu0  ;;  %v8133_v15 = vcombine.high %v257_v53, %v261_v51  ;;  %v8132_v30 = vcombine.low %v257_v53, %v261_v51  ;;  %v8635_v49 = vcombine.high %v10402_v54, %v10404_v5 }
 0x2e8   :  { %6737 = vmatprep.mubr.bf16.mxu1 %v9070_v58  ;;  %6819 = vmatpush2.bf16.msra.mxu0 %v8666_v25  ;;  %7798 = vst [vmem:[#allocation8 + $0x290] sm:$0xff] %v6118_v12  ;;  %v6120_v45 = vadd.f32 %v6119_v63, %v5967_v29  ;;  %v5969_v35 = vadd.f32 %v5968_v37, %v10160_v27  ;;  %v6121_v0 = vpop.f32.mrf.mxu1 }
 0x2e9   :  { %6972 = vmatpush2.bf16.msra.mxu1 %v8156_v34  ;;  %6820 = vmatprep.subr.bf16.mxu0 %v8659_v13  ;;  %v5970_v44 = vpop.f32.mrf.mxu0  ;;  %v10407_v13 = vld [vmem:[#allocation5 + $0x258] sm:$0xff]  ;;  %v8634_v29 = vcombine.low %v10402_v54, %v10404_v5  ;;  %v8627_v18 = vcombine.high %v752_v47, %v756_v33 }
 0x2ea   :  { %6973 = vmatprep.subr.bf16.mxu1 %v8149_v14  ;;  %7799 = vst [vmem:[#allocation8 + $0x298] sm:$0xff] %v6120_v45  ;;  %v6122_v19 = vadd.f32 %v6121_v0, %v5969_v35  ;;  %v5971_v32 = vadd.f32 %v5970_v44, %v11270_v24  ;;  %v6123_v26 = vpop.f32.mrf.mxu1  ;;  %v9074_v14 = vld [vmem:[#allocation2 + $0x24c] ss:$40 sps:$4 sm:$0xff]   ;;  %v8125_v21 = vcombine.high %v10407_v13, %v10409_v57  ;;  %v10422_v35 = vld [vmem:[#allocation5 + $0x5d8] sm:$0xff] }
 0x2eb   :  { %v5974_v27 = vpop.f32.mrf.mxu0  ;;  %v8124_v63 = vcombine.low %v10407_v13, %v10409_v57  ;;  %v10424_v0 = vld [vmem:[#allocation5 + $0x5f8] sm:$0xff] }
 0x2ec   :  { %6821 = vmatpush2.bf16.msra.mxu0 %v8658_v43  ;;  %7806 = vst [vmem:[#allocation8 + $0x2d0] sm:$0xff] %v6122_v19  ;;  %v6124_v25 = vadd.f32 %v6123_v26, %v5971_v32  ;;  %v5975_v34 = vadd.f32 %v5974_v27, %v10176_v52  ;;  %v6127_v10 = vpop.f32.mrf.mxu1  ;;  %v10429_v19 = vld [vmem:[#allocation5 + $0x9f8] sm:$0xff]  ;;  %v8626_v26 = vcombine.low %v752_v47, %v756_v33 }
 0x2ed   :  { %6974 = vmatpush2.bf16.msra.mxu1 %v8148_v20  ;;  %6822 = vmatprep.subr.bf16.mxu0 %v8651_v56  ;;  %v5976_v1 = vpop.f32.mrf.mxu0  ;;  %v241_v20 = vld [vmem:[#allocation5 + $0x218] sm:$0xff] }
 0x2ee   :  { %6585 = vmatmul.mubr.bf16.gmra.mxu0 %v9071_v17  ;;  %6975 = vmatprep.subr.bf16.mxu1 %v8141_v48  ;;  %7807 = vst [vmem:[#allocation8 + $0x2d8] sm:$0xff] %v6124_v25  ;;  %v6128_v4 = vadd.f32 %v6127_v10, %v5975_v34  ;;  %v5977_v36 = vadd.f32 %v5976_v1, %v10184_v2  ;;  %v6129_v52 = vpop.f32.mrf.mxu1  ;;  %v245_v2 = vld [vmem:[#allocation5 + $0x238] sm:$0xff] }
 0x2ef   :  { %6738 = vmatmul.mubr.bf16.gmra.mxu1 %v9072_v7  ;;  %6594 = vmatprep.mubr.bf16.mxu0 %v9073_v41  ;;  %v5978_v60 = vpop.f32.mrf.mxu0  ;;  %v8117_v45 = vcombine.high %v241_v20, %v245_v2  ;;  %v9078_v32 = vld [vmem:[#allocation2 + $0x29c] ss:$40 sps:$4 sm:$0xff]   ;;  %v9079_v1 = vld [vmem:[#allocation2 + $0x290] ss:$40 sps:$4 sm:$0xff]  }
 0x2f0   :  { %6747 = vmatprep.mubr.bf16.mxu1 %v9074_v14  ;;  %6823 = vmatpush2.bf16.msra.mxu0 %v8650_v50  ;;  %7814 = vst [vmem:[#allocation8 + $0x310] sm:$0xff] %v6128_v4  ;;  %v6130_v46 = vadd.f32 %v6129_v52, %v5977_v36  ;;  %v5979_v58 = vadd.f32 %v5978_v60, %v10192_v31  ;;  %v6131_v43 = vpop.f32.mrf.mxu1  ;;  %v9076_v50 = vld [vmem:[#allocation2 + $0x248] ss:$40 sps:$4 sm:$0xff]   ;;  %v9081_v4 = vld [vmem:[#allocation2 + $0x2e4] ss:$40 sps:$4 sm:$0xff]  }
 0x2f1   :  { %6976 = vmatpush2.bf16.msra.mxu1 %v8140_v23  ;;  %6824 = vmatprep.subr.bf16.mxu0 %v8643_v11  ;;  %v5980_v12 = vpop.f32.mrf.mxu0  ;;  %v10427_v23 = vld [vmem:[#allocation5 + $0x9d8] sm:$0xff]  ;;  %v8116_v11 = vcombine.low %v241_v20, %v245_v2  ;;  %v9082_v52 = vld [vmem:[#allocation2 + $0x2ec] ss:$40 sps:$4 sm:$0xff]  }
 0x2f2   :  { %6977 = vmatprep.subr.bf16.mxu1 %v8133_v15  ;;  %7815 = vst [vmem:[#allocation8 + $0x318] sm:$0xff] %v6130_v46  ;;  %v6132_v56 = vadd.f32 %v6131_v43, %v5979_v58  ;;  %v5981_v37 = vadd.f32 %v5980_v12, %v10200_v9  ;;  %v6133_v48 = vpop.f32.mrf.mxu1  ;;  %v9077_v9 = vld [vmem:[#allocation2 + $0x294] ss:$40 sps:$4 sm:$0xff]   ;;  %v8237_v15 = vcombine.high %v10422_v35, %v10424_v0  ;;  %v9083_v12 = vld [vmem:[#allocation2 + $0x2e0] ss:$40 sps:$4 sm:$0xff]  }
 0x2f3   :  { %v5984_v31 = vpop.f32.mrf.mxu0  ;;  %v8365_v5 = vcombine.high %v10427_v23, %v10429_v19 }
 0x2f4   :  { %6825 = vmatpush2.bf16.msra.mxu0 %v8642_v40  ;;  %7822 = vst [vmem:[#allocation8 + $0x350] sm:$0xff] %v6132_v56  ;;  %v6134_v53 = vadd.f32 %v6133_v48, %v5981_v37  ;;  %v5985_v51 = vadd.f32 %v5984_v31, %v10208_v28  ;;  %v6137_v44 = vpop.f32.mrf.mxu1  ;;  %v9084_v56 = vld [vmem:[#allocation2 + $0x2e8] ss:$40 sps:$4 sm:$0xff]   ;;  %v9085_v37 = vld [vmem:[#allocation2 + $0x334] ss:$40 sps:$4 sm:$0xff]  }
 0x2f5   :  { %6978 = vmatpush2.bf16.msra.mxu1 %v8132_v30  ;;  %6826 = vmatprep.subr.bf16.mxu0 %v8635_v49  ;;  %v5986_v24 = vpop.f32.mrf.mxu0  ;;  %v9086_v48 = vld [vmem:[#allocation2 + $0x33c] ss:$40 sps:$4 sm:$0xff]  }
 0x2f6   :  { %6595 = vmatmul.mubr.bf16.gmra.mxu0 %v9075_v39  ;;  %6979 = vmatprep.subr.bf16.mxu1 %v8125_v21  ;;  %7823 = vst [vmem:[#allocation8 + $0x358] sm:$0xff] %v6134_v53  ;;  %v6138_v27 = vadd.f32 %v6137_v44, %v5985_v51  ;;  %v5987_v17 = vadd.f32 %v5986_v24, %v10216_v6  ;;  %v6139_v28 = vpop.f32.mrf.mxu1 }
 0x2f7   :  { %6748 = vmatmul.mubr.bf16.gmra.mxu1 %v9076_v50  ;;  %6604 = vmatprep.mubr.bf16.mxu0 %v9077_v9  ;;  %v5988_v54 = vpop.f32.mrf.mxu0  ;;  %v11271_v50 = vld [vmem:[#allocation22_spill] sm:$0xff] }
 0x2f8   :  { %6757 = vmatprep.mubr.bf16.mxu1 %v9078_v32  ;;  %6827 = vmatpush2.bf16.msra.mxu0 %v8634_v29  ;;  %7830 = vst [vmem:[#allocation8 + $0x390] sm:$0xff] %v6138_v27  ;;  %v6140_v25 = vadd.f32 %v6139_v28, %v5987_v17  ;;  %v5989_v34 = vadd.f32 %v5988_v54, %v10220_v16  ;;  %v6141_v10 = vpop.f32.mrf.mxu1  ;;  %v9080_v16 = vld [vmem:[#allocation2 + $0x298] ss:$40 sps:$4 sm:$0xff]   ;;  %v11272_v27 = vld [vmem:[#allocation13_spill] sm:$0xff] }
 0x2f9   :  { %6980 = vmatpush2.bf16.msra.mxu1 %v8124_v63  ;;  %6828 = vmatprep.subr.bf16.mxu0 %v8627_v18  ;;  %v5990_v7 = vpop.f32.mrf.mxu0  ;;  %v9088_v28 = vld [vmem:[#allocation2 + $0x338] ss:$40 sps:$4 sm:$0xff]   ;;  %v9090_v54 = vld [vmem:[#allocation2 + $0x38c] ss:$40 sps:$4 sm:$0xff]  }
 0x2fa   :  { %6981 = vmatprep.subr.bf16.mxu1 %v8117_v45  ;;  %7831 = vst [vmem:[#allocation8 + $0x398] sm:$0xff] %v6140_v25  ;;  %v6142_v6 = vadd.f32 %v6141_v10, %v5989_v34  ;;  %v5991_v41 = vadd.f32 %v5990_v7, %v10224_v8  ;;  %v6143_v13 = vpop.f32.mrf.mxu1  ;;  %v11273_v25 = vld [vmem:[#allocation14_spill] sm:$0xff] }
 0x2fb   :  { %v5994_v57 = vpop.f32.mrf.mxu0 }
 0x2fc   :  { %6829 = vmatpush2.bf16.msra.mxu0 %v8626_v26  ;;  %7838 = vst [vmem:[#allocation8 + $0x3d0] sm:$0xff] %v6142_v6  ;;  %v6144_v14 = vadd.f32 %v6143_v13, %v5991_v41  ;;  %v5995_v40 = vadd.f32 %v5994_v57, %v10228_v55  ;;  %v6147_v30 = vpop.f32.mrf.mxu1  ;;  %v9087_v26 = vld [vmem:[#allocation2 + $0x330] ss:$40 sps:$4 sm:$0xff]   ;;  %v11274_v41 = vld [vmem:[#allocation15_spill] sm:$0xff] }
 0x2fd   :  { %6982 = vmatpush2.bf16.msra.mxu1 %v8116_v11  ;;  %7104 = vmatprep.subr.bf16.mxu0 %v8237_v15  ;;  %v5996_v36 = vpop.f32.mrf.mxu0  ;;  %v9089_v15 = vld [vmem:[#allocation2 + $0x384] ss:$40 sps:$4 sm:$0xff]  }
 0x2fe   :  { %6605 = vmatmul.mubr.bf16.gmra.mxu0 %v9079_v1  ;;  %7257 = vmatprep.subr.bf16.mxu1 %v8365_v5  ;;  %7839 = vst [vmem:[#allocation8 + $0x3d8] sm:$0xff] %v6144_v14  ;;  %v6148_v8 = vadd.f32 %v6147_v30, %v5995_v40  ;;  %v5997_v49 = vadd.f32 %v5996_v36, %v10232_v59  ;;  %v6149_v60 = vpop.f32.mrf.mxu1  ;;  %v11275_v40 = vld [vmem:[#allocation16_spill] sm:$0xff] }
 0x2ff   :  { %6758 = vmatmul.mubr.bf16.gmra.mxu1 %v9080_v16  ;;  %6614 = vmatprep.mubr.bf16.mxu0 %v9081_v4  ;;  %v5998_v21 = vpop.f32.mrf.mxu0  ;;  %v9091_v36 = vld [vmem:[#allocation2 + $0x380] ss:$40 sps:$4 sm:$0xff]  }
 0x300   :  { %6767 = vmatprep.mubr.bf16.mxu1 %v9082_v52  ;;  %7846 = vst [vmem:[#allocation8 + $0x410] sm:$0xff] %v6148_v8  ;;  %v6150_v47 = vadd.f32 %v6149_v60, %v5997_v49  ;;  %v5999_v33 = vadd.f32 %v5998_v21, %v10236_v62  ;;  %v6151_v46 = vpop.f32.mrf.mxu1  ;;  %v11276_v8 = vld [vmem:[#allocation17_spill] sm:$0xff] }
 0x301   :  { %v6000_v55 = vpop.f32.mrf.mxu0  ;;  %v9092_v21 = vld [vmem:[#allocation2 + $0x388] ss:$40 sps:$4 sm:$0xff]  }
 0x302   :  { %7847 = vst [vmem:[#allocation8 + $0x418] sm:$0xff] %v6150_v47  ;;  %v6152_v58 = vadd.f32 %v6151_v46, %v5999_v33  ;;  %v6001_v43 = vadd.f32 %v6000_v55, %v10240_v22  ;;  %v6153_v20 = vpop.f32.mrf.mxu1  ;;  %v9093_v47 = vld [vmem:[#allocation2 + $0x24] ss:$40 sps:$4 sm:$0xff]  }
 0x303   :  { %v6004_v2 = vpop.f32.mrf.mxu0  ;;  %v11277_v33 = vld [vmem:[#allocation12_spill] sm:$0xff] }
 0x304   :  { %7854 = vst [vmem:[#allocation8 + $0x450] sm:$0xff] %v6152_v58  ;;  %v6154_v29 = vadd.f32 %v6153_v20, %v6001_v43  ;;  %v6005_v59 = vadd.f32 %v6004_v2, %v10244_v38  ;;  %v6157_v63 = vpop.f32.mrf.mxu1  ;;  %v834_v46 = vsub.s32 4, %v11277_v33  ;;  %v9094_v58 = vld [vmem:[#allocation2 + $0x4] ss:$40 sps:$4 sm:$0xff]   ;;  %v11278_v20 = vld [vmem:[#allocation18_spill] sm:$0xff] }
 0x305   :  { %v6006_v62 = vpop.f32.mrf.mxu0 }
 0x306   :  { %6615 = vmatmul.mubr.bf16.gmra.mxu0 %v9083_v12  ;;  %7855 = vst [vmem:[#allocation8 + $0x458] sm:$0xff] %v6154_v29  ;;  %v6158_v18 = vadd.f32 %v6157_v63, %v6005_v59  ;;  %v6007_v22 = vadd.f32 %v6006_v62, %v10248_v3  ;;  %v6159_v31 = vpop.f32.mrf.mxu1  ;;  %v838_v29 = vsub.s32 5, %v11277_v33  ;;  %v353_v59 = vld [vmem:[#allocation5 + $0x598] sm:$0xff]  ;;  %v11279_v62 = vld [vmem:[#allocation19_spill] sm:$0xff] }
 0x307   :  { %6768 = vmatmul.mubr.bf16.gmra.mxu1 %v9084_v56  ;;  %6624 = vmatprep.mubr.bf16.mxu0 %v9085_v37  ;;  %v6008_v39 = vpop.f32.mrf.mxu0  ;;  %v357_v63 = vld [vmem:[#allocation5 + $0x5b8] sm:$0xff] }
 0x308   :  { %6777 = vmatprep.mubr.bf16.mxu1 %v9086_v48  ;;  %7862 = vst [vmem:[#allocation8 + $0x490] sm:$0xff] %v6158_v18  ;;  %v6160_v45 = vadd.f32 %v6159_v31, %v6007_v22  ;;  %v6009_v53 = vadd.f32 %v6008_v39, %v10252_v42  ;;  %v6161_v51 = vpop.f32.mrf.mxu1  ;;  %v9095_v22 = vld [vmem:[#allocation7] sm:$0xff]  ;;  %v8236_v39 = vcombine.low %v10422_v35, %v10424_v0  ;;  %v10464_v0 = vld [vmem:[#allocation5 + $0x958] sm:$0xff] }
 0x309   :  { %v6010_v38 = vpop.f32.mrf.mxu0  ;;  %v10455_v31 = vrot.slane %v9095_v22, %v834_v46  ;;  %v10482_v46 = vld [vmem:[#allocation5 + $0x4d8] sm:$0xff] }
 0x30a   :  { %7863 = vst [vmem:[#allocation8 + $0x498] sm:$0xff] %v6160_v45  ;;  %v6162_v44 = vadd.f32 %v6161_v51, %v6009_v53  ;;  %v6011_v9 = vadd.f32 %v6010_v38, %v11271_v50  ;;  %v6163_v24 = vpop.f32.mrf.mxu1  ;;  %v481_v45 = vld [vmem:[#allocation5 + $0x998] sm:$0xff]  ;;  %v8364_v38 = vcombine.low %v10427_v23, %v10429_v19 }
 0x30b   :  { %v6014_v32 = vpop.f32.mrf.mxu0  ;;  %v485_v53 = vld [vmem:[#allocation5 + $0x9b8] sm:$0xff] }
 0x30c   :  { %7870 = vst [vmem:[#allocation8 + $0x4d0] sm:$0xff] %v6162_v44  ;;  %v6164_v11 = vadd.f32 %v6163_v24, %v6011_v9  ;;  %v6015_v3 = vadd.f32 %v6014_v32, %v11272_v27  ;;  %v6167_v17 = vpop.f32.mrf.mxu1  ;;  %v8229_v44 = vcombine.high %v353_v59, %v357_v63  ;;  %v10462_v32 = vrot.slane %v9095_v22, %v838_v29  ;;  %v609_v33 = vld [vmem:[#allocation5 + $0xd98] sm:$0xff] }
 0x30d   :  { %v6016_v42 = vpop.f32.mrf.mxu0  ;;  %v8357_v35 = vcombine.high %v481_v45, %v485_v53 }
 0x30e   :  { %6625 = vmatmul.mubr.bf16.gmra.mxu0 %v9087_v26  ;;  %7871 = vst [vmem:[#allocation8 + $0x4d8] sm:$0xff] %v6164_v11  ;;  %v6168_v5 = vadd.f32 %v6167_v17, %v6015_v3  ;;  %v6017_v34 = vadd.f32 %v6016_v42, %v11273_v25  ;;  %v6169_v10 = vpop.f32.mrf.mxu1  ;;  %v345_v26 = vld [vmem:[#allocation5 + $0x558] sm:$0xff]  ;;  %v9096_v3 = vld [vmem:[#allocation2 + $0x20] ss:$40 sps:$4 sm:$0xff]  }
 0x30f   :  { %6778 = vmatmul.mubr.bf16.gmra.mxu1 %v9088_v28  ;;  %6634 = vmatprep.mubr.bf16.mxu0 %v9089_v15  ;;  %v6018_v7 = vpop.f32.mrf.mxu0  ;;  %v349_v11 = vld [vmem:[#allocation5 + $0x578] sm:$0xff]  ;;  %v9097_v15 = vld [vmem:[#allocation2] ss:$40 sps:$4 sm:$0xff]  }
 0x310   :  { %6787 = vmatprep.mubr.bf16.mxu1 %v9090_v54  ;;  %7878 = vst [vmem:[#allocation8 + $0x510] sm:$0xff] %v6168_v5  ;;  %v6170_v6 = vadd.f32 %v6169_v10, %v6017_v34  ;;  %v6019_v13 = vadd.f32 %v6018_v7, %v11274_v41  ;;  %v6171_v57 = vpop.f32.mrf.mxu1  ;;  %v10466_v17 = vld [vmem:[#allocation5 + $0x978] sm:$0xff]  ;;  %v8356_v54 = vcombine.low %v481_v45, %v485_v53 }
 0x311   :  { %v6020_v1 = vpop.f32.mrf.mxu0  ;;  %v8221_v5 = vcombine.high %v345_v26, %v349_v11  ;;  %v9098_v7 = vld [vmem:[#allocation2 + $0x74] ss:$40 sps:$4 sm:$0xff]   ;;  %v8349_v41 = vcombine.high %v10464_v0, %v10466_v17 }
 0x312   :  { %7879 = vst [vmem:[#allocation8 + $0x518] sm:$0xff] %v6170_v6  ;;  %v6172_v14 = vadd.f32 %v6171_v57, %v6019_v13  ;;  %v6021_v30 = vadd.f32 %v6020_v1, %v11275_v40  ;;  %v6173_v16 = vpop.f32.mrf.mxu1  ;;  %v9099_v6 = vld [vmem:[#allocation2 + $0x54] ss:$40 sps:$4 sm:$0xff]  }
 0x313   :  { %v6024_v4 = vpop.f32.mrf.mxu0  ;;  %v337_v57 = vld [vmem:[#allocation5 + $0x518] sm:$0xff] }
 0x314   :  { %7886 = vst [vmem:[#allocation8 + $0x550] sm:$0xff] %v6172_v14  ;;  %v6174_v52 = vadd.f32 %v6173_v16, %v6021_v30  ;;  %v6025_v49 = vadd.f32 %v6024_v4, %v11276_v8  ;;  %v6177_v60 = vpop.f32.mrf.mxu1  ;;  %v341_v1 = vld [vmem:[#allocation5 + $0x538] sm:$0xff]  ;;  %v8220_v16 = vcombine.low %v345_v26, %v349_v11 }
 0x315   :  { %v6026_v55 = vpop.f32.mrf.mxu0  ;;  %v465_v4 = vld [vmem:[#allocation5 + $0x918] sm:$0xff] }
 0x316   :  { %6635 = vmatmul.mubr.bf16.gmra.mxu0 %v9091_v36  ;;  %7887 = vst [vmem:[#allocation8 + $0x558] sm:$0xff] %v6174_v52  ;;  %v6178_v43 = vadd.f32 %v6177_v60, %v6025_v49  ;;  %v6027_v2 = vadd.f32 %v6026_v55, %v11278_v20  ;;  %v6179_v12 = vpop.f32.mrf.mxu1  ;;  %v469_v36 = vld [vmem:[#allocation5 + $0x938] sm:$0xff] }
 0x317   :  { %6788 = vmatmul.mubr.bf16.gmra.mxu1 %v9092_v21  ;;  %6830 = vmatprep.mubr.bf16.mxu0 %v9093_v47  ;;  %v6028_v56 = vpop.f32.mrf.mxu0  ;;  %v8348_v21 = vcombine.low %v10464_v0, %v10466_v17  ;;  %v8213_v47 = vcombine.high %v337_v57, %v341_v1  ;;  %v10484_v55 = vld [vmem:[#allocation5 + $0x4f8] sm:$0xff]  ;;  %v8341_v20 = vcombine.high %v465_v4, %v469_v36 }
 0x318   :  { %6983 = vmatprep.mubr.bf16.mxu1 %v9094_v58  ;;  %7894 = vst [vmem:[#allocation8 + $0x590] sm:$0xff] %v6178_v43  ;;  %v6180_v37 = vadd.f32 %v6179_v12, %v6027_v2  ;;  %v6029_v48 = vadd.f32 %v6028_v56, %v11279_v62  ;;  %v6181_v18 = vpop.f32.mrf.mxu1  ;;  %v9100_v43 = vld [vmem:[#allocation2 + $0x70] ss:$40 sps:$4 sm:$0xff]   ;;  %v8205_v22 = vcombine.high %v10482_v46, %v10484_v55 }
 0x319   :  { %v6030_v51 = vpop.f32.mrf.mxu0  ;;  %v457_v56 = vld [vmem:[#allocation5 + $0x8d8] sm:$0xff]  ;;  %v8204_v0 = vcombine.low %v10482_v46, %v10484_v55 }
 0x31a   :  { %7895 = vst [vmem:[#allocation8 + $0x598] sm:$0xff] %v6180_v37  ;;  %v6182_v50 = vadd.f32 %v6181_v18, %v6029_v48  ;;  %v6031_v9 = vadd.f32 %v6030_v51, %v10292_v61  ;;  %v6183_v24 = vpop.f32.mrf.mxu1  ;;  %v8228_v61 = vcombine.low %v353_v59, %v357_v63  ;;  %v9101_v59 = vld [vmem:[#allocation2 + $0x50] ss:$40 sps:$4 sm:$0xff]   ;;  %v8212_v63 = vcombine.low %v337_v57, %v341_v1  ;;  %v9102_v48 = vld [vmem:[#allocation2 + $0xc4] ss:$40 sps:$4 sm:$0xff]  }
 0x31b   :  { %v6220_v27 = vpop.f32.mrf.mxu0  ;;  %v461_v37 = vld [vmem:[#allocation5 + $0x8f8] sm:$0xff]  ;;  %v9103_v18 = vld [vmem:[#allocation2 + $0xa4] ss:$40 sps:$4 sm:$0xff]   ;;  %v8340_v51 = vcombine.low %v465_v4, %v469_v36 }
 0x31c   :  { %7902 = vst [vmem:[#allocation8 + $0x5d0] sm:$0xff] %v6182_v50  ;;  %v6184_v23 = vadd.f32 %v6183_v24, %v6031_v9  ;;  %v6221_v19 = vadd.f32 %v6220_v27, %v10455_v31  ;;  %v6373_v28 = vpop.f32.mrf.mxu1  ;;  %v321_v50 = vld [vmem:[#allocation5 + $0x498] sm:$0xff] }
 0x31d   :  { %v6222_v42 = vpop.f32.mrf.mxu0  ;;  %v325_v9 = vld [vmem:[#allocation5 + $0x4b8] sm:$0xff] }
 0x31e   :  { %6831 = vmatmul.mubr.bf16.vlgmr.msra.gmra.mxu0 %v9096_v3  ;;  %7903 = vst [vmem:[#allocation8 + $0x5d8] sm:$0xff] %v6184_v23  ;;  %v10469_v25 = vadd.f32 %v6373_v28, %v6221_v19  ;;  %v6223_v34 = vadd.f32 %v6222_v42, %v10462_v32  ;;  %v6375_v10 = vpop.f32.mrf.mxu1  ;;  %v449_v27 = vld [vmem:[#allocation5 + $0x898] sm:$0xff]  ;;  %v8332_v28 = vcombine.low %v457_v56, %v461_v37  ;;  %v9104_v42 = vld [vmem:[#allocation2 + $0xc0] ss:$40 sps:$4 sm:$0xff]  }
 0x31f   :  { %6984 = vmatmul.mubr.bf16.vlgmr.msra.gmra.mxu1 %v9097_v15  ;;  %7105 = vmatpush1.bf16.msra.mxu0 %v8236_v39  ;;  %v6224_v13 = vpop.f32.mrf.mxu0  ;;  %v453_v3 = vld [vmem:[#allocation5 + $0x8b8] sm:$0xff]  ;;  %v8197_v15 = vcombine.high %v321_v50, %v325_v9 }
 0x320   :  { %7258 = vmatpush1.bf16.msra.mxu1 %v8364_v38  ;;  %7106 = vmatprep.subr.bf16.mxu0 %v8229_v44  ;;  %v10474_v14 = vadd.f32 %v6375_v10, %v6223_v34  ;;  %v6225_v40 = vadd.f32 %v6224_v13, %v10455_v31  ;;  %v6377_v30 = vpop.f32.mrf.mxu1  ;;  %v8333_v44 = vcombine.high %v457_v56, %v461_v37  ;;  %v317_v34 = vld [vmem:[#allocation5 + $0x478] sm:$0xff] }
 0x321   :  { %6840 = vmatprep.mubr.bf16.mxu0 %v9098_v7  ;;  %6993 = vmatprep.mubr.bf16.mxu1 %v9099_v6  ;;  %v6226_v52 = vpop.f32.mrf.mxu0  ;;  %v9106_v13 = vld [vmem:[#allocation2 + $0x114] ss:$40 sps:$4 sm:$0xff]   ;;  %v8324_v4 = vcombine.low %v449_v27, %v453_v3 }
 0x322   :  { %7259 = vmatprep.subr.bf16.mxu1 %v8357_v35  ;;  %v10477_v8 = vadd.f32 %v6377_v30, %v6225_v40  ;;  %v6227_v49 = vadd.f32 %v6226_v52, %v10462_v32  ;;  %v6379_v60 = vpop.f32.mrf.mxu1  ;;  %v441_v57 = vld [vmem:[#allocation5 + $0x858] sm:$0xff] }
 0x323   :  { %7107 = vmatpush1.bf16.msra.mxu0 %v8228_v61  ;;  %v6230_v58 = vpop.f32.mrf.mxu0  ;;  %v445_v1 = vld [vmem:[#allocation5 + $0x878] sm:$0xff] }
 0x324   :  { %7260 = vmatpush1.bf16.msra.mxu1 %v8356_v54  ;;  %7108 = vmatprep.subr.bf16.mxu0 %v8221_v5  ;;  %v10486_v2 = vadd.f32 %v6379_v60, %v6227_v49  ;;  %v6231_v12 = vadd.f32 %v6230_v58, %v10455_v31  ;;  %v6383_v29 = vpop.f32.mrf.mxu1  ;;  %v8325_v54 = vcombine.high %v449_v27, %v453_v3  ;;  %v313_v5 = vld [vmem:[#allocation5 + $0x458] sm:$0xff] }
 0x325   :  { %7261 = vmatprep.subr.bf16.mxu1 %v8349_v41  ;;  %v6232_v62 = vpop.f32.mrf.mxu0  ;;  %v9105_v41 = vld [vmem:[#allocation2 + $0xa0] ss:$40 sps:$4 sm:$0xff]   ;;  %v9107_v30 = vld [vmem:[#allocation2 + $0xf4] ss:$40 sps:$4 sm:$0xff]   ;;  %v8189_v60 = vcombine.high %v313_v5, %v317_v34  ;;  %v8316_v56 = vcombine.low %v441_v57, %v445_v1 }
 0x326   :  { %6841 = vmatmul.mubr.bf16.gmra.mxu0 %v9100_v43  ;;  %v10491_v39 = vadd.f32 %v6383_v29, %v6231_v12  ;;  %v6233_v45 = vadd.f32 %v6232_v62, %v10462_v32  ;;  %v6385_v53 = vpop.f32.mrf.mxu1  ;;  %v305_v46 = vld [vmem:[#allocation5 + $0x418] sm:$0xff] }
 0x327   :  { %6994 = vmatmul.mubr.bf16.gmra.mxu1 %v9101_v59  ;;  %7109 = vmatpush1.bf16.msra.mxu0 %v8220_v16  ;;  %v6234_v38 = vpop.f32.mrf.mxu0  ;;  %v8196_v16 = vcombine.low %v321_v50, %v325_v9  ;;  %v309_v55 = vld [vmem:[#allocation5 + $0x438] sm:$0xff] }
 0x328   :  { %6850 = vmatprep.mubr.bf16.mxu0 %v9102_v48  ;;  %7003 = vmatprep.mubr.bf16.mxu1 %v9103_v18  ;;  %v10494_v24 = vadd.f32 %v6385_v53, %v6233_v45  ;;  %v6235_v26 = vadd.f32 %v6234_v38, %v10455_v31  ;;  %v6387_v11 = vpop.f32.mrf.mxu1  ;;  %v433_v12 = vld [vmem:[#allocation5 + $0x818] sm:$0xff]  ;;  %v8181_v18 = vcombine.high %v305_v46, %v309_v55 }
 0x329   :  { %7262 = vmatpush1.bf16.msra.mxu1 %v8348_v21  ;;  %7110 = vmatprep.subr.bf16.mxu0 %v8213_v47  ;;  %v6236_v35 = vpop.f32.mrf.mxu0  ;;  %v8317_v47 = vcombine.high %v441_v57, %v445_v1  ;;  %v437_v29 = vld [vmem:[#allocation5 + $0x838] sm:$0xff] }
 0x32a   :  { %7263 = vmatprep.subr.bf16.mxu1 %v8341_v20  ;;  %v10499_v17 = vadd.f32 %v6387_v11, %v6235_v26  ;;  %v6237_v23 = vadd.f32 %v6236_v35, %v10462_v32  ;;  %v6389_v19 = vpop.f32.mrf.mxu1  ;;  %v9108_v45 = vld [vmem:[#allocation2 + $0x110] ss:$40 sps:$4 sm:$0xff]   ;;  %v8309_v53 = vcombine.high %v433_v12, %v437_v29  ;;  %v9110_v11 = vld [vmem:[#allocation2 + $0x164] ss:$40 sps:$4 sm:$0xff]  }
 0x32b   :  { %7111 = vmatpush1.bf16.msra.mxu0 %v8212_v63  ;;  %v6240_v61 = vpop.f32.mrf.mxu0  ;;  %v8188_v63 = vcombine.low %v313_v5, %v317_v34  ;;  %v429_v38 = vld [vmem:[#allocation5 + $0x7f8] sm:$0xff] }
 0x32c   :  { %7112 = vmatprep.subr.bf16.mxu0 %v8205_v22  ;;  %v10502_v10 = vadd.f32 %v6389_v19, %v6237_v23  ;;  %v6241_v7 = vadd.f32 %v6240_v61, %v10455_v31  ;;  %v6393_v6 = vpop.f32.mrf.mxu1  ;;  %v9109_v26 = vld [vmem:[#allocation2 + $0xf0] ss:$40 sps:$4 sm:$0xff]   ;;  %v8180_v23 = vcombine.low %v305_v46, %v309_v55  ;;  %v8308_v19 = vcombine.low %v433_v12, %v437_v29 }
 0x32d   :  { %7264 = vmatpush1.bf16.msra.mxu1 %v8340_v51  ;;  %v6242_v40 = vpop.f32.mrf.mxu0  ;;  %v425_v51 = vld [vmem:[#allocation5 + $0x7d8] sm:$0xff] }
 0x32e   :  { %6851 = vmatmul.mubr.bf16.gmra.mxu0 %v9104_v42  ;;  %7265 = vmatprep.subr.bf16.mxu1 %v8333_v44  ;;  %v10505_v36 = vadd.f32 %v6393_v6, %v6241_v7  ;;  %v6243_v52 = vadd.f32 %v6242_v40, %v10462_v32  ;;  %v6395_v49 = vpop.f32.mrf.mxu1  ;;  %v553_v27 = vld [vmem:[#allocation5 + $0xbd8] sm:$0xff]  ;;  %v8301_v42 = vcombine.high %v425_v51, %v429_v38 }
 0x32f   :  { %7004 = vmatmul.mubr.bf16.gmra.mxu1 %v9105_v41  ;;  %6860 = vmatprep.mubr.bf16.mxu0 %v9106_v13  ;;  %v6244_v21 = vpop.f32.mrf.mxu0  ;;  %v557_v3 = vld [vmem:[#allocation5 + $0xbf8] sm:$0xff] }
 0x330   :  { %7013 = vmatprep.mubr.bf16.mxu1 %v9107_v30  ;;  %7113 = vmatpush1.bf16.msra.mxu0 %v8204_v0  ;;  %v10508_v58 = vadd.f32 %v6395_v49, %v6243_v52  ;;  %v6245_v43 = vadd.f32 %v6244_v21, %v10455_v31  ;;  %v6397_v20 = vpop.f32.mrf.mxu1  ;;  %v9111_v0 = vld [vmem:[#allocation2 + $0x144] ss:$40 sps:$4 sm:$0xff]   ;;  %v8429_v5 = vcombine.high %v553_v27, %v557_v3  ;;  %v417_v34 = vld [vmem:[#allocation5 + $0x798] sm:$0xff] }
 0x331   :  { %7266 = vmatpush1.bf16.msra.mxu1 %v8332_v28  ;;  %7114 = vmatprep.subr.bf16.mxu0 %v8197_v15  ;;  %v6246_v59 = vpop.f32.mrf.mxu0  ;;  %v421_v7 = vld [vmem:[#allocation5 + $0x7b8] sm:$0xff]  ;;  %v8300_v30 = vcombine.low %v425_v51, %v429_v38 }
 0x332   :  { %7267 = vmatprep.subr.bf16.mxu1 %v8325_v54  ;;  %v10511_v37 = vadd.f32 %v6397_v20, %v6245_v43  ;;  %v6247_v62 = vadd.f32 %v6246_v59, %v10462_v32  ;;  %v6399_v48 = vpop.f32.mrf.mxu1  ;;  %v545_v57 = vld [vmem:[#allocation5 + $0xb98] sm:$0xff]  ;;  %v9113_v59 = vld [vmem:[#allocation2 + $0x140] ss:$40 sps:$4 sm:$0xff]  }
 0x333   :  { %v549_v1 = vld [vmem:[#allocation5 + $0xbb8] sm:$0xff] }
 0x334   :  { %7115 = vmatpush1.bf16.msra.mxu0 %v8196_v16  ;;  %v6250_v22 = vpop.f32.mrf.mxu0  ;;  %v10514_v44 = vadd.f32 %v6399_v48, %v6247_v62  ;;  %v6403_v9 = vpop.f32.mrf.mxu1  ;;  %v8428_v16 = vcombine.low %v553_v27, %v557_v3  ;;  %v8421_v46 = vcombine.high %v545_v57, %v549_v1  ;;  %v409_v55 = vld [vmem:[#allocation5 + $0x758] sm:$0xff] }
 0x335   :  { %7268 = vmatpush1.bf16.msra.mxu1 %v8324_v4  ;;  %7116 = vmatprep.subr.bf16.mxu0 %v8189_v60  ;;  %v6251_v50 = vadd.f32 %v6250_v22, %v10455_v31  ;;  %v8293_v60 = vcombine.high %v417_v34, %v421_v7  ;;  %v413_v43 = vld [vmem:[#allocation5 + $0x778] sm:$0xff]  ;;  %v8292_v22 = vcombine.low %v417_v34, %v421_v7 }
 0x336   :  { %6861 = vmatmul.mubr.bf16.gmra.mxu0 %v9108_v45  ;;  %7269 = vmatprep.subr.bf16.mxu1 %v8317_v47  ;;  %v6252_v35 = vpop.f32.mrf.mxu0  ;;  %v6405_v61 = vpop.f32.mrf.mxu1  ;;  %v9112_v47 = vld [vmem:[#allocation2 + $0x160] ss:$40 sps:$4 sm:$0xff]   ;;  %v541_v62 = vld [vmem:[#allocation5 + $0xb78] sm:$0xff]  ;;  %v8420_v45 = vcombine.low %v545_v57, %v549_v1 }
 0x337   :  { %7014 = vmatmul.mubr.bf16.gmra.mxu1 %v9109_v26  ;;  %6870 = vmatprep.mubr.bf16.mxu0 %v9110_v11  ;;  %v10517_v28 = vadd.f32 %v6403_v9, %v6251_v50  ;;  %v6253_v15 = vadd.f32 %v6252_v35, %v10462_v32  ;;  %v8285_v50 = vcombine.high %v409_v55, %v413_v43  ;;  %v401_v11 = vld [vmem:[#allocation5 + $0x718] sm:$0xff] }
 0x338   :  { %7023 = vmatprep.mubr.bf16.mxu1 %v9111_v0  ;;  %7117 = vmatpush1.bf16.msra.mxu0 %v8188_v63  ;;  %v6254_v54 = vpop.f32.mrf.mxu0  ;;  %v6407_v13 = vpop.f32.mrf.mxu1  ;;  %v9114_v63 = vld [vmem:[#allocation2 + $0x1b4] ss:$40 sps:$4 sm:$0xff]  }
 0x339   :  { %7270 = vmatpush1.bf16.msra.mxu1 %v8316_v56  ;;  %7118 = vmatprep.subr.bf16.mxu0 %v8181_v18  ;;  %v10520_v6 = vadd.f32 %v6405_v61, %v6253_v15  ;;  %v6255_v41 = vadd.f32 %v6254_v54, %v10455_v31  ;;  %v537_v56 = vld [vmem:[#allocation5 + $0xb58] sm:$0xff]  ;;  %v8284_v61 = vcombine.low %v409_v55, %v413_v43  ;;  %v9119_v55 = vld [vmem:[#allocation2 + $0x1e4] ss:$40 sps:$4 sm:$0xff]  }
 0x33a   :  { %7271 = vmatprep.subr.bf16.mxu1 %v8309_v53  ;;  %v6256_v40 = vpop.f32.mrf.mxu0  ;;  %v6409_v49 = vpop.f32.mrf.mxu1  ;;  %v9115_v18 = vld [vmem:[#allocation2 + $0x194] ss:$40 sps:$4 sm:$0xff]   ;;  %v8413_v26 = vcombine.high %v537_v56, %v541_v62 }
 0x33b   :  { %v10523_v4 = vadd.f32 %v6407_v13, %v6255_v41  ;;  %v6257_v52 = vadd.f32 %v6256_v40, %v10462_v32  ;;  %v405_v27 = vld [vmem:[#allocation5 + $0x738] sm:$0xff] }
 0x33c   :  { %7119 = vmatpush1.bf16.msra.mxu0 %v8180_v23  ;;  %v6260_v21 = vpop.f32.mrf.mxu0  ;;  %v529_v23 = vld [vmem:[#allocation5 + $0xb18] sm:$0xff]  ;;  %v8277_v7 = vcombine.high %v401_v11, %v405_v27  ;;  %v8276_v43 = vcombine.low %v401_v11, %v405_v27 }
 0x33d   :  { %7272 = vmatpush1.bf16.msra.mxu1 %v8308_v19  ;;  %7120 = vmatprep.subr.bf16.mxu0 %v8301_v42  ;;  %v10526_v20 = vadd.f32 %v6409_v49, %v6257_v52  ;;  %v6261_v12 = vadd.f32 %v6260_v21, %v10455_v31  ;;  %v6413_v29 = vpop.f32.mrf.mxu1  ;;  %v533_v19 = vld [vmem:[#allocation5 + $0xb38] sm:$0xff]  ;;  %v8412_v42 = vcombine.low %v537_v56, %v541_v62 }
 0x33e   :  { %6871 = vmatmul.mubr.bf16.gmra.mxu0 %v9112_v47  ;;  %7273 = vmatprep.subr.bf16.mxu1 %v8429_v5  ;;  %v6262_v48 = vpop.f32.mrf.mxu0  ;;  %v9116_v13 = vld [vmem:[#allocation2 + $0x1b0] ss:$40 sps:$4 sm:$0xff]   ;;  %v8405_v57 = vcombine.high %v529_v23, %v533_v19 }
 0x33f   :  { %7024 = vmatmul.mubr.bf16.gmra.mxu1 %v9113_v59  ;;  %6880 = vmatprep.mubr.bf16.mxu0 %v9114_v63  ;;  %v10529_v53 = vadd.f32 %v6413_v29, %v6261_v12  ;;  %v6263_v51 = vadd.f32 %v6262_v48, %v10462_v32  ;;  %v6415_v38 = vpop.f32.mrf.mxu1  ;;  %v393_v1 = vld [vmem:[#allocation5 + $0x6d8] sm:$0xff]  ;;  %v8404_v12 = vcombine.low %v529_v23, %v533_v19 }
 0x340   :  { %7033 = vmatprep.mubr.bf16.mxu1 %v9115_v18  ;;  %7121 = vmatpush2.bf16.msra.mxu0 %v8300_v30  ;;  %v6264_v9 = vpop.f32.mrf.mxu0  ;;  %v397_v40 = vld [vmem:[#allocation5 + $0x6f8] sm:$0xff] }
 0x341   :  { %7274 = vmatpush2.bf16.msra.mxu1 %v8428_v16  ;;  %7122 = vmatprep.subr.bf16.mxu0 %v8293_v60  ;;  %v10532_v3 = vadd.f32 %v6415_v38, %v6263_v51  ;;  %v6265_v35 = vadd.f32 %v6264_v9, %v10455_v31  ;;  %v6417_v0 = vpop.f32.mrf.mxu1  ;;  %v9117_v49 = vld [vmem:[#allocation2 + $0x190] ss:$40 sps:$4 sm:$0xff]   ;;  %v9118_v60 = vld [vmem:[#allocation2 + $0x204] ss:$40 sps:$4 sm:$0xff]   ;;  %v8269_v56 = vcombine.high %v393_v1, %v397_v40 }
 0x342   :  { %7275 = vmatprep.subr.bf16.mxu1 %v8421_v46  ;;  %v6266_v15 = vpop.f32.mrf.mxu0  ;;  %v521_v21 = vld [vmem:[#allocation5 + $0xad8] sm:$0xff]  ;;  %v8268_v11 = vcombine.low %v393_v1, %v397_v40 }
 0x343   :  { %v10535_v54 = vadd.f32 %v6417_v0, %v6265_v35  ;;  %v6267_v5 = vadd.f32 %v6266_v15, %v10462_v32  ;;  %v6419_v34 = vpop.f32.mrf.mxu1  ;;  %v525_v47 = vld [vmem:[#allocation5 + $0xaf8] sm:$0xff] }
 0x344   :  { %7123 = vmatpush2.bf16.msra.mxu0 %v8292_v22  ;;  %v8397_v48 = vcombine.high %v521_v21, %v525_v47  ;;  %v385_v18 = vld [vmem:[#allocation5 + $0x698] sm:$0xff]  ;;  %v8396_v27 = vcombine.low %v521_v21, %v525_v47 }
 0x345   :  { %7276 = vmatpush2.bf16.msra.mxu1 %v8420_v45  ;;  %7124 = vmatprep.subr.bf16.mxu0 %v8285_v50  ;;  %v10538_v30 = vadd.f32 %v6419_v34, %v6267_v5  ;;  %v6423_v52 = vpop.f32.mrf.mxu1  ;;  %v389_v22 = vld [vmem:[#allocation5 + $0x6b8] sm:$0xff] }
 0x346   :  { %v6270_v41 = vpop.f32.mrf.mxu0  ;;  %6881 = vmatmul.mubr.bf16.gmra.mxu0 %v9116_v13  ;;  %7277 = vmatprep.subr.bf16.mxu1 %v8413_v26  ;;  %v513_v50 = vld [vmem:[#allocation5 + $0xa98] sm:$0xff]  ;;  %v8261_v19 = vcombine.high %v385_v18, %v389_v22 }
 0x347   :  { %v6271_v16 = vadd.f32 %v6270_v41, %v10455_v31  ;;  %7034 = vmatmul.mubr.bf16.gmra.mxu1 %v9117_v49  ;;  %6890 = vmatprep.mubr.bf16.mxu0 %v9118_v60  ;;  %v6425_v63 = vpop.f32.mrf.mxu1  ;;  %v517_v9 = vld [vmem:[#allocation5 + $0xab8] sm:$0xff]  ;;  %v8260_v60 = vcombine.low %v385_v18, %v389_v22 }
 0x348   :  { %v6272_v46 = vpop.f32.mrf.mxu0  ;;  %7043 = vmatprep.mubr.bf16.mxu1 %v9119_v55  ;;  %7125 = vmatpush2.bf16.msra.mxu0 %v8284_v61  ;;  %v9120_v61 = vld [vmem:[#allocation2 + $0x200] ss:$40 sps:$4 sm:$0xff]   ;;  %v377_v5 = vld [vmem:[#allocation5 + $0x658] sm:$0xff]  ;;  %v8388_v21 = vcombine.low %v513_v50, %v517_v9 }
 0x349   :  { %v10541_v29 = vadd.f32 %v6423_v52, %v6271_v16  ;;  %v6273_v59 = vadd.f32 %v6272_v46, %v10462_v32  ;;  %7278 = vmatpush2.bf16.msra.mxu1 %v8412_v42  ;;  %7126 = vmatprep.subr.bf16.mxu0 %v8277_v7  ;;  %v6427_v38 = vpop.f32.mrf.mxu1  ;;  %v8389_v42 = vcombine.high %v513_v50, %v517_v9  ;;  %v381_v34 = vld [vmem:[#allocation5 + $0x678] sm:$0xff] }
 0x34a   :  { %v6274_v62 = vpop.f32.mrf.mxu0  ;;  %7279 = vmatprep.subr.bf16.mxu1 %v8405_v57  ;;  %v9121_v57 = vld [vmem:[#allocation2 + $0x1e0] ss:$40 sps:$4 sm:$0xff]   ;;  %v9122_v1 = vld [vmem:[#allocation2 + $0x254] ss:$40 sps:$4 sm:$0xff]   ;;  %v8252_v50 = vcombine.low %v377_v5, %v381_v34 }
 0x34b   :  { %v10544_v45 = vadd.f32 %v6425_v63, %v6273_v59  ;;  %v6275_v51 = vadd.f32 %v6274_v62, %v10455_v31  ;;  %v6429_v23 = vpop.f32.mrf.mxu1  ;;  %v505_v40 = vld [vmem:[#allocation5 + $0xa58] sm:$0xff] }
 0x34c   :  { %v6276_v26 = vpop.f32.mrf.mxu0  ;;  %7127 = vmatpush2.bf16.msra.mxu0 %v8276_v43  ;;  %v509_v16 = vld [vmem:[#allocation5 + $0xa78] sm:$0xff]  ;;  %v8253_v43 = vcombine.high %v377_v5, %v381_v34 }
 0x34d   :  { %v10547_v35 = vadd.f32 %v6427_v38, %v6275_v51  ;;  %v6277_v0 = vadd.f32 %v6276_v26, %v10462_v32  ;;  %7280 = vmatpush2.bf16.msra.mxu1 %v8404_v12  ;;  %7128 = vmatprep.subr.bf16.mxu0 %v8269_v56  ;;  %v9123_v49 = vld [vmem:[#allocation2 + $0x234] ss:$40 sps:$4 sm:$0xff]   ;;  %v8381_v59 = vcombine.high %v505_v40, %v509_v16 }
 0x34e   :  { %v6280_v15 = vpop.f32.mrf.mxu0  ;;  %6891 = vmatmul.mubr.bf16.gmra.mxu0 %v9120_v61  ;;  %7281 = vmatprep.subr.bf16.mxu1 %v8397_v48  ;;  %v369_v63 = vld [vmem:[#allocation5 + $0x618] sm:$0xff]  ;;  %v8380_v9 = vcombine.low %v505_v40, %v509_v16 }
 0x34f   :  { %v10550_v7 = vadd.f32 %v6429_v23, %v6277_v0  ;;  %v6281_v41 = vadd.f32 %v6280_v15, %v10455_v31  ;;  %v6433_v13 = vpop.f32.mrf.mxu1  ;;  %7044 = vmatmul.mubr.bf16.gmra.mxu1 %v9121_v57  ;;  %6900 = vmatprep.mubr.bf16.mxu0 %v9122_v1  ;;  %v373_v56 = vld [vmem:[#allocation5 + $0x638] sm:$0xff]  ;;  %v9126_v57 = vld [vmem:[#allocation2 + $0x2a4] ss:$40 sps:$4 sm:$0xff]  }
 0x350   :  { %v6282_v52 = vpop.f32.mrf.mxu0  ;;  %7053 = vmatprep.mubr.bf16.mxu1 %v9123_v49  ;;  %7129 = vmatpush2.bf16.msra.mxu0 %v8268_v11  ;;  %v497_v18 = vld [vmem:[#allocation5 + $0xa18] sm:$0xff]  ;;  %v8245_v0 = vcombine.high %v369_v63, %v373_v56  ;;  %v8244_v49 = vcombine.low %v369_v63, %v373_v56 }
 0x351   :  { %v10553_v47 = vadd.f32 %v6433_v13, %v6281_v41  ;;  %v6283_v46 = vadd.f32 %v6282_v52, %v10462_v32  ;;  %v6435_v55 = vpop.f32.mrf.mxu1  ;;  %7282 = vmatpush2.bf16.msra.mxu1 %v8396_v27  ;;  %7130 = vmatprep.subr.bf16.mxu0 %v8261_v19  ;;  %v501_v22 = vld [vmem:[#allocation5 + $0xa38] sm:$0xff]  ;;  %v9127_v52 = vld [vmem:[#allocation2 + $0x284] ss:$40 sps:$4 sm:$0xff]  }
 0x352   :  { %v6284_v12 = vpop.f32.mrf.mxu0  ;;  %7283 = vmatprep.subr.bf16.mxu1 %v8389_v42  ;;  %v9124_v19 = vld [vmem:[#allocation2 + $0x250] ss:$40 sps:$4 sm:$0xff]   ;;  %v8373_v15 = vcombine.high %v497_v18, %v501_v22 }
 0x353   :  { %v10556_v62 = vadd.f32 %v6435_v55, %v6283_v46  ;;  %v6285_v48 = vadd.f32 %v6284_v12, %v10455_v31  ;;  %v6437_v51 = vpop.f32.mrf.mxu1  ;;  %v10562_v61 = vld [vmem:[#allocation5 + $0xdd8] sm:$0xff] }
 0x354   :  { %v6286_v38 = vpop.f32.mrf.mxu0  ;;  %7131 = vmatpush2.bf16.msra.mxu0 %v8260_v60  ;;  %v10564_v42 = vld [vmem:[#allocation5 + $0xdf8] sm:$0xff]  ;;  %v8372_v60 = vcombine.low %v497_v18, %v501_v22 }
 0x355   :  { %v10559_v26 = vadd.f32 %v6437_v51, %v6285_v48  ;;  %v6287_v11 = vadd.f32 %v6286_v38, %v10462_v32  ;;  %v6439_v27 = vpop.f32.mrf.mxu1  ;;  %7284 = vmatpush2.bf16.msra.mxu1 %v8388_v21  ;;  %7132 = vmatprep.subr.bf16.mxu0 %v8253_v43  ;;  %v9125_v13 = vld [vmem:[#allocation2 + $0x230] ss:$40 sps:$4 sm:$0xff]   ;;  %v8493_v43 = vcombine.high %v10562_v61, %v10564_v42 }
 0x356   :  { %v6290_v23 = vpop.f32.mrf.mxu0  ;;  %6901 = vmatmul.mubr.bf16.gmra.mxu0 %v9124_v19  ;;  %7285 = vmatprep.subr.bf16.mxu1 %v8381_v59  ;;  %v10569_v1 = vld [vmem:[#allocation5 + $0x11d8] sm:$0xff] }
 0x357   :  { %v10566_v41 = vadd.f32 %v6439_v27, %v6287_v11  ;;  %v6291_v5 = vadd.f32 %v6290_v23, %v10455_v31  ;;  %v6443_v34 = vpop.f32.mrf.mxu1  ;;  %7054 = vmatmul.mubr.bf16.gmra.mxu1 %v9125_v13  ;;  %6910 = vmatprep.mubr.bf16.mxu0 %v9126_v57  ;;  %v10571_v40 = vld [vmem:[#allocation5 + $0x11f8] sm:$0xff]  ;;  %v9129_v23 = vld [vmem:[#allocation2 + $0x280] ss:$40 sps:$4 sm:$0xff]  }
 0x358   :  { %v6292_v16 = vpop.f32.mrf.mxu0  ;;  %7063 = vmatprep.mubr.bf16.mxu1 %v9127_v52  ;;  %7133 = vmatpush2.bf16.msra.mxu0 %v8252_v50  ;;  %v8621_v59 = vcombine.high %v10569_v1, %v10571_v40  ;;  %v9130_v19 = vld [vmem:[#allocation2 + $0x2f4] ss:$40 sps:$4 sm:$0xff]  }
 0x359   :  { %v10573_v21 = vadd.f32 %v6443_v34, %v6291_v5  ;;  %v6293_v46 = vadd.f32 %v6292_v16, %v10462_v32  ;;  %v6445_v55 = vpop.f32.mrf.mxu1  ;;  %7286 = vmatpush2.bf16.msra.mxu1 %v8380_v9  ;;  %7134 = vmatprep.subr.bf16.mxu0 %v8245_v0  ;;  %v9128_v9 = vld [vmem:[#allocation2 + $0x2a0] ss:$40 sps:$4 sm:$0xff]   ;;  %v9131_v5 = vld [vmem:[#allocation2 + $0x2d4] ss:$40 sps:$4 sm:$0xff]  }
 0x35a   :  { %v6294_v12 = vpop.f32.mrf.mxu0  ;;  %7287 = vmatprep.subr.bf16.mxu1 %v8373_v15 }
 0x35b   :  { %v10580_v48 = vadd.f32 %v6445_v55, %v6293_v46  ;;  %v6295_v63 = vadd.f32 %v6294_v12, %v10455_v31  ;;  %v6447_v56 = vpop.f32.mrf.mxu1 }
 0x35c   :  { %v6296_v51 = vpop.f32.mrf.mxu0  ;;  %7135 = vmatpush2.bf16.msra.mxu0 %v8244_v49 }
 0x35d   :  { %v10583_v18 = vadd.f32 %v6447_v56, %v6295_v63  ;;  %v6297_v22 = vadd.f32 %v6296_v51, %v10462_v32  ;;  %v6449_v38 = vpop.f32.mrf.mxu1  ;;  %7288 = vmatpush2.bf16.msra.mxu1 %v8372_v60  ;;  %7410 = vmatprep.subr.bf16.mxu0 %v8493_v43  ;;  %v9132_v63 = vld [vmem:[#allocation2 + $0x2f0] ss:$40 sps:$4 sm:$0xff]  }
 0x35e   :  { %v6300_v50 = vpop.f32.mrf.mxu0  ;;  %6911 = vmatmul.mubr.bf16.gmra.mxu0 %v9128_v9  ;;  %7563 = vmatprep.subr.bf16.mxu1 %v8621_v59 }
 0x35f   :  { %v10586_v11 = vadd.f32 %v6449_v38, %v6297_v22  ;;  %v6301_v27 = vadd.f32 %v6300_v50, %v10455_v31  ;;  %v6453_v0 = vpop.f32.mrf.mxu1  ;;  %7064 = vmatmul.mubr.bf16.gmra.mxu1 %v9129_v23  ;;  %6920 = vmatprep.mubr.bf16.mxu0 %v9130_v19  ;;  %v9133_v38 = vld [vmem:[#allocation2 + $0x2d0] ss:$40 sps:$4 sm:$0xff]   ;;  %v9134_v50 = vld [vmem:[#allocation2 + $0x344] ss:$40 sps:$4 sm:$0xff]  }
 0x360   :  { %v6302_v15 = vpop.f32.mrf.mxu0  ;;  %7073 = vmatprep.mubr.bf16.mxu1 %v9131_v5 }
 0x361   :  { %v10589_v34 = vadd.f32 %v6453_v0, %v6301_v27  ;;  %v6303_v13 = vadd.f32 %v6302_v15, %v10462_v32  ;;  %v6455_v57 = vpop.f32.mrf.mxu1  ;;  %v9135_v27 = vld [vmem:[#allocation2 + $0x324] ss:$40 sps:$4 sm:$0xff]  }
 0x362   :  { %v6304_v16 = vpop.f32.mrf.mxu0 }
 0x363   :  { %v10592_v52 = vadd.f32 %v6455_v57, %v6303_v13  ;;  %v6305_v49 = vadd.f32 %v6304_v16, %v10455_v31  ;;  %v6457_v60 = vpop.f32.mrf.mxu1 }
 0x364   :  { %v6306_v46 = vpop.f32.mrf.mxu0 }
 0x365   :  { %v10595_v55 = vadd.f32 %v6457_v60, %v6305_v49  ;;  %v6307_v43 = vadd.f32 %v6306_v46, %v10462_v32  ;;  %v6459_v12 = vpop.f32.mrf.mxu1 }
 0x366   :  { %v6310_v59 = vpop.f32.mrf.mxu0  ;;  %6921 = vmatmul.mubr.bf16.gmra.mxu0 %v9132_v63 }
 0x367   :  { %v10598_v56 = vadd.f32 %v6459_v12, %v6307_v43  ;;  %v6311_v51 = vadd.f32 %v6310_v59, %v10455_v31  ;;  %v6463_v22 = vpop.f32.mrf.mxu1  ;;  %7074 = vmatmul.mubr.bf16.gmra.mxu1 %v9133_v38  ;;  %6930 = vmatprep.mubr.bf16.mxu0 %v9134_v50  ;;  %v9136_v12 = vld [vmem:[#allocation2 + $0x340] ss:$40 sps:$4 sm:$0xff]   ;;  %v9138_v38 = vld [vmem:[#allocation2 + $0x394] ss:$40 sps:$4 sm:$0xff]  }
 0x368   :  { %v6312_v9 = vpop.f32.mrf.mxu0  ;;  %7083 = vmatprep.mubr.bf16.mxu1 %v9135_v27 }
 0x369   :  { %v10601_v0 = vadd.f32 %v6463_v22, %v6311_v51  ;;  %v6313_v23 = vadd.f32 %v6312_v9, %v10462_v32  ;;  %v6465_v19 = vpop.f32.mrf.mxu1  ;;  %v9137_v22 = vld [vmem:[#allocation2 + $0x320] ss:$40 sps:$4 sm:$0xff]   ;;  %v9139_v9 = vld [vmem:[#allocation2 + $0x374] ss:$40 sps:$4 sm:$0xff]  }
 0x36a   :  { %v6314_v15 = vpop.f32.mrf.mxu0 }
 0x36b   :  { %v10604_v5 = vadd.f32 %v6465_v19, %v6313_v23  ;;  %v6315_v13 = vadd.f32 %v6314_v15, %v10455_v31  ;;  %v6467_v57 = vpop.f32.mrf.mxu1 }
 0x36c   :  { %v6316_v16 = vpop.f32.mrf.mxu0 }
 0x36d   :  { %11280 = vst [vmem:[#allocation20_spill] sm:$0xff] %v10604_v5  ;;  %v10607_v49 = vadd.f32 %v6467_v57, %v6315_v13  ;;  %v6317_v60 = vadd.f32 %v6316_v16, %v10462_v32  ;;  %v6469_v46 = vpop.f32.mrf.mxu1  ;;  %v9146_v5 = vld [vmem:[#allocation2 + $0x5c] ss:$40 sps:$4 sm:$0xff]  }
 0x36e   :  { %v6320_v43 = vpop.f32.mrf.mxu0  ;;  %6931 = vmatmul.mubr.bf16.gmra.mxu0 %v9136_v12 }
 0x36f   :  { %11281 = vst [vmem:[#allocation23_spill] sm:$0xff] %v10607_v49  ;;  %v10610_v59 = vadd.f32 %v6469_v46, %v6317_v60  ;;  %v6321_v63 = vadd.f32 %v6320_v43, %v10455_v31  ;;  %v6473_v51 = vpop.f32.mrf.mxu1  ;;  %7084 = vmatmul.mubr.bf16.gmra.mxu1 %v9137_v22  ;;  %6940 = vmatprep.mubr.bf16.mxu0 %v9138_v38  ;;  %v9140_v38 = vld [vmem:[#allocation2 + $0x390] ss:$40 sps:$4 sm:$0xff]  }
 0x370   :  { %v6322_v50 = vpop.f32.mrf.mxu0  ;;  %7093 = vmatprep.mubr.bf16.mxu1 %v9139_v9  ;;  %v9141_v9 = vld [vmem:[#allocation2 + $0x370] ss:$40 sps:$4 sm:$0xff]  }
 0x371   :  { %11282 = vst [vmem:[#allocation21_spill] sm:$0xff] %v10610_v59  ;;  %v10613_v27 = vadd.f32 %v6473_v51, %v6321_v63  ;;  %v6323_v23 = vadd.f32 %v6322_v50, %v10462_v32  ;;  %v6475_v19 = vpop.f32.mrf.mxu1 }
 0x372   :  { %v6324_v15 = vpop.f32.mrf.mxu0 }
 0x373   :  { %11283 = vst [vmem:[#allocation22_spill] sm:$0xff] %v10613_v27  ;;  %v10616_v13 = vadd.f32 %v6475_v19, %v6323_v23  ;;  %v6325_v57 = vadd.f32 %v6324_v15, %v10455_v31  ;;  %v6477_v16 = vpop.f32.mrf.mxu1  ;;  %v9142_v23 = vld [vmem:[#allocation2 + $0xc] ss:$40 sps:$4 sm:$0xff]   ;;  %v10638_v27 = vld [vmem:[#allocation5 + $0x1158] sm:$0xff] }
 0x374   :  { %v6326_v60 = vpop.f32.mrf.mxu0  ;;  %v9143_v15 = vld [vmem:[#allocation2 + $0x14] ss:$40 sps:$4 sm:$0xff]  }
 0x375   :  { %11284 = vst [vmem:[#allocation13_spill] sm:$0xff] %v10616_v13  ;;  %v10619_v46 = vadd.f32 %v6477_v16, %v6325_v57  ;;  %v6327_v43 = vadd.f32 %v6326_v60, %v10462_v32  ;;  %v6479_v12 = vpop.f32.mrf.mxu1 }
 0x376   :  { %v6330_v22 = vpop.f32.mrf.mxu0  ;;  %6941 = vmatmul.mubr.bf16.gmra.mxu0 %v9140_v38 }
 0x377   :  { %11285 = vst [vmem:[#allocation14_spill] sm:$0xff] %v10619_v46  ;;  %v10622_v63 = vadd.f32 %v6479_v12, %v6327_v43  ;;  %v6331_v51 = vadd.f32 %v6330_v22, %v10455_v31  ;;  %v6483_v50 = vpop.f32.mrf.mxu1  ;;  %7094 = vmatmul.mubr.bf16.gmra.mxu1 %v9141_v9  ;;  %7136 = vmatprep.mubr.bf16.mxu0 %v9142_v23  ;;  %v613_v46 = vld [vmem:[#allocation5 + $0xdb8] sm:$0xff] }
 0x378   :  { %v6332_v19 = vpop.f32.mrf.mxu0  ;;  %7289 = vmatprep.mubr.bf16.mxu1 %v9143_v15  ;;  %v8492_v9 = vcombine.low %v10562_v61, %v10564_v42  ;;  %v737_v23 = vld [vmem:[#allocation5 + $0x1198] sm:$0xff] }
 0x379   :  { %11286 = vst [vmem:[#allocation15_spill] sm:$0xff] %v10622_v63  ;;  %v10625_v57 = vadd.f32 %v6483_v50, %v6331_v51  ;;  %v6333_v16 = vadd.f32 %v6332_v19, %v10462_v32  ;;  %v6485_v60 = vpop.f32.mrf.mxu1  ;;  %v741_v63 = vld [vmem:[#allocation5 + $0x11b8] sm:$0xff]  ;;  %v8620_v51 = vcombine.low %v10569_v1, %v10571_v40  ;;  %v8485_v50 = vcombine.high %v609_v33, %v613_v46 }
 0x37a   :  { %v6334_v38 = vpop.f32.mrf.mxu0  ;;  %v10640_v61 = vld [vmem:[#allocation5 + $0x1178] sm:$0xff] }
 0x37b   :  { %11287 = vst [vmem:[#allocation16_spill] sm:$0xff] %v10625_v57  ;;  %v10628_v43 = vadd.f32 %v6485_v60, %v6333_v16  ;;  %v6335_v12 = vadd.f32 %v6334_v38, %v10455_v31  ;;  %v6487_v22 = vpop.f32.mrf.mxu1  ;;  %v601_v16 = vld [vmem:[#allocation5 + $0xd58] sm:$0xff]  ;;  %v9144_v31 = vld [vmem:[#allocation2 + $0x8] ss:$40 sps:$4 sm:$0xff]   ;;  %v8613_v38 = vcombine.high %v737_v23, %v741_v63 }
 0x37c   :  { %v6336_v13 = vpop.f32.mrf.mxu0  ;;  %v605_v60 = vld [vmem:[#allocation5 + $0xd78] sm:$0xff] }
 0x37d   :  { %11288 = vst [vmem:[#allocation17_spill] sm:$0xff] %v10628_v43  ;;  %v10635_v19 = vadd.f32 %v6487_v22, %v6335_v12  ;;  %v6337_v15 = vadd.f32 %v6336_v13, %v10462_v32  ;;  %v6489_v57 = vpop.f32.mrf.mxu1  ;;  %v9145_v12 = vld [vmem:[#allocation2 + $0x10] ss:$40 sps:$4 sm:$0xff]   ;;  %v8484_v32 = vcombine.low %v609_v33, %v613_v46  ;;  %v8612_v22 = vcombine.low %v737_v23, %v741_v63 }
 0x37e   :  { %v6526_v43 = vpop.f32.mrf.mxu0  ;;  %7137 = vmatmul.mubr.bf16.vlgmr.msra.gmra.mxu0 %v9144_v31  ;;  %v593_v33 = vld [vmem:[#allocation5 + $0xd18] sm:$0xff] }
 0x37f   :  { %11289 = vst [vmem:[#allocation18_spill] sm:$0xff] %v10635_v19  ;;  %v10642_v42 = vadd.f32 %v6489_v57, %v6337_v15  ;;  %v6527_v1 = vadd.f32 %v6526_v43, %v10469_v25  ;;  %v6679_v40 = vpop.f32.mrf.mxu1  ;;  %7290 = vmatmul.mubr.bf16.vlgmr.msra.gmra.mxu1 %v9145_v12  ;;  %7411 = vmatpush1.bf16.msra.mxu0 %v8492_v9  ;;  %v9147_v57 = vld [vmem:[#allocation2 + $0x64] ss:$40 sps:$4 sm:$0xff]   ;;  %v597_v46 = vld [vmem:[#allocation5 + $0xd38] sm:$0xff] }
 0x380   :  { %v6528_v13 = vpop.f32.mrf.mxu0  ;;  %7564 = vmatpush1.bf16.msra.mxu1 %v8620_v51  ;;  %7412 = vmatprep.subr.bf16.mxu0 %v8485_v50  ;;  %v8477_v19 = vcombine.high %v601_v16, %v605_v60  ;;  %v8605_v25 = vcombine.high %v10638_v27, %v10640_v61  ;;  %v8476_v51 = vcombine.low %v601_v16, %v605_v60  ;;  %v725_v50 = vld [vmem:[#allocation5 + $0x1138] sm:$0xff] }
 0x381   :  { %v10645_v31 = vadd.f32 %v6679_v40, %v6527_v1  ;;  %v6529_v59 = vadd.f32 %v6528_v13, %v10474_v14  ;;  %v6681_v49 = vpop.f32.mrf.mxu1  ;;  %7146 = vmatprep.mubr.bf16.mxu0 %v9146_v5  ;;  %7299 = vmatprep.mubr.bf16.mxu1 %v9147_v57  ;;  %v721_v14 = vld [vmem:[#allocation5 + $0x1118] sm:$0xff] }
 0x382   :  { %v6530_v43 = vpop.f32.mrf.mxu0  ;;  %7565 = vmatprep.subr.bf16.mxu1 %v8613_v38  ;;  %v8604_v38 = vcombine.low %v10638_v27, %v10640_v61  ;;  %v9148_v60 = vld [vmem:[#allocation2 + $0x58] ss:$40 sps:$4 sm:$0xff]   ;;  %v8597_v12 = vcombine.high %v721_v14, %v725_v50 }
 0x383   :  { %v10650_v9 = vadd.f32 %v6681_v49, %v6529_v59  ;;  %v6531_v63 = vadd.f32 %v6530_v43, %v10477_v8  ;;  %v6683_v23 = vpop.f32.mrf.mxu1  ;;  %7413 = vmatpush1.bf16.msra.mxu0 %v8484_v32  ;;  %v8469_v49 = vcombine.high %v593_v33, %v597_v46  ;;  %v10658_v59 = vld [vmem:[#allocation5 + $0xcd8] sm:$0xff] }
 0x384   :  { %v6532_v15 = vpop.f32.mrf.mxu0  ;;  %7566 = vmatpush1.bf16.msra.mxu1 %v8612_v22  ;;  %7414 = vmatprep.subr.bf16.mxu0 %v8477_v19  ;;  %v10660_v8 = vld [vmem:[#allocation5 + $0xcf8] sm:$0xff]  ;;  %v8468_v22 = vcombine.low %v593_v33, %v597_v46 }
 0x385   :  { %v10653_v5 = vadd.f32 %v6683_v23, %v6531_v63  ;;  %v6533_v1 = vadd.f32 %v6532_v15, %v10486_v2  ;;  %v6685_v40 = vpop.f32.mrf.mxu1  ;;  %7567 = vmatprep.subr.bf16.mxu1 %v8605_v25  ;;  %v9149_v2 = vld [vmem:[#allocation2 + $0x60] ss:$40 sps:$4 sm:$0xff]   ;;  %v713_v27 = vld [vmem:[#allocation5 + $0x10d8] sm:$0xff]  ;;  %v9150_v25 = vld [vmem:[#allocation2 + $0xac] ss:$40 sps:$4 sm:$0xff]   ;;  %v8461_v63 = vcombine.high %v10658_v59, %v10660_v8 }
 0x386   :  { %v6536_v16 = vpop.f32.mrf.mxu0  ;;  %7147 = vmatmul.mubr.bf16.gmra.mxu0 %v9148_v60  ;;  %v717_v61 = vld [vmem:[#allocation5 + $0x10f8] sm:$0xff] }
 0x387   :  { %v10662_v32 = vadd.f32 %v6685_v40, %v6533_v1  ;;  %v6537_v19 = vadd.f32 %v6536_v16, %v10491_v39  ;;  %v6689_v13 = vpop.f32.mrf.mxu1  ;;  %7300 = vmatmul.mubr.bf16.gmra.mxu1 %v9149_v2  ;;  %7415 = vmatpush1.bf16.msra.mxu0 %v8476_v51  ;;  %v9151_v43 = vld [vmem:[#allocation2 + $0xb4] ss:$40 sps:$4 sm:$0xff]   ;;  %v8596_v1 = vcombine.low %v721_v14, %v725_v50 }
 0x388   :  { %v6538_v57 = vpop.f32.mrf.mxu0  ;;  %7156 = vmatprep.mubr.bf16.mxu0 %v9150_v25  ;;  %7309 = vmatprep.mubr.bf16.mxu1 %v9151_v43  ;;  %v8589_v33 = vcombine.high %v713_v27, %v717_v61  ;;  %v577_v46 = vld [vmem:[#allocation5 + $0xc98] sm:$0xff]  ;;  %v9152_v43 = vld [vmem:[#allocation2 + $0xa8] ss:$40 sps:$4 sm:$0xff]  }
 0x389   :  { %v10667_v23 = vadd.f32 %v6689_v13, %v6537_v19  ;;  %v6539_v15 = vadd.f32 %v6538_v57, %v10494_v24  ;;  %v6691_v39 = vpop.f32.mrf.mxu1  ;;  %7568 = vmatpush1.bf16.msra.mxu1 %v8604_v38  ;;  %7416 = vmatprep.subr.bf16.mxu0 %v8469_v49  ;;  %v581_v40 = vld [vmem:[#allocation5 + $0xcb8] sm:$0xff]  ;;  %v8460_v24 = vcombine.low %v10658_v59, %v10660_v8 }
 0x38a   :  { %v6540_v51 = vpop.f32.mrf.mxu0  ;;  %7569 = vmatprep.subr.bf16.mxu1 %v8597_v12  ;;  %v705_v25 = vld [vmem:[#allocation5 + $0x1098] sm:$0xff]  ;;  %v8588_v49 = vcombine.low %v713_v27, %v717_v61  ;;  %v8453_v12 = vcombine.high %v577_v46, %v581_v40  ;;  %v9155_v61 = vld [vmem:[#allocation2 + $0x104] ss:$40 sps:$4 sm:$0xff]  }
 0x38b   :  { %v10670_v16 = vadd.f32 %v6691_v39, %v6539_v15  ;;  %v6541_v60 = vadd.f32 %v6540_v51, %v10499_v17  ;;  %v6693_v2 = vpop.f32.mrf.mxu1  ;;  %7417 = vmatpush1.bf16.msra.mxu0 %v8468_v22  ;;  %v709_v19 = vld [vmem:[#allocation5 + $0x10b8] sm:$0xff] }
 0x38c   :  { %v6542_v13 = vpop.f32.mrf.mxu0  ;;  %7418 = vmatprep.subr.bf16.mxu0 %v8461_v63  ;;  %v8581_v17 = vcombine.high %v705_v25, %v709_v19  ;;  %v569_v22 = vld [vmem:[#allocation5 + $0xc58] sm:$0xff] }
 0x38d   :  { %v10675_v38 = vadd.f32 %v6693_v2, %v6541_v60  ;;  %v6543_v14 = vadd.f32 %v6542_v13, %v10502_v10  ;;  %v6695_v50 = vpop.f32.mrf.mxu1  ;;  %7570 = vmatpush1.bf16.msra.mxu1 %v8596_v1  ;;  %v573_v15 = vld [vmem:[#allocation5 + $0xc78] sm:$0xff]  ;;  %v8452_v60 = vcombine.low %v577_v46, %v581_v40 }
 0x38e   :  { %v6546_v57 = vpop.f32.mrf.mxu0  ;;  %7157 = vmatmul.mubr.bf16.gmra.mxu0 %v9152_v43  ;;  %7571 = vmatprep.subr.bf16.mxu1 %v8589_v33  ;;  %v9153_v63 = vld [vmem:[#allocation2 + $0xb0] ss:$40 sps:$4 sm:$0xff]   ;;  %v9154_v51 = vld [vmem:[#allocation2 + $0xfc] ss:$40 sps:$4 sm:$0xff]   ;;  %v8580_v33 = vcombine.low %v705_v25, %v709_v19  ;;  %v8444_v19 = vcombine.low %v569_v22, %v573_v15 }
 0x38f   :  { %v10678_v39 = vadd.f32 %v6695_v50, %v6543_v14  ;;  %v6547_v59 = vadd.f32 %v6546_v57, %v10505_v36  ;;  %v6699_v8 = vpop.f32.mrf.mxu1  ;;  %7310 = vmatmul.mubr.bf16.gmra.mxu1 %v9153_v63  ;;  %7166 = vmatprep.mubr.bf16.mxu0 %v9154_v51  ;;  %v697_v10 = vld [vmem:[#allocation5 + $0x1058] sm:$0xff]  ;;  %v8445_v36 = vcombine.high %v569_v22, %v573_v15 }
 0x390   :  { %v701_v1 = vld [vmem:[#allocation5 + $0x1078] sm:$0xff]  ;;  %v6548_v27 = vpop.f32.mrf.mxu0  ;;  %7319 = vmatprep.mubr.bf16.mxu1 %v9155_v61  ;;  %7419 = vmatpush1.bf16.msra.mxu0 %v8460_v24 }
 0x391   :  { %v10681_v2 = vadd.f32 %v6699_v8, %v6547_v59  ;;  %v6549_v13 = vadd.f32 %v6548_v27, %v10508_v58  ;;  %v6701_v14 = vpop.f32.mrf.mxu1  ;;  %7572 = vmatpush1.bf16.msra.mxu1 %v8588_v49  ;;  %7420 = vmatprep.subr.bf16.mxu0 %v8453_v12  ;;  %v8573_v57 = vcombine.high %v697_v10, %v701_v1  ;;  %v561_v43 = vld [vmem:[#allocation5 + $0xc18] sm:$0xff] }
 0x392   :  { %v6550_v50 = vpop.f32.mrf.mxu0  ;;  %7573 = vmatprep.subr.bf16.mxu1 %v8581_v17  ;;  %v565_v63 = vld [vmem:[#allocation5 + $0xc38] sm:$0xff]  ;;  %v8572_v58 = vcombine.low %v697_v10, %v701_v1  ;;  %v9157_v10 = vld [vmem:[#allocation2 + $0x100] ss:$40 sps:$4 sm:$0xff]   ;;  %v9158_v1 = vld [vmem:[#allocation2 + $0x14c] ss:$40 sps:$4 sm:$0xff]  }
 0x393   :  { %v10684_v51 = vadd.f32 %v6701_v14, %v6549_v13  ;;  %v6551_v61 = vadd.f32 %v6550_v50, %v10511_v37  ;;  %v6703_v24 = vpop.f32.mrf.mxu1  ;;  %v689_v46 = vld [vmem:[#allocation5 + $0x1018] sm:$0xff]  ;;  %v8437_v17 = vcombine.high %v561_v43, %v565_v63 }
 0x394   :  { %v693_v40 = vld [vmem:[#allocation5 + $0x1038] sm:$0xff]  ;;  %v6552_v25 = vpop.f32.mrf.mxu0  ;;  %7421 = vmatpush1.bf16.msra.mxu0 %v8452_v60 }
 0x395   :  { %v10687_v59 = vadd.f32 %v6703_v24, %v6551_v61  ;;  %v6553_v49 = vadd.f32 %v6552_v25, %v10514_v44  ;;  %v6705_v12 = vpop.f32.mrf.mxu1  ;;  %7574 = vmatpush1.bf16.msra.mxu1 %v8580_v33  ;;  %7422 = vmatprep.subr.bf16.mxu0 %v8445_v36  ;;  %v9156_v27 = vld [vmem:[#allocation2 + $0xf8] ss:$40 sps:$4 sm:$0xff]   ;;  %v8565_v37 = vcombine.high %v689_v46, %v693_v40  ;;  %v9159_v36 = vld [vmem:[#allocation2 + $0x154] ss:$40 sps:$4 sm:$0xff]  }
 0x396   :  { %v6556_v8 = vpop.f32.mrf.mxu0  ;;  %7167 = vmatmul.mubr.bf16.gmra.mxu0 %v9156_v27  ;;  %7575 = vmatprep.subr.bf16.mxu1 %v8573_v57  ;;  %v681_v13 = vld [vmem:[#allocation5 + $0xfd8] sm:$0xff]  ;;  %v8436_v61 = vcombine.low %v561_v43, %v565_v63  ;;  %v8564_v57 = vcombine.low %v689_v46, %v693_v40 }
 0x397   :  { %v685_v14 = vld [vmem:[#allocation5 + $0xff8] sm:$0xff]  ;;  %v10690_v50 = vadd.f32 %v6705_v12, %v6553_v49  ;;  %v6557_v22 = vadd.f32 %v6556_v8, %v10517_v28  ;;  %v6709_v15 = vpop.f32.mrf.mxu1  ;;  %7320 = vmatmul.mubr.bf16.gmra.mxu1 %v9157_v10  ;;  %7176 = vmatprep.mubr.bf16.mxu0 %v9158_v1 }
 0x398   :  { %v809_v44 = vld [vmem:[#allocation5 + $0x13d8] sm:$0xff]  ;;  %v6558_v33 = vpop.f32.mrf.mxu0  ;;  %7329 = vmatprep.mubr.bf16.mxu1 %v9159_v36  ;;  %7423 = vmatpush1.bf16.msra.mxu0 %v8444_v19  ;;  %v8557_v28 = vcombine.high %v681_v13, %v685_v14  ;;  %v8556_v40 = vcombine.low %v681_v13, %v685_v14 }
 0x399   :  { %v813_v60 = vld [vmem:[#allocation5 + $0x13f8] sm:$0xff]  ;;  %v10693_v24 = vadd.f32 %v6709_v15, %v6557_v22  ;;  %v6559_v25 = vadd.f32 %v6558_v33, %v10520_v6  ;;  %v6711_v49 = vpop.f32.mrf.mxu1  ;;  %7576 = vmatpush1.bf16.msra.mxu1 %v8572_v58  ;;  %7424 = vmatprep.subr.bf16.mxu0 %v8437_v17  ;;  %v9160_v33 = vld [vmem:[#allocation2 + $0x148] ss:$40 sps:$4 sm:$0xff]  }
 0x39a   :  { %v6560_v12 = vpop.f32.mrf.mxu0  ;;  %7577 = vmatprep.subr.bf16.mxu1 %v8565_v37  ;;  %v8685_v8 = vcombine.high %v809_v44, %v813_v60  ;;  %v673_v27 = vld [vmem:[#allocation5 + $0xf98] sm:$0xff]  ;;  %v8684_v6 = vcombine.low %v809_v44, %v813_v60 }
 0x39b   :  { %v677_v10 = vld [vmem:[#allocation5 + $0xfb8] sm:$0xff]  ;;  %v10696_v1 = vadd.f32 %v6711_v49, %v6559_v25  ;;  %v6561_v36 = vadd.f32 %v6560_v12, %v10523_v4  ;;  %v6713_v19 = vpop.f32.mrf.mxu1 }
 0x39c   :  { %v801_v43 = vld [vmem:[#allocation5 + $0x1398] sm:$0xff]  ;;  %v6562_v46 = vpop.f32.mrf.mxu0  ;;  %7425 = vmatpush1.bf16.msra.mxu0 %v8436_v61  ;;  %v8549_v37 = vcombine.high %v673_v27, %v677_v10 }
 0x39d   :  { %v805_v63 = vld [vmem:[#allocation5 + $0x13b8] sm:$0xff]  ;;  %v10699_v22 = vadd.f32 %v6713_v19, %v6561_v36  ;;  %v6563_v58 = vadd.f32 %v6562_v46, %v10526_v20  ;;  %v6715_v17 = vpop.f32.mrf.mxu1  ;;  %7578 = vmatpush1.bf16.msra.mxu1 %v8564_v57  ;;  %7426 = vmatprep.subr.bf16.mxu0 %v8557_v28  ;;  %v9163_v28 = vld [vmem:[#allocation2 + $0x1a4] ss:$40 sps:$4 sm:$0xff]   ;;  %v8548_v36 = vcombine.low %v673_v27, %v677_v10 }
 0x39e   :  { %v6566_v15 = vpop.f32.mrf.mxu0  ;;  %7177 = vmatmul.mubr.bf16.gmra.mxu0 %v9160_v33  ;;  %7579 = vmatprep.subr.bf16.mxu1 %v8685_v8  ;;  %v8677_v4 = vcombine.high %v801_v43, %v805_v63  ;;  %v665_v25 = vld [vmem:[#allocation5 + $0xf58] sm:$0xff]  ;;  %v8676_v8 = vcombine.low %v801_v43, %v805_v63 }
 0x39f   :  { %v669_v49 = vld [vmem:[#allocation5 + $0xf78] sm:$0xff]  ;;  %v10702_v12 = vadd.f32 %v6715_v17, %v6563_v58  ;;  %v6567_v13 = vadd.f32 %v6566_v15, %v10529_v53  ;;  %v6719_v14 = vpop.f32.mrf.mxu1 }
 0x3a0   :  { %v9161_v44 = vld [vmem:[#allocation2 + $0x150] ss:$40 sps:$4 sm:$0xff]   ;;  %v9162_v60 = vld [vmem:[#allocation2 + $0x19c] ss:$40 sps:$4 sm:$0xff]   ;;  %v6568_v57 = vpop.f32.mrf.mxu0  ;;  %7427 = vmatpush2.bf16.msra.mxu0 %v8556_v40  ;;  %v8541_v53 = vcombine.high %v665_v25, %v669_v49  ;;  %v8540_v63 = vcombine.low %v665_v25, %v669_v49 }
 0x3a1   :  { %7330 = vmatmul.mubr.bf16.gmra.mxu1 %v9161_v44  ;;  %7186 = vmatprep.mubr.bf16.mxu0 %v9162_v60  ;;  %v793_v20 = vld [vmem:[#allocation5 + $0x1358] sm:$0xff]  ;;  %v10705_v19 = vadd.f32 %v6719_v14, %v6567_v13  ;;  %v6569_v46 = vadd.f32 %v6568_v57, %v10532_v3  ;;  %v6721_v58 = vpop.f32.mrf.mxu1 }
 0x3a2   :  { %v797_v61 = vld [vmem:[#allocation5 + $0x1378] sm:$0xff]  ;;  %7339 = vmatprep.mubr.bf16.mxu1 %v9163_v28  ;;  %7580 = vmatpush2.bf16.msra.mxu1 %v8684_v6  ;;  %v6570_v17 = vpop.f32.mrf.mxu0 }
 0x3a3   :  { %7428 = vmatprep.subr.bf16.mxu0 %v8549_v37  ;;  %7581 = vmatprep.subr.bf16.mxu1 %v8677_v4  ;;  %v8669_v15 = vcombine.high %v793_v20, %v797_v61  ;;  %v657_v33 = vld [vmem:[#allocation5 + $0xf18] sm:$0xff]  ;;  %v10708_v60 = vadd.f32 %v6721_v58, %v6569_v46  ;;  %v6571_v28 = vadd.f32 %v6570_v17, %v10535_v54  ;;  %v6723_v40 = vpop.f32.mrf.mxu1 }
 0x3a4   :  { %v661_v44 = vld [vmem:[#allocation5 + $0xf38] sm:$0xff]  ;;  %v6572_v43 = vpop.f32.mrf.mxu0  ;;  %7429 = vmatpush2.bf16.msra.mxu0 %v8548_v36  ;;  %v8668_v3 = vcombine.low %v793_v20, %v797_v61  ;;  %v9165_v20 = vld [vmem:[#allocation2 + $0x1a0] ss:$40 sps:$4 sm:$0xff]   ;;  %v9166_v61 = vld [vmem:[#allocation2 + $0x1ec] ss:$40 sps:$4 sm:$0xff]  }
 0x3a5   :  { %v785_v27 = vld [vmem:[#allocation5 + $0x1318] sm:$0xff]  ;;  %v10711_v13 = vadd.f32 %v6723_v40, %v6571_v28  ;;  %v6573_v6 = vadd.f32 %v6572_v43, %v10538_v30  ;;  %v6725_v37 = vpop.f32.mrf.mxu1  ;;  %7430 = vmatprep.subr.bf16.mxu0 %v8541_v53  ;;  %v8533_v4 = vcombine.high %v657_v33, %v661_v44  ;;  %v8532_v28 = vcombine.low %v657_v33, %v661_v44 }
 0x3a6   :  { %v789_v10 = vld [vmem:[#allocation5 + $0x1338] sm:$0xff]  ;;  %7582 = vmatpush2.bf16.msra.mxu1 %v8676_v8  ;;  %v6576_v14 = vpop.f32.mrf.mxu0 }
 0x3a7   :  { %v9164_v57 = vld [vmem:[#allocation2 + $0x198] ss:$40 sps:$4 sm:$0xff]   ;;  %7583 = vmatprep.subr.bf16.mxu1 %v8669_v15  ;;  %v8661_v54 = vcombine.high %v785_v27, %v789_v10  ;;  %v10714_v17 = vadd.f32 %v6725_v37, %v6573_v6  ;;  %v6577_v25 = vadd.f32 %v6576_v14, %v10541_v29  ;;  %v6729_v49 = vpop.f32.mrf.mxu1  ;;  %v9167_v53 = vld [vmem:[#allocation2 + $0x1f4] ss:$40 sps:$4 sm:$0xff]   ;;  %v8660_v15 = vcombine.low %v785_v27, %v789_v10 }
 0x3a8   :  { %7187 = vmatmul.mubr.bf16.gmra.mxu0 %v9164_v57  ;;  %v649_v46 = vld [vmem:[#allocation5 + $0xed8] sm:$0xff]  ;;  %v6578_v8 = vpop.f32.mrf.mxu0 }
 0x3a9   :  { %v653_v58 = vld [vmem:[#allocation5 + $0xef8] sm:$0xff]  ;;  %7340 = vmatmul.mubr.bf16.gmra.mxu1 %v9165_v20  ;;  %7196 = vmatprep.mubr.bf16.mxu0 %v9166_v61  ;;  %v10717_v40 = vadd.f32 %v6729_v49, %v6577_v25  ;;  %v6579_v43 = vadd.f32 %v6578_v8, %v10544_v45  ;;  %v6731_v6 = vpop.f32.mrf.mxu1  ;;  %v9168_v8 = vld [vmem:[#allocation2 + $0x1e8] ss:$40 sps:$4 sm:$0xff]  }
 0x3aa   :  { %v777_v30 = vld [vmem:[#allocation5 + $0x12d8] sm:$0xff]  ;;  %7349 = vmatprep.mubr.bf16.mxu1 %v9167_v53  ;;  %7431 = vmatpush2.bf16.msra.mxu0 %v8540_v63  ;;  %v8525_v29 = vcombine.high %v649_v46, %v653_v58  ;;  %v6580_v37 = vpop.f32.mrf.mxu0  ;;  %v8524_v10 = vcombine.low %v649_v46, %v653_v58 }
 0x3ab   :  { %v781_v36 = vld [vmem:[#allocation5 + $0x12f8] sm:$0xff]  ;;  %7584 = vmatpush2.bf16.msra.mxu1 %v8668_v3  ;;  %7432 = vmatprep.subr.bf16.mxu0 %v8533_v4  ;;  %v10720_v61 = vadd.f32 %v6731_v6, %v6579_v43  ;;  %v6581_v53 = vadd.f32 %v6580_v37, %v10547_v35  ;;  %v6733_v63 = vpop.f32.mrf.mxu1 }
 0x3ac   :  { %7585 = vmatprep.subr.bf16.mxu1 %v8661_v54  ;;  %v8653_v14 = vcombine.high %v777_v30, %v781_v36  ;;  %v641_v57 = vld [vmem:[#allocation5 + $0xe98] sm:$0xff]  ;;  %v6582_v27 = vpop.f32.mrf.mxu0  ;;  %v8652_v45 = vcombine.low %v777_v30, %v781_v36 }
 0x3ad   :  { %v645_v20 = vld [vmem:[#allocation5 + $0xeb8] sm:$0xff]  ;;  %v10723_v25 = vadd.f32 %v6733_v63, %v6581_v53  ;;  %v6583_v3 = vadd.f32 %v6582_v27, %v10550_v7  ;;  %v6735_v4 = vpop.f32.mrf.mxu1 }
 0x3ae   :  { %v769_v33 = vld [vmem:[#allocation5 + $0x1298] sm:$0xff]  ;;  %7433 = vmatpush2.bf16.msra.mxu0 %v8532_v28  ;;  %v8517_v54 = vcombine.high %v641_v57, %v645_v20  ;;  %v6586_v49 = vpop.f32.mrf.mxu0  ;;  %v8516_v53 = vcombine.low %v641_v57, %v645_v20 }
 0x3af   :  { %v773_v44 = vld [vmem:[#allocation5 + $0x12b8] sm:$0xff]  ;;  %7586 = vmatpush2.bf16.msra.mxu1 %v8660_v15  ;;  %7434 = vmatprep.subr.bf16.mxu0 %v8525_v29  ;;  %v10726_v37 = vadd.f32 %v6735_v4, %v6583_v3  ;;  %v6587_v46 = vadd.f32 %v6586_v49, %v10553_v47  ;;  %v6739_v58 = vpop.f32.mrf.mxu1  ;;  %v9171_v29 = vld [vmem:[#allocation2 + $0x244] ss:$40 sps:$4 sm:$0xff]  }
 0x3b0   :  { %7197 = vmatmul.mubr.bf16.gmra.mxu0 %v9168_v8  ;;  %7587 = vmatprep.subr.bf16.mxu1 %v8653_v14  ;;  %v8645_v35 = vcombine.high %v769_v33, %v773_v44  ;;  %v633_v43 = vld [vmem:[#allocation5 + $0xe58] sm:$0xff]  ;;  %v6588_v15 = vpop.f32.mrf.mxu0  ;;  %v8644_v14 = vcombine.low %v769_v33, %v773_v44 }
 0x3b1   :  { %v637_v6 = vld [vmem:[#allocation5 + $0xe78] sm:$0xff]  ;;  %v10729_v63 = vadd.f32 %v6739_v58, %v6587_v46  ;;  %v6589_v27 = vadd.f32 %v6588_v15, %v10556_v62  ;;  %v6741_v3 = vpop.f32.mrf.mxu1 }
 0x3b2   :  { %v9169_v30 = vld [vmem:[#allocation2 + $0x1f0] ss:$40 sps:$4 sm:$0xff]   ;;  %v9170_v36 = vld [vmem:[#allocation2 + $0x23c] ss:$40 sps:$4 sm:$0xff]   ;;  %7435 = vmatpush2.bf16.msra.mxu0 %v8524_v10  ;;  %v8509_v47 = vcombine.high %v633_v43, %v637_v6  ;;  %v6590_v4 = vpop.f32.mrf.mxu0  ;;  %v8508_v44 = vcombine.low %v633_v43, %v637_v6  ;;  %v9173_v43 = vld [vmem:[#allocation2 + $0x240] ss:$40 sps:$4 sm:$0xff]  }
 0x3b3   :  { %7350 = vmatmul.mubr.bf16.gmra.mxu1 %v9169_v30  ;;  %7206 = vmatprep.mubr.bf16.mxu0 %v9170_v36  ;;  %v761_v7 = vld [vmem:[#allocation5 + $0x1258] sm:$0xff]  ;;  %v10732_v36 = vadd.f32 %v6741_v3, %v6589_v27  ;;  %v6743_v10 = vpop.f32.mrf.mxu1  ;;  %v9174_v6 = vld [vmem:[#allocation2 + $0x28c] ss:$40 sps:$4 sm:$0xff]  }
 0x3b4   :  { %v765_v28 = vld [vmem:[#allocation5 + $0x1278] sm:$0xff]  ;;  %7359 = vmatprep.mubr.bf16.mxu1 %v9171_v29  ;;  %7588 = vmatpush2.bf16.msra.mxu1 %v8652_v45  ;;  %v6591_v29 = vadd.f32 %v6590_v4, %v10559_v26  ;;  %v6592_v33 = vpop.f32.mrf.mxu0 }
 0x3b5   :  { %7436 = vmatprep.subr.bf16.mxu0 %v8517_v54  ;;  %7589 = vmatprep.subr.bf16.mxu1 %v8645_v35  ;;  %v8637_v49 = vcombine.high %v761_v7, %v765_v28  ;;  %v625_v8 = vld [vmem:[#allocation5 + $0xe18] sm:$0xff]  ;;  %v8636_v62 = vcombine.low %v761_v7, %v765_v28  ;;  %v6593_v45 = vadd.f32 %v6592_v33, %v10566_v41  ;;  %v6745_v54 = vpop.f32.mrf.mxu1 }
 0x3b6   :  { %v629_v30 = vld [vmem:[#allocation5 + $0xe38] sm:$0xff]  ;;  %7437 = vmatpush2.bf16.msra.mxu0 %v8516_v53  ;;  %v10735_v46 = vadd.f32 %v6743_v10, %v6591_v29  ;;  %v6596_v58 = vpop.f32.mrf.mxu0 }
 0x3b7   :  { %v753_v57 = vld [vmem:[#allocation5 + $0x1218] sm:$0xff]  ;;  %7438 = vmatprep.subr.bf16.mxu0 %v8509_v47  ;;  %v8501_v35 = vcombine.high %v625_v8, %v629_v30  ;;  %v10738_v27 = vadd.f32 %v6745_v54, %v6593_v45  ;;  %v6597_v3 = vadd.f32 %v6596_v58, %v10573_v21  ;;  %v6749_v53 = vpop.f32.mrf.mxu1  ;;  %v8500_v28 = vcombine.low %v625_v8, %v629_v30 }
 0x3b8   :  { %v757_v20 = vld [vmem:[#allocation5 + $0x1238] sm:$0xff]  ;;  %7590 = vmatpush2.bf16.msra.mxu1 %v8644_v14  ;;  %v6598_v7 = vpop.f32.mrf.mxu0 }
 0x3b9   :  { %v9172_v15 = vld [vmem:[#allocation2 + $0x238] ss:$40 sps:$4 sm:$0xff]   ;;  %7591 = vmatprep.subr.bf16.mxu1 %v8637_v49  ;;  %v8629_v26 = vcombine.high %v753_v57, %v757_v20  ;;  %v9175_v41 = vld [vmem:[#allocation2 + $0x294] ss:$40 sps:$4 sm:$0xff]   ;;  %v10741_v14 = vadd.f32 %v6749_v53, %v6597_v3  ;;  %v6599_v47 = vadd.f32 %v6598_v7, %v10580_v48  ;;  %v6751_v4 = vpop.f32.mrf.mxu1  ;;  %v8628_v49 = vcombine.low %v753_v57, %v757_v20 }
 0x3ba   :  { %7207 = vmatmul.mubr.bf16.gmra.mxu0 %v9172_v15  ;;  %v6600_v29 = vpop.f32.mrf.mxu0  ;;  %v9179_v15 = vld [vmem:[#allocation2 + $0x2e4] ss:$40 sps:$4 sm:$0xff]  }
 0x3bb   :  { %7360 = vmatmul.mubr.bf16.gmra.mxu1 %v9173_v43  ;;  %7216 = vmatprep.mubr.bf16.mxu0 %v9174_v6  ;;  %v10744_v21 = vadd.f32 %v6751_v4, %v6599_v47  ;;  %v6601_v10 = vadd.f32 %v6600_v29, %v10583_v18  ;;  %v6753_v33 = vpop.f32.mrf.mxu1  ;;  %v9178_v18 = vld [vmem:[#allocation2 + $0x2dc] ss:$40 sps:$4 sm:$0xff]  }
 0x3bc   :  { %7369 = vmatprep.mubr.bf16.mxu1 %v9175_v41  ;;  %7439 = vmatpush2.bf16.msra.mxu0 %v8508_v44  ;;  %v6602_v45 = vpop.f32.mrf.mxu0  ;;  %v9176_v44 = vld [vmem:[#allocation2 + $0x288] ss:$40 sps:$4 sm:$0xff]  }
 0x3bd   :  { %7592 = vmatpush2.bf16.msra.mxu1 %v8636_v62  ;;  %7440 = vmatprep.subr.bf16.mxu0 %v8501_v35  ;;  %v10747_v54 = vadd.f32 %v6753_v33, %v6601_v10  ;;  %v6603_v8 = vadd.f32 %v6602_v45, %v10586_v11  ;;  %v6755_v30 = vpop.f32.mrf.mxu1  ;;  %v9177_v35 = vld [vmem:[#allocation2 + $0x290] ss:$40 sps:$4 sm:$0xff]   ;;  %v9181_v33 = vld [vmem:[#allocation2 + $0x2e0] ss:$40 sps:$4 sm:$0xff]   ;;  %v9182_v45 = vld [vmem:[#allocation2 + $0x32c] ss:$40 sps:$4 sm:$0xff]  }
 0x3be   :  { %7593 = vmatprep.subr.bf16.mxu1 %v8629_v26  ;;  %v6606_v48 = vpop.f32.mrf.mxu0 }
 0x3bf   :  { %v10750_v62 = vadd.f32 %v6755_v30, %v6603_v8  ;;  %v6607_v57 = vadd.f32 %v6606_v48, %v10589_v34  ;;  %v6759_v20 = vpop.f32.mrf.mxu1  ;;  %v9183_v8 = vld [vmem:[#allocation2 + $0x334] ss:$40 sps:$4 sm:$0xff]   ;;  %v11290_v48 = vld [vmem:[#allocation20_spill] sm:$0xff] }
 0x3c0   :  { %7441 = vmatpush2.bf16.msra.mxu0 %v8500_v28  ;;  %v6608_v58 = vpop.f32.mrf.mxu0 }
 0x3c1   :  { %7594 = vmatpush2.bf16.msra.mxu1 %v8628_v49  ;;  %v10753_v26 = vadd.f32 %v6759_v20, %v6607_v57  ;;  %v6609_v11 = vadd.f32 %v6608_v58, %v10592_v52  ;;  %v6761_v3 = vpop.f32.mrf.mxu1  ;;  %v9180_v49 = vld [vmem:[#allocation2 + $0x2d8] ss:$40 sps:$4 sm:$0xff]  }
 0x3c2   :  { %7217 = vmatmul.mubr.bf16.gmra.mxu0 %v9176_v44  ;;  %v6610_v53 = vpop.f32.mrf.mxu0 }
 0x3c3   :  { %7370 = vmatmul.mubr.bf16.gmra.mxu1 %v9177_v35  ;;  %7226 = vmatprep.mubr.bf16.mxu0 %v9178_v18  ;;  %v10756_v43 = vadd.f32 %v6761_v3, %v6609_v11  ;;  %v6611_v6 = vadd.f32 %v6610_v53, %v10595_v55  ;;  %v6763_v7 = vpop.f32.mrf.mxu1  ;;  %v11291_v35 = vld [vmem:[#allocation23_spill] sm:$0xff]  ;;  %v11292_v11 = vld [vmem:[#allocation21_spill] sm:$0xff] }
 0x3c4   :  { %7379 = vmatprep.mubr.bf16.mxu1 %v9179_v15  ;;  %v6612_v34 = vpop.f32.mrf.mxu0 }
 0x3c5   :  { %v10759_v41 = vadd.f32 %v6763_v7, %v6611_v6  ;;  %v6613_v28 = vadd.f32 %v6612_v34, %v10598_v56  ;;  %v6765_v47 = vpop.f32.mrf.mxu1  ;;  %v9184_v7 = vld [vmem:[#allocation2 + $0x328] ss:$40 sps:$4 sm:$0xff]  }
 0x3c6   :  { %v6616_v4 = vpop.f32.mrf.mxu0 }
 0x3c7   :  { %v10762_v29 = vadd.f32 %v6765_v47, %v6613_v28  ;;  %v6617_v52 = vadd.f32 %v6616_v4, %v10601_v0  ;;  %v6769_v10 = vpop.f32.mrf.mxu1  ;;  %v11293_v28 = vld [vmem:[#allocation22_spill] sm:$0xff] }
 0x3c8   :  { %v6618_v55 = vpop.f32.mrf.mxu0 }
 0x3c9   :  { %v10765_v30 = vadd.f32 %v6769_v10, %v6617_v52  ;;  %v6619_v56 = vadd.f32 %v6618_v55, %v11290_v48  ;;  %v6771_v44 = vpop.f32.mrf.mxu1  ;;  %v9186_v52 = vld [vmem:[#allocation2 + $0x37c] ss:$40 sps:$4 sm:$0xff]   ;;  %v11294_v55 = vld [vmem:[#allocation13_spill] sm:$0xff] }
 0x3ca   :  { %7227 = vmatmul.mubr.bf16.gmra.mxu0 %v9180_v49  ;;  %v6620_v57 = vpop.f32.mrf.mxu0  ;;  %v9185_v49 = vld [vmem:[#allocation2 + $0x330] ss:$40 sps:$4 sm:$0xff]  }
 0x3cb   :  { %7380 = vmatmul.mubr.bf16.gmra.mxu1 %v9181_v33  ;;  %7236 = vmatprep.mubr.bf16.mxu0 %v9182_v45  ;;  %v10768_v20 = vadd.f32 %v6771_v44, %v6619_v56  ;;  %v6621_v18 = vadd.f32 %v6620_v57, %v11291_v35  ;;  %v6773_v58 = vpop.f32.mrf.mxu1  ;;  %v9187_v33 = vld [vmem:[#allocation2 + $0x384] ss:$40 sps:$4 sm:$0xff]   ;;  %v11295_v57 = vld [vmem:[#allocation14_spill] sm:$0xff] }
 0x3cc   :  { %7389 = vmatprep.mubr.bf16.mxu1 %v9183_v8  ;;  %v6622_v0 = vpop.f32.mrf.mxu0 }
 0x3cd   :  { %v10771_v15 = vadd.f32 %v6773_v58, %v6621_v18  ;;  %v6623_v3 = vadd.f32 %v6622_v0, %v11292_v11  ;;  %v6775_v53 = vpop.f32.mrf.mxu1  ;;  %v11296_v11 = vld [vmem:[#allocation15_spill] sm:$0xff] }
 0x3ce   :  { %v6626_v6 = vpop.f32.mrf.mxu0 }
 0x3cf   :  { %v10774_v34 = vadd.f32 %v6775_v53, %v6623_v3  ;;  %v6627_v47 = vadd.f32 %v6626_v6, %v11293_v28  ;;  %v6779_v4 = vpop.f32.mrf.mxu1 }
 0x3d0   :  { %v6628_v10 = vpop.f32.mrf.mxu0 }
 0x3d1   :  { %v10777_v45 = vadd.f32 %v6779_v4, %v6627_v47  ;;  %v6629_v8 = vadd.f32 %v6628_v10, %v11294_v55  ;;  %v6781_v48 = vpop.f32.mrf.mxu1  ;;  %v11297_v47 = vld [vmem:[#allocation16_spill] sm:$0xff]  ;;  %v9190_v10 = vld [vmem:[#allocation2 + $0x1c] ss:$40 sps:$4 sm:$0xff]  }
 0x3d2   :  { %7237 = vmatmul.mubr.bf16.gmra.mxu0 %v9184_v7  ;;  %v6630_v56 = vpop.f32.mrf.mxu0  ;;  %v9188_v7 = vld [vmem:[#allocation2 + $0x378] ss:$40 sps:$4 sm:$0xff]   ;;  %v9191_v55 = vld [vmem:[#allocation2 + $0x24] ss:$40 sps:$4 sm:$0xff]  }
 0x3d3   :  { %7390 = vmatmul.mubr.bf16.gmra.mxu1 %v9185_v49  ;;  %7246 = vmatprep.mubr.bf16.mxu0 %v9186_v52  ;;  %v10780_v44 = vadd.f32 %v6781_v48, %v6629_v8  ;;  %v6631_v35 = vadd.f32 %v6630_v56, %v11295_v57  ;;  %v6783_v18 = vpop.f32.mrf.mxu1  ;;  %v9189_v52 = vld [vmem:[#allocation2 + $0x380] ss:$40 sps:$4 sm:$0xff]   ;;  %v11298_v48 = vld [vmem:[#allocation17_spill] sm:$0xff] }
 0x3d4   :  { %7399 = vmatprep.mubr.bf16.mxu1 %v9187_v33  ;;  %v6632_v58 = vpop.f32.mrf.mxu0 }
 0x3d5   :  { %v10783_v0 = vadd.f32 %v6783_v18, %v6631_v35  ;;  %v6633_v3 = vadd.f32 %v6632_v58, %v11296_v11  ;;  %v6785_v53 = vpop.f32.mrf.mxu1  ;;  %v11299_v58 = vld [vmem:[#allocation18_spill] sm:$0xff] }
 0x3d6   :  { %v6636_v6 = vpop.f32.mrf.mxu0 }
 0x3d7   :  { %v10786_v28 = vadd.f32 %v6785_v53, %v6633_v3  ;;  %v6637_v4 = vadd.f32 %v6636_v6, %v11297_v47  ;;  %v6789_v49 = vpop.f32.mrf.mxu1 }
 0x3d8   :  { %v6638_v33 = vpop.f32.mrf.mxu0 }
 0x3d9   :  { %v10789_v8 = vadd.f32 %v6789_v49, %v6637_v4  ;;  %v6639_v56 = vadd.f32 %v6638_v33, %v11298_v48  ;;  %v6791_v57 = vpop.f32.mrf.mxu1  ;;  %v9194_v48 = vld [vmem:[#allocation2 + $0x6c] ss:$40 sps:$4 sm:$0xff]  }
 0x3da   :  { %7247 = vmatmul.mubr.bf16.gmra.mxu0 %v9188_v7  ;;  %v6640_v35 = vpop.f32.mrf.mxu0 }
 0x3db   :  { %7400 = vmatmul.mubr.bf16.gmra.mxu1 %v9189_v52  ;;  %7442 = vmatprep.mubr.bf16.mxu0 %v9190_v10  ;;  %v10792_v18 = vadd.f32 %v6791_v57, %v6639_v56  ;;  %v6641_v11 = vadd.f32 %v6640_v35, %v11299_v58  ;;  %v6793_v3 = vpop.f32.mrf.mxu1  ;;  %v9192_v10 = vld [vmem:[#allocation2 + $0x18] ss:$40 sps:$4 sm:$0xff]   ;;  %v9195_v57 = vld [vmem:[#allocation2 + $0x74] ss:$40 sps:$4 sm:$0xff]  }
 0x3dc   :  { %7595 = vmatprep.mubr.bf16.mxu1 %v9191_v55  ;;  %v6642_v53 = vpop.f32.mrf.mxu0  ;;  %v9193_v55 = vld [vmem:[#allocation2 + $0x20] ss:$40 sps:$4 sm:$0xff]  }
 0x3dd   :  { %v10795_v6 = vadd.f32 %v6793_v3, %v6641_v11  ;;  %v6643_v7 = vadd.f32 %v6642_v53, %v10642_v42  ;;  %v6795_v47 = vpop.f32.mrf.mxu1 }
 0x3de   :  { %v6832_v52 = vpop.f32.mrf.mxu0 }
 0x3df   :  { %v10798_v4 = vadd.f32 %v6795_v47, %v6643_v7  ;;  %v6833_v49 = vadd.f32 %v6832_v52, %v10645_v31  ;;  %v10801_v33 = vpop.f32.mrf.mxu1  ;;  %v9196_v52 = vld [vmem:[#allocation2 + $0x68] ss:$40 sps:$4 sm:$0xff]  }
 0x3e0   :  { %v6834_v56 = vpop.f32.mrf.mxu0 }
 0x3e1   :  { %7720 = vst [vmem:[#allocation8 + $0x20] sm:$0xff] %v6833_v49  ;;  %v6835_v42 = vadd.f32 %v6834_v56, %v10650_v9  ;;  %v10804_v35 = vpop.f32.mrf.mxu1  ;;  %v9197_v49 = vld [vmem:[#allocation2 + $0x70] ss:$40 sps:$4 sm:$0xff]  }
 0x3e2   :  { %7443 = vmatmul.mubr.bf16.vlgmr.msra.gmra.mxu0 %v9192_v10  ;;  %v6836_v58 = vpop.f32.mrf.mxu0 }
 0x3e3   :  { %7596 = vmatmul.mubr.bf16.vlgmr.msra.gmra.mxu1 %v9193_v55  ;;  %7452 = vmatprep.mubr.bf16.mxu0 %v9194_v48  ;;  %7721 = vst [vmem:[#allocation8 + $0x28] sm:$0xff] %v6835_v42  ;;  %v6837_v11 = vadd.f32 %v6836_v58, %v10653_v5  ;;  %v10807_v3 = vpop.f32.mrf.mxu1  ;;  %v9198_v55 = vld [vmem:[#allocation2 + $0xbc] ss:$40 sps:$4 sm:$0xff]  }
 0x3e4   :  { %7605 = vmatprep.mubr.bf16.mxu1 %v9195_v57  ;;  %v6838_v31 = vpop.f32.mrf.mxu0  ;;  %v9199_v48 = vld [vmem:[#allocation2 + $0xc4] ss:$40 sps:$4 sm:$0xff]  }
 0x3e5   :  { %7728 = vst [vmem:[#allocation8 + $0x60] sm:$0xff] %v6837_v11  ;;  %v6839_v53 = vadd.f32 %v6838_v31, %v10662_v32  ;;  %v10810_v7 = vpop.f32.mrf.mxu1 }
 0x3e6   :  { %v6842_v47 = vpop.f32.mrf.mxu0 }
 0x3e7   :  { %7729 = vst [vmem:[#allocation8 + $0x68] sm:$0xff] %v6839_v53  ;;  %v6843_v9 = vadd.f32 %v6842_v47, %v10667_v23  ;;  %v10813_v10 = vpop.f32.mrf.mxu1  ;;  %v9200_v47 = vld [vmem:[#allocation2 + $0xb8] ss:$40 sps:$4 sm:$0xff]  }
 0x3e8   :  { %v6844_v5 = vpop.f32.mrf.mxu0 }
 0x3e9   :  { %7736 = vst [vmem:[#allocation8 + $0xa0] sm:$0xff] %v6843_v9  ;;  %v6845_v32 = vadd.f32 %v6844_v5, %v10670_v16  ;;  %v10816_v56 = vpop.f32.mrf.mxu1  ;;  %v9201_v9 = vld [vmem:[#allocation2 + $0xc0] ss:$40 sps:$4 sm:$0xff]  }
 0x3ea   :  { %7453 = vmatmul.mubr.bf16.gmra.mxu0 %v9196_v52  ;;  %v6846_v57 = vpop.f32.mrf.mxu0 }
 0x3eb   :  { %7606 = vmatmul.mubr.bf16.gmra.mxu1 %v9197_v49  ;;  %7462 = vmatprep.mubr.bf16.mxu0 %v9198_v55  ;;  %7737 = vst [vmem:[#allocation8 + $0xa8] sm:$0xff] %v6845_v32  ;;  %v6847_v42 = vadd.f32 %v6846_v57, %v10675_v38  ;;  %v10819_v58 = vpop.f32.mrf.mxu1  ;;  %v9202_v49 = vld [vmem:[#allocation2 + $0x10c] ss:$40 sps:$4 sm:$0xff]  }
 0x3ec   :  { %7615 = vmatprep.mubr.bf16.mxu1 %v9199_v48  ;;  %v6848_v23 = vpop.f32.mrf.mxu0  ;;  %v9203_v55 = vld [vmem:[#allocation2 + $0x114] ss:$40 sps:$4 sm:$0xff]  }
 0x3ed   :  { %7744 = vst [vmem:[#allocation8 + $0xe0] sm:$0xff] %v6847_v42  ;;  %v6849_v11 = vadd.f32 %v6848_v23, %v10678_v39  ;;  %v10822_v31 = vpop.f32.mrf.mxu1 }
 0x3ee   :  { %v6852_v53 = vpop.f32.mrf.mxu0 }
 0x3ef   :  { %7745 = vst [vmem:[#allocation8 + $0xe8] sm:$0xff] %v6849_v11  ;;  %v6853_v16 = vadd.f32 %v6852_v53, %v10681_v2  ;;  %v10825_v52 = vpop.f32.mrf.mxu1  ;;  %v9204_v53 = vld [vmem:[#allocation2 + $0x108] ss:$40 sps:$4 sm:$0xff]  }
 0x3f0   :  { %v6854_v38 = vpop.f32.mrf.mxu0 }
 0x3f1   :  { %7752 = vst [vmem:[#allocation8 + $0x120] sm:$0xff] %v6853_v16  ;;  %v6855_v39 = vadd.f32 %v6854_v38, %v10684_v51  ;;  %v10828_v5 = vpop.f32.mrf.mxu1  ;;  %v9205_v16 = vld [vmem:[#allocation2 + $0x110] ss:$40 sps:$4 sm:$0xff]  }
 0x3f2   :  { %7463 = vmatmul.mubr.bf16.gmra.mxu0 %v9200_v47  ;;  %v6856_v48 = vpop.f32.mrf.mxu0 }
 0x3f3   :  { %7616 = vmatmul.mubr.bf16.gmra.mxu1 %v9201_v9  ;;  %7472 = vmatprep.mubr.bf16.mxu0 %v9202_v49  ;;  %7753 = vst [vmem:[#allocation8 + $0x128] sm:$0xff] %v6855_v39  ;;  %v6857_v32 = vadd.f32 %v6856_v48, %v10687_v59  ;;  %v10831_v57 = vpop.f32.mrf.mxu1  ;;  %v9206_v9 = vld [vmem:[#allocation2 + $0x15c] ss:$40 sps:$4 sm:$0xff]  }
 0x3f4   :  { %7625 = vmatprep.mubr.bf16.mxu1 %v9203_v55  ;;  %v6858_v2 = vpop.f32.mrf.mxu0  ;;  %v9207_v49 = vld [vmem:[#allocation2 + $0x164] ss:$40 sps:$4 sm:$0xff]  }
 0x3f5   :  { %7760 = vst [vmem:[#allocation8 + $0x160] sm:$0xff] %v6857_v32  ;;  %v6859_v42 = vadd.f32 %v6858_v2, %v10690_v50  ;;  %v10834_v23 = vpop.f32.mrf.mxu1 }
 0x3f6   :  { %v6862_v11 = vpop.f32.mrf.mxu0 }
 0x3f7   :  { %7761 = vst [vmem:[#allocation8 + $0x168] sm:$0xff] %v6859_v42  ;;  %v6863_v51 = vadd.f32 %v6862_v11, %v10693_v24  ;;  %v10837_v47 = vpop.f32.mrf.mxu1  ;;  %v9208_v11 = vld [vmem:[#allocation2 + $0x158] ss:$40 sps:$4 sm:$0xff]  }
 0x3f8   :  { %v6864_v59 = vpop.f32.mrf.mxu0 }
 0x3f9   :  { %7768 = vst [vmem:[#allocation8 + $0x1a0] sm:$0xff] %v6863_v51  ;;  %v6865_v50 = vadd.f32 %v6864_v59, %v10696_v1  ;;  %v10840_v38 = vpop.f32.mrf.mxu1  ;;  %v9209_v51 = vld [vmem:[#allocation2 + $0x160] ss:$40 sps:$4 sm:$0xff]  }
 0x3fa   :  { %7473 = vmatmul.mubr.bf16.gmra.mxu0 %v9204_v53  ;;  %v6866_v55 = vpop.f32.mrf.mxu0 }
 0x3fb   :  { %7626 = vmatmul.mubr.bf16.gmra.mxu1 %v9205_v16  ;;  %7482 = vmatprep.mubr.bf16.mxu0 %v9206_v9  ;;  %7769 = vst [vmem:[#allocation8 + $0x1a8] sm:$0xff] %v6865_v50  ;;  %v6867_v39 = vadd.f32 %v6866_v55, %v10699_v22  ;;  %v10843_v48 = vpop.f32.mrf.mxu1  ;;  %v9210_v16 = vld [vmem:[#allocation2 + $0x1ac] ss:$40 sps:$4 sm:$0xff]  }
 0x3fc   :  { %7635 = vmatprep.mubr.bf16.mxu1 %v9207_v49  ;;  %v6868_v24 = vpop.f32.mrf.mxu0  ;;  %v9211_v9 = vld [vmem:[#allocation2 + $0x1b4] ss:$40 sps:$4 sm:$0xff]  }
 0x3fd   :  { %7776 = vst [vmem:[#allocation8 + $0x1e0] sm:$0xff] %v6867_v39  ;;  %v6869_v32 = vadd.f32 %v6868_v24, %v10702_v12  ;;  %v10846_v2 = vpop.f32.mrf.mxu1 }
 0x3fe   :  { %v6872_v42 = vpop.f32.mrf.mxu0 }
 0x3ff   :  { %7777 = vst [vmem:[#allocation8 + $0x1e8] sm:$0xff] %v6869_v32  ;;  %v6873_v1 = vadd.f32 %v6872_v42, %v10705_v19  ;;  %v10849_v53 = vpop.f32.mrf.mxu1  ;;  %v9212_v42 = vld [vmem:[#allocation2 + $0x1a8] ss:$40 sps:$4 sm:$0xff]  }
 0x400   :  { %v6874_v22 = vpop.f32.mrf.mxu0 }
 0x401   :  { %7784 = vst [vmem:[#allocation8 + $0x220] sm:$0xff] %v6873_v1  ;;  %v6875_v12 = vadd.f32 %v6874_v22, %v10708_v60  ;;  %v10852_v59 = vpop.f32.mrf.mxu1  ;;  %v9213_v1 = vld [vmem:[#allocation2 + $0x1b0] ss:$40 sps:$4 sm:$0xff]  }
 0x402   :  { %7483 = vmatmul.mubr.bf16.gmra.mxu0 %v9208_v11  ;;  %v6876_v49 = vpop.f32.mrf.mxu0 }
 0x403   :  { %7636 = vmatmul.mubr.bf16.gmra.mxu1 %v9209_v51  ;;  %7492 = vmatprep.mubr.bf16.mxu0 %v9210_v16  ;;  %7785 = vst [vmem:[#allocation8 + $0x228] sm:$0xff] %v6875_v12  ;;  %v6877_v50 = vadd.f32 %v6876_v49, %v10711_v13  ;;  %v10855_v55 = vpop.f32.mrf.mxu1  ;;  %v9214_v51 = vld [vmem:[#allocation2 + $0x1fc] ss:$40 sps:$4 sm:$0xff]  }
 0x404   :  { %7645 = vmatprep.mubr.bf16.mxu1 %v9211_v9  ;;  %v6878_v19 = vpop.f32.mrf.mxu0  ;;  %v9215_v16 = vld [vmem:[#allocation2 + $0x204] ss:$40 sps:$4 sm:$0xff]  }
 0x405   :  { %7792 = vst [vmem:[#allocation8 + $0x260] sm:$0xff] %v6877_v50  ;;  %v6879_v39 = vadd.f32 %v6878_v19, %v10714_v17  ;;  %v10858_v24 = vpop.f32.mrf.mxu1 }
 0x406   :  { %v6882_v32 = vpop.f32.mrf.mxu0 }
 0x407   :  { %7793 = vst [vmem:[#allocation8 + $0x268] sm:$0xff] %v6879_v39  ;;  %v6883_v60 = vadd.f32 %v6882_v32, %v10717_v40  ;;  %v10861_v11 = vpop.f32.mrf.mxu1  ;;  %v9216_v32 = vld [vmem:[#allocation2 + $0x1f8] ss:$40 sps:$4 sm:$0xff]  }
 0x408   :  { %v6884_v13 = vpop.f32.mrf.mxu0 }
 0x409   :  { %7800 = vst [vmem:[#allocation8 + $0x2a0] sm:$0xff] %v6883_v60  ;;  %v6885_v17 = vadd.f32 %v6884_v13, %v10720_v61  ;;  %v10864_v22 = vpop.f32.mrf.mxu1  ;;  %v9217_v60 = vld [vmem:[#allocation2 + $0x200] ss:$40 sps:$4 sm:$0xff]  }
 0x40a   :  { %7493 = vmatmul.mubr.bf16.gmra.mxu0 %v9212_v42  ;;  %v6886_v9 = vpop.f32.mrf.mxu0 }
 0x40b   :  { %7646 = vmatmul.mubr.bf16.gmra.mxu1 %v9213_v1  ;;  %7502 = vmatprep.mubr.bf16.mxu0 %v9214_v51  ;;  %7801 = vst [vmem:[#allocation8 + $0x2a8] sm:$0xff] %v6885_v17  ;;  %v6887_v12 = vadd.f32 %v6886_v9, %v10723_v25  ;;  %v10867_v49 = vpop.f32.mrf.mxu1  ;;  %v9218_v1 = vld [vmem:[#allocation2 + $0x24c] ss:$40 sps:$4 sm:$0xff]  }
 0x40c   :  { %7655 = vmatprep.mubr.bf16.mxu1 %v9215_v16  ;;  %v6888_v40 = vpop.f32.mrf.mxu0  ;;  %v9219_v51 = vld [vmem:[#allocation2 + $0x254] ss:$40 sps:$4 sm:$0xff]  }
 0x40d   :  { %7808 = vst [vmem:[#allocation8 + $0x2e0] sm:$0xff] %v6887_v12  ;;  %v6889_v50 = vadd.f32 %v6888_v40, %v10726_v37  ;;  %v10870_v19 = vpop.f32.mrf.mxu1 }
 0x40e   :  { %v6892_v39 = vpop.f32.mrf.mxu0 }
 0x40f   :  { %7809 = vst [vmem:[#allocation8 + $0x2e8] sm:$0xff] %v6889_v50  ;;  %v6893_v61 = vadd.f32 %v6892_v39, %v10729_v63  ;;  %v10873_v42 = vpop.f32.mrf.mxu1  ;;  %v9220_v39 = vld [vmem:[#allocation2 + $0x248] ss:$40 sps:$4 sm:$0xff]  }
 0x410   :  { %v6894_v25 = vpop.f32.mrf.mxu0 }
 0x411   :  { %7816 = vst [vmem:[#allocation8 + $0x320] sm:$0xff] %v6893_v61  ;;  %v6895_v37 = vadd.f32 %v6894_v25, %v10732_v36  ;;  %v10876_v13 = vpop.f32.mrf.mxu1  ;;  %v9221_v61 = vld [vmem:[#allocation2 + $0x250] ss:$40 sps:$4 sm:$0xff]  }
 0x412   :  { %7503 = vmatmul.mubr.bf16.gmra.mxu0 %v9216_v32  ;;  %v6896_v16 = vpop.f32.mrf.mxu0 }
 0x413   :  { %7656 = vmatmul.mubr.bf16.gmra.mxu1 %v9217_v60  ;;  %7512 = vmatprep.mubr.bf16.mxu0 %v9218_v1  ;;  %7817 = vst [vmem:[#allocation8 + $0x328] sm:$0xff] %v6895_v37  ;;  %v6897_v17 = vadd.f32 %v6896_v16, %v10735_v46  ;;  %v10879_v9 = vpop.f32.mrf.mxu1  ;;  %v9222_v60 = vld [vmem:[#allocation2 + $0x29c] ss:$40 sps:$4 sm:$0xff]  }
 0x414   :  { %7665 = vmatprep.mubr.bf16.mxu1 %v9219_v51  ;;  %v6898_v63 = vpop.f32.mrf.mxu0  ;;  %v9223_v1 = vld [vmem:[#allocation2 + $0x2a4] ss:$40 sps:$4 sm:$0xff]  }
 0x415   :  { %7824 = vst [vmem:[#allocation8 + $0x360] sm:$0xff] %v6897_v17  ;;  %v6899_v12 = vadd.f32 %v6898_v63, %v10738_v27  ;;  %v10882_v40 = vpop.f32.mrf.mxu1 }
 0x416   :  { %v6902_v50 = vpop.f32.mrf.mxu0 }
 0x417   :  { %7825 = vst [vmem:[#allocation8 + $0x368] sm:$0xff] %v6899_v12  ;;  %v6903_v36 = vadd.f32 %v6902_v50, %v10741_v14  ;;  %v10885_v32 = vpop.f32.mrf.mxu1  ;;  %v9224_v50 = vld [vmem:[#allocation2 + $0x298] ss:$40 sps:$4 sm:$0xff]  }
 0x418   :  { %v6904_v46 = vpop.f32.mrf.mxu0 }
 0x419   :  { %7832 = vst [vmem:[#allocation8 + $0x3a0] sm:$0xff] %v6903_v36  ;;  %v6905_v27 = vadd.f32 %v6904_v46, %v10744_v21  ;;  %v10888_v25 = vpop.f32.mrf.mxu1  ;;  %v9225_v36 = vld [vmem:[#allocation2 + $0x2a0] ss:$40 sps:$4 sm:$0xff]  }
 0x41a   :  { %7513 = vmatmul.mubr.bf16.gmra.mxu0 %v9220_v39  ;;  %v6906_v51 = vpop.f32.mrf.mxu0 }
 0x41b   :  { %7666 = vmatmul.mubr.bf16.gmra.mxu1 %v9221_v61  ;;  %7522 = vmatprep.mubr.bf16.mxu0 %v9222_v60  ;;  %7833 = vst [vmem:[#allocation8 + $0x3a8] sm:$0xff] %v6905_v27  ;;  %v6907_v37 = vadd.f32 %v6906_v51, %v10747_v54  ;;  %v10891_v16 = vpop.f32.mrf.mxu1  ;;  %v9226_v61 = vld [vmem:[#allocation2 + $0x2ec] ss:$40 sps:$4 sm:$0xff]  }
 0x41c   :  { %7675 = vmatprep.mubr.bf16.mxu1 %v9223_v1  ;;  %v6908_v14 = vpop.f32.mrf.mxu0  ;;  %v9227_v60 = vld [vmem:[#allocation2 + $0x2f4] ss:$40 sps:$4 sm:$0xff]  }
 0x41d   :  { %7840 = vst [vmem:[#allocation8 + $0x3e0] sm:$0xff] %v6907_v37  ;;  %v6909_v17 = vadd.f32 %v6908_v14, %v10750_v62  ;;  %v10894_v63 = vpop.f32.mrf.mxu1 }
 0x41e   :  { %v6912_v12 = vpop.f32.mrf.mxu0 }
 0x41f   :  { %7841 = vst [vmem:[#allocation8 + $0x3e8] sm:$0xff] %v6909_v17  ;;  %v6913_v21 = vadd.f32 %v6912_v12, %v10753_v26  ;;  %v10897_v39 = vpop.f32.mrf.mxu1  ;;  %v9228_v12 = vld [vmem:[#allocation2 + $0x2e8] ss:$40 sps:$4 sm:$0xff]  }
 0x420   :  { %v6914_v54 = vpop.f32.mrf.mxu0 }
 0x421   :  { %7848 = vst [vmem:[#allocation8 + $0x420] sm:$0xff] %v6913_v21  ;;  %v6915_v62 = vadd.f32 %v6914_v54, %v10756_v43  ;;  %v10900_v46 = vpop.f32.mrf.mxu1  ;;  %v9229_v21 = vld [vmem:[#allocation2 + $0x2f0] ss:$40 sps:$4 sm:$0xff]  }
 0x422   :  { %7523 = vmatmul.mubr.bf16.gmra.mxu0 %v9224_v50  ;;  %v6916_v1 = vpop.f32.mrf.mxu0 }
 0x423   :  { %7676 = vmatmul.mubr.bf16.gmra.mxu1 %v9225_v36  ;;  %7532 = vmatprep.mubr.bf16.mxu0 %v9226_v61  ;;  %7849 = vst [vmem:[#allocation8 + $0x428] sm:$0xff] %v6915_v62  ;;  %v6917_v27 = vadd.f32 %v6916_v1, %v10759_v41  ;;  %v10903_v51 = vpop.f32.mrf.mxu1  ;;  %v9230_v36 = vld [vmem:[#allocation2 + $0x33c] ss:$40 sps:$4 sm:$0xff]  }
 0x424   :  { %7685 = vmatprep.mubr.bf16.mxu1 %v9227_v60  ;;  %v6918_v26 = vpop.f32.mrf.mxu0  ;;  %v9231_v61 = vld [vmem:[#allocation2 + $0x344] ss:$40 sps:$4 sm:$0xff]  }
 0x425   :  { %7856 = vst [vmem:[#allocation8 + $0x460] sm:$0xff] %v6917_v27  ;;  %v6919_v37 = vadd.f32 %v6918_v26, %v10762_v29  ;;  %v10906_v14 = vpop.f32.mrf.mxu1 }
 0x426   :  { %v6922_v17 = vpop.f32.mrf.mxu0 }
 0x427   :  { %7857 = vst [vmem:[#allocation8 + $0x468] sm:$0xff] %v6919_v37  ;;  %v6923_v43 = vadd.f32 %v6922_v17, %v10765_v30  ;;  %v10909_v50 = vpop.f32.mrf.mxu1  ;;  %v9232_v17 = vld [vmem:[#allocation2 + $0x338] ss:$40 sps:$4 sm:$0xff]  }
 0x428   :  { %v6924_v41 = vpop.f32.mrf.mxu0 }
 0x429   :  { %7864 = vst [vmem:[#allocation8 + $0x4a0] sm:$0xff] %v6923_v43  ;;  %v6925_v29 = vadd.f32 %v6924_v41, %v10768_v20  ;;  %v10912_v54 = vpop.f32.mrf.mxu1  ;;  %v9233_v43 = vld [vmem:[#allocation2 + $0x340] ss:$40 sps:$4 sm:$0xff]  }
 0x42a   :  { %7533 = vmatmul.mubr.bf16.gmra.mxu0 %v9228_v12  ;;  %v6926_v60 = vpop.f32.mrf.mxu0 }
 0x42b   :  { %7686 = vmatmul.mubr.bf16.gmra.mxu1 %v9229_v21  ;;  %7542 = vmatprep.mubr.bf16.mxu0 %v9230_v36  ;;  %7865 = vst [vmem:[#allocation8 + $0x4a8] sm:$0xff] %v6925_v29  ;;  %v6927_v62 = vadd.f32 %v6926_v60, %v10771_v15  ;;  %v10915_v1 = vpop.f32.mrf.mxu1  ;;  %v9234_v21 = vld [vmem:[#allocation2 + $0x38c] ss:$40 sps:$4 sm:$0xff]  }
 0x42c   :  { %7695 = vmatprep.mubr.bf16.mxu1 %v9231_v61  ;;  %v6928_v30 = vpop.f32.mrf.mxu0  ;;  %v9235_v36 = vld [vmem:[#allocation2 + $0x394] ss:$40 sps:$4 sm:$0xff]  }
 0x42d   :  { %7872 = vst [vmem:[#allocation8 + $0x4e0] sm:$0xff] %v6927_v62  ;;  %v6929_v27 = vadd.f32 %v6928_v30, %v10774_v34  ;;  %v10918_v26 = vpop.f32.mrf.mxu1  ;;  %v11300_v62 = vld [vmem:[#allocation12_spill] sm:$0xff] }
 0x42e   :  { %v6932_v37 = vpop.f32.mrf.mxu0  ;;  %v842_v30 = vsub.s32 6, %v11300_v62 }
 0x42f   :  { %7873 = vst [vmem:[#allocation8 + $0x4e8] sm:$0xff] %v6929_v27  ;;  %v6933_v20 = vadd.f32 %v6932_v37, %v10777_v45  ;;  %v10921_v12 = vpop.f32.mrf.mxu1 }
 0x430   :  { %v6934_v15 = vpop.f32.mrf.mxu0 }
 0x431   :  { %7880 = vst [vmem:[#allocation8 + $0x520] sm:$0xff] %v6933_v20  ;;  %v6935_v34 = vadd.f32 %v6934_v15, %v10780_v44  ;;  %v10924_v41 = vpop.f32.mrf.mxu1  ;;  %v9236_v20 = vld [vmem:[#allocation2 + $0x388] ss:$40 sps:$4 sm:$0xff]   ;;  %v846_v44 = vsub.s32 7, %v11300_v62 }
 0x432   :  { %7543 = vmatmul.mubr.bf16.gmra.mxu0 %v9232_v17  ;;  %v6936_v61 = vpop.f32.mrf.mxu0 }
 0x433   :  { %7696 = vmatmul.mubr.bf16.gmra.mxu1 %v9233_v43  ;;  %7552 = vmatprep.mubr.bf16.mxu0 %v9234_v21  ;;  %7881 = vst [vmem:[#allocation8 + $0x528] sm:$0xff] %v6935_v34  ;;  %v6937_v29 = vadd.f32 %v6936_v61, %v10783_v0  ;;  %v10927_v60 = vpop.f32.mrf.mxu1  ;;  %v9237_v0 = vld [vmem:[#allocation2 + $0x390] ss:$40 sps:$4 sm:$0xff]  }
 0x434   :  { %7705 = vmatprep.mubr.bf16.mxu1 %v9235_v36  ;;  %v6938_v45 = vpop.f32.mrf.mxu0  ;;  %v9238_v36 = vld [vmem:[#allocation7] sm:$0xff] }
 0x435   :  { %7888 = vst [vmem:[#allocation8 + $0x560] sm:$0xff] %v6937_v29  ;;  %v6939_v27 = vadd.f32 %v6938_v45, %v10786_v28  ;;  %v10931_v37 = vpop.f32.mrf.mxu1  ;;  %v10937_v34 = vrot.slane %v9238_v36, %v842_v30  ;;  %v10942_v45 = vrot.slane %v9238_v36, %v846_v44 }
 0x436   :  { %v6942_v17 = vpop.f32.mrf.mxu0 }
 0x437   :  { %7889 = vst [vmem:[#allocation8 + $0x568] sm:$0xff] %v6939_v27  ;;  %v6943_v43 = vadd.f32 %v6942_v17, %v10789_v8  ;;  %v10935_v21 = vpop.f32.mrf.mxu1  ;;  %v6986_v17 = vadd.f32 %v10801_v33, %v10937_v34 }
 0x438   :  { %v6944_v15 = vpop.f32.mrf.mxu0 }
 0x439   :  { %7896 = vst [vmem:[#allocation8 + $0x5a0] sm:$0xff] %v6943_v43  ;;  %v6945_v28 = vadd.f32 %v6944_v15, %v10792_v18  ;;  %v10940_v61 = vpop.f32.mrf.mxu1  ;;  %v6988_v43 = vadd.f32 %v10804_v35, %v10942_v45 }
 0x43a   :  { %7553 = vmatmul.mubr.bf16.gmra.mxu0 %v9236_v20  ;;  %v6946_v29 = vpop.f32.mrf.mxu0 }
 0x43b   :  { %7706 = vmatmul.mubr.bf16.gmra.mxu1 %v9237_v0  ;;  %7897 = vst [vmem:[#allocation8 + $0x5a8] sm:$0xff] %v6945_v28  ;;  %v6947_v62 = vadd.f32 %v6946_v29, %v10795_v6  ;;  %v10945_v8 = vpop.f32.mrf.mxu1  ;;  %v6990_v6 = vadd.f32 %v10807_v3, %v10937_v34 }
 0x43c   :  { %v6948_v27 = vpop.f32.mrf.mxu0 }
 0x43d   :  { %7904 = vst [vmem:[#allocation8 + $0x5e0] sm:$0xff] %v6947_v62  ;;  %v6949_v30 = vadd.f32 %v6948_v27, %v10798_v4  ;;  %v10950_v20 = vpop.f32.mrf.mxu1  ;;  %v6992_v4 = vadd.f32 %v10810_v7, %v10942_v45 }
 0x43e   :  { %11301 = vst [vmem:[#allocation19_spill] sm:$0xff] %v10950_v20  ;;  %v7138_v18 = vpop.f32.mrf.mxu0 }
 0x43f   :  { %7905 = vst [vmem:[#allocation8 + $0x5e8] sm:$0xff] %v6949_v30  ;;  %v7139_v44 = vadd.f32 %v7138_v18, %v6986_v17  ;;  %v7291_v0 = vpop.f32.mrf.mxu1  ;;  %v6996_v17 = vadd.f32 %v10813_v10, %v10937_v34 }
 0x440   :  { %v7140_v15 = vpop.f32.mrf.mxu0 }
 0x441   :  { %v10956_v36 = vadd.f32 %v7291_v0, %v7139_v44  ;;  %v7141_v28 = vadd.f32 %v7140_v15, %v6988_v43  ;;  %v7293_v33 = vpop.f32.mrf.mxu1  ;;  %v6998_v43 = vadd.f32 %v10816_v56, %v10942_v45 }
 0x442   :  { %v7142_v29 = vpop.f32.mrf.mxu0 }
 0x443   :  { %v10960_v62 = vadd.f32 %v7293_v33, %v7141_v28  ;;  %v7143_v27 = vadd.f32 %v7142_v29, %v6990_v6  ;;  %v7295_v20 = vpop.f32.mrf.mxu1  ;;  %v7000_v6 = vadd.f32 %v10819_v58, %v10937_v34 }
 0x444   :  { %v7144_v35 = vpop.f32.mrf.mxu0 }
 0x445   :  { %v10964_v30 = vadd.f32 %v7295_v20, %v7143_v27  ;;  %v7145_v18 = vadd.f32 %v7144_v35, %v6992_v4  ;;  %v7297_v3 = vpop.f32.mrf.mxu1  ;;  %v7002_v4 = vadd.f32 %v10822_v31, %v10942_v45 }
 0x446   :  { %v7148_v44 = vpop.f32.mrf.mxu0 }
 0x447   :  { %v10968_v0 = vadd.f32 %v7297_v3, %v7145_v18  ;;  %v7149_v15 = vadd.f32 %v7148_v44, %v6996_v17  ;;  %v7301_v7 = vpop.f32.mrf.mxu1  ;;  %v7006_v17 = vadd.f32 %v10825_v52, %v10937_v34 }
 0x448   :  { %v7150_v28 = vpop.f32.mrf.mxu0 }
 0x449   :  { %v10972_v33 = vadd.f32 %v7301_v7, %v7149_v15  ;;  %v7151_v29 = vadd.f32 %v7150_v28, %v6998_v43  ;;  %v7303_v10 = vpop.f32.mrf.mxu1  ;;  %v7008_v43 = vadd.f32 %v10828_v5, %v10942_v45 }
 0x44a   :  { %v7152_v20 = vpop.f32.mrf.mxu0 }
 0x44b   :  { %v10976_v27 = vadd.f32 %v7303_v10, %v7151_v29  ;;  %v7153_v35 = vadd.f32 %v7152_v20, %v7000_v6  ;;  %v7305_v56 = vpop.f32.mrf.mxu1  ;;  %v7010_v6 = vadd.f32 %v10831_v57, %v10937_v34 }
 0x44c   :  { %v7154_v18 = vpop.f32.mrf.mxu0 }
 0x44d   :  { %v10980_v3 = vadd.f32 %v7305_v56, %v7153_v35  ;;  %v7155_v44 = vadd.f32 %v7154_v18, %v7002_v4  ;;  %v7307_v58 = vpop.f32.mrf.mxu1  ;;  %v7012_v4 = vadd.f32 %v10834_v23, %v10942_v45 }
 0x44e   :  { %v7158_v15 = vpop.f32.mrf.mxu0 }
 0x44f   :  { %v10984_v7 = vadd.f32 %v7307_v58, %v7155_v44  ;;  %v7159_v28 = vadd.f32 %v7158_v15, %v7006_v17  ;;  %v7311_v31 = vpop.f32.mrf.mxu1  ;;  %v7016_v17 = vadd.f32 %v10837_v47, %v10937_v34 }
 0x450   :  { %v7160_v29 = vpop.f32.mrf.mxu0 }
 0x451   :  { %v10988_v10 = vadd.f32 %v7311_v31, %v7159_v28  ;;  %v7161_v20 = vadd.f32 %v7160_v29, %v7008_v43  ;;  %v7313_v52 = vpop.f32.mrf.mxu1  ;;  %v7018_v43 = vadd.f32 %v10840_v38, %v10942_v45 }
 0x452   :  { %v7162_v35 = vpop.f32.mrf.mxu0 }
 0x453   :  { %v10992_v56 = vadd.f32 %v7313_v52, %v7161_v20  ;;  %v7163_v18 = vadd.f32 %v7162_v35, %v7010_v6  ;;  %v7315_v5 = vpop.f32.mrf.mxu1  ;;  %v7020_v6 = vadd.f32 %v10843_v48, %v10937_v34 }
 0x454   :  { %v7164_v44 = vpop.f32.mrf.mxu0 }
 0x455   :  { %v10996_v58 = vadd.f32 %v7315_v5, %v7163_v18  ;;  %v7165_v15 = vadd.f32 %v7164_v44, %v7012_v4  ;;  %v7317_v57 = vpop.f32.mrf.mxu1  ;;  %v7022_v4 = vadd.f32 %v10846_v2, %v10942_v45 }
 0x456   :  { %v7168_v28 = vpop.f32.mrf.mxu0 }
 0x457   :  { %v11000_v31 = vadd.f32 %v7317_v57, %v7165_v15  ;;  %v7169_v29 = vadd.f32 %v7168_v28, %v7016_v17  ;;  %v7321_v23 = vpop.f32.mrf.mxu1  ;;  %v7026_v17 = vadd.f32 %v10849_v53, %v10937_v34 }
 0x458   :  { %v7170_v20 = vpop.f32.mrf.mxu0 }
 0x459   :  { %v11004_v52 = vadd.f32 %v7321_v23, %v7169_v29  ;;  %v7171_v35 = vadd.f32 %v7170_v20, %v7018_v43  ;;  %v7323_v47 = vpop.f32.mrf.mxu1  ;;  %v7028_v43 = vadd.f32 %v10852_v59, %v10942_v45 }
 0x45a   :  { %v7172_v18 = vpop.f32.mrf.mxu0 }
 0x45b   :  { %v11008_v5 = vadd.f32 %v7323_v47, %v7171_v35  ;;  %v7173_v44 = vadd.f32 %v7172_v18, %v7020_v6  ;;  %v7325_v38 = vpop.f32.mrf.mxu1  ;;  %v7030_v6 = vadd.f32 %v10855_v55, %v10937_v34 }
 0x45c   :  { %v7174_v15 = vpop.f32.mrf.mxu0 }
 0x45d   :  { %v11012_v57 = vadd.f32 %v7325_v38, %v7173_v44  ;;  %v7175_v28 = vadd.f32 %v7174_v15, %v7022_v4  ;;  %v7327_v48 = vpop.f32.mrf.mxu1  ;;  %v7032_v4 = vadd.f32 %v10858_v24, %v10942_v45 }
 0x45e   :  { %v7178_v29 = vpop.f32.mrf.mxu0 }
 0x45f   :  { %v11016_v23 = vadd.f32 %v7327_v48, %v7175_v28  ;;  %v7179_v20 = vadd.f32 %v7178_v29, %v7026_v17  ;;  %v7036_v17 = vadd.f32 %v10861_v11, %v10937_v34 }
 0x460   :  { %v7180_v35 = vpop.f32.mrf.mxu0 }
 0x461   :  { %v7331_v2 = vpop.f32.mrf.mxu1  ;;  %v7181_v18 = vadd.f32 %v7180_v35, %v7028_v43  ;;  %v7038_v43 = vadd.f32 %v10864_v22, %v10942_v45 }
 0x462   :  { %v11020_v47 = vadd.f32 %v7331_v2, %v7179_v20  ;;  %v7182_v44 = vpop.f32.mrf.mxu0 }
 0x463   :  { %v7333_v53 = vpop.f32.mrf.mxu1  ;;  %v7183_v15 = vadd.f32 %v7182_v44, %v7030_v6  ;;  %v7040_v6 = vadd.f32 %v10867_v49, %v10937_v34 }
 0x464   :  { %v11024_v38 = vadd.f32 %v7333_v53, %v7181_v18  ;;  %v7184_v28 = vpop.f32.mrf.mxu0 }
 0x465   :  { %v7335_v59 = vpop.f32.mrf.mxu1  ;;  %v7185_v29 = vadd.f32 %v7184_v28, %v7032_v4  ;;  %v7042_v4 = vadd.f32 %v10870_v19, %v10942_v45 }
 0x466   :  { %v11028_v48 = vadd.f32 %v7335_v59, %v7183_v15 }
 0x467   :  { %v7337_v55 = vpop.f32.mrf.mxu1 }
 0x468   :  { %v7188_v20 = vpop.f32.mrf.mxu0  ;;  %v11032_v2 = vadd.f32 %v7337_v55, %v7185_v29 }
 0x469   :  { %v7189_v35 = vadd.f32 %v7188_v20, %v7036_v17  ;;  %v7341_v24 = vpop.f32.mrf.mxu1  ;;  %v7046_v17 = vadd.f32 %v10873_v42, %v10937_v34 }
 0x46a   :  { %v7190_v18 = vpop.f32.mrf.mxu0 }
 0x46b   :  { %v11036_v53 = vadd.f32 %v7341_v24, %v7189_v35  ;;  %v7191_v44 = vadd.f32 %v7190_v18, %v7038_v43  ;;  %v7343_v11 = vpop.f32.mrf.mxu1  ;;  %v7048_v43 = vadd.f32 %v10876_v13, %v10942_v45 }
 0x46c   :  { %v7192_v15 = vpop.f32.mrf.mxu0 }
 0x46d   :  { %v11040_v59 = vadd.f32 %v7343_v11, %v7191_v44  ;;  %v7193_v28 = vadd.f32 %v7192_v15, %v7040_v6  ;;  %v7345_v22 = vpop.f32.mrf.mxu1  ;;  %v7050_v6 = vadd.f32 %v10879_v9, %v10937_v34 }
 0x46e   :  { %v7194_v29 = vpop.f32.mrf.mxu0 }
 0x46f   :  { %v11044_v55 = vadd.f32 %v7345_v22, %v7193_v28  ;;  %v7195_v20 = vadd.f32 %v7194_v29, %v7042_v4  ;;  %v7347_v49 = vpop.f32.mrf.mxu1  ;;  %v7052_v4 = vadd.f32 %v10882_v40, %v10942_v45 }
 0x470   :  { %v7198_v35 = vpop.f32.mrf.mxu0 }
 0x471   :  { %v11048_v24 = vadd.f32 %v7347_v49, %v7195_v20  ;;  %v7199_v18 = vadd.f32 %v7198_v35, %v7046_v17  ;;  %v7056_v17 = vadd.f32 %v10885_v32, %v10937_v34 }
 0x472   :  { %v7200_v44 = vpop.f32.mrf.mxu0 }
 0x473   :  { %v7351_v19 = vpop.f32.mrf.mxu1  ;;  %v7201_v15 = vadd.f32 %v7200_v44, %v7048_v43  ;;  %v7058_v43 = vadd.f32 %v10888_v25, %v10942_v45 }
 0x474   :  { %v11052_v11 = vadd.f32 %v7351_v19, %v7199_v18  ;;  %v7202_v28 = vpop.f32.mrf.mxu0 }
 0x475   :  { %v7353_v42 = vpop.f32.mrf.mxu1  ;;  %v7203_v29 = vadd.f32 %v7202_v28, %v7050_v6  ;;  %v7060_v6 = vadd.f32 %v10891_v16, %v10937_v34 }
 0x476   :  { %v11056_v22 = vadd.f32 %v7353_v42, %v7201_v15  ;;  %v7204_v20 = vpop.f32.mrf.mxu0 }
 0x477   :  { %v7355_v13 = vpop.f32.mrf.mxu1  ;;  %v7205_v35 = vadd.f32 %v7204_v20, %v7052_v4  ;;  %v7062_v4 = vadd.f32 %v10894_v63, %v10942_v45 }
 0x478   :  { %v11060_v49 = vadd.f32 %v7355_v13, %v7203_v29 }
 0x479   :  { %v7357_v9 = vpop.f32.mrf.mxu1 }
 0x47a   :  { %v7208_v18 = vpop.f32.mrf.mxu0  ;;  %v11064_v19 = vadd.f32 %v7357_v9, %v7205_v35 }
 0x47b   :  { %v7209_v44 = vadd.f32 %v7208_v18, %v7056_v17  ;;  %v7361_v40 = vpop.f32.mrf.mxu1  ;;  %v7066_v17 = vadd.f32 %v10897_v39, %v10937_v34 }
 0x47c   :  { %v7210_v15 = vpop.f32.mrf.mxu0 }
 0x47d   :  { %v11068_v42 = vadd.f32 %v7361_v40, %v7209_v44  ;;  %v7211_v28 = vadd.f32 %v7210_v15, %v7058_v43  ;;  %v7363_v32 = vpop.f32.mrf.mxu1  ;;  %v7068_v43 = vadd.f32 %v10900_v46, %v10942_v45 }
 0x47e   :  { %v7212_v29 = vpop.f32.mrf.mxu0 }
 0x47f   :  { %v11072_v13 = vadd.f32 %v7363_v32, %v7211_v28  ;;  %v7213_v20 = vadd.f32 %v7212_v29, %v7060_v6  ;;  %v7365_v25 = vpop.f32.mrf.mxu1  ;;  %v7070_v6 = vadd.f32 %v10903_v51, %v10937_v34 }
 0x480   :  { %v7214_v35 = vpop.f32.mrf.mxu0 }
 0x481   :  { %v11076_v9 = vadd.f32 %v7365_v25, %v7213_v20  ;;  %v7215_v18 = vadd.f32 %v7214_v35, %v7062_v4  ;;  %v7367_v16 = vpop.f32.mrf.mxu1  ;;  %v7072_v4 = vadd.f32 %v10906_v14, %v10942_v45 }
 0x482   :  { %v7218_v44 = vpop.f32.mrf.mxu0 }
 0x483   :  { %v11080_v40 = vadd.f32 %v7367_v16, %v7215_v18  ;;  %v7219_v15 = vadd.f32 %v7218_v44, %v7066_v17  ;;  %v7371_v63 = vpop.f32.mrf.mxu1  ;;  %v7076_v17 = vadd.f32 %v10909_v50, %v10937_v34 }
 0x484   :  { %v7220_v28 = vpop.f32.mrf.mxu0 }
 0x485   :  { %v11084_v32 = vadd.f32 %v7371_v63, %v7219_v15  ;;  %v7221_v29 = vadd.f32 %v7220_v28, %v7068_v43  ;;  %v7373_v39 = vpop.f32.mrf.mxu1  ;;  %v7078_v43 = vadd.f32 %v10912_v54, %v10942_v45 }
 0x486   :  { %v7222_v20 = vpop.f32.mrf.mxu0 }
 0x487   :  { %v11088_v25 = vadd.f32 %v7373_v39, %v7221_v29  ;;  %v7223_v35 = vadd.f32 %v7222_v20, %v7070_v6  ;;  %v7375_v46 = vpop.f32.mrf.mxu1  ;;  %v7080_v6 = vadd.f32 %v10915_v1, %v10937_v34 }
 0x488   :  { %v7224_v18 = vpop.f32.mrf.mxu0 }
 0x489   :  { %v11092_v16 = vadd.f32 %v7375_v46, %v7223_v35  ;;  %v7225_v44 = vadd.f32 %v7224_v18, %v7072_v4  ;;  %v7377_v51 = vpop.f32.mrf.mxu1  ;;  %v7082_v4 = vadd.f32 %v10918_v26, %v10942_v45 }
 0x48a   :  { %v7228_v15 = vpop.f32.mrf.mxu0 }
 0x48b   :  { %v11096_v63 = vadd.f32 %v7377_v51, %v7225_v44  ;;  %v7229_v28 = vadd.f32 %v7228_v15, %v7076_v17  ;;  %v7381_v14 = vpop.f32.mrf.mxu1  ;;  %v7086_v17 = vadd.f32 %v10921_v12, %v10937_v34 }
 0x48c   :  { %v7230_v29 = vpop.f32.mrf.mxu0 }
 0x48d   :  { %v11100_v39 = vadd.f32 %v7381_v14, %v7229_v28  ;;  %v7231_v20 = vadd.f32 %v7230_v29, %v7078_v43  ;;  %v7383_v50 = vpop.f32.mrf.mxu1  ;;  %v7088_v43 = vadd.f32 %v10924_v41, %v10942_v45 }
 0x48e   :  { %v7232_v35 = vpop.f32.mrf.mxu0 }
 0x48f   :  { %v11104_v46 = vadd.f32 %v7383_v50, %v7231_v20  ;;  %v7233_v18 = vadd.f32 %v7232_v35, %v7080_v6  ;;  %v7385_v54 = vpop.f32.mrf.mxu1  ;;  %v7090_v6 = vadd.f32 %v10927_v60, %v10937_v34 }
 0x490   :  { %v7234_v44 = vpop.f32.mrf.mxu0 }
 0x491   :  { %v11108_v51 = vadd.f32 %v7385_v54, %v7233_v18  ;;  %v7235_v15 = vadd.f32 %v7234_v44, %v7082_v4  ;;  %v7387_v1 = vpop.f32.mrf.mxu1  ;;  %v7092_v4 = vadd.f32 %v10931_v37, %v10942_v45 }
 0x492   :  { %v7238_v28 = vpop.f32.mrf.mxu0 }
 0x493   :  { %v11112_v14 = vadd.f32 %v7387_v1, %v7235_v15  ;;  %v7239_v29 = vadd.f32 %v7238_v28, %v7086_v17  ;;  %v7391_v26 = vpop.f32.mrf.mxu1  ;;  %v7096_v17 = vadd.f32 %v10935_v21, %v10937_v34 }
 0x494   :  { %v7240_v20 = vpop.f32.mrf.mxu0 }
 0x495   :  { %v11116_v50 = vadd.f32 %v7391_v26, %v7239_v29  ;;  %v7241_v35 = vadd.f32 %v7240_v20, %v7088_v43  ;;  %v7393_v12 = vpop.f32.mrf.mxu1  ;;  %v7098_v43 = vadd.f32 %v10940_v61, %v10942_v45 }
 0x496   :  { %v7242_v18 = vpop.f32.mrf.mxu0 }
 0x497   :  { %v11120_v54 = vadd.f32 %v7393_v12, %v7241_v35  ;;  %v7243_v44 = vadd.f32 %v7242_v18, %v7090_v6  ;;  %v7395_v41 = vpop.f32.mrf.mxu1  ;;  %v7100_v6 = vadd.f32 %v10945_v8, %v10937_v34 }
 0x498   :  { %v7244_v15 = vpop.f32.mrf.mxu0 }
 0x499   :  { %11302 = vst [vmem:[#allocation20_spill] sm:$0xff] %v11120_v54  ;;  %v11124_v1 = vadd.f32 %v7395_v41, %v7243_v44  ;;  %v7245_v28 = vadd.f32 %v7244_v15, %v7092_v4  ;;  %v7397_v60 = vpop.f32.mrf.mxu1  ;;  %v11305_v4 = vld [vmem:[#allocation19_spill] sm:$0xff] }
 0x49a   :  { %v7248_v29 = vpop.f32.mrf.mxu0  ;;  %v7102_v41 = vadd.f32 %v11305_v4, %v10942_v45 }
 0x49b   :  { %11303 = vst [vmem:[#allocation23_spill] sm:$0xff] %v11124_v1  ;;  %v11128_v26 = vadd.f32 %v7397_v60, %v7245_v28  ;;  %v7249_v20 = vadd.f32 %v7248_v29, %v7096_v17  ;;  %v7401_v37 = vpop.f32.mrf.mxu1 }
 0x49c   :  { %v7250_v35 = vpop.f32.mrf.mxu0 }
 0x49d   :  { %11304 = vst [vmem:[#allocation21_spill] sm:$0xff] %v11128_v26  ;;  %v11132_v12 = vadd.f32 %v7401_v37, %v7249_v20  ;;  %v7251_v18 = vadd.f32 %v7250_v35, %v7098_v43  ;;  %v7403_v21 = vpop.f32.mrf.mxu1 }
 0x49e   :  { %v7252_v44 = vpop.f32.mrf.mxu0 }
 0x49f   :  { %v11136_v15 = vadd.f32 %v7403_v21, %v7251_v18  ;;  %v7253_v1 = vadd.f32 %v7252_v44, %v7100_v6  ;;  %v7405_v61 = vpop.f32.mrf.mxu1 }
 0x4a0   :  { %v7254_v28 = vpop.f32.mrf.mxu0 }
 0x4a1   :  { %v11138_v60 = vadd.f32 %v7405_v61, %v7253_v1  ;;  %v7255_v17 = vadd.f32 %v7254_v28, %v7102_v41  ;;  %v7407_v29 = vpop.f32.mrf.mxu1 }
 0x4a2   :  { %v7444_v26 = vpop.f32.mrf.mxu0 }
 0x4a3   :  { %v11140_v54 = vadd.f32 %v7407_v29, %v7255_v17  ;;  %v7445_v34 = vadd.f32 %v7444_v26, %v10956_v36  ;;  %v7597_v8 = vpop.f32.mrf.mxu1 }
 0x4a4   :  { %v7446_v43 = vpop.f32.mrf.mxu0 }
 0x4a5   :  { %v7598_v20 = vadd.f32 %v7597_v8, %v7445_v34  ;;  %v7447_v37 = vadd.f32 %v7446_v43, %v10960_v62  ;;  %v7599_v45 = vpop.f32.mrf.mxu1 }
 0x4a6   :  { %v7448_v35 = vpop.f32.mrf.mxu0 }
 0x4a7   :  { %7722 = vst [vmem:[#allocation8 + $0x30] sm:$0xff] %v7598_v20  ;;  %v7600_v6 = vadd.f32 %v7599_v45, %v7447_v37  ;;  %v7449_v18 = vadd.f32 %v7448_v35, %v10964_v30  ;;  %v7601_v1 = vpop.f32.mrf.mxu1 }
 0x4a8   :  { %v7450_v21 = vpop.f32.mrf.mxu0 }
 0x4a9   :  { %7723 = vst [vmem:[#allocation8 + $0x38] sm:$0xff] %v7600_v6  ;;  %v7602_v44 = vadd.f32 %v7601_v1, %v7449_v18  ;;  %v7451_v4 = vadd.f32 %v7450_v21, %v10968_v0  ;;  %v7603_v41 = vpop.f32.mrf.mxu1 }
 0x4aa   :  { %v7454_v61 = vpop.f32.mrf.mxu0 }
 0x4ab   :  { %7730 = vst [vmem:[#allocation8 + $0x70] sm:$0xff] %v7602_v44  ;;  %v7604_v36 = vadd.f32 %v7603_v41, %v7451_v4  ;;  %v7455_v26 = vadd.f32 %v7454_v61, %v10972_v33  ;;  %v7607_v28 = vpop.f32.mrf.mxu1 }
 0x4ac   :  { %v7456_v62 = vpop.f32.mrf.mxu0 }
 0x4ad   :  { %7731 = vst [vmem:[#allocation8 + $0x78] sm:$0xff] %v7604_v36  ;;  %v7608_v17 = vadd.f32 %v7607_v28, %v7455_v26  ;;  %v7457_v29 = vadd.f32 %v7456_v62, %v10976_v27  ;;  %v7609_v34 = vpop.f32.mrf.mxu1 }
 0x4ae   :  { %v7458_v30 = vpop.f32.mrf.mxu0 }
 0x4af   :  { %7738 = vst [vmem:[#allocation8 + $0xb0] sm:$0xff] %v7608_v17  ;;  %v7610_v8 = vadd.f32 %v7609_v34, %v7457_v29  ;;  %v7459_v43 = vadd.f32 %v7458_v30, %v10980_v3  ;;  %v7611_v20 = vpop.f32.mrf.mxu1 }
 0x4b0   :  { %v7460_v0 = vpop.f32.mrf.mxu0 }
 0x4b1   :  { %7739 = vst [vmem:[#allocation8 + $0xb8] sm:$0xff] %v7610_v8  ;;  %v7612_v37 = vadd.f32 %v7611_v20, %v7459_v43  ;;  %v7461_v45 = vadd.f32 %v7460_v0, %v10984_v7  ;;  %v7613_v35 = vpop.f32.mrf.mxu1 }
 0x4b2   :  { %v7464_v33 = vpop.f32.mrf.mxu0 }
 0x4b3   :  { %7746 = vst [vmem:[#allocation8 + $0xf0] sm:$0xff] %v7612_v37  ;;  %v7614_v6 = vadd.f32 %v7613_v35, %v7461_v45  ;;  %v7465_v18 = vadd.f32 %v7464_v33, %v10988_v10  ;;  %v7617_v1 = vpop.f32.mrf.mxu1 }
 0x4b4   :  { %v7466_v27 = vpop.f32.mrf.mxu0 }
 0x4b5   :  { %7747 = vst [vmem:[#allocation8 + $0xf8] sm:$0xff] %v7614_v6  ;;  %v7618_v21 = vadd.f32 %v7617_v1, %v7465_v18  ;;  %v7467_v44 = vadd.f32 %v7466_v27, %v10992_v56  ;;  %v7619_v4 = vpop.f32.mrf.mxu1 }
 0x4b6   :  { %v7468_v3 = vpop.f32.mrf.mxu0 }
 0x4b7   :  { %7754 = vst [vmem:[#allocation8 + $0x130] sm:$0xff] %v7618_v21  ;;  %v7620_v41 = vadd.f32 %v7619_v4, %v7467_v44  ;;  %v7469_v61 = vadd.f32 %v7468_v3, %v10996_v58  ;;  %v7621_v36 = vpop.f32.mrf.mxu1 }
 0x4b8   :  { %v7470_v7 = vpop.f32.mrf.mxu0 }
 0x4b9   :  { %7755 = vst [vmem:[#allocation8 + $0x138] sm:$0xff] %v7620_v41  ;;  %v7622_v26 = vadd.f32 %v7621_v36, %v7469_v61  ;;  %v7471_v28 = vadd.f32 %v7470_v7, %v11000_v31  ;;  %v7623_v62 = vpop.f32.mrf.mxu1 }
 0x4ba   :  { %v7474_v10 = vpop.f32.mrf.mxu0 }
 0x4bb   :  { %7762 = vst [vmem:[#allocation8 + $0x170] sm:$0xff] %v7622_v26  ;;  %v7624_v17 = vadd.f32 %v7623_v62, %v7471_v28  ;;  %v7475_v29 = vadd.f32 %v7474_v10, %v11004_v52  ;;  %v7627_v34 = vpop.f32.mrf.mxu1 }
 0x4bc   :  { %v7476_v56 = vpop.f32.mrf.mxu0 }
 0x4bd   :  { %7763 = vst [vmem:[#allocation8 + $0x178] sm:$0xff] %v7624_v17  ;;  %v7628_v30 = vadd.f32 %v7627_v34, %v7475_v29  ;;  %v7477_v8 = vadd.f32 %v7476_v56, %v11008_v5  ;;  %v7629_v43 = vpop.f32.mrf.mxu1 }
 0x4be   :  { %v7478_v58 = vpop.f32.mrf.mxu0 }
 0x4bf   :  { %7770 = vst [vmem:[#allocation8 + $0x1b0] sm:$0xff] %v7628_v30  ;;  %v7630_v20 = vadd.f32 %v7629_v43, %v7477_v8  ;;  %v7479_v0 = vadd.f32 %v7478_v58, %v11012_v57  ;;  %v7631_v37 = vpop.f32.mrf.mxu1 }
 0x4c0   :  { %v7480_v31 = vpop.f32.mrf.mxu0 }
 0x4c1   :  { %7771 = vst [vmem:[#allocation8 + $0x1b8] sm:$0xff] %v7630_v20  ;;  %v7632_v45 = vadd.f32 %v7631_v37, %v7479_v0  ;;  %v7481_v35 = vadd.f32 %v7480_v31, %v11016_v23  ;;  %v7633_v33 = vpop.f32.mrf.mxu1 }
 0x4c2   :  { %v7484_v52 = vpop.f32.mrf.mxu0 }
 0x4c3   :  { %7778 = vst [vmem:[#allocation8 + $0x1f0] sm:$0xff] %v7632_v45  ;;  %v7634_v6 = vadd.f32 %v7633_v33, %v7481_v35  ;;  %v7485_v18 = vadd.f32 %v7484_v52, %v11020_v47  ;;  %v7637_v1 = vpop.f32.mrf.mxu1 }
 0x4c4   :  { %v7486_v5 = vpop.f32.mrf.mxu0 }
 0x4c5   :  { %7779 = vst [vmem:[#allocation8 + $0x1f8] sm:$0xff] %v7634_v6  ;;  %v7638_v27 = vadd.f32 %v7637_v1, %v7485_v18  ;;  %v7487_v21 = vadd.f32 %v7486_v5, %v11024_v38  ;;  %v7639_v44 = vpop.f32.mrf.mxu1 }
 0x4c6   :  { %v7488_v57 = vpop.f32.mrf.mxu0 }
 0x4c7   :  { %7786 = vst [vmem:[#allocation8 + $0x230] sm:$0xff] %v7638_v27  ;;  %v7640_v4 = vadd.f32 %v7639_v44, %v7487_v21  ;;  %v7489_v3 = vadd.f32 %v7488_v57, %v11028_v48  ;;  %v7641_v41 = vpop.f32.mrf.mxu1 }
 0x4c8   :  { %v7490_v23 = vpop.f32.mrf.mxu0 }
 0x4c9   :  { %7787 = vst [vmem:[#allocation8 + $0x238] sm:$0xff] %v7640_v4  ;;  %v7642_v61 = vadd.f32 %v7641_v41, %v7489_v3  ;;  %v7491_v36 = vadd.f32 %v7490_v23, %v11032_v2  ;;  %v7643_v7 = vpop.f32.mrf.mxu1 }
 0x4ca   :  { %v7494_v47 = vpop.f32.mrf.mxu0 }
 0x4cb   :  { %7794 = vst [vmem:[#allocation8 + $0x270] sm:$0xff] %v7642_v61  ;;  %v7644_v26 = vadd.f32 %v7643_v7, %v7491_v36  ;;  %v7495_v28 = vadd.f32 %v7494_v47, %v11036_v53  ;;  %v7647_v62 = vpop.f32.mrf.mxu1 }
 0x4cc   :  { %v7496_v38 = vpop.f32.mrf.mxu0 }
 0x4cd   :  { %7795 = vst [vmem:[#allocation8 + $0x278] sm:$0xff] %v7644_v26  ;;  %v7648_v10 = vadd.f32 %v7647_v62, %v7495_v28  ;;  %v7497_v17 = vadd.f32 %v7496_v38, %v11040_v59  ;;  %v7649_v29 = vpop.f32.mrf.mxu1 }
 0x4ce   :  { %v7498_v48 = vpop.f32.mrf.mxu0 }
 0x4cf   :  { %7802 = vst [vmem:[#allocation8 + $0x2b0] sm:$0xff] %v7648_v10  ;;  %v7650_v34 = vadd.f32 %v7649_v29, %v7497_v17  ;;  %v7499_v56 = vadd.f32 %v7498_v48, %v11044_v55  ;;  %v7651_v30 = vpop.f32.mrf.mxu1 }
 0x4d0   :  { %v7500_v2 = vpop.f32.mrf.mxu0 }
 0x4d1   :  { %7803 = vst [vmem:[#allocation8 + $0x2b8] sm:$0xff] %v7650_v34  ;;  %v7652_v8 = vadd.f32 %v7651_v30, %v7499_v56  ;;  %v7501_v43 = vadd.f32 %v7500_v2, %v11048_v24  ;;  %v7653_v58 = vpop.f32.mrf.mxu1 }
 0x4d2   :  { %v7504_v53 = vpop.f32.mrf.mxu0 }
 0x4d3   :  { %7810 = vst [vmem:[#allocation8 + $0x2f0] sm:$0xff] %v7652_v8  ;;  %v7654_v20 = vadd.f32 %v7653_v58, %v7501_v43  ;;  %v7505_v0 = vadd.f32 %v7504_v53, %v11052_v11  ;;  %v7657_v37 = vpop.f32.mrf.mxu1 }
 0x4d4   :  { %v7506_v59 = vpop.f32.mrf.mxu0 }
 0x4d5   :  { %7811 = vst [vmem:[#allocation8 + $0x2f8] sm:$0xff] %v7654_v20  ;;  %v7658_v31 = vadd.f32 %v7657_v37, %v7505_v0  ;;  %v7507_v45 = vadd.f32 %v7506_v59, %v11056_v22  ;;  %v7659_v35 = vpop.f32.mrf.mxu1 }
 0x4d6   :  { %v7508_v55 = vpop.f32.mrf.mxu0 }
 0x4d7   :  { %7818 = vst [vmem:[#allocation8 + $0x330] sm:$0xff] %v7658_v31  ;;  %v7660_v33 = vadd.f32 %v7659_v35, %v7507_v45  ;;  %v7509_v52 = vadd.f32 %v7508_v55, %v11060_v49  ;;  %v7661_v6 = vpop.f32.mrf.mxu1 }
 0x4d8   :  { %v7510_v24 = vpop.f32.mrf.mxu0 }
 0x4d9   :  { %7819 = vst [vmem:[#allocation8 + $0x338] sm:$0xff] %v7660_v33  ;;  %v7662_v18 = vadd.f32 %v7661_v6, %v7509_v52  ;;  %v7511_v1 = vadd.f32 %v7510_v24, %v11064_v19  ;;  %v7663_v5 = vpop.f32.mrf.mxu1 }
 0x4da   :  { %v7514_v11 = vpop.f32.mrf.mxu0 }
 0x4db   :  { %7826 = vst [vmem:[#allocation8 + $0x370] sm:$0xff] %v7662_v18  ;;  %v7664_v27 = vadd.f32 %v7663_v5, %v7511_v1  ;;  %v7515_v21 = vadd.f32 %v7514_v11, %v11068_v42  ;;  %v7667_v44 = vpop.f32.mrf.mxu1  ;;  %v11306_v18 = vld [vmem:[#allocation20_spill] sm:$0xff] }
 0x4dc   :  { %v7516_v22 = vpop.f32.mrf.mxu0 }
 0x4dd   :  { %7827 = vst [vmem:[#allocation8 + $0x378] sm:$0xff] %v7664_v27  ;;  %v7668_v57 = vadd.f32 %v7667_v44, %v7515_v21  ;;  %v7517_v4 = vadd.f32 %v7516_v22, %v11072_v13  ;;  %v7669_v3 = vpop.f32.mrf.mxu1  ;;  %v11307_v27 = vld [vmem:[#allocation23_spill] sm:$0xff] }
 0x4de   :  { %v7518_v49 = vpop.f32.mrf.mxu0 }
 0x4df   :  { %7834 = vst [vmem:[#allocation8 + $0x3b0] sm:$0xff] %v7668_v57  ;;  %v7670_v41 = vadd.f32 %v7669_v3, %v7517_v4  ;;  %v7519_v23 = vadd.f32 %v7518_v49, %v11076_v9  ;;  %v7671_v61 = vpop.f32.mrf.mxu1  ;;  %v11308_v57 = vld [vmem:[#allocation21_spill] sm:$0xff] }
 0x4e0   :  { %v7520_v19 = vpop.f32.mrf.mxu0 }
 0x4e1   :  { %7835 = vst [vmem:[#allocation8 + $0x3b8] sm:$0xff] %v7670_v41  ;;  %v7672_v36 = vadd.f32 %v7671_v61, %v7519_v23  ;;  %v7521_v7 = vadd.f32 %v7520_v19, %v11080_v40  ;;  %v7673_v47 = vpop.f32.mrf.mxu1 }
 0x4e2   :  { %v7524_v42 = vpop.f32.mrf.mxu0 }
 0x4e3   :  { %7842 = vst [vmem:[#allocation8 + $0x3f0] sm:$0xff] %v7672_v36  ;;  %v7674_v26 = vadd.f32 %v7673_v47, %v7521_v7  ;;  %v7525_v28 = vadd.f32 %v7524_v42, %v11084_v32  ;;  %v7677_v62 = vpop.f32.mrf.mxu1 }
 0x4e4   :  { %v7526_v13 = vpop.f32.mrf.mxu0 }
 0x4e5   :  { %7843 = vst [vmem:[#allocation8 + $0x3f8] sm:$0xff] %v7674_v26  ;;  %v7678_v38 = vadd.f32 %v7677_v62, %v7525_v28  ;;  %v7527_v10 = vadd.f32 %v7526_v13, %v11088_v25  ;;  %v7679_v17 = vpop.f32.mrf.mxu1 }
 0x4e6   :  { %v7528_v9 = vpop.f32.mrf.mxu0 }
 0x4e7   :  { %7850 = vst [vmem:[#allocation8 + $0x430] sm:$0xff] %v7678_v38  ;;  %v7680_v29 = vadd.f32 %v7679_v17, %v7527_v10  ;;  %v7529_v48 = vadd.f32 %v7528_v9, %v11092_v16  ;;  %v7681_v34 = vpop.f32.mrf.mxu1 }
 0x4e8   :  { %v7530_v40 = vpop.f32.mrf.mxu0 }
 0x4e9   :  { %7851 = vst [vmem:[#allocation8 + $0x438] sm:$0xff] %v7680_v29  ;;  %v7682_v56 = vadd.f32 %v7681_v34, %v7529_v48  ;;  %v7531_v30 = vadd.f32 %v7530_v40, %v11096_v63  ;;  %v7683_v2 = vpop.f32.mrf.mxu1 }
 0x4ea   :  { %v7534_v32 = vpop.f32.mrf.mxu0 }
 0x4eb   :  { %7858 = vst [vmem:[#allocation8 + $0x470] sm:$0xff] %v7682_v56  ;;  %v7684_v8 = vadd.f32 %v7683_v2, %v7531_v30  ;;  %v7535_v43 = vadd.f32 %v7534_v32, %v11100_v39  ;;  %v7687_v58 = vpop.f32.mrf.mxu1 }
 0x4ec   :  { %v7536_v25 = vpop.f32.mrf.mxu0 }
 0x4ed   :  { %7859 = vst [vmem:[#allocation8 + $0x478] sm:$0xff] %v7684_v8  ;;  %v7688_v53 = vadd.f32 %v7687_v58, %v7535_v43  ;;  %v7537_v20 = vadd.f32 %v7536_v25, %v11104_v46  ;;  %v7689_v0 = vpop.f32.mrf.mxu1 }
 0x4ee   :  { %v7538_v16 = vpop.f32.mrf.mxu0 }
 0x4ef   :  { %7866 = vst [vmem:[#allocation8 + $0x4b0] sm:$0xff] %v7688_v53  ;;  %v7690_v37 = vadd.f32 %v7689_v0, %v7537_v20  ;;  %v7539_v59 = vadd.f32 %v7538_v16, %v11108_v51  ;;  %v7691_v31 = vpop.f32.mrf.mxu1 }
 0x4f0   :  { %v7540_v63 = vpop.f32.mrf.mxu0 }
 0x4f1   :  { %7867 = vst [vmem:[#allocation8 + $0x4b8] sm:$0xff] %v7690_v37  ;;  %v7692_v45 = vadd.f32 %v7691_v31, %v7539_v59  ;;  %v7541_v35 = vadd.f32 %v7540_v63, %v11112_v14  ;;  %v7693_v55 = vpop.f32.mrf.mxu1 }
 0x4f2   :  { %v7544_v39 = vpop.f32.mrf.mxu0 }
 0x4f3   :  { %7874 = vst [vmem:[#allocation8 + $0x4f0] sm:$0xff] %v7692_v45  ;;  %v7694_v33 = vadd.f32 %v7693_v55, %v7541_v35  ;;  %v7545_v52 = vadd.f32 %v7544_v39, %v11116_v50  ;;  %v7697_v6 = vpop.f32.mrf.mxu1 }
 0x4f4   :  { %v7546_v46 = vpop.f32.mrf.mxu0 }
 0x4f5   :  { %7875 = vst [vmem:[#allocation8 + $0x4f8] sm:$0xff] %v7694_v33  ;;  %v7698_v24 = vadd.f32 %v7697_v6, %v7545_v52  ;;  %v7547_v1 = vadd.f32 %v7546_v46, %v11306_v18  ;;  %v7699_v5 = vpop.f32.mrf.mxu1 }
 0x4f6   :  { %v7548_v51 = vpop.f32.mrf.mxu0 }
 0x4f7   :  { %7882 = vst [vmem:[#allocation8 + $0x530] sm:$0xff] %v7698_v24  ;;  %v7700_v11 = vadd.f32 %v7699_v5, %v7547_v1  ;;  %v7549_v21 = vadd.f32 %v7548_v51, %v11307_v27  ;;  %v7701_v44 = vpop.f32.mrf.mxu1 }
 0x4f8   :  { %v7550_v14 = vpop.f32.mrf.mxu0 }
 0x4f9   :  { %7883 = vst [vmem:[#allocation8 + $0x538] sm:$0xff] %v7700_v11  ;;  %v7702_v22 = vadd.f32 %v7701_v44, %v7549_v21  ;;  %v7551_v4 = vadd.f32 %v7550_v14, %v11308_v57  ;;  %v7703_v3 = vpop.f32.mrf.mxu1 }
 0x4fa   :  { %v7554_v50 = vpop.f32.mrf.mxu0 }
 0x4fb   :  { %7890 = vst [vmem:[#allocation8 + $0x570] sm:$0xff] %v7702_v22  ;;  %v7704_v49 = vadd.f32 %v7703_v3, %v7551_v4  ;;  %v7555_v41 = vadd.f32 %v7554_v50, %v11132_v12  ;;  %v7707_v23 = vpop.f32.mrf.mxu1 }
 0x4fc   :  { %v7556_v61 = vpop.f32.mrf.mxu0 }
 0x4fd   :  { %7891 = vst [vmem:[#allocation8 + $0x578] sm:$0xff] %v7704_v49  ;;  %v7708_v19 = vadd.f32 %v7707_v23, %v7555_v41  ;;  %v7557_v36 = vadd.f32 %v7556_v61, %v11136_v15  ;;  %v7709_v7 = vpop.f32.mrf.mxu1 }
 0x4fe   :  { %v7558_v47 = vpop.f32.mrf.mxu0 }
 0x4ff   :  { %7898 = vst [vmem:[#allocation8 + $0x5b0] sm:$0xff] %v7708_v19  ;;  %v7710_v42 = vadd.f32 %v7709_v7, %v7557_v36  ;;  %v7559_v26 = vadd.f32 %v7558_v47, %v11138_v60  ;;  %v7711_v28 = vpop.f32.mrf.mxu1 }
 0x500   :  { %v7560_v62 = vpop.f32.mrf.mxu0 }
 0x501   :  { %7899 = vst [vmem:[#allocation8 + $0x5b8] sm:$0xff] %v7710_v42  ;;  %v7712_v13 = vadd.f32 %v7711_v28, %v7559_v26  ;;  %v7561_v12 = vadd.f32 %v7560_v62, %v11140_v54  ;;  %v7713_v38 = vpop.f32.mrf.mxu1 }
 0x503   :  { %7906 = vst [vmem:[#allocation8 + $0x5f0] sm:$0xff] %v7712_v13  ;;  %v7714_v10 = vadd.f32 %v7713_v38, %v7561_v12 }
 0x505   :  { %7907 = vst [vmem:[#allocation8 + $0x5f8] sm:$0xff] %v7714_v10 }
 0x506   :  { %9310 = shalt.err (!%p9307_p5)
}
 0x507   :  { %s9333_s4 = smov 1024   ;;  %s9334_s5 = smov 64  }
 0x508   :  { %7919 = dma.vmem_to_hbm [thread:$0]  %s7914_s2, 24576, %s11196_s3, [#allocation4], %s9333_s4, %s9333_s4, %s9334_s5  }
 0x509   :  { %9323 = dma.done.wait [#allocation4], 24576  }
 0x50a   :  { %9324 = vsyncadd [#allocation4], 4294942720 }
 0x50b   :  { %7923 = vsyncpa [#allocation3], 1 }
 0x50c   :  { %7924 = vsyncpa [#allocation6], 1 }
 0x50d   :  { %7925 = vsyncpa [#allocation4], 1 }

</bundles_post_ra>
